<compile_context>
chip_gen: v7x
topology: tpu7x:2x2x1
jax: 0.10.0
libtpu: 0.0.40
codegen_flags: <defaults>
</compile_context>

<pallas_src>
import jax
import jax.numpy as jnp
from jax.experimental import pallas as pl
from jax.experimental.pallas import tpu as pltpu


def _softplus(z):
    # Numerically stable softplus; matches torch.nn.Softplus (beta=1) up to its
    # threshold-20 shortcut (~2e-9).
    return jnp.maximum(z, 0.0) + jnp.log1p(jnp.exp(-jnp.abs(z)))


def decoder_kernel(x_ref,
                   w1_ref, b1_ref, w2_ref, b2_ref, w3_ref, b3_ref,
                   out_ref):
    # Hoist the (1, F) bias rows once per body (JAX does not CSE broadcasts).
    b1 = b1_ref[...]
    b2 = b2_ref[...]
    b3 = b3_ref[...]

    # bf16 (or f32) inputs -> f32 accumulation on the MXU.
    x = x_ref[...]
    z1 = jnp.dot(x, w1_ref[...], preferred_element_type=jnp.float32) + b1
    h1 = _softplus(z1).astype(w2_ref.dtype)

    z2 = jnp.dot(h1, w2_ref[...], preferred_element_type=jnp.float32) + b2
    h2 = _softplus(z2).astype(w3_ref.dtype)

    out = jnp.dot(h2, w3_ref[...], preferred_element_type=jnp.float32) + b3
    out_ref[...] = out.astype(out_ref.dtype)


def _round_up(n, m):
    return (n + m - 1) // m * m


def _pad2(a, rows, cols):
    return jnp.pad(a, ((0, rows - a.shape[0]), (0, cols - a.shape[1])))


def decoder_forward(x, params, *, block_batch=512, compute_dtype=jnp.bfloat16):
    """x: (B, input_units).  params: dict w1,b1,w2,b2,w3,b3 (see init_params).

    Wrapper pads feature dims to multiples of 128 (lane-dense tiles) and the
    batch to a tile multiple, runs the fused 3-layer MLP kernel, and slices the
    padding back off.
    """
    B, input_units = x.shape
    d_theta = params["w1"].shape[1]
    output_units = params["w3"].shape[1]

    Fp = _round_up(input_units, 128)
    Hp = _round_up(d_theta, 128)
    Op = _round_up(output_units, 128)

    # --- batch tile selection (per-chip guidance) -------------------------
    # v6e/v7x like 256-512 row tiles; keep >= 2 parallel tiles so v7x's two
    # TensorCores both get work; small batches collapse to a single tile.
    bb = max(8, min(block_batch, B))
    if B >= 2 * 128:
        bb = min(bb, B // 2)
    bb = (bb // 8) * 8                      # sublane-align
    Bp = _round_up(B, bb)
    n_blocks = Bp // bb

    # --- pad & cast operands ----------------------------------------------
    # Zero padding is exact: padded hidden units see softplus(0) but multiply
    # into zero-padded rows of the next weight, so they never leak into the
    # real outputs; padded output columns are sliced off below.
    x_p = jnp.pad(x, ((0, Bp - B), (0, Fp - input_units))).astype(compute_dtype)
    w1 = _pad2(params["w1"], Fp, Hp).astype(compute_dtype)
    w2 = _pad2(params["w2"], Hp, Hp).astype(compute_dtype)
    w3 = _pad2(params["w3"], Hp, Op).astype(compute_dtype)
    b1 = _pad2(params["b1"], 1, Hp).astype(jnp.float32)
    b2 = _pad2(params["b2"], 1, Hp).astype(jnp.float32)
    b3 = _pad2(params["b3"], 1, Op).astype(jnp.float32)

    # --- specs --------------------------------------------------------------
    x_spec = pl.BlockSpec((bb, Fp), lambda i: (i, 0))
    out_spec = pl.BlockSpec((bb, Op), lambda i: (i, 0))

    def resident_spec(shape):
        # Constant index_map -> stays resident across grid steps; Buffered(1)
        # avoids pointless double-buffering of the parameters.
        return pl.BlockSpec(shape, lambda i: (0, 0),
                            pipeline_mode=pl.Buffered(1))

    param_arrays = [w1, b1, w2, b2, w3, b3]
    param_specs = [resident_spec(p.shape) for p in param_arrays]

    # --- advisory cost estimate ---------------------------------------------
    itemsize = jnp.dtype(compute_dtype).itemsize
    flops = 2 * Bp * (Fp * Hp + Hp * Hp + Hp * Op)
    transcendentals = 4 * Bp * Hp          # exp + log1p per hidden unit, 2 layers
    bytes_accessed = (x_p.size * x_p.dtype.itemsize
                      + sum(int(p.size) * p.dtype.itemsize for p in param_arrays)
                      + Bp * Op * itemsize)
    cost = pl.CostEstimate(flops=int(flops),
                           transcendentals=int(transcendentals),
                           bytes_accessed=int(bytes_accessed))

    out_p = pl.pallas_call(
        decoder_kernel,
        out_shape=jax.ShapeDtypeStruct((Bp, Op), compute_dtype),
        grid=(n_blocks,),
        in_specs=[x_spec] + param_specs,
        out_specs=out_spec,
        compiler_params=pltpu.CompilerParams(
            dimension_semantics=("parallel",)),
        cost_estimate=cost,
    )(x_p, *param_arrays)

    return out_p[:B, :output_units]


def init_params(key, input_units, d_theta, output_units, dtype=jnp.float32):
    """Deterministic init mimicking PyTorch Linear (uniform +/- 1/sqrt(fan_in)).

    Weights are stored as (in_features, out_features) so the kernel computes
    x @ W + b (== PyTorch's x @ W.T + b); biases are (1, F) rows.
    """
    def linear(k, fan_in, fan_out):
        kw, kb = jax.random.split(k)
        bound = 1.0 / jnp.sqrt(fan_in)
        w = jax.random.uniform(kw, (fan_in, fan_out), dtype, -bound, bound)
        b = jax.random.uniform(kb, (1, fan_out), dtype, -bound, bound)
        return w, b

    keys = jax.random.split(key, 3)
    w1, b1 = linear(keys[0], input_units, d_theta)
    w2, b2 = linear(keys[1], d_theta, d_theta)
    w3, b3 = linear(keys[2], d_theta, output_units)
    return dict(w1=w1, b1=b1, w2=w2, b2=b2, w3=w3, b3=b3)


def decoder_reference(x, p):
    """Pure-JAX f32 reference (matches the PyTorch module)."""
    h = jax.nn.softplus(x @ p["w1"] + p["b1"])
    h = jax.nn.softplus(h @ p["w2"] + p["b2"])
    return h @ p["w3"] + p["b3"]


if __name__ == "__main__":
    # Module defaults: input_units = d_theta = output_units = 400 (the wrapper
    # pads to 512 internally).  batch 256 -> two "parallel" 128-row tiles.
    B, INPUT_UNITS, D_THETA, OUTPUT_UNITS = 256, 400, 400, 400

    key = jax.random.PRNGKey(0)
    kx, kp = jax.random.split(key)
    x = jax.random.normal(kx, (B, INPUT_UNITS), jnp.float32)
    params = init_params(kp, INPUT_UNITS, D_THETA, OUTPUT_UNITS)

    out_ref = decoder_reference(x, params)

    # 1) f32 path: exact semantics of the PyTorch module.
    out_f32 = decoder_forward(x, params, compute_dtype=jnp.float32)
    jax.block_until_ready(out_f32)
    assert out_f32.shape == (B, OUTPUT_UNITS)
    assert jnp.allclose(out_f32, out_ref, atol=1e-5, rtol=1e-5), \
        "decoder f32 output mismatch"

    # 2) bf16 MXU fast path (f32 accumulation): looser tolerance vs f32 ref.
    out_bf16 = decoder_forward(x, params, compute_dtype=jnp.bfloat16)
    jax.block_until_ready(out_bf16)
    assert out_bf16.shape == (B, OUTPUT_UNITS)
    assert jnp.allclose(out_bf16.astype(jnp.float32), out_ref,
                        atol=5e-2, rtol=5e-2), "decoder bf16 output mismatch"

    print("KERNEL_OK")
</pallas_src>

<mosaic_0001>
module attributes {stable_mosaic.version = 11 : i64} {
  func.func @decoder_kernel(%arg0: i32, %arg1: memref<128x512xf32, #tpu.memory_space<vmem>>, %arg2: memref<512x512xf32, #tpu.memory_space<vmem>>, %arg3: memref<1x512xf32, #tpu.memory_space<vmem>>, %arg4: memref<512x512xf32, #tpu.memory_space<vmem>>, %arg5: memref<1x512xf32, #tpu.memory_space<vmem>>, %arg6: memref<512x512xf32, #tpu.memory_space<vmem>>, %arg7: memref<1x512xf32, #tpu.memory_space<vmem>>, %arg8: memref<128x512xf32, #tpu.memory_space<vmem>>) attributes {dimension_semantics = [#tpu.dimension_semantics<parallel>], iteration_bounds = array<i64: 2>, scalar_prefetch = 0 : i64, scratch_operands = 0 : i64, tpu.core_type = #tpu.core_type<tc>, window_params = [{transform_indices = @transform_0, window_bounds = array<i64: 128, 512>}, {pipeline_mode = #tpu.pipeline_mode<synchronous>, transform_indices = @transform_1, window_bounds = array<i64: 512, 512>}, {pipeline_mode = #tpu.pipeline_mode<synchronous>, transform_indices = @transform_2, window_bounds = array<i64: 1, 512>}, {pipeline_mode = #tpu.pipeline_mode<synchronous>, transform_indices = @transform_3, window_bounds = array<i64: 512, 512>}, {pipeline_mode = #tpu.pipeline_mode<synchronous>, transform_indices = @transform_4, window_bounds = array<i64: 1, 512>}, {pipeline_mode = #tpu.pipeline_mode<synchronous>, transform_indices = @transform_5, window_bounds = array<i64: 512, 512>}, {pipeline_mode = #tpu.pipeline_mode<synchronous>, transform_indices = @transform_6, window_bounds = array<i64: 1, 512>}, {transform_indices = @transform_7, window_bounds = array<i64: 128, 512>}]} {
    %c0 = arith.constant 0 : index
    %c0_0 = arith.constant 0 : index
    %0 = vector.load %arg3[%c0, %c0_0] : memref<1x512xf32, #tpu.memory_space<vmem>>, vector<1x512xf32>
    %c0_1 = arith.constant 0 : index
    %c0_2 = arith.constant 0 : index
    %1 = vector.load %arg5[%c0_1, %c0_2] : memref<1x512xf32, #tpu.memory_space<vmem>>, vector<1x512xf32>
    %c0_3 = arith.constant 0 : index
    %c0_4 = arith.constant 0 : index
    %2 = vector.load %arg7[%c0_3, %c0_4] : memref<1x512xf32, #tpu.memory_space<vmem>>, vector<1x512xf32>
    %c0_5 = arith.constant 0 : index
    %c0_6 = arith.constant 0 : index
    %3 = vector.load %arg1[%c0_5, %c0_6] : memref<128x512xf32, #tpu.memory_space<vmem>>, vector<128x512xf32>
    %c0_7 = arith.constant 0 : index
    %c0_8 = arith.constant 0 : index
    %4 = vector.load %arg2[%c0_7, %c0_8] : memref<512x512xf32, #tpu.memory_space<vmem>>, vector<512x512xf32>
    %cst = arith.constant dense<0.000000e+00> : vector<128x512xf32>
    %5 = tpu.matmul %3, %4, %cst {dimension_numbers = #tpu.dot_dimension_numbers<[1], [0], [0], [1], [0, 0, 1, 1], [], []>} : vector<128x512xf32>, vector<512x512xf32>, vector<128x512xf32> -> vector<128x512xf32>
    %6 = vector.broadcast %0 : vector<1x512xf32> to vector<128x512xf32>
    %7 = arith.addf %5, %6 : vector<128x512xf32>
    %cst_9 = arith.constant 0.000000e+00 : f32
    %8 = vector.broadcast %cst_9 : f32 to vector<128x512xf32>
    %9 = arith.maximumf %7, %8 : vector<128x512xf32>
    %10 = math.absf %7 : vector<128x512xf32>
    %cst_10 = arith.constant 0.000000e+00 : f32
    %11 = vector.broadcast %cst_10 : f32 to vector<128x512xf32>
    %12 = arith.subf %11, %10 : vector<128x512xf32>
    %13 = math.exp %12 : vector<128x512xf32>
    %14 = math.log1p %13 : vector<128x512xf32>
    %15 = arith.addf %9, %14 : vector<128x512xf32>
    %c0_11 = arith.constant 0 : index
    %c0_12 = arith.constant 0 : index
    %16 = vector.load %arg4[%c0_11, %c0_12] : memref<512x512xf32, #tpu.memory_space<vmem>>, vector<512x512xf32>
    %cst_13 = arith.constant dense<0.000000e+00> : vector<128x512xf32>
    %17 = tpu.matmul %15, %16, %cst_13 {dimension_numbers = #tpu.dot_dimension_numbers<[1], [0], [0], [1], [0, 0, 1, 1], [], []>} : vector<128x512xf32>, vector<512x512xf32>, vector<128x512xf32> -> vector<128x512xf32>
    %18 = vector.broadcast %1 : vector<1x512xf32> to vector<128x512xf32>
    %19 = arith.addf %17, %18 : vector<128x512xf32>
    %cst_14 = arith.constant 0.000000e+00 : f32
    %20 = vector.broadcast %cst_14 : f32 to vector<128x512xf32>
    %21 = arith.maximumf %19, %20 : vector<128x512xf32>
    %22 = math.absf %19 : vector<128x512xf32>
    %cst_15 = arith.constant 0.000000e+00 : f32
    %23 = vector.broadcast %cst_15 : f32 to vector<128x512xf32>
    %24 = arith.subf %23, %22 : vector<128x512xf32>
    %25 = math.exp %24 : vector<128x512xf32>
    %26 = math.log1p %25 : vector<128x512xf32>
    %27 = arith.addf %21, %26 : vector<128x512xf32>
    %c0_16 = arith.constant 0 : index
    %c0_17 = arith.constant 0 : index
    %28 = vector.load %arg6[%c0_16, %c0_17] : memref<512x512xf32, #tpu.memory_space<vmem>>, vector<512x512xf32>
    %cst_18 = arith.constant dense<0.000000e+00> : vector<128x512xf32>
    %29 = tpu.matmul %27, %28, %cst_18 {dimension_numbers = #tpu.dot_dimension_numbers<[1], [0], [0], [1], [0, 0, 1, 1], [], []>} : vector<128x512xf32>, vector<512x512xf32>, vector<128x512xf32> -> vector<128x512xf32>
    %30 = vector.broadcast %2 : vector<1x512xf32> to vector<128x512xf32>
    %31 = arith.addf %29, %30 : vector<128x512xf32>
    %c0_19 = arith.constant 0 : index
    %c0_20 = arith.constant 0 : index
    %32 = vector.load %arg8[%c0_19, %c0_20] : memref<128x512xf32, #tpu.memory_space<vmem>>, vector<128x512xf32>
    tpu.vector_store %arg8[%c0_19, %c0_20], %31 {strides = array<i32>} : memref<128x512xf32, #tpu.memory_space<vmem>>, vector<128x512xf32>,
    return
  }
  func.func @transform_0(%arg0: i32) -> (i32, i32) {
    %c0_i32 = arith.constant 0 : i32
    %c0_i32_0 = arith.constant 0 : i32
    return %arg0, %c0_i32 : i32, i32
  }
  func.func @transform_1(%arg0: i32) -> (i32, i32) {
    %c0_i32 = arith.constant 0 : i32
    %c0_i32_0 = arith.constant 0 : i32
    %c0_i32_1 = arith.constant 0 : i32
    return %c0_i32, %c0_i32_0 : i32, i32
  }
  func.func @transform_2(%arg0: i32) -> (i32, i32) {
    %c0_i32 = arith.constant 0 : i32
    %c0_i32_0 = arith.constant 0 : i32
    %c0_i32_1 = arith.constant 0 : i32
    return %c0_i32, %c0_i32_0 : i32, i32
  }
  func.func @transform_3(%arg0: i32) -> (i32, i32) {
    %c0_i32 = arith.constant 0 : i32
    %c0_i32_0 = arith.constant 0 : i32
    %c0_i32_1 = arith.constant 0 : i32
    return %c0_i32, %c0_i32_0 : i32, i32
  }
  func.func @transform_4(%arg0: i32) -> (i32, i32) {
    %c0_i32 = arith.constant 0 : i32
    %c0_i32_0 = arith.constant 0 : i32
    %c0_i32_1 = arith.constant 0 : i32
    return %c0_i32, %c0_i32_0 : i32, i32
  }
  func.func @transform_5(%arg0: i32) -> (i32, i32) {
    %c0_i32 = arith.constant 0 : i32
    %c0_i32_0 = arith.constant 0 : i32
    %c0_i32_1 = arith.constant 0 : i32
    return %c0_i32, %c0_i32_0 : i32, i32
  }
  func.func @transform_6(%arg0: i32) -> (i32, i32) {
    %c0_i32 = arith.constant 0 : i32
    %c0_i32_0 = arith.constant 0 : i32
    %c0_i32_1 = arith.constant 0 : i32
    return %c0_i32, %c0_i32_0 : i32, i32
  }
  func.func @transform_7(%arg0: i32) -> (i32, i32) {
    %c0_i32 = arith.constant 0 : i32
    %c0_i32_0 = arith.constant 0 : i32
    return %arg0, %c0_i32 : i32, i32
  }
}

</mosaic_0001>

<bundles_post_ra>
// kernel: tpu_custom_call.1
= control target key start
LH: loop header
LB: loop body
LE: loop exit
PB: predicated region body
PF: predicated region fallthrough
CT: control target
= control target key end

     0   :  { %12 = vsyncpa [#allocation3], 0  ;;  %s10715_s0 = inlined_call_operand.hbm [shape: f32[256,512], index: 0, kind: input, shape index: {}]   ;;  %s10716_s1 = inlined_call_operand.hbm [shape: f32[512,512], index: 1, kind: input, shape index: {}]   ;;  %s10717_s2 = inlined_call_operand.vmem [shape: f32[1,512], index: 2, kind: input, shape index: {}]   ;;  %s10718_s3 = inlined_call_operand.hbm [shape: f32[512,512], index: 3, kind: input, shape index: {}]   ;;  %s10719_s4 = inlined_call_operand.vmem [shape: f32[1,512], index: 4, kind: input, shape index: {}]   ;;  %s10720_s5 = inlined_call_operand.hbm [shape: f32[512,512], index: 5, kind: input, shape index: {}]   ;;  %s10721_s6 = inlined_call_operand.vmem [shape: f32[1,512], index: 6, kind: input, shape index: {}]   ;;  %s10722_s7 = inlined_call_operand.hbm [shape: f32[256,512], index: 7, kind: output, shape index: {}]  }
   0x1   :  { %14 = vsyncpa [#allocation3 + $0x1], 0 }
   0x2   :  { %15 = vsyncpa [#allocation6], 0 }
   0x3   :  { %16 = vsyncpa [#allocation9], 0 }
   0x4   :  { %17 = vsyncpa [#allocation4], 0 }
   0x5   :  { %19 = vsyncpa [#allocation4 + $0x1], 0  ;;  %s7285_s24 = smov 0   ;;  %s7287_s25 = smov 0  }
   0x6   :  { %s7289_s26 = smov 0   ;;  %s7291_s27 = smov 0  }
   0x7 LB: > { %s7306_s28 = sadd.s32 4294967295, %s7234_s27   ;;  %s5275_s29 = sadd.s32 4294967294, %s7234_s27   ;;  %s7234_s27 = sphi %s7291_s27, %s11812_s27   ;;  %s7230_s26 = sphi %s7289_s26, %s11811_s26   ;;  %s7226_s25 = sphi %s7287_s25, %s11810_s25   ;;  %s7222_s24 = sphi %s7285_s24, %s11809_s24  }
   0x8   : > { %p45_p0 = scmp.ne.s32.totalorder %s7226_s25, %s7222_s24  ;;  %p10723_p1 = scmp.eq.s32.totalorder %s7306_s28, 0 }
   0x9   : > { %p201_p3 = scmp.eq.s32.totalorder %s5275_s29, 1  ;;  %p5276_p5 = scmp.ge.s32.totalorder %s7234_s27, 1 }
   0xa   : > { %p7315_p4 = por %p10723_p1, %p45_p0  ;;  %p208_p7 = scmp.lt.s32.totalorder %s7234_s27, 3 }
   0xb   : > { %p7320_p6 = por %p201_p3, %p45_p0  ;;  %s7236_s10 = smov [#allocation5]  }
   0xc   : > { %s10955_s30 = scalar_select %p7315_p4, 1, 0 }
   0xd   : > { %s10956_s8 = scalar_select %p7320_p6, 1, 0 }
   0xe   : > { %p7325_p8 = pnand %p5276_p5, %p208_p7  ;;  %s220_s11 = sshll.u32 %s7236_s10, 4  ;;  %s7329_s11 = int_to_ptr.vmem [resolvable:$true] %s220_s11 }
   0xf   : > { %10957 = sst [smem:[#allocation15_spill]] %s10956_s8  ;;  %s7237_s13 = smov [#allocation7]  }
  0x10   : > { %s10958_s9 = scalar_select %p7325_p8, 1, 0 }
  0x11   : > { %p6469_p9 = pneg %p7325_p8  ;;  %s236_s14 = sshll.u32 %s7237_s13, 4  ;;  %s7340_s14 = int_to_ptr.vmem [resolvable:$true] %s236_s14 }
  0x12   : > { %s7238_s15 = smov [#allocation8]   ;;  %s7046_s19 = scalar_lea.hbm %s10716_s1, 32768 }
  0x13   : > { %p7336_p11 = pnand %p6469_p9, %p10723_p1  ;;  %s7342_s16 = sshll.u32 %s7238_s15, 4  ;;  %s253_s16 = int_to_ptr.vmem [resolvable:$true] %s7342_s16 }
  0x14   : > { %p7047_p12 = scmp.ne.s32.totalorder %s10716_s1, %s7046_s19  ;;  %p7053_p5 = scmp.lt.u32.totalorder %s7046_s19, %s10716_s1 }
  0x15   : > { %p7352_p13 = pneg %p7336_p11 }
  0x17   : > { %p7049_p0 = pnand %p7352_p13, %p7047_p12 }
  0x19   : > { %p7050_p3 = pneg %p7049_p0 }
  0x1b   : > { %p7055_p7 = pnand %p7053_p5, %p7050_p3 }
  0x1d   : > { %7058 = shalt.err (!%p7055_p7)
}
  0x1e   : > { %s7059_s10 = scalar_lea.vmem %s7329_s11, 32768  ;;  %p7067_p2 = scmp.lt.s32.totalorder %s7329_s11, %s7329_s11 }
  0x1f   : > { %p7060_p9 = scmp.ne.s32.totalorder %s7329_s11, %s7059_s10  ;;  %p7068_p6 = scmp.lt.s32.totalorder %s7059_s10, %s7059_s10 }
  0x21   : > { %p7062_p10 = pnand %p7060_p9, %p7352_p13  ;;  %p7069_p12 = por %p7068_p6, %p7067_p2 }
  0x23   : > { %p7063_p1 = pneg %p7062_p10 }
  0x25   : > { %p7070_p0 = pnand %p7069_p12, %p7063_p1 }
  0x27   : > { %7073 = shalt.err (!%p7070_p0)
}
  0x28   : > { %s7239_s13 = smov 512   ;;  %s7240_s15 = smov 32  }
  0x29   : > { %6472 = dma.hbm_to_vmem [thread:$0]  (!%p7336_p11), %s10716_s1, 32768, %s7329_s11, [#allocation6], %s7239_s13, %s7239_s13, %s7240_s15  }
  0x2a   : > { %s7074_s21 = scalar_lea.hbm %s10718_s3, 32768 }
  0x2b   : > { %p7075_p1 = scmp.ne.s32.totalorder %s10718_s3, %s7074_s21  ;;  %p7081_p10 = scmp.lt.u32.totalorder %s7074_s21, %s10718_s3 }
  0x2d   : > { %p7077_p2 = pnand %p7075_p1, %p7352_p13 }
  0x2f   : > { %p7078_p6 = pneg %p7077_p2 }
  0x31   : > { %p7083_p3 = pnand %p7081_p10, %p7078_p6 }
  0x33   : > { %7086 = shalt.err (!%p7083_p3)
}
  0x34   : > { %s7087_s11 = scalar_lea.vmem %s7340_s14, 32768  ;;  %p7095_p12 = scmp.lt.s32.totalorder %s7340_s14, %s7340_s14 }
  0x35   : > { %p7088_p5 = scmp.ne.s32.totalorder %s7340_s14, %s7087_s11  ;;  %p7096_p0 = scmp.lt.s32.totalorder %s7087_s11, %s7087_s11 }
  0x37   : > { %p7090_p7 = pnand %p7088_p5, %p7352_p13  ;;  %p7097_p1 = por %p7096_p0, %p7095_p12 }
  0x39   : > { %p7091_p9 = pneg %p7090_p7 }
  0x3b   : > { %p7098_p2 = pnand %p7097_p1, %p7091_p9 }
  0x3d   : > { %7101 = shalt.err (!%p7098_p2)
}
  0x3e   : > { %6475 = dma.hbm_to_vmem [thread:$0]  (!%p7336_p11), %s10718_s3, 32768, %s7340_s14, [#allocation6], %s7239_s13, %s7239_s13, %s7240_s15  }
  0x3f   : > { %s7102_s20 = scalar_lea.hbm %s10720_s5, 32768 }
  0x40   : > { %p7103_p6 = scmp.ne.s32.totalorder %s10720_s5, %s7102_s20  ;;  %p7109_p5 = scmp.lt.u32.totalorder %s7102_s20, %s10720_s5 }
  0x42   : > { %p7105_p10 = pnand %p7103_p6, %p7352_p13 }
  0x44   : > { %p7106_p3 = pneg %p7105_p10 }
  0x46   : > { %p7111_p7 = pnand %p7109_p5, %p7106_p3 }
  0x48   : > { %7114 = shalt.err (!%p7111_p7)
}
  0x49   : > { %s7115_s11 = scalar_lea.vmem %s253_s16, 32768  ;;  %p7123_p1 = scmp.lt.s32.totalorder %s253_s16, %s253_s16 }
  0x4a   : > { %p7116_p9 = scmp.ne.s32.totalorder %s253_s16, %s7115_s11  ;;  %p7124_p2 = scmp.lt.s32.totalorder %s7115_s11, %s7115_s11 }
  0x4c   : > { %p7118_p12 = pnand %p7116_p9, %p7352_p13  ;;  %p7125_p4 = por %p7124_p2, %p7123_p1 }
  0x4e   : > { %p7119_p0 = pneg %p7118_p12 }
  0x50   : > { %p7126_p8 = pnand %p7125_p4, %p7119_p0 }
  0x52   : > { %7129 = shalt.err (!%p7126_p8)
}
  0x53   : > { %6478 = dma.hbm_to_vmem [thread:$0]  (!%p7336_p11), %s10720_s5, 32768, %s253_s16, [#allocation9], %s7239_s13, %s7239_s13, %s7240_s15  }
  0x54   : > { %s7425_s22 = sadd.s32 1, %s7234_s27   ;;  %s32_s17 = sadd.s32 1, %s7230_s26 }
  0x55   : > { %s29_s12 = ssub.s32 %s7234_s27, %s7425_s22  ;;  %p39_p8 = scmp.ne.s32.totalorder %s7230_s26, %s7226_s25 }
  0x56   : > { %p30_p4 = scmp.eq.s32.totalorder %s29_s12, 0  ;;  %p40_p13 = scmp.eq.s32.totalorder %s7234_s27, 0 }
  0x57   : > { %p6490_p6 = scmp.lt.s32.totalorder %s7234_s27, 2  ;;  %p10961_p3 = scmp.eq.s32.totalorder %s7306_s28, 1 }
  0x58   : > { %s7435_s18 = scalar_select %p30_p4, %s7230_s26, %s32_s17  }
  0x59   : > { %p41_p10 = por %p40_p13, %p39_p8  ;;  %p7439_p5 = por %p10961_p3, %p39_p8 }
  0x5a   : > { %s269_s20 = sand.u32 1, %s7230_s26   ;;  %s5298_s21 = sshll.u32 %s7234_s27, 13 }
  0x5b   : > { %s5281_s16 = sshll.u32 %s269_s20, 9  ;;  %s7448_s10 = scalar_lea.hbm %s10715_s0, %s5298_s21 }
  0x5c   : > { %s273_s11 = scalar_lea.vmem [#allocation2], %s5281_s16  ;;  %p7450_p11 = pnand %p6490_p6, %p41_p10 }
  0x5d   : > { %s281_s14 = sshll.u32 %s273_s11, 4  ;;  %s7456_s12 = scalar_lea.sflag [#allocation3], %s269_s20  ;;  %s7454_s14 = int_to_ptr.vmem [resolvable:$true] %s281_s14 }
  0x5e   : > { %s7130_s17 = scalar_lea.hbm %s7448_s10, 8192  ;;  %p7132_p9 = pneg %p7450_p11 }
  0x5f   : > { %p7131_p7 = scmp.ne.s32.totalorder %s7448_s10, %s7130_s17  ;;  %s7135_s23 = scalar_lea.hbm %s10715_s0, 16384 }
  0x60   : > { %p7136_p1 = scmp.lt.u32.totalorder %s7448_s10, %s10715_s0  ;;  %p7137_p2 = scmp.lt.u32.totalorder %s7135_s23, %s7130_s17 }
  0x61   : > { %p7133_p12 = pnand %p7132_p9, %p7131_p7  ;;  %p7139_p8 = scmp.lt.u32.totalorder %s7130_s17, %s7448_s10 }
  0x62   : > { %p7138_p4 = por %p7137_p2, %p7136_p1 }
  0x63   : > { %p7134_p0 = pneg %p7133_p12 }
  0x64   : > { %p7140_p13 = por %p7139_p8, %p7138_p4 }
  0x66   : > { %p7141_p6 = pnand %p7140_p13, %p7134_p0 }
  0x68   : > { %7144 = shalt.err (!%p7141_p6)
}
  0x69   : > { %s7145_s20 = scalar_lea.vmem %s7454_s14, 8192  ;;  %s7241_s21 = smov [#allocation2]  }
  0x6a   : > { %p7146_p10 = scmp.ne.s32.totalorder %s7454_s14, %s7145_s20  ;;  %s7150_s16 = sshll.u32 %s7241_s21, 4  ;;  %s7151_s16 = int_to_ptr.vmem [resolvable:$false] %s7150_s16 }
  0x6b   : > { %s7152_s29 = scalar_lea.vmem %s7151_s16, 16384  ;;  %p7153_p12 = scmp.lt.s32.totalorder %s7454_s14, %s7151_s16 }
  0x6c   : > { %p7148_p3 = pnand %p7146_p10, %p7132_p9  ;;  %p7154_p1 = scmp.lt.s32.totalorder %s7152_s29, %s7145_s20 }
  0x6e   : > { %p7149_p7 = pneg %p7148_p3  ;;  %p7155_p2 = por %p7154_p1, %p7153_p12 }
  0x70   : > { %p7156_p4 = pnand %p7155_p2, %p7149_p7 }
  0x72   : > { %7159 = shalt.err (!%p7156_p4)
}
  0x73   : > { %6482 = dma.hbm_to_vmem [thread:$0]  (!%p7450_p11), %s7448_s10, 8192, %s7454_s14, %s7456_s12, %s7239_s13, %s7239_s13, %s7240_s15  }
  0x74   : > { %p10964_p9 = scmp.ne.s32.totalorder %s10958_s9, 0 }
  0x76   : > { %293 = sbr.rel (%p10964_p9) target bundleno = 1419 (0x58b), region = 48 }
  0x7d   : > { %s7490_s17 = sand.u32 1, %s7226_s25   ;;  %p10965_p0 = scmp.ne.s32.totalorder %s10955_s30, 0 }
  0x7e   : > { %s5286_s23 = sshll.u32 %s7490_s17, 9  ;;  %s296_s11 = scalar_lea.sflag [#allocation3], %s7490_s17 }
  0x7f   : > { %s7496_s8 = scalar_lea.vmem [#allocation2], %s5286_s23 }
  0x80   : > { %7205 = dma.done.wait (%p10965_p0), %s296_s11, 8192  }
  0x81   : > { %7207 = vsyncadd (%p10965_p0), %s296_s11, 4294959104  ;;  %p10966_p11 = scmp.eq.s32.totalorder %s7306_s28, 0 }
  0x83   : > { %7209 = dma.done.wait (%p10966_p11), [#allocation6], 65536   ;;  %p10967_p8 = pmov %p10966_p11 }
  0x85   : > { %7211 = vsyncadd (%p10967_p8), [#allocation6], 4294901760  ;;  %p10968_p13 = pmov %p10967_p8 }
  0x86   : > { %p10969_p6 = pmov %p10967_p8 }
  0x87   : > { %7213 = dma.done.wait (%p10968_p13), [#allocation9], 32768  }
  0x88   : > { %7215 = vsyncadd (%p10969_p6), [#allocation9], 4294934528  ;;  %v412_v0 = vld [vmem:[#allocation5 + $0x8] sm:$0xff]  ;;  %v414_v2 = vld [vmem:[#allocation5 + $0x18] sm:$0xff]  ;;  %s10538_s12 = scalar_lea.vmem [#allocation10], %s5286_s23  ;;  %s5300_s20 = sshll.u32 %s7306_s28, 13 }
  0x89   : > { %v416_v1 = vld [vmem:[#allocation5 + $0x28] sm:$0xff]  ;;  %v418_v4 = vld [vmem:[#allocation5 + $0x38] sm:$0xff]  ;;  %v411_v5 = vld [vmem:[#allocation5] sm:$0xff]  ;;  %s5173_s21 = sshll.u32 %s10538_s12, 4  ;;  %s10663_s29 = scalar_lea.hbm %s10722_s7, %s5300_s20  ;;  %s10665_s21 = int_to_ptr.vmem [resolvable:$true] %s5173_s21 }
  0x8a   : > { %v5301_v3 = vpack.c.bf16 %v416_v1, %v412_v0  ;;  %v415_v6 = vld [vmem:[#allocation5 + $0x20] sm:$0xff]  ;;  %v5429_v7 = vpack.c.bf16 %v418_v4, %v414_v2  ;;  %v413_v9 = vld [vmem:[#allocation5 + $0x10] sm:$0xff]  ;;  %v420_v11 = vld [vmem:[#allocation5 + $0x48] sm:$0xff]  ;;  %s5159_s23 = scalar_lea.sflag [#allocation4], %s7490_s17  ;;  %s7160_s11 = scalar_lea.vmem %s10665_s21, 8192 }
  0x8b   : > { %v5303_v8 = vpack.c.bf16 %v415_v6, %v411_v5  ;;  %v417_v10 = vld [vmem:[#allocation5 + $0x30] sm:$0xff]  ;;  %v424_v13 = vld [vmem:[#allocation5 + $0x68] sm:$0xff]  ;;  %v422_v14 = vld [vmem:[#allocation5 + $0x58] sm:$0xff]  ;;  %p7161_p10 = scmp.ne.s32.totalorder %s10665_s21, %s7160_s11 }
  0x8c   : > { %5302 = vmatprep.subr.bf16.mxu0 %v5301_v3  ;;  %v5431_v12 = vpack.c.bf16 %v417_v10, %v413_v9  ;;  %v426_v15 = vld [vmem:[#allocation5 + $0x78] sm:$0xff]  ;;  %5430 = vmatprep.subr.bf16.mxu1 %v5429_v7  ;;  %v5305_v16 = vpack.c.bf16 %v424_v13, %v420_v11  ;;  %v419_v18 = vld [vmem:[#allocation5 + $0x40] sm:$0xff]  ;;  %v421_v20 = vld [vmem:[#allocation5 + $0x50] sm:$0xff] }
  0x8d   : > { %5304 = vmatpush1.bf16.msra.mxu0 %v5303_v8  ;;  %v5433_v17 = vpack.c.bf16 %v426_v15, %v422_v14  ;;  %v423_v19 = vld [vmem:[#allocation5 + $0x60] sm:$0xff]  ;;  %v425_v22 = vld [vmem:[#allocation5 + $0x70] sm:$0xff]  ;;  %v428_v23 = vld [vmem:[#allocation5 + $0x88] sm:$0xff]  ;;  %p7162_p3 = pnand %p7161_p10, %p7439_p5 }
  0x8e   : > { %5432 = vmatpush1.bf16.msra.mxu1 %v5431_v12  ;;  %v5307_v21 = vpack.c.bf16 %v423_v19, %v419_v18  ;;  %v432_v24 = vld [vmem:[#allocation5 + $0xa8] sm:$0xff]  ;;  %5306 = vmatprep.subr.bf16.mxu0 %v5305_v16  ;;  %v5435_v25 = vpack.c.bf16 %v425_v22, %v421_v20  ;;  %v430_v27 = vld [vmem:[#allocation5 + $0x98] sm:$0xff]  ;;  %v427_v29 = vld [vmem:[#allocation5 + $0x80] sm:$0xff] }
  0x8f   : > { %5434 = vmatprep.subr.bf16.mxu1 %v5433_v17  ;;  %v5309_v26 = vpack.c.bf16 %v432_v24, %v428_v23  ;;  %v434_v28 = vld [vmem:[#allocation5 + $0xb8] sm:$0xff]  ;;  %v431_v31 = vld [vmem:[#allocation5 + $0xa0] sm:$0xff]  ;;  %v429_v32 = vld [vmem:[#allocation5 + $0x90] sm:$0xff]  ;;  %p7163_p7 = pneg %p7162_p3 }
  0x90   : > { %v5437_v30 = vpack.c.bf16 %v434_v28, %v430_v27  ;;  %v433_v33 = vld [vmem:[#allocation5 + $0xb0] sm:$0xff]  ;;  %v5311_v34 = vpack.c.bf16 %v431_v31, %v427_v29  ;;  %v436_v35 = vld [vmem:[#allocation5 + $0xc8] sm:$0xff]  ;;  %v438_v37 = vld [vmem:[#allocation5 + $0xd8] sm:$0xff] }
  0x91   : > { %5308 = vmatpush1.bf16.msra.mxu0 %v5307_v21  ;;  %v440_v36 = vld [vmem:[#allocation5 + $0xe8] sm:$0xff]  ;;  %v5439_v38 = vpack.c.bf16 %v433_v33, %v429_v32  ;;  %v442_v40 = vld [vmem:[#allocation5 + $0xf8] sm:$0xff]  ;;  %v435_v41 = vld [vmem:[#allocation5 + $0xc0] sm:$0xff] }
  0x92   : > { %5436 = vmatpush1.bf16.msra.mxu1 %v5435_v25  ;;  %5310 = vmatprep.subr.bf16.mxu0 %v5309_v26  ;;  %v5313_v39 = vpack.c.bf16 %v440_v36, %v436_v35  ;;  %v439_v42 = vld [vmem:[#allocation5 + $0xe0] sm:$0xff]  ;;  %v5441_v43 = vpack.c.bf16 %v442_v40, %v438_v37  ;;  %v437_v44 = vld [vmem:[#allocation5 + $0xd0] sm:$0xff]  ;;  %v444_v46 = vld [vmem:[#allocation5 + $0x108] sm:$0xff] }
  0x93   : > { %5438 = vmatprep.subr.bf16.mxu1 %v5437_v30  ;;  %v441_v45 = vld [vmem:[#allocation5 + $0xf0] sm:$0xff]  ;;  %v448_v47 = vld [vmem:[#allocation5 + $0x128] sm:$0xff]  ;;  %v446_v48 = vld [vmem:[#allocation5 + $0x118] sm:$0xff]  ;;  %v5315_v50 = vpack.c.bf16 %v439_v42, %v435_v41 }
  0x94   : > { %v450_v49 = vld [vmem:[#allocation5 + $0x138] sm:$0xff]  ;;  %v5443_v51 = vpack.c.bf16 %v441_v45, %v437_v44  ;;  %v5317_v52 = vpack.c.bf16 %v448_v47, %v444_v46  ;;  %v443_v53 = vld [vmem:[#allocation5 + $0x100] sm:$0xff]  ;;  %v445_v55 = vld [vmem:[#allocation5 + $0x110] sm:$0xff] }
  0x95   : > { %5312 = vmatpush1.bf16.msra.mxu0 %v5311_v34  ;;  %v447_v54 = vld [vmem:[#allocation5 + $0x120] sm:$0xff]  ;;  %v5445_v56 = vpack.c.bf16 %v450_v49, %v446_v48  ;;  %v449_v57 = vld [vmem:[#allocation5 + $0x130] sm:$0xff]  ;;  %v452_v58 = vld [vmem:[#allocation5 + $0x148] sm:$0xff] }
  0x96   : > { %5440 = vmatpush1.bf16.msra.mxu1 %v5439_v38  ;;  %5314 = vmatprep.subr.bf16.mxu0 %v5313_v39  ;;  %v456_v59 = vld [vmem:[#allocation5 + $0x168] sm:$0xff]  ;;  %v454_v60 = vld [vmem:[#allocation5 + $0x158] sm:$0xff]  ;;  %v5319_v62 = vpack.c.bf16 %v447_v54, %v443_v53  ;;  %v5447_v63 = vpack.c.bf16 %v449_v57, %v445_v55  ;;  %v451_v1 = vld [vmem:[#allocation5 + $0x140] sm:$0xff] }
  0x97   : > { %5442 = vmatprep.subr.bf16.mxu1 %v5441_v43  ;;  %v458_v61 = vld [vmem:[#allocation5 + $0x178] sm:$0xff]  ;;  %v5321_v0 = vpack.c.bf16 %v456_v59, %v452_v58  ;;  %v455_v2 = vld [vmem:[#allocation5 + $0x160] sm:$0xff]  ;;  %v453_v3 = vld [vmem:[#allocation5 + $0x150] sm:$0xff] }
  0x98   : > { %v5449_v4 = vpack.c.bf16 %v458_v61, %v454_v60  ;;  %v457_v5 = vld [vmem:[#allocation5 + $0x170] sm:$0xff]  ;;  %v460_v6 = vld [vmem:[#allocation5 + $0x188] sm:$0xff]  ;;  %v462_v8 = vld [vmem:[#allocation5 + $0x198] sm:$0xff]  ;;  %v5323_v10 = vpack.c.bf16 %v455_v2, %v451_v1 }
  0x99   : > { %5316 = vmatpush1.bf16.msra.mxu0 %v5315_v50  ;;  %v464_v7 = vld [vmem:[#allocation5 + $0x1a8] sm:$0xff]  ;;  %v466_v9 = vld [vmem:[#allocation5 + $0x1b8] sm:$0xff]  ;;  %v5451_v11 = vpack.c.bf16 %v457_v5, %v453_v3  ;;  %v459_v13 = vld [vmem:[#allocation5 + $0x180] sm:$0xff] }
  0x9a   : > { %5444 = vmatpush1.bf16.msra.mxu1 %v5443_v51  ;;  %5318 = vmatprep.subr.bf16.mxu0 %v5317_v52  ;;  %v5325_v12 = vpack.c.bf16 %v464_v7, %v460_v6  ;;  %v463_v14 = vld [vmem:[#allocation5 + $0x1a0] sm:$0xff]  ;;  %v461_v15 = vld [vmem:[#allocation5 + $0x190] sm:$0xff]  ;;  %v5453_v16 = vpack.c.bf16 %v466_v9, %v462_v8  ;;  %v468_v18 = vld [vmem:[#allocation5 + $0x1c8] sm:$0xff] }
  0x9b   : > { %5446 = vmatprep.subr.bf16.mxu1 %v5445_v56  ;;  %v465_v17 = vld [vmem:[#allocation5 + $0x1b0] sm:$0xff]  ;;  %v472_v19 = vld [vmem:[#allocation5 + $0x1e8] sm:$0xff]  ;;  %v470_v20 = vld [vmem:[#allocation5 + $0x1d8] sm:$0xff]  ;;  %v5327_v22 = vpack.c.bf16 %v463_v14, %v459_v13 }
  0x9c   : > { %v474_v21 = vld [vmem:[#allocation5 + $0x1f8] sm:$0xff]  ;;  %v5455_v23 = vpack.c.bf16 %v465_v17, %v461_v15  ;;  %v5329_v24 = vpack.c.bf16 %v472_v19, %v468_v18  ;;  %v467_v25 = vld [vmem:[#allocation5 + $0x1c0] sm:$0xff]  ;;  %v469_v27 = vld [vmem:[#allocation5 + $0x1d0] sm:$0xff] }
  0x9d   : > { %5320 = vmatpush1.bf16.msra.mxu0 %v5319_v62  ;;  %v471_v26 = vld [vmem:[#allocation5 + $0x1e0] sm:$0xff]  ;;  %v5457_v28 = vpack.c.bf16 %v474_v21, %v470_v20  ;;  %v473_v29 = vld [vmem:[#allocation5 + $0x1f0] sm:$0xff]  ;;  %v476_v30 = vld [vmem:[#allocation5 + $0x208] sm:$0xff] }
  0x9e   : > { %5448 = vmatpush1.bf16.msra.mxu1 %v5447_v63  ;;  %5322 = vmatprep.subr.bf16.mxu0 %v5321_v0  ;;  %v480_v31 = vld [vmem:[#allocation5 + $0x228] sm:$0xff]  ;;  %v478_v32 = vld [vmem:[#allocation5 + $0x218] sm:$0xff]  ;;  %v5331_v34 = vpack.c.bf16 %v471_v26, %v467_v25  ;;  %v5459_v35 = vpack.c.bf16 %v473_v29, %v469_v27  ;;  %v475_v37 = vld [vmem:[#allocation5 + $0x200] sm:$0xff] }
  0x9f   : > { %5450 = vmatprep.subr.bf16.mxu1 %v5449_v4  ;;  %v482_v33 = vld [vmem:[#allocation5 + $0x238] sm:$0xff]  ;;  %v5333_v36 = vpack.c.bf16 %v480_v31, %v476_v30  ;;  %v479_v38 = vld [vmem:[#allocation5 + $0x220] sm:$0xff]  ;;  %v477_v39 = vld [vmem:[#allocation5 + $0x210] sm:$0xff] }
  0xa0   : > { %v5461_v40 = vpack.c.bf16 %v482_v33, %v478_v32  ;;  %v481_v41 = vld [vmem:[#allocation5 + $0x230] sm:$0xff]  ;;  %v484_v42 = vld [vmem:[#allocation5 + $0x248] sm:$0xff]  ;;  %v486_v44 = vld [vmem:[#allocation5 + $0x258] sm:$0xff]  ;;  %v5335_v46 = vpack.c.bf16 %v479_v38, %v475_v37 }
  0xa1   : > { %5324 = vmatpush1.bf16.msra.mxu0 %v5323_v10  ;;  %v488_v43 = vld [vmem:[#allocation5 + $0x268] sm:$0xff]  ;;  %v490_v45 = vld [vmem:[#allocation5 + $0x278] sm:$0xff]  ;;  %v5463_v47 = vpack.c.bf16 %v481_v41, %v477_v39  ;;  %v483_v49 = vld [vmem:[#allocation5 + $0x240] sm:$0xff] }
  0xa2   : > { %5452 = vmatpush1.bf16.msra.mxu1 %v5451_v11  ;;  %5326 = vmatprep.subr.bf16.mxu0 %v5325_v12  ;;  %v5337_v48 = vpack.c.bf16 %v488_v43, %v484_v42  ;;  %v487_v50 = vld [vmem:[#allocation5 + $0x260] sm:$0xff]  ;;  %v485_v51 = vld [vmem:[#allocation5 + $0x250] sm:$0xff]  ;;  %v5465_v52 = vpack.c.bf16 %v490_v45, %v486_v44  ;;  %v492_v54 = vld [vmem:[#allocation5 + $0x288] sm:$0xff] }
  0xa3   : > { %5454 = vmatprep.subr.bf16.mxu1 %v5453_v16  ;;  %v489_v53 = vld [vmem:[#allocation5 + $0x270] sm:$0xff]  ;;  %v496_v55 = vld [vmem:[#allocation5 + $0x2a8] sm:$0xff]  ;;  %v494_v56 = vld [vmem:[#allocation5 + $0x298] sm:$0xff]  ;;  %v5339_v58 = vpack.c.bf16 %v487_v50, %v483_v49 }
  0xa4   : > { %v498_v57 = vld [vmem:[#allocation5 + $0x2b8] sm:$0xff]  ;;  %v5467_v59 = vpack.c.bf16 %v489_v53, %v485_v51  ;;  %v5341_v60 = vpack.c.bf16 %v496_v55, %v492_v54  ;;  %v491_v61 = vld [vmem:[#allocation5 + $0x280] sm:$0xff]  ;;  %v493_v63 = vld [vmem:[#allocation5 + $0x290] sm:$0xff] }
  0xa5   : > { %5328 = vmatpush1.bf16.msra.mxu0 %v5327_v22  ;;  %v495_v62 = vld [vmem:[#allocation5 + $0x2a0] sm:$0xff]  ;;  %v5469_v0 = vpack.c.bf16 %v498_v57, %v494_v56  ;;  %v497_v1 = vld [vmem:[#allocation5 + $0x2b0] sm:$0xff]  ;;  %v500_v2 = vld [vmem:[#allocation5 + $0x2c8] sm:$0xff] }
  0xa6   : > { %5456 = vmatpush1.bf16.msra.mxu1 %v5455_v23  ;;  %5330 = vmatprep.subr.bf16.mxu0 %v5329_v24  ;;  %v504_v3 = vld [vmem:[#allocation5 + $0x2e8] sm:$0xff]  ;;  %v502_v4 = vld [vmem:[#allocation5 + $0x2d8] sm:$0xff]  ;;  %v5343_v6 = vpack.c.bf16 %v495_v62, %v491_v61  ;;  %v499_v7 = vld [vmem:[#allocation5 + $0x2c0] sm:$0xff]  ;;  %v5471_v8 = vpack.c.bf16 %v497_v1, %v493_v63 }
  0xa7   : > { %5458 = vmatprep.subr.bf16.mxu1 %v5457_v28  ;;  %v506_v5 = vld [vmem:[#allocation5 + $0x2f8] sm:$0xff]  ;;  %v5345_v9 = vpack.c.bf16 %v504_v3, %v500_v2  ;;  %v503_v10 = vld [vmem:[#allocation5 + $0x2e0] sm:$0xff]  ;;  %v501_v11 = vld [vmem:[#allocation5 + $0x2d0] sm:$0xff] }
  0xa8   : > { %v505_v12 = vld [vmem:[#allocation5 + $0x2f0] sm:$0xff]  ;;  %v5473_v13 = vpack.c.bf16 %v506_v5, %v502_v4  ;;  %v508_v14 = vld [vmem:[#allocation5 + $0x308] sm:$0xff]  ;;  %v510_v17 = vld [vmem:[#allocation5 + $0x318] sm:$0xff]  ;;  %v5347_v19 = vpack.c.bf16 %v503_v10, %v499_v7 }
  0xa9   : > { %5332 = vmatpush1.bf16.msra.mxu0 %v5331_v34  ;;  %v512_v15 = vld [vmem:[#allocation5 + $0x328] sm:$0xff]  ;;  %v514_v18 = vld [vmem:[#allocation5 + $0x338] sm:$0xff]  ;;  %v5475_v20 = vpack.c.bf16 %v505_v12, %v501_v11  ;;  %v507_v22 = vld [vmem:[#allocation5 + $0x300] sm:$0xff] }
  0xaa   : > { %5460 = vmatpush1.bf16.msra.mxu1 %v5459_v35  ;;  %5334 = vmatprep.subr.bf16.mxu0 %v5333_v36  ;;  %v348_v16 = vld [vmem:[%s7496_s8 + $0x8] sm:$0xff]  ;;  %v5349_v21 = vpack.c.bf16 %v512_v15, %v508_v14  ;;  %v511_v23 = vld [vmem:[#allocation5 + $0x320] sm:$0xff]  ;;  %v509_v24 = vld [vmem:[#allocation5 + $0x310] sm:$0xff]  ;;  %v5477_v25 = vpack.c.bf16 %v514_v18, %v510_v17 }
  0xab   : > { %5462 = vmatprep.subr.bf16.mxu1 %v5461_v40  ;;  %752 = vmatprep.mubr.f32.mxu0 %v348_v16  ;;  %v513_v26 = vld [vmem:[#allocation5 + $0x330] sm:$0xff]  ;;  %v516_v27 = vld [vmem:[#allocation5 + $0x348] sm:$0xff]  ;;  %v518_v29 = vld [vmem:[#allocation5 + $0x358] sm:$0xff]  ;;  %v5351_v31 = vpack.c.bf16 %v511_v23, %v507_v22 }
  0xac   : > { %1074 = vmatprep.mubr.f32.mxu1 %v348_v16  ;;  %v520_v28 = vld [vmem:[#allocation5 + $0x368] sm:$0xff]  ;;  %v522_v30 = vld [vmem:[#allocation5 + $0x378] sm:$0xff]  ;;  %v5479_v32 = vpack.c.bf16 %v513_v26, %v509_v24  ;;  %v515_v34 = vld [vmem:[#allocation5 + $0x340] sm:$0xff] }
  0xad   : > { %5336 = vmatpush1.bf16.msra.mxu0 %v5335_v46  ;;  %v5353_v33 = vpack.c.bf16 %v520_v28, %v516_v27  ;;  %v519_v35 = vld [vmem:[#allocation5 + $0x360] sm:$0xff]  ;;  %v517_v36 = vld [vmem:[#allocation5 + $0x350] sm:$0xff]  ;;  %v5481_v37 = vpack.c.bf16 %v522_v30, %v518_v29  ;;  %v524_v39 = vld [vmem:[#allocation5 + $0x388] sm:$0xff] }
  0xae   : > { %5464 = vmatpush1.bf16.msra.mxu1 %v5463_v47  ;;  %5338 = vmatprep.subr.bf16.mxu0 %v5337_v48  ;;  %v521_v38 = vld [vmem:[#allocation5 + $0x370] sm:$0xff]  ;;  %v528_v40 = vld [vmem:[#allocation5 + $0x3a8] sm:$0xff]  ;;  %v526_v41 = vld [vmem:[#allocation5 + $0x398] sm:$0xff]  ;;  %v5355_v43 = vpack.c.bf16 %v519_v35, %v515_v34 }
  0xaf   : > { %5466 = vmatprep.subr.bf16.mxu1 %v5465_v52  ;;  %v530_v42 = vld [vmem:[#allocation5 + $0x3b8] sm:$0xff]  ;;  %v5483_v44 = vpack.c.bf16 %v521_v38, %v517_v36  ;;  %v5357_v45 = vpack.c.bf16 %v528_v40, %v524_v39  ;;  %v523_v46 = vld [vmem:[#allocation5 + $0x380] sm:$0xff]  ;;  %v525_v48 = vld [vmem:[#allocation5 + $0x390] sm:$0xff] }
  0xb0   : > { %v527_v47 = vld [vmem:[#allocation5 + $0x3a0] sm:$0xff]  ;;  %v5485_v49 = vpack.c.bf16 %v530_v42, %v526_v41  ;;  %v529_v50 = vld [vmem:[#allocation5 + $0x3b0] sm:$0xff]  ;;  %v532_v51 = vld [vmem:[#allocation5 + $0x3c8] sm:$0xff] }
  0xb1   : > { %5340 = vmatpush1.bf16.msra.mxu0 %v5339_v58  ;;  %v536_v52 = vld [vmem:[#allocation5 + $0x3e8] sm:$0xff]  ;;  %v534_v53 = vld [vmem:[#allocation5 + $0x3d8] sm:$0xff]  ;;  %v5359_v55 = vpack.c.bf16 %v527_v47, %v523_v46  ;;  %v5487_v56 = vpack.c.bf16 %v529_v50, %v525_v48  ;;  %v531_v58 = vld [vmem:[#allocation5 + $0x3c0] sm:$0xff] }
  0xb2   : > { %5468 = vmatpush1.bf16.msra.mxu1 %v5467_v59  ;;  %5342 = vmatprep.subr.bf16.mxu0 %v5341_v60  ;;  %v538_v54 = vld [vmem:[#allocation5 + $0x3f8] sm:$0xff]  ;;  %v5361_v57 = vpack.c.bf16 %v536_v52, %v532_v51  ;;  %v535_v59 = vld [vmem:[#allocation5 + $0x3e0] sm:$0xff]  ;;  %v533_v60 = vld [vmem:[#allocation5 + $0x3d0] sm:$0xff] }
  0xb3   : > { %5470 = vmatprep.subr.bf16.mxu1 %v5469_v0  ;;  %v5489_v61 = vpack.c.bf16 %v538_v54, %v534_v53  ;;  %v537_v62 = vld [vmem:[#allocation5 + $0x3f0] sm:$0xff]  ;;  %v540_v63 = vld [vmem:[#allocation5 + $0x408] sm:$0xff]  ;;  %v542_v1 = vld [vmem:[#allocation5 + $0x418] sm:$0xff]  ;;  %v5363_v3 = vpack.c.bf16 %v535_v59, %v531_v58 }
  0xb4   : > { %v544_v0 = vld [vmem:[#allocation5 + $0x428] sm:$0xff]  ;;  %v546_v2 = vld [vmem:[#allocation5 + $0x438] sm:$0xff]  ;;  %v5491_v4 = vpack.c.bf16 %v537_v62, %v533_v60  ;;  %v543_v7 = vld [vmem:[#allocation5 + $0x420] sm:$0xff] }
  0xb5   : > { %5344 = vmatpush1.bf16.msra.mxu0 %v5343_v6  ;;  %v5365_v5 = vpack.c.bf16 %v544_v0, %v540_v63  ;;  %v539_v6 = vld [vmem:[#allocation5 + $0x400] sm:$0xff]  ;;  %v545_v10 = vld [vmem:[#allocation5 + $0x430] sm:$0xff]  ;;  %v548_v11 = vld [vmem:[#allocation5 + $0x448] sm:$0xff] }
  0xb6   : > { %5472 = vmatpush1.bf16.msra.mxu1 %v5471_v8  ;;  %5346 = vmatprep.subr.bf16.mxu0 %v5345_v9  ;;  %v5493_v8 = vpack.c.bf16 %v546_v2, %v542_v1  ;;  %v541_v9 = vld [vmem:[#allocation5 + $0x410] sm:$0xff]  ;;  %v552_v12 = vld [vmem:[#allocation5 + $0x468] sm:$0xff]  ;;  %v5367_v14 = vpack.c.bf16 %v543_v7, %v539_v6  ;;  %v550_v15 = vld [vmem:[#allocation5 + $0x458] sm:$0xff] }
  0xb7   : > { %5474 = vmatprep.subr.bf16.mxu1 %v5473_v13  ;;  %v347_v13 = vld [vmem:[%s7496_s8] sm:$0xff]  ;;  %v554_v16 = vld [vmem:[#allocation5 + $0x478] sm:$0xff]  ;;  %v5495_v17 = vpack.c.bf16 %v545_v10, %v541_v9  ;;  %v549_v22 = vld [vmem:[#allocation5 + $0x450] sm:$0xff] }
  0xb8   : > { %v547_v18 = vld [vmem:[#allocation5 + $0x440] sm:$0xff]  ;;  %v553_v23 = vld [vmem:[#allocation5 + $0x470] sm:$0xff]  ;;  %v5497_v24 = vpack.c.bf16 %v554_v16, %v550_v15  ;;  %v560_v26 = vld [vmem:[#allocation5 + $0x4a8] sm:$0xff] }
  0xb9   : > { %5348 = vmatpush1.bf16.msra.mxu0 %v5347_v19  ;;  %v551_v19 = vld [vmem:[#allocation5 + $0x460] sm:$0xff]  ;;  %v558_v29 = vld [vmem:[#allocation5 + $0x498] sm:$0xff]  ;;  %v356_v34 = vld [vmem:[%s7496_s8 + $0x48] sm:$0xff] }
  0xba   : > { %5476 = vmatpush1.bf16.msra.mxu1 %v5475_v20  ;;  %5350 = vmatprep.subr.bf16.mxu0 %v5349_v21  ;;  %v352_v20 = vld [vmem:[%s7496_s8 + $0x28] sm:$0xff]  ;;  %v5369_v21 = vpack.c.bf16 %v552_v12, %v548_v11  ;;  %v351_v27 = vld [vmem:[%s7496_s8 + $0x20] sm:$0xff]  ;;  %v5371_v28 = vpack.c.bf16 %v551_v19, %v547_v18  ;;  %v562_v30 = vld [vmem:[#allocation5 + $0x4b8] sm:$0xff] }
  0xbb   : > { %5478 = vmatprep.subr.bf16.mxu1 %v5477_v25  ;;  %v556_v25 = vld [vmem:[#allocation5 + $0x488] sm:$0xff]  ;;  %v557_v36 = vld [vmem:[#allocation5 + $0x490] sm:$0xff]  ;;  %v5501_v38 = vpack.c.bf16 %v562_v30, %v558_v29  ;;  %v355_v41 = vld [vmem:[%s7496_s8 + $0x40] sm:$0xff] }
  0xbc   : > { %v5373_v35 = vpack.c.bf16 %v560_v26, %v556_v25  ;;  %v564_v39 = vld [vmem:[#allocation5 + $0x4c8] sm:$0xff]  ;;  %v563_v46 = vld [vmem:[#allocation5 + $0x4c0] sm:$0xff]  ;;  %v565_v50 = vld [vmem:[#allocation5 + $0x4d0] sm:$0xff] }
  0xbd   : > { %5352 = vmatpush1.bf16.msra.mxu0 %v5351_v31  ;;  %v5499_v31 = vpack.c.bf16 %v553_v23, %v549_v22  ;;  %v568_v40 = vld [vmem:[#allocation5 + $0x4e8] sm:$0xff]  ;;  %v567_v47 = vld [vmem:[#allocation5 + $0x4e0] sm:$0xff]  ;;  %v569_v51 = vld [vmem:[#allocation5 + $0x4f0] sm:$0xff] }
  0xbe   : > { %5480 = vmatpush1.bf16.msra.mxu1 %v5479_v32  ;;  %5354 = vmatprep.subr.bf16.mxu0 %v5353_v33  ;;  %v555_v32 = vld [vmem:[#allocation5 + $0x480] sm:$0xff]  ;;  %v360_v48 = vld [vmem:[%s7496_s8 + $0x68] sm:$0xff]  ;;  %v578_v58 = vld [vmem:[#allocation5 + $0x538] sm:$0xff]  ;;  %v5507_v59 = vpack.c.bf16 %v569_v51, %v565_v50 }
  0xbf   : > { %5482 = vmatprep.subr.bf16.mxu1 %v5481_v37  ;;  %v559_v33 = vld [vmem:[#allocation5 + $0x4a0] sm:$0xff]  ;;  %v561_v37 = vld [vmem:[#allocation5 + $0x4b0] sm:$0xff]  ;;  %v572_v53 = vld [vmem:[#allocation5 + $0x508] sm:$0xff] }
  0xc0   : > { %v5375_v42 = vpack.c.bf16 %v559_v33, %v555_v32  ;;  %v576_v54 = vld [vmem:[#allocation5 + $0x528] sm:$0xff]  ;;  %v571_v60 = vld [vmem:[#allocation5 + $0x500] sm:$0xff]  ;;  %v573_v0 = vld [vmem:[#allocation5 + $0x510] sm:$0xff] }
  0xc1   : > { %5356 = vmatpush1.bf16.msra.mxu0 %v5355_v43  ;;  %v566_v43 = vld [vmem:[#allocation5 + $0x4d8] sm:$0xff]  ;;  %v364_v62 = vld [vmem:[%s7496_s8 + $0x88] sm:$0xff]  ;;  %v5381_v63 = vpack.c.bf16 %v576_v54, %v572_v53  ;;  %v577_v1 = vld [vmem:[#allocation5 + $0x530] sm:$0xff] }
  0xc2   : > { %5484 = vmatpush1.bf16.msra.mxu1 %v5483_v44  ;;  %5358 = vmatprep.subr.bf16.mxu0 %v5357_v45  ;;  %v570_v44 = vld [vmem:[#allocation5 + $0x4f8] sm:$0xff]  ;;  %v5503_v45 = vpack.c.bf16 %v561_v37, %v557_v36  ;;  %v5511_v9 = vpack.c.bf16 %v577_v1, %v573_v0  ;;  %v579_v10 = vld [vmem:[#allocation5 + $0x540] sm:$0xff]  ;;  %v368_v12 = vld [vmem:[%s7496_s8 + $0xa8] sm:$0xff] }
  0xc3   : > { %5486 = vmatprep.subr.bf16.mxu1 %v5485_v49  ;;  %v5377_v49 = vpack.c.bf16 %v568_v40, %v564_v39  ;;  %v5505_v52 = vpack.c.bf16 %v570_v44, %v566_v43  ;;  %v582_v7 = vld [vmem:[#allocation5 + $0x558] sm:$0xff]  ;;  %v583_v11 = vld [vmem:[#allocation5 + $0x560] sm:$0xff]  ;;  %v585_v15 = vld [vmem:[#allocation5 + $0x570] sm:$0xff] }
  0xc4   : > { %v592_v18 = vld [vmem:[#allocation5 + $0x5a8] sm:$0xff]  ;;  %v367_v19 = vld [vmem:[%s7496_s8 + $0xa0] sm:$0xff]  ;;  %v594_v22 = vld [vmem:[#allocation5 + $0x5b8] sm:$0xff] }
  0xc5   : > { %5360 = vmatpush1.bf16.msra.mxu0 %v5359_v55  ;;  %v359_v55 = vld [vmem:[%s7496_s8 + $0x60] sm:$0xff]  ;;  %v372_v26 = vld [vmem:[%s7496_s8 + $0xc8] sm:$0xff]  ;;  %v593_v29 = vld [vmem:[#allocation5 + $0x5b0] sm:$0xff] }
  0xc6   : > { %5488 = vmatpush1.bf16.msra.mxu1 %v5487_v56  ;;  %5362 = vmatprep.subr.bf16.mxu0 %v5361_v57  ;;  %v5379_v56 = vpack.c.bf16 %v567_v47, %v563_v46  ;;  %v574_v57 = vld [vmem:[#allocation5 + $0x518] sm:$0xff]  ;;  %v591_v25 = vld [vmem:[#allocation5 + $0x5a0] sm:$0xff]  ;;  %v600_v32 = vld [vmem:[#allocation5 + $0x5e8] sm:$0xff] }
  0xc7   : > { %5490 = vmatprep.subr.bf16.mxu1 %v5489_v61  ;;  %v575_v61 = vld [vmem:[#allocation5 + $0x520] sm:$0xff]  ;;  %v5509_v2 = vpack.c.bf16 %v578_v58, %v574_v57  ;;  %v602_v36 = vld [vmem:[#allocation5 + $0x5f8] sm:$0xff]  ;;  %v376_v40 = vld [vmem:[%s7496_s8 + $0xe8] sm:$0xff] }
  0xc8   : > { %v5383_v6 = vpack.c.bf16 %v575_v61, %v571_v60  ;;  %v371_v33 = vld [vmem:[%s7496_s8 + $0xc0] sm:$0xff]  ;;  %v601_v43 = vld [vmem:[#allocation5 + $0x5f0] sm:$0xff]  ;;  %v608_v46 = vld [vmem:[#allocation5 + $0x628] sm:$0xff] }
  0xc9   : > { %5364 = vmatpush1.bf16.msra.mxu0 %v5363_v3  ;;  %v580_v3 = vld [vmem:[#allocation5 + $0x548] sm:$0xff]  ;;  %v599_v39 = vld [vmem:[#allocation5 + $0x5e0] sm:$0xff]  ;;  %v610_v50 = vld [vmem:[#allocation5 + $0x638] sm:$0xff] }
  0xca   : > { %5492 = vmatpush1.bf16.msra.mxu1 %v5491_v4  ;;  %5366 = vmatprep.subr.bf16.mxu0 %v5365_v5  ;;  %v584_v4 = vld [vmem:[#allocation5 + $0x568] sm:$0xff]  ;;  %v363_v5 = vld [vmem:[%s7496_s8 + $0x80] sm:$0xff]  ;;  %v609_v57 = vld [vmem:[#allocation5 + $0x630] sm:$0xff] }
  0xcb   : > { %5494 = vmatprep.subr.bf16.mxu1 %v5493_v8  ;;  %v586_v8 = vld [vmem:[#allocation5 + $0x578] sm:$0xff]  ;;  %v375_v47 = vld [vmem:[%s7496_s8 + $0xe0] sm:$0xff]  ;;  %v380_v54 = vld [vmem:[%s7496_s8 + $0x108] sm:$0xff] }
  0xcc   : > { %753 = vmatmul.mubr.f32.vlgmr.msra.gmra.mrb[0].mxu0 %v347_v13  ;;  %v5513_v16 = vpack.c.bf16 %v586_v8, %v582_v7  ;;  %v607_v53 = vld [vmem:[#allocation5 + $0x620] sm:$0xff]  ;;  %v616_v60 = vld [vmem:[#allocation5 + $0x668] sm:$0xff]  ;;  %v618_v0 = vld [vmem:[#allocation5 + $0x678] sm:$0xff] }
  0xcd   : > { %1075 = vmatmul.mubr.f32.vlgmr.msra.gmra.mrb[0].mxu1 %v347_v13  ;;  %5368 = vmatpush1.bf16.msra.mxu0 %v5367_v14  ;;  %v5385_v13 = vpack.c.bf16 %v584_v4, %v580_v3  ;;  %v581_v14 = vld [vmem:[#allocation5 + $0x550] sm:$0xff]  ;;  %v379_v61 = vld [vmem:[%s7496_s8 + $0x100] sm:$0xff]  ;;  %v384_v4 = vld [vmem:[%s7496_s8 + $0x128] sm:$0xff] }
  0xce   : > { %5496 = vmatpush1.bf16.msra.mxu1 %v5495_v17  ;;  %758 = vmatprep.mubr.f32.mxu0 %v352_v20  ;;  %v588_v17 = vld [vmem:[#allocation5 + $0x588] sm:$0xff]  ;;  %v5515_v23 = vpack.c.bf16 %v585_v15, %v581_v14  ;;  %v615_v3 = vld [vmem:[#allocation5 + $0x660] sm:$0xff]  ;;  %v617_v7 = vld [vmem:[#allocation5 + $0x670] sm:$0xff] }
  0xcf   : > { %1080 = vmatprep.mubr.f32.mxu1 %v352_v20  ;;  %5370 = vmatprep.subr.bf16.mxu0 %v5369_v21  ;;  %v5387_v20 = vpack.c.bf16 %v583_v11, %v579_v10  ;;  %v590_v21 = vld [vmem:[#allocation5 + $0x598] sm:$0xff]  ;;  %v624_v10 = vld [vmem:[#allocation5 + $0x6a8] sm:$0xff]  ;;  %v383_v11 = vld [vmem:[%s7496_s8 + $0x120] sm:$0xff] }
  0xd0   : > { %759 = vmatmul.mubr.f32.gmra.mrb[2].mxu0 %v351_v27  ;;  %5498 = vmatprep.subr.bf16.mxu1 %v5497_v24  ;;  %v587_v24 = vld [vmem:[#allocation5 + $0x580] sm:$0xff]  ;;  %v5517_v30 = vpack.c.bf16 %v594_v22, %v590_v21  ;;  %v626_v14 = vld [vmem:[#allocation5 + $0x6b8] sm:$0xff]  ;;  %v625_v21 = vld [vmem:[#allocation5 + $0x6b0] sm:$0xff] }
  0xd1   : > { %1081 = vmatmul.mubr.f32.gmra.mrb[2].mxu1 %v351_v27  ;;  %5372 = vmatpush1.bf16.msra.mxu0 %v5371_v28  ;;  %v5389_v27 = vpack.c.bf16 %v592_v18, %v588_v17  ;;  %v589_v28 = vld [vmem:[#allocation5 + $0x590] sm:$0xff]  ;;  %v623_v17 = vld [vmem:[#allocation5 + $0x6a0] sm:$0xff]  ;;  %v388_v18 = vld [vmem:[%s7496_s8 + $0x148] sm:$0xff] }
  0xd2   : > { %5500 = vmatpush1.bf16.msra.mxu1 %v5499_v31  ;;  %764 = vmatprep.mubr.f32.mxu0 %v356_v34  ;;  %v596_v31 = vld [vmem:[#allocation5 + $0x5c8] sm:$0xff]  ;;  %v5519_v37 = vpack.c.bf16 %v593_v29, %v589_v28  ;;  %v634_v28 = vld [vmem:[#allocation5 + $0x6f8] sm:$0xff] }
  0xd3   : > { %1086 = vmatprep.mubr.f32.mxu1 %v356_v34  ;;  %5374 = vmatprep.subr.bf16.mxu0 %v5373_v35  ;;  %v5391_v34 = vpack.c.bf16 %v591_v25, %v587_v24  ;;  %v598_v35 = vld [vmem:[#allocation5 + $0x5d8] sm:$0xff]  ;;  %v632_v24 = vld [vmem:[#allocation5 + $0x6e8] sm:$0xff]  ;;  %v387_v25 = vld [vmem:[%s7496_s8 + $0x140] sm:$0xff] }
  0xd4   : > { %765 = vmatmul.mubr.f32.gmra.mrb[4].mxu0 %v355_v41  ;;  %5502 = vmatprep.subr.bf16.mxu1 %v5501_v38  ;;  %v595_v38 = vld [vmem:[#allocation5 + $0x5c0] sm:$0xff]  ;;  %v5521_v44 = vpack.c.bf16 %v602_v36, %v598_v35  ;;  %v633_v35 = vld [vmem:[#allocation5 + $0x6f0] sm:$0xff] }
  0xd5   : > { %1087 = vmatmul.mubr.f32.gmra.mrb[4].mxu1 %v355_v41  ;;  %5376 = vmatpush1.bf16.msra.mxu0 %v5375_v42  ;;  %v5393_v41 = vpack.c.bf16 %v600_v32, %v596_v31  ;;  %v597_v42 = vld [vmem:[#allocation5 + $0x5d0] sm:$0xff]  ;;  %v631_v31 = vld [vmem:[#allocation5 + $0x6e0] sm:$0xff]  ;;  %v392_v32 = vld [vmem:[%s7496_s8 + $0x168] sm:$0xff] }
  0xd6   : > { %5504 = vmatpush1.bf16.msra.mxu1 %v5503_v45  ;;  %770 = vmatprep.mubr.f32.mxu0 %v360_v48  ;;  %v604_v45 = vld [vmem:[#allocation5 + $0x608] sm:$0xff]  ;;  %v5523_v51 = vpack.c.bf16 %v601_v43, %v597_v42  ;;  %v642_v42 = vld [vmem:[#allocation5 + $0x738] sm:$0xff] }
  0xd7   : > { %1092 = vmatprep.mubr.f32.mxu1 %v360_v48  ;;  %5378 = vmatprep.subr.bf16.mxu0 %v5377_v49  ;;  %v5395_v48 = vpack.c.bf16 %v599_v39, %v595_v38  ;;  %v606_v49 = vld [vmem:[#allocation5 + $0x618] sm:$0xff]  ;;  %v640_v38 = vld [vmem:[#allocation5 + $0x728] sm:$0xff]  ;;  %v391_v39 = vld [vmem:[%s7496_s8 + $0x160] sm:$0xff] }
  0xd8   : > { %771 = vmatmul.mubr.f32.gmra.mrb[6].mxu0 %v359_v55  ;;  %5506 = vmatprep.subr.bf16.mxu1 %v5505_v52  ;;  %v603_v52 = vld [vmem:[#allocation5 + $0x600] sm:$0xff]  ;;  %v5525_v58 = vpack.c.bf16 %v610_v50, %v606_v49  ;;  %v641_v49 = vld [vmem:[#allocation5 + $0x730] sm:$0xff] }
  0xd9   : > { %1093 = vmatmul.mubr.f32.gmra.mrb[6].mxu1 %v359_v55  ;;  %5380 = vmatpush1.bf16.msra.mxu0 %v5379_v56  ;;  %v5397_v55 = vpack.c.bf16 %v608_v46, %v604_v45  ;;  %v605_v56 = vld [vmem:[#allocation5 + $0x610] sm:$0xff]  ;;  %v639_v45 = vld [vmem:[#allocation5 + $0x720] sm:$0xff]  ;;  %v396_v46 = vld [vmem:[%s7496_s8 + $0x188] sm:$0xff] }
  0xda   : > { %5508 = vmatpush1.bf16.msra.mxu1 %v5507_v59  ;;  %776 = vmatprep.mubr.f32.mxu0 %v364_v62  ;;  %v612_v59 = vld [vmem:[#allocation5 + $0x648] sm:$0xff]  ;;  %v5527_v1 = vpack.c.bf16 %v609_v57, %v605_v56  ;;  %v650_v56 = vld [vmem:[#allocation5 + $0x778] sm:$0xff] }
  0xdb   : > { %1098 = vmatprep.mubr.f32.mxu1 %v364_v62  ;;  %5382 = vmatprep.subr.bf16.mxu0 %v5381_v63  ;;  %v5399_v62 = vpack.c.bf16 %v607_v53, %v603_v52  ;;  %v614_v63 = vld [vmem:[#allocation5 + $0x658] sm:$0xff]  ;;  %v648_v52 = vld [vmem:[#allocation5 + $0x768] sm:$0xff]  ;;  %v395_v53 = vld [vmem:[%s7496_s8 + $0x180] sm:$0xff] }
  0xdc   : > { %777 = vmatmul.mubr.f32.gmra.mrb[8].mxu0 %v363_v5  ;;  %5510 = vmatprep.subr.bf16.mxu1 %v5509_v2  ;;  %v611_v2 = vld [vmem:[#allocation5 + $0x640] sm:$0xff]  ;;  %v5529_v8 = vpack.c.bf16 %v618_v0, %v614_v63  ;;  %v649_v63 = vld [vmem:[#allocation5 + $0x770] sm:$0xff] }
  0xdd   : > { %1099 = vmatmul.mubr.f32.gmra.mrb[8].mxu1 %v363_v5  ;;  %5384 = vmatpush1.bf16.msra.mxu0 %v5383_v6  ;;  %v5401_v5 = vpack.c.bf16 %v616_v60, %v612_v59  ;;  %v613_v6 = vld [vmem:[#allocation5 + $0x650] sm:$0xff]  ;;  %v647_v59 = vld [vmem:[#allocation5 + $0x760] sm:$0xff]  ;;  %v400_v60 = vld [vmem:[%s7496_s8 + $0x1a8] sm:$0xff] }
  0xde   : > { %5512 = vmatpush1.bf16.msra.mxu1 %v5511_v9  ;;  %782 = vmatprep.mubr.f32.mxu0 %v368_v12  ;;  %v620_v9 = vld [vmem:[#allocation5 + $0x688] sm:$0xff]  ;;  %v5531_v15 = vpack.c.bf16 %v617_v7, %v613_v6  ;;  %v658_v6 = vld [vmem:[#allocation5 + $0x7b8] sm:$0xff] }
  0xdf   : > { %1104 = vmatprep.mubr.f32.mxu1 %v368_v12  ;;  %5386 = vmatprep.subr.bf16.mxu0 %v5385_v13  ;;  %v5403_v12 = vpack.c.bf16 %v615_v3, %v611_v2  ;;  %v622_v13 = vld [vmem:[#allocation5 + $0x698] sm:$0xff]  ;;  %v656_v2 = vld [vmem:[#allocation5 + $0x7a8] sm:$0xff]  ;;  %v399_v3 = vld [vmem:[%s7496_s8 + $0x1a0] sm:$0xff] }
  0xe0   : > { %783 = vmatmul.mubr.f32.gmra.mrb[10].mxu0 %v367_v19  ;;  %5514 = vmatprep.subr.bf16.mxu1 %v5513_v16  ;;  %v619_v16 = vld [vmem:[#allocation5 + $0x680] sm:$0xff]  ;;  %v5533_v22 = vpack.c.bf16 %v626_v14, %v622_v13  ;;  %v657_v13 = vld [vmem:[#allocation5 + $0x7b0] sm:$0xff] }
  0xe1   : > { %1105 = vmatmul.mubr.f32.gmra.mrb[10].mxu1 %v367_v19  ;;  %5388 = vmatpush1.bf16.msra.mxu0 %v5387_v20  ;;  %v5405_v19 = vpack.c.bf16 %v624_v10, %v620_v9  ;;  %v621_v20 = vld [vmem:[#allocation5 + $0x690] sm:$0xff]  ;;  %v655_v9 = vld [vmem:[#allocation5 + $0x7a0] sm:$0xff]  ;;  %v404_v10 = vld [vmem:[%s7496_s8 + $0x1c8] sm:$0xff] }
  0xe2   : > { %5516 = vmatpush1.bf16.msra.mxu1 %v5515_v23  ;;  %788 = vmatprep.mubr.f32.mxu0 %v372_v26  ;;  %v628_v23 = vld [vmem:[#allocation5 + $0x6c8] sm:$0xff]  ;;  %v5535_v29 = vpack.c.bf16 %v625_v21, %v621_v20  ;;  %v666_v20 = vld [vmem:[#allocation5 + $0x7f8] sm:$0xff] }
  0xe3   : > { %1110 = vmatprep.mubr.f32.mxu1 %v372_v26  ;;  %5390 = vmatprep.subr.bf16.mxu0 %v5389_v27  ;;  %v5407_v26 = vpack.c.bf16 %v623_v17, %v619_v16  ;;  %v630_v27 = vld [vmem:[#allocation5 + $0x6d8] sm:$0xff]  ;;  %v664_v16 = vld [vmem:[#allocation5 + $0x7e8] sm:$0xff]  ;;  %v403_v17 = vld [vmem:[%s7496_s8 + $0x1c0] sm:$0xff] }
  0xe4   : > { %789 = vmatmul.mubr.f32.gmra.mrb[12].mxu0 %v371_v33  ;;  %5518 = vmatprep.subr.bf16.mxu1 %v5517_v30  ;;  %v627_v30 = vld [vmem:[#allocation5 + $0x6c0] sm:$0xff]  ;;  %v5537_v36 = vpack.c.bf16 %v634_v28, %v630_v27  ;;  %v665_v27 = vld [vmem:[#allocation5 + $0x7f0] sm:$0xff] }
  0xe5   : > { %1111 = vmatmul.mubr.f32.gmra.mrb[12].mxu1 %v371_v33  ;;  %5392 = vmatpush1.bf16.msra.mxu0 %v5391_v34  ;;  %v5409_v33 = vpack.c.bf16 %v632_v24, %v628_v23  ;;  %v629_v34 = vld [vmem:[#allocation5 + $0x6d0] sm:$0xff]  ;;  %v663_v23 = vld [vmem:[#allocation5 + $0x7e0] sm:$0xff]  ;;  %v408_v24 = vld [vmem:[%s7496_s8 + $0x1e8] sm:$0xff] }
  0xe6   : > { %5520 = vmatpush1.bf16.msra.mxu1 %v5519_v37  ;;  %794 = vmatprep.mubr.f32.mxu0 %v376_v40  ;;  %v636_v37 = vld [vmem:[#allocation5 + $0x708] sm:$0xff]  ;;  %v5539_v43 = vpack.c.bf16 %v633_v35, %v629_v34  ;;  %v2299_v34 = vld [vmem:[#allocation7 + $0x38] sm:$0xff] }
  0xe7   : > { %1116 = vmatprep.mubr.f32.mxu1 %v376_v40  ;;  %5394 = vmatprep.subr.bf16.mxu0 %v5393_v41  ;;  %v5411_v40 = vpack.c.bf16 %v631_v31, %v627_v30  ;;  %v638_v41 = vld [vmem:[#allocation5 + $0x718] sm:$0xff]  ;;  %v2297_v30 = vld [vmem:[#allocation7 + $0x28] sm:$0xff]  ;;  %v407_v31 = vld [vmem:[%s7496_s8 + $0x1e0] sm:$0xff] }
  0xe8   : > { %795 = vmatmul.mubr.f32.gmra.mrb[14].mxu0 %v375_v47  ;;  %5522 = vmatprep.subr.bf16.mxu1 %v5521_v44  ;;  %v635_v44 = vld [vmem:[#allocation5 + $0x700] sm:$0xff]  ;;  %v5541_v50 = vpack.c.bf16 %v642_v42, %v638_v41  ;;  %v2298_v42 = vld [vmem:[#allocation7 + $0x30] sm:$0xff] }
  0xe9   : > { %1117 = vmatmul.mubr.f32.gmra.mrb[14].mxu1 %v375_v47  ;;  %5396 = vmatpush1.bf16.msra.mxu0 %v5395_v48  ;;  %v5413_v47 = vpack.c.bf16 %v640_v38, %v636_v37  ;;  %v637_v48 = vld [vmem:[#allocation5 + $0x710] sm:$0xff]  ;;  %v2292_v38 = vld [vmem:[#allocation7] sm:$0xff] }
  0xea   : > { %5524 = vmatpush1.bf16.msra.mxu1 %v5523_v51  ;;  %800 = vmatprep.mubr.f32.mxu0 %v380_v54  ;;  %v644_v51 = vld [vmem:[#allocation5 + $0x748] sm:$0xff]  ;;  %v5543_v57 = vpack.c.bf16 %v641_v49, %v637_v48  ;;  %v354_v48 = vld [vmem:[%s7496_s8 + $0x38] sm:$0xff] }
  0xeb   : > { %1122 = vmatprep.mubr.f32.mxu1 %v380_v54  ;;  %5398 = vmatprep.subr.bf16.mxu0 %v5397_v55  ;;  %v5415_v54 = vpack.c.bf16 %v639_v45, %v635_v44  ;;  %v646_v55 = vld [vmem:[#allocation5 + $0x758] sm:$0xff]  ;;  %v2305_v44 = vld [vmem:[#allocation7 + $0x68] sm:$0xff]  ;;  %v349_v45 = vld [vmem:[%s7496_s8 + $0x10] sm:$0xff] }
  0xec   : > { %801 = vmatmul.mubr.f32.gmra.mrb[16].mxu0 %v379_v61  ;;  %5526 = vmatprep.subr.bf16.mxu1 %v5525_v58  ;;  %v643_v58 = vld [vmem:[#allocation5 + $0x740] sm:$0xff]  ;;  %v5545_v0 = vpack.c.bf16 %v650_v56, %v646_v55  ;;  %v2306_v56 = vld [vmem:[#allocation7 + $0x70] sm:$0xff] }
  0xed   : > { %1123 = vmatmul.mubr.f32.gmra.mrb[16].mxu1 %v379_v61  ;;  %5400 = vmatpush1.bf16.msra.mxu0 %v5399_v62  ;;  %v5417_v61 = vpack.c.bf16 %v648_v52, %v644_v51  ;;  %v645_v62 = vld [vmem:[#allocation5 + $0x750] sm:$0xff]  ;;  %v2300_v52 = vld [vmem:[#allocation7 + $0x40] sm:$0xff] }
  0xee   : > { %5528 = vmatpush1.bf16.msra.mxu1 %v5527_v1  ;;  %806 = vmatprep.mubr.f32.mxu0 %v384_v4  ;;  %v652_v1 = vld [vmem:[#allocation5 + $0x788] sm:$0xff]  ;;  %v5547_v7 = vpack.c.bf16 %v649_v63, %v645_v62  ;;  %v358_v62 = vld [vmem:[%s7496_s8 + $0x58] sm:$0xff] }
  0xef   : > { %1128 = vmatprep.mubr.f32.mxu1 %v384_v4  ;;  %5402 = vmatprep.subr.bf16.mxu0 %v5401_v5  ;;  %v5419_v4 = vpack.c.bf16 %v647_v59, %v643_v58  ;;  %v654_v5 = vld [vmem:[#allocation5 + $0x798] sm:$0xff]  ;;  %v2313_v58 = vld [vmem:[#allocation7 + $0xa8] sm:$0xff]  ;;  %v353_v59 = vld [vmem:[%s7496_s8 + $0x30] sm:$0xff] }
  0xf0   : > { %807 = vmatmul.mubr.f32.gmra.mrb[18].mxu0 %v383_v11  ;;  %5530 = vmatprep.subr.bf16.mxu1 %v5529_v8  ;;  %v651_v8 = vld [vmem:[#allocation5 + $0x780] sm:$0xff]  ;;  %v5549_v14 = vpack.c.bf16 %v658_v6, %v654_v5  ;;  %v2314_v6 = vld [vmem:[#allocation7 + $0xb0] sm:$0xff] }
  0xf1   : > { %1129 = vmatmul.mubr.f32.gmra.mrb[18].mxu1 %v383_v11  ;;  %5404 = vmatpush1.bf16.msra.mxu0 %v5403_v12  ;;  %v5421_v11 = vpack.c.bf16 %v656_v2, %v652_v1  ;;  %v653_v12 = vld [vmem:[#allocation5 + $0x790] sm:$0xff]  ;;  %v2308_v2 = vld [vmem:[#allocation7 + $0x80] sm:$0xff] }
  0xf2   : > { %5532 = vmatpush1.bf16.msra.mxu1 %v5531_v15  ;;  %812 = vmatprep.mubr.f32.mxu0 %v388_v18  ;;  %v660_v15 = vld [vmem:[#allocation5 + $0x7c8] sm:$0xff]  ;;  %v5551_v21 = vpack.c.bf16 %v657_v13, %v653_v12  ;;  %v362_v12 = vld [vmem:[%s7496_s8 + $0x78] sm:$0xff] }
  0xf3   : > { %1134 = vmatprep.mubr.f32.mxu1 %v388_v18  ;;  %5406 = vmatprep.subr.bf16.mxu0 %v5405_v19  ;;  %v5423_v18 = vpack.c.bf16 %v655_v9, %v651_v8  ;;  %v662_v19 = vld [vmem:[#allocation5 + $0x7d8] sm:$0xff]  ;;  %v2321_v8 = vld [vmem:[#allocation7 + $0xe8] sm:$0xff]  ;;  %v357_v9 = vld [vmem:[%s7496_s8 + $0x50] sm:$0xff] }
  0xf4   : > { %813 = vmatmul.mubr.f32.gmra.mrb[20].mxu0 %v387_v25  ;;  %5534 = vmatprep.subr.bf16.mxu1 %v5533_v22  ;;  %v659_v22 = vld [vmem:[#allocation5 + $0x7c0] sm:$0xff]  ;;  %v5553_v28 = vpack.c.bf16 %v666_v20, %v662_v19  ;;  %v2322_v20 = vld [vmem:[#allocation7 + $0xf0] sm:$0xff] }
  0xf5   : > { %1135 = vmatmul.mubr.f32.gmra.mrb[20].mxu1 %v387_v25  ;;  %5408 = vmatpush1.bf16.msra.mxu0 %v5407_v26  ;;  %v5425_v25 = vpack.c.bf16 %v664_v16, %v660_v15  ;;  %v661_v26 = vld [vmem:[#allocation5 + $0x7d0] sm:$0xff]  ;;  %v2316_v16 = vld [vmem:[#allocation7 + $0xc0] sm:$0xff] }
  0xf6   : > { %5536 = vmatpush1.bf16.msra.mxu1 %v5535_v29  ;;  %818 = vmatprep.mubr.f32.mxu0 %v392_v32  ;;  %v2293_v29 = vld [vmem:[#allocation7 + $0x8] sm:$0xff]  ;;  %v5555_v35 = vpack.c.bf16 %v665_v27, %v661_v26  ;;  %v366_v26 = vld [vmem:[%s7496_s8 + $0x98] sm:$0xff] }
  0xf7   : > { %1140 = vmatprep.mubr.f32.mxu1 %v392_v32  ;;  %5410 = vmatprep.subr.bf16.mxu0 %v5409_v33  ;;  %v5427_v32 = vpack.c.bf16 %v663_v23, %v659_v22  ;;  %v2295_v33 = vld [vmem:[#allocation7 + $0x18] sm:$0xff]  ;;  %v5557_v37 = vpack.c.bf16 %v2297_v30, %v2293_v29  ;;  %v2329_v22 = vld [vmem:[#allocation7 + $0x128] sm:$0xff]  ;;  %v361_v23 = vld [vmem:[%s7496_s8 + $0x70] sm:$0xff] }
  0xf8   : > { %819 = vmatmul.mubr.f32.gmra.mrb[22].mxu0 %v391_v39  ;;  %5538 = vmatprep.subr.bf16.mxu1 %v5537_v36  ;;  %v350_v36 = vld [vmem:[%s7496_s8 + $0x18] sm:$0xff]  ;;  %v5685_v41 = vpack.c.bf16 %v2299_v34, %v2295_v33  ;;  %v2324_v30 = vld [vmem:[#allocation7 + $0x100] sm:$0xff]  ;;  %v2330_v34 = vld [vmem:[#allocation7 + $0x130] sm:$0xff] }
  0xf9   : > { %1141 = vmatmul.mubr.f32.gmra.mrb[22].mxu1 %v391_v39  ;;  %5412 = vmatpush1.bf16.msra.mxu0 %v5411_v40  ;;  %v2296_v39 = vld [vmem:[#allocation7 + $0x20] sm:$0xff]  ;;  %v2294_v40 = vld [vmem:[#allocation7 + $0x10] sm:$0xff] }
  0xfa   : > { %5540 = vmatpush1.bf16.msra.mxu1 %v5539_v43  ;;  %824 = vmatprep.mubr.f32.mxu0 %v396_v46  ;;  %v2301_v43 = vld [vmem:[#allocation7 + $0x48] sm:$0xff]  ;;  %v5559_v49 = vpack.c.bf16 %v2296_v39, %v2292_v38  ;;  %v2335_v38 = vld [vmem:[#allocation7 + $0x158] sm:$0xff] }
  0xfb   : > { %1146 = vmatprep.mubr.f32.mxu1 %v396_v46  ;;  %5414 = vmatprep.subr.bf16.mxu0 %v5413_v47  ;;  %v2303_v46 = vld [vmem:[#allocation7 + $0x58] sm:$0xff]  ;;  %v5561_v51 = vpack.c.bf16 %v2305_v44, %v2301_v43  ;;  %v2332_v44 = vld [vmem:[#allocation7 + $0x140] sm:$0xff] }
  0xfc   : > { %825 = vmatmul.mubr.f32.gmra.mrb[24].mxu0 %v395_v53  ;;  %5542 = vmatprep.subr.bf16.mxu1 %v5541_v50  ;;  %v2307_v47 = vld [vmem:[#allocation7 + $0x78] sm:$0xff]  ;;  %v5687_v50 = vpack.c.bf16 %v2298_v42, %v2294_v40 }
  0xfd   : > { %1147 = vmatmul.mubr.f32.gmra.mrb[24].mxu1 %v395_v53  ;;  %5416 = vmatpush1.bf16.msra.mxu0 %v5415_v54  ;;  %v2304_v53 = vld [vmem:[#allocation7 + $0x60] sm:$0xff]  ;;  %v2302_v54 = vld [vmem:[#allocation7 + $0x50] sm:$0xff]  ;;  %v5689_v55 = vpack.c.bf16 %v2307_v47, %v2303_v46  ;;  %v2339_v39 = vld [vmem:[#allocation7 + $0x178] sm:$0xff] }
  0xfe   : > { %5544 = vmatpush1.bf16.msra.mxu1 %v5543_v57  ;;  %830 = vmatprep.mubr.f32.mxu0 %v400_v60  ;;  %v2309_v57 = vld [vmem:[#allocation7 + $0x88] sm:$0xff]  ;;  %v5563_v63 = vpack.c.bf16 %v2304_v53, %v2300_v52  ;;  %v370_v40 = vld [vmem:[%s7496_s8 + $0xb8] sm:$0xff]  ;;  %v5705_v46 = vpack.c.bf16 %v2339_v39, %v2335_v38  ;;  %v2334_v47 = vld [vmem:[#allocation7 + $0x150] sm:$0xff] }
  0xff   : > { %1152 = vmatprep.mubr.f32.mxu1 %v400_v60  ;;  %5418 = vmatprep.subr.bf16.mxu0 %v5417_v61  ;;  %v2311_v60 = vld [vmem:[#allocation7 + $0x98] sm:$0xff]  ;;  %v5565_v1 = vpack.c.bf16 %v2313_v58, %v2309_v57  ;;  %v373_v53 = vld [vmem:[%s7496_s8 + $0xd0] sm:$0xff]  ;;  %v2356_v38 = vld [vmem:[#allocation7 + $0x200] sm:$0xff] }
 0x100   : > { %831 = vmatmul.mubr.f32.gmra.mrb[26].mxu0 %v399_v3  ;;  %5546 = vmatprep.subr.bf16.mxu1 %v5545_v0  ;;  %v2315_v61 = vld [vmem:[#allocation7 + $0xb8] sm:$0xff]  ;;  %v5691_v0 = vpack.c.bf16 %v2306_v56, %v2302_v54  ;;  %v381_v57 = vld [vmem:[%s7496_s8 + $0x110] sm:$0xff]  ;;  %v2360_v39 = vld [vmem:[#allocation7 + $0x220] sm:$0xff] }
 0x101   : > { %1153 = vmatmul.mubr.f32.gmra.mrb[26].mxu1 %v399_v3  ;;  %5420 = vmatpush1.bf16.msra.mxu0 %v5419_v4  ;;  %v2312_v3 = vld [vmem:[#allocation7 + $0xa0] sm:$0xff]  ;;  %v2310_v4 = vld [vmem:[#allocation7 + $0x90] sm:$0xff]  ;;  %v5693_v5 = vpack.c.bf16 %v2315_v61, %v2311_v60  ;;  %v378_v54 = vld [vmem:[%s7496_s8 + $0xf8] sm:$0xff] }
 0x102   : > { %5548 = vmatpush1.bf16.msra.mxu1 %v5547_v7  ;;  %836 = vmatprep.mubr.f32.mxu0 %v404_v10  ;;  %v2317_v7 = vld [vmem:[#allocation7 + $0xc8] sm:$0xff]  ;;  %v5567_v13 = vpack.c.bf16 %v2312_v3, %v2308_v2  ;;  %v382_v56 = vld [vmem:[%s7496_s8 + $0x118] sm:$0xff]  ;;  %v389_v61 = vld [vmem:[%s7496_s8 + $0x150] sm:$0xff] }
 0x103   : > { %1158 = vmatprep.mubr.f32.mxu1 %v404_v10  ;;  %5422 = vmatprep.subr.bf16.mxu0 %v5421_v11  ;;  %v2319_v10 = vld [vmem:[#allocation7 + $0xd8] sm:$0xff]  ;;  %v5569_v15 = vpack.c.bf16 %v2321_v8, %v2317_v7  ;;  %v401_v3 = vld [vmem:[%s7496_s8 + $0x1b0] sm:$0xff]  ;;  %v2341_v8 = vld [vmem:[#allocation7 + $0x188] sm:$0xff] }
 0x104   : > { %837 = vmatmul.mubr.f32.gmra.mrb[28].mxu0 %v403_v17  ;;  %5550 = vmatprep.subr.bf16.mxu1 %v5549_v14  ;;  %v2323_v11 = vld [vmem:[#allocation7 + $0xf8] sm:$0xff]  ;;  %v5695_v14 = vpack.c.bf16 %v2314_v6, %v2310_v4  ;;  %v409_v7 = vld [vmem:[%s7496_s8 + $0x1f0] sm:$0xff] }
 0x105   : > { %1159 = vmatmul.mubr.f32.gmra.mrb[28].mxu1 %v403_v17  ;;  %5424 = vmatpush1.bf16.msra.mxu0 %v5423_v18  ;;  %v2320_v17 = vld [vmem:[#allocation7 + $0xe0] sm:$0xff]  ;;  %v2318_v18 = vld [vmem:[#allocation7 + $0xd0] sm:$0xff]  ;;  %v5697_v19 = vpack.c.bf16 %v2323_v11, %v2319_v10  ;;  %v386_v58 = vld [vmem:[%s7496_s8 + $0x138] sm:$0xff] }
 0x106   : > { %5552 = vmatpush1.bf16.msra.mxu1 %v5551_v21  ;;  %842 = vmatprep.mubr.f32.mxu0 %v408_v24  ;;  %v2325_v21 = vld [vmem:[#allocation7 + $0x108] sm:$0xff]  ;;  %v5571_v27 = vpack.c.bf16 %v2320_v17, %v2316_v16  ;;  %v390_v60 = vld [vmem:[%s7496_s8 + $0x158] sm:$0xff]  ;;  %v2342_v16 = vld [vmem:[#allocation7 + $0x190] sm:$0xff] }
 0x107   : > { %1164 = vmatprep.mubr.f32.mxu1 %v408_v24  ;;  %5426 = vmatprep.subr.bf16.mxu0 %v5425_v25  ;;  %v2327_v24 = vld [vmem:[#allocation7 + $0x118] sm:$0xff]  ;;  %v5573_v29 = vpack.c.bf16 %v2329_v22, %v2325_v21  ;;  %v2353_v21 = vld [vmem:[#allocation7 + $0x1e8] sm:$0xff] }
 0x108   : > { %843 = vmatmul.mubr.f32.gmra.mrb[30].mxu0 %v407_v31  ;;  %5554 = vmatprep.subr.bf16.mxu1 %v5553_v28  ;;  %v2331_v25 = vld [vmem:[#allocation7 + $0x138] sm:$0xff]  ;;  %v5699_v28 = vpack.c.bf16 %v2322_v20, %v2318_v18  ;;  %v2346_v18 = vld [vmem:[#allocation7 + $0x1b0] sm:$0xff]  ;;  %v2349_v20 = vld [vmem:[#allocation7 + $0x1c8] sm:$0xff] }
 0x109   : > { %1165 = vmatmul.mubr.f32.gmra.mrb[30].mxu1 %v407_v31  ;;  %5428 = vmatpush1.bf16.msra.mxu0 %v5427_v32  ;;  %v2328_v31 = vld [vmem:[#allocation7 + $0x120] sm:$0xff]  ;;  %v2326_v32 = vld [vmem:[#allocation7 + $0x110] sm:$0xff]  ;;  %v5701_v33 = vpack.c.bf16 %v2331_v25, %v2327_v24  ;;  %v402_v2 = vld [vmem:[%s7496_s8 + $0x1b8] sm:$0xff] }
 0x10a   : > { %5556 = vmatpush1.bf16.msra.mxu1 %v5555_v35  ;;  %913 = vmatprep.mubr.f32.mxu0 %v350_v36  ;;  %v2333_v35 = vld [vmem:[#allocation7 + $0x148] sm:$0xff]  ;;  %v5703_v42 = vpack.c.bf16 %v2330_v34, %v2326_v32  ;;  %v406_v4 = vld [vmem:[%s7496_s8 + $0x1d8] sm:$0xff] }
 0x10b   : > { %1235 = vmatprep.mubr.f32.mxu1 %v350_v36  ;;  %5558 = vmatprep.subr.bf16.mxu0 %v5557_v37  ;;  %v2337_v36 = vld [vmem:[#allocation7 + $0x168] sm:$0xff]  ;;  %v365_v37 = vld [vmem:[%s7496_s8 + $0x90] sm:$0xff]  ;;  %v410_v6 = vld [vmem:[%s7496_s8 + $0x1f8] sm:$0xff] }
 0x10c   : > { %914 = vmatmul.mubr.f32.vlgmr.msra.gmra.mrb[0].mxu0 %v349_v45  ;;  %5686 = vmatprep.subr.bf16.mxu1 %v5685_v41  ;;  %v5575_v41 = vpack.c.bf16 %v2328_v31, %v2324_v30  ;;  %v5577_v43 = vpack.c.bf16 %v2337_v36, %v2333_v35  ;;  %v2343_v10 = vld [vmem:[#allocation7 + $0x198] sm:$0xff]  ;;  %v2354_v30 = vld [vmem:[#allocation7 + $0x1f0] sm:$0xff]  ;;  %v2357_v32 = vld [vmem:[#allocation7 + $0x208] sm:$0xff] }
 0x10d   : > { %1236 = vmatmul.mubr.f32.vlgmr.msra.gmra.mrb[0].mxu1 %v349_v45  ;;  %919 = vmatprep.mubr.f32.mxu0 %v354_v48  ;;  %v2336_v45 = vld [vmem:[#allocation7 + $0x160] sm:$0xff]  ;;  %v2351_v22 = vld [vmem:[#allocation7 + $0x1d8] sm:$0xff] }
 0x10e   : > { %1241 = vmatprep.mubr.f32.mxu1 %v354_v48  ;;  %5560 = vmatpush1.bf16.msra.mxu0 %v5559_v49  ;;  %v2338_v48 = vld [vmem:[#allocation7 + $0x170] sm:$0xff]  ;;  %v2355_v24 = vld [vmem:[#allocation7 + $0x1f8] sm:$0xff] }
 0x10f   : > { %5688 = vmatpush1.bf16.msra.mxu1 %v5687_v50  ;;  %5562 = vmatprep.subr.bf16.mxu0 %v5561_v51  ;;  %v369_v49 = vld [vmem:[%s7496_s8 + $0xb0] sm:$0xff]  ;;  %v374_v50 = vld [vmem:[%s7496_s8 + $0xd8] sm:$0xff]  ;;  %v5579_v51 = vpack.c.bf16 %v2336_v45, %v2332_v44  ;;  %v5707_v52 = vpack.c.bf16 %v2338_v48, %v2334_v47  ;;  %v5713_v25 = vpack.c.bf16 %v2355_v24, %v2351_v22  ;;  %v2365_v44 = vld [vmem:[#allocation7 + $0x248] sm:$0xff] }
 0x110   : > { %920 = vmatmul.mubr.f32.gmra.mrb[2].mxu0 %v353_v59  ;;  %5690 = vmatprep.subr.bf16.mxu1 %v5689_v55  ;;  %v377_v55 = vld [vmem:[%s7496_s8 + $0xf0] sm:$0xff]  ;;  %v2359_v34 = vld [vmem:[#allocation7 + $0x218] sm:$0xff]  ;;  %v2369_v45 = vld [vmem:[#allocation7 + $0x268] sm:$0xff] }
 0x111   : > { %1242 = vmatmul.mubr.f32.gmra.mrb[2].mxu1 %v353_v59  ;;  %925 = vmatprep.mubr.f32.mxu0 %v358_v62  ;;  %v385_v59 = vld [vmem:[%s7496_s8 + $0x130] sm:$0xff]  ;;  %v2363_v36 = vld [vmem:[#allocation7 + $0x238] sm:$0xff]  ;;  %v5593_v47 = vpack.c.bf16 %v2369_v45, %v2365_v44  ;;  %v2388_v22 = vld [vmem:[#allocation7 + $0x300] sm:$0xff] }
 0x112   : > { %1247 = vmatprep.mubr.f32.mxu1 %v358_v62  ;;  %5564 = vmatpush1.bf16.msra.mxu0 %v5563_v63  ;;  %v394_v62 = vld [vmem:[%s7496_s8 + $0x178] sm:$0xff]  ;;  %v393_v63 = vld [vmem:[%s7496_s8 + $0x170] sm:$0xff] }
 0x113   : > { %5692 = vmatpush1.bf16.msra.mxu1 %v5691_v0  ;;  %5566 = vmatprep.subr.bf16.mxu0 %v5565_v1  ;;  %v398_v0 = vld [vmem:[%s7496_s8 + $0x198] sm:$0xff]  ;;  %v397_v1 = vld [vmem:[%s7496_s8 + $0x190] sm:$0xff] }
 0x114   : > { %926 = vmatmul.mubr.f32.gmra.mrb[4].mxu0 %v357_v9  ;;  %5694 = vmatprep.subr.bf16.mxu1 %v5693_v5  ;;  %v405_v5 = vld [vmem:[%s7496_s8 + $0x1d0] sm:$0xff]  ;;  %v2371_v48 = vld [vmem:[#allocation7 + $0x278] sm:$0xff]  ;;  %s7242_s8 = smov [#allocation10]  }
 0x115   : > { %1248 = vmatmul.mubr.f32.gmra.mrb[4].mxu1 %v357_v9  ;;  %931 = vmatprep.mubr.f32.mxu0 %v362_v12  ;;  %v2345_v9 = vld [vmem:[#allocation7 + $0x1a8] sm:$0xff]  ;;  %v2390_v24 = vld [vmem:[#allocation7 + $0x310] sm:$0xff]  ;;  %v2411_v44 = vld [vmem:[#allocation7 + $0x3b8] sm:$0xff]  ;;  %s7164_s30 = sshll.u32 %s7242_s8, 4  ;;  %s7165_s30 = int_to_ptr.vmem [resolvable:$false] %s7164_s30 }
 0x116   : > { %1253 = vmatprep.mubr.f32.mxu1 %v362_v12  ;;  %5568 = vmatpush1.bf16.msra.mxu0 %v5567_v13  ;;  %v5581_v11 = vpack.c.bf16 %v2345_v9, %v2341_v8  ;;  %v2347_v12 = vld [vmem:[#allocation7 + $0x1b8] sm:$0xff]  ;;  %s7166_s9 = scalar_lea.vmem %s7165_s30, 16384  ;;  %p7167_p12 = scmp.lt.s32.totalorder %s10665_s21, %s7165_s30 }
 0x117   : > { %5696 = vmatpush1.bf16.msra.mxu1 %v5695_v14  ;;  %5570 = vmatprep.subr.bf16.mxu0 %v5569_v15  ;;  %v5709_v13 = vpack.c.bf16 %v2347_v12, %v2343_v10  ;;  %v2340_v14 = vld [vmem:[#allocation7 + $0x180] sm:$0xff]  ;;  %v2387_v8 = vld [vmem:[#allocation7 + $0x2f8] sm:$0xff]  ;;  %v2382_v12 = vld [vmem:[#allocation7 + $0x2d0] sm:$0xff]  ;;  %p7168_p1 = scmp.lt.s32.totalorder %s7166_s9, %s7160_s11 }
 0x118   : > { %932 = vmatmul.mubr.f32.gmra.mrb[6].mxu0 %v361_v23  ;;  %5698 = vmatprep.subr.bf16.mxu1 %v5697_v19  ;;  %v2344_v15 = vld [vmem:[#allocation7 + $0x1a0] sm:$0xff]  ;;  %v5711_v19 = vpack.c.bf16 %v2346_v18, %v2342_v16  ;;  %v2389_v16 = vld [vmem:[#allocation7 + $0x308] sm:$0xff]  ;;  %v2391_v18 = vld [vmem:[#allocation7 + $0x318] sm:$0xff] }
 0x119   : > { %1254 = vmatmul.mubr.f32.gmra.mrb[6].mxu1 %v361_v23  ;;  %937 = vmatprep.mubr.f32.mxu0 %v366_v26  ;;  %v5583_v17 = vpack.c.bf16 %v2344_v15, %v2340_v14  ;;  %v5585_v23 = vpack.c.bf16 %v2353_v21, %v2349_v20  ;;  %v2380_v10 = vld [vmem:[#allocation7 + $0x2c0] sm:$0xff]  ;;  %v2386_v14 = vld [vmem:[#allocation7 + $0x2f0] sm:$0xff]  ;;  %v2395_v20 = vld [vmem:[#allocation7 + $0x338] sm:$0xff]  ;;  %p7169_p2 = por %p7168_p1, %p7167_p12 }
 0x11a   : > { %1259 = vmatprep.mubr.f32.mxu1 %v366_v26  ;;  %5572 = vmatpush1.bf16.msra.mxu0 %v5571_v27  ;;  %v2348_v26 = vld [vmem:[#allocation7 + $0x1c0] sm:$0xff]  ;;  %v5731_v15 = vpack.c.bf16 %v2386_v14, %v2382_v12  ;;  %v5733_v21 = vpack.c.bf16 %v2395_v20, %v2391_v18  ;;  %v7603_v20 = vld [vmem:[#allocation7 + $0x430] sm:$0xff] }
 0x11b   : > { %5700 = vmatpush1.bf16.msra.mxu1 %v5699_v28  ;;  %5574 = vmatprep.subr.bf16.mxu0 %v5573_v29  ;;  %v2352_v27 = vld [vmem:[#allocation7 + $0x1e0] sm:$0xff]  ;;  %v2350_v28 = vld [vmem:[#allocation7 + $0x1d0] sm:$0xff]  ;;  %p7170_p4 = pnand %p7169_p2, %p7163_p7 }
 0x11c   : > { %938 = vmatmul.mubr.f32.gmra.mrb[8].mxu0 %v365_v37  ;;  %5702 = vmatprep.subr.bf16.mxu1 %v5701_v33  ;;  %v5587_v29 = vpack.c.bf16 %v2352_v27, %v2348_v26  ;;  %v5715_v31 = vpack.c.bf16 %v2354_v30, %v2350_v28  ;;  %v2361_v33 = vld [vmem:[#allocation7 + $0x228] sm:$0xff]  ;;  %v2394_v26 = vld [vmem:[#allocation7 + $0x330] sm:$0xff]  ;;  %v2399_v30 = vld [vmem:[#allocation7 + $0x358] sm:$0xff] }
 0x11d   : > { %1260 = vmatmul.mubr.f32.gmra.mrb[8].mxu1 %v365_v37  ;;  %943 = vmatprep.mubr.f32.mxu0 %v370_v40  ;;  %v5589_v35 = vpack.c.bf16 %v2361_v33, %v2357_v32  ;;  %v5717_v37 = vpack.c.bf16 %v2363_v36, %v2359_v34  ;;  %v5735_v27 = vpack.c.bf16 %v2394_v26, %v2390_v24  ;;  %v2397_v28 = vld [vmem:[#allocation7 + $0x348] sm:$0xff]  ;;  %v2403_v32 = vld [vmem:[#allocation7 + $0x378] sm:$0xff]  ;;  %v2396_v34 = vld [vmem:[#allocation7 + $0x340] sm:$0xff] }
 0x11e   : > { %1265 = vmatprep.mubr.f32.mxu1 %v370_v40  ;;  %5576 = vmatpush1.bf16.msra.mxu0 %v5575_v41  ;;  %v2358_v40 = vld [vmem:[#allocation7 + $0x210] sm:$0xff]  ;;  %v5591_v41 = vpack.c.bf16 %v2360_v39, %v2356_v38  ;;  %v5737_v33 = vpack.c.bf16 %v2403_v32, %v2399_v30  ;;  %v7609_v24 = vld [vmem:[#allocation7 + $0x458] sm:$0xff]  ;;  %v7618_v30 = vld [vmem:[#allocation7 + $0x460] sm:$0xff] }
 0x11f   : > { %5704 = vmatpush1.bf16.msra.mxu1 %v5703_v42  ;;  %5578 = vmatprep.subr.bf16.mxu0 %v5577_v43  ;;  %v2362_v42 = vld [vmem:[#allocation7 + $0x230] sm:$0xff]  ;;  %10975 = vst [vmem:[#allocation21_spill] sm:$0xff] %v7618_v30 }
 0x120   : > { %944 = vmatmul.mubr.f32.gmra.mrb[10].mxu0 %v369_v49  ;;  %5706 = vmatprep.subr.bf16.mxu1 %v5705_v46  ;;  %v5719_v43 = vpack.c.bf16 %v2362_v42, %v2358_v40  ;;  %v2367_v46 = vld [vmem:[#allocation7 + $0x258] sm:$0xff]  ;;  %v2398_v36 = vld [vmem:[#allocation7 + $0x350] sm:$0xff]  ;;  %v2405_v40 = vld [vmem:[#allocation7 + $0x388] sm:$0xff] }
 0x121   : > { %1266 = vmatmul.mubr.f32.gmra.mrb[10].mxu1 %v369_v49  ;;  %949 = vmatprep.mubr.f32.mxu0 %v374_v50  ;;  %v5721_v49 = vpack.c.bf16 %v2371_v48, %v2367_v46  ;;  %v2402_v38 = vld [vmem:[#allocation7 + $0x370] sm:$0xff]  ;;  %v2407_v42 = vld [vmem:[#allocation7 + $0x398] sm:$0xff]  ;;  %v2404_v46 = vld [vmem:[#allocation7 + $0x380] sm:$0xff] }
 0x122   : > { %1271 = vmatprep.mubr.f32.mxu1 %v374_v50  ;;  %5580 = vmatpush1.bf16.msra.mxu0 %v5579_v51  ;;  %v2364_v50 = vld [vmem:[#allocation7 + $0x240] sm:$0xff]  ;;  %v5739_v39 = vpack.c.bf16 %v2402_v38, %v2398_v36  ;;  %v5741_v45 = vpack.c.bf16 %v2411_v44, %v2407_v42  ;;  %v2406_v48 = vld [vmem:[#allocation7 + $0x390] sm:$0xff]  ;;  %v7630_v36 = vld [vmem:[#allocation7 + $0x488] sm:$0xff] }
 0x123   : > { %5708 = vmatpush1.bf16.msra.mxu1 %v5707_v52  ;;  %5582 = vmatprep.subr.bf16.mxu0 %v5581_v11  ;;  %v2368_v51 = vld [vmem:[#allocation7 + $0x260] sm:$0xff]  ;;  %v2366_v52 = vld [vmem:[#allocation7 + $0x250] sm:$0xff]  ;;  %10978 = vst [vmem:[#allocation24_spill] sm:$0xff] %v7630_v36  ;;  %v7642_v42 = vld [vmem:[#allocation7 + $0x4b8] sm:$0xff] }
 0x124   : > { %950 = vmatmul.mubr.f32.gmra.mrb[12].mxu0 %v373_v53  ;;  %5710 = vmatprep.subr.bf16.mxu1 %v5709_v13  ;;  %v2384_v11 = vld [vmem:[#allocation7 + $0x2e0] sm:$0xff]  ;;  %10982 = vst [vmem:[#allocation28_spill] sm:$0xff] %v7642_v42 }
 0x125   : > { %1272 = vmatmul.mubr.f32.gmra.mrb[12].mxu1 %v373_v53  ;;  %955 = vmatprep.mubr.f32.mxu0 %v378_v54  ;;  %v5595_v53 = vpack.c.bf16 %v2368_v51, %v2364_v50  ;;  %v5603_v13 = vpack.c.bf16 %v2384_v11, %v2380_v10  ;;  %v2410_v50 = vld [vmem:[#allocation7 + $0x3b0] sm:$0xff] }
 0x126   : > { %1277 = vmatprep.mubr.f32.mxu1 %v378_v54  ;;  %5584 = vmatpush1.bf16.msra.mxu0 %v5583_v17  ;;  %v2370_v54 = vld [vmem:[#allocation7 + $0x270] sm:$0xff]  ;;  %v2393_v17 = vld [vmem:[#allocation7 + $0x328] sm:$0xff]  ;;  %v5743_v51 = vpack.c.bf16 %v2410_v50, %v2406_v48  ;;  %v7653_v48 = vld [vmem:[#allocation7 + $0x4a0] sm:$0xff] }
 0x127   : > { %5712 = vmatpush1.bf16.msra.mxu1 %v5711_v19  ;;  %5586 = vmatprep.subr.bf16.mxu0 %v5585_v23  ;;  %v5605_v19 = vpack.c.bf16 %v2393_v17, %v2389_v16  ;;  %v2392_v23 = vld [vmem:[#allocation7 + $0x320] sm:$0xff]  ;;  %10984 = vst [vmem:[#allocation30_spill] sm:$0xff] %v7653_v48  ;;  %v7657_v50 = vld [vmem:[#allocation7 + $0x4b0] sm:$0xff] }
 0x128   : > { %956 = vmatmul.mubr.f32.gmra.mrb[14].mxu0 %v377_v55  ;;  %5714 = vmatprep.subr.bf16.mxu1 %v5713_v25  ;;  %v5607_v25 = vpack.c.bf16 %v2392_v23, %v2388_v22  ;;  %v7594_v16 = vld [vmem:[#allocation7 + $0x400] sm:$0xff]  ;;  %v7607_v23 = vld [vmem:[#allocation7 + $0x468] sm:$0xff]  ;;  %10986 = vst [vmem:[#allocation32_spill] sm:$0xff] %v7657_v50 }
 0x129   : > { %1278 = vmatmul.mubr.f32.gmra.mrb[14].mxu1 %v377_v55  ;;  %961 = vmatprep.mubr.f32.mxu0 %v382_v56  ;;  %v5723_v55 = vpack.c.bf16 %v2370_v54, %v2366_v52  ;;  %v2413_v52 = vld [vmem:[#allocation7 + $0x3c8] sm:$0xff]  ;;  %v2415_v54 = vld [vmem:[#allocation7 + $0x3d8] sm:$0xff]  ;;  %v7596_v17 = vld [vmem:[#allocation7 + $0x420] sm:$0xff] }
 0x12a   : > { %1283 = vmatprep.mubr.f32.mxu1 %v382_v56  ;;  %5588 = vmatpush1.bf16.msra.mxu0 %v5587_v29  ;;  %v2373_v56 = vld [vmem:[#allocation7 + $0x288] sm:$0xff] }
 0x12b   : > { %5716 = vmatpush1.bf16.msra.mxu1 %v5715_v31  ;;  %5590 = vmatprep.subr.bf16.mxu0 %v5589_v35  ;;  %v2401_v29 = vld [vmem:[#allocation7 + $0x368] sm:$0xff]  ;;  %v2400_v35 = vld [vmem:[#allocation7 + $0x360] sm:$0xff] }
 0x12c   : > { %962 = vmatmul.mubr.f32.gmra.mrb[16].mxu0 %v381_v57  ;;  %5718 = vmatprep.subr.bf16.mxu1 %v5717_v37  ;;  %v5609_v31 = vpack.c.bf16 %v2401_v29, %v2397_v28  ;;  %v5611_v37 = vpack.c.bf16 %v2400_v35, %v2396_v34  ;;  %v7616_v29 = vld [vmem:[#allocation7 + $0x440] sm:$0xff]  ;;  %v7628_v35 = vld [vmem:[#allocation7 + $0x470] sm:$0xff] }
 0x12d   : > { %1284 = vmatmul.mubr.f32.gmra.mrb[16].mxu1 %v381_v57  ;;  %967 = vmatprep.mubr.f32.mxu0 %v386_v58  ;;  %v2377_v57 = vld [vmem:[#allocation7 + $0x2a8] sm:$0xff]  ;;  %10974 = vst [vmem:[#allocation20_spill] sm:$0xff] %v7616_v29  ;;  %10977 = vst [vmem:[#allocation23_spill] sm:$0xff] %v7628_v35 }
 0x12e   : > { %1289 = vmatprep.mubr.f32.mxu1 %v386_v58  ;;  %5592 = vmatpush1.bf16.msra.mxu0 %v5591_v41  ;;  %v2375_v58 = vld [vmem:[#allocation7 + $0x298] sm:$0xff]  ;;  %v2409_v41 = vld [vmem:[#allocation7 + $0x3a8] sm:$0xff] }
 0x12f   : > { %5720 = vmatpush1.bf16.msra.mxu1 %v5719_v43  ;;  %5594 = vmatprep.subr.bf16.mxu0 %v5593_v47  ;;  %v5613_v43 = vpack.c.bf16 %v2409_v41, %v2405_v40  ;;  %v2408_v47 = vld [vmem:[#allocation7 + $0x3a0] sm:$0xff]  ;;  %v7640_v41 = vld [vmem:[#allocation7 + $0x498] sm:$0xff] }
 0x130   : > { %968 = vmatmul.mubr.f32.gmra.mrb[18].mxu0 %v385_v59  ;;  %5722 = vmatprep.subr.bf16.mxu1 %v5721_v49  ;;  %v5615_v49 = vpack.c.bf16 %v2408_v47, %v2404_v46  ;;  %10981 = vst [vmem:[#allocation27_spill] sm:$0xff] %v7640_v41 }
 0x131   : > { %1290 = vmatmul.mubr.f32.gmra.mrb[18].mxu1 %v385_v59  ;;  %973 = vmatprep.mubr.f32.mxu0 %v390_v60  ;;  %v5597_v59 = vpack.c.bf16 %v2377_v57, %v2373_v56  ;;  %v2419_v56 = vld [vmem:[#allocation7 + $0x3f8] sm:$0xff] }
 0x132   : > { %1295 = vmatprep.mubr.f32.mxu1 %v390_v60  ;;  %5596 = vmatpush1.bf16.msra.mxu0 %v5595_v53  ;;  %v2379_v60 = vld [vmem:[#allocation7 + $0x2b8] sm:$0xff]  ;;  %v2417_v53 = vld [vmem:[#allocation7 + $0x3e8] sm:$0xff]  ;;  %v5745_v57 = vpack.c.bf16 %v2419_v56, %v2415_v54 }
 0x133   : > { %5724 = vmatpush1.bf16.msra.mxu1 %v5723_v55  ;;  %5598 = vmatprep.subr.bf16.mxu0 %v5597_v59  ;;  %v5617_v55 = vpack.c.bf16 %v2417_v53, %v2413_v52  ;;  %v2416_v59 = vld [vmem:[#allocation7 + $0x3e0] sm:$0xff]  ;;  %v7710_v56 = vld [vmem:[#allocation7 + $0x518] sm:$0xff] }
 0x134   : > { %974 = vmatmul.mubr.f32.gmra.mrb[20].mxu0 %v389_v61  ;;  %11000 = vst [vmem:[#allocation46_spill] sm:$0xff] %v7710_v56 }
 0x135   : > { %1296 = vmatmul.mubr.f32.gmra.mrb[20].mxu1 %v389_v61  ;;  %979 = vmatprep.mubr.f32.mxu0 %v394_v62  ;;  %v5725_v61 = vpack.c.bf16 %v2379_v60, %v2375_v58  ;;  %v2412_v58 = vld [vmem:[#allocation7 + $0x3c0] sm:$0xff]  ;;  %v2414_v60 = vld [vmem:[#allocation7 + $0x3d0] sm:$0xff] }
 0x136   : > { %1301 = vmatprep.mubr.f32.mxu1 %v394_v62  ;;  %v2372_v62 = vld [vmem:[#allocation7 + $0x280] sm:$0xff] }
 0x137   : > { %5726 = vmatprep.subr.bf16.mxu1 %v5725_v61  ;;  %v5619_v61 = vpack.c.bf16 %v2416_v59, %v2412_v58  ;;  %v7666_v58 = vld [vmem:[#allocation7 + $0x4e8] sm:$0xff] }
 0x138   : > { %980 = vmatmul.mubr.f32.gmra.mrb[22].mxu0 %v393_v63  ;;  %10988 = vst [vmem:[#allocation34_spill] sm:$0xff] %v7666_v58 }
 0x139   : > { %1302 = vmatmul.mubr.f32.gmra.mrb[22].mxu1 %v393_v63  ;;  %985 = vmatprep.mubr.f32.mxu0 %v398_v0  ;;  %v2376_v63 = vld [vmem:[#allocation7 + $0x2a0] sm:$0xff] }
 0x13a   : > { %1307 = vmatprep.mubr.f32.mxu1 %v398_v0  ;;  %v2374_v0 = vld [vmem:[#allocation7 + $0x290] sm:$0xff] }
 0x13c   : > { %986 = vmatmul.mubr.f32.gmra.mrb[24].mxu0 %v397_v1 }
 0x13d   : > { %1308 = vmatmul.mubr.f32.gmra.mrb[24].mxu1 %v397_v1  ;;  %991 = vmatprep.mubr.f32.mxu0 %v402_v2  ;;  %v5599_v1 = vpack.c.bf16 %v2376_v63, %v2372_v62  ;;  %v2418_v62 = vld [vmem:[#allocation7 + $0x3f0] sm:$0xff] }
 0x13e   : > { %1313 = vmatprep.mubr.f32.mxu1 %v402_v2  ;;  %v2378_v2 = vld [vmem:[#allocation7 + $0x2b0] sm:$0xff]  ;;  %v5747_v63 = vpack.c.bf16 %v2418_v62, %v2414_v60 }
 0x13f   : > { %5600 = vmatpush1.bf16.msra.mxu0 %v5599_v1  ;;  %v2425_v1 = vld [vmem:[#allocation7 + $0x428] sm:$0xff] }
 0x140   : > { %992 = vmatmul.mubr.f32.gmra.mrb[26].mxu0 %v401_v3 }
 0x141   : > { %1314 = vmatmul.mubr.f32.gmra.mrb[26].mxu1 %v401_v3  ;;  %997 = vmatprep.mubr.f32.mxu0 %v406_v4  ;;  %v5727_v3 = vpack.c.bf16 %v2378_v2, %v2374_v0  ;;  %v2421_v0 = vld [vmem:[#allocation7 + $0x408] sm:$0xff]  ;;  %v2423_v2 = vld [vmem:[#allocation7 + $0x418] sm:$0xff] }
 0x142   : > { %1319 = vmatprep.mubr.f32.mxu1 %v406_v4  ;;  %v2381_v4 = vld [vmem:[#allocation7 + $0x2c8] sm:$0xff] }
 0x143   : > { %5728 = vmatpush1.bf16.msra.mxu1 %v5727_v3  ;;  %v5621_v3 = vpack.c.bf16 %v2425_v1, %v2421_v0  ;;  %v7675_v1 = vld [vmem:[#allocation7 + $0x4d8] sm:$0xff] }
 0x144   : > { %998 = vmatmul.mubr.f32.gmra.mrb[28].mxu0 %v405_v5  ;;  %10991 = vst [vmem:[#allocation37_spill] sm:$0xff] %v7675_v1 }
 0x145   : > { %1320 = vmatmul.mubr.f32.gmra.mrb[28].mxu1 %v405_v5  ;;  %1003 = vmatprep.mubr.f32.mxu0 %v410_v6  ;;  %v2385_v5 = vld [vmem:[#allocation7 + $0x2e8] sm:$0xff] }
 0x146   : > { %1325 = vmatprep.mubr.f32.mxu1 %v410_v6  ;;  %v2383_v6 = vld [vmem:[#allocation7 + $0x2d8] sm:$0xff] }
 0x147   : > { %v5729_v9 = vpack.c.bf16 %v2387_v8, %v2383_v6  ;;  %v668_v6 = vlaneseq }
 0x148   : > { %1004 = vmatmul.mubr.f32.gmra.mrb[30].mxu0 %v409_v7 }
 0x149   : > { %1326 = vmatmul.mubr.f32.gmra.mrb[30].mxu1 %v409_v7  ;;  %v5601_v7 = vpack.c.bf16 %v2385_v5, %v2381_v4  ;;  %5730 = vmatprep.subr.bf16.mxu1 %v5729_v9  ;;  %v2427_v4 = vld [vmem:[#allocation7 + $0x438] sm:$0xff]  ;;  %v344_v9 = vld [vmem:[%s10717_s2] sm:$0xf] }
 0x14a   : > { %5732 = vmatpush1.bf16.msra.mxu1 %v5731_v15  ;;  %v5749_v5 = vpack.c.bf16 %v2427_v4, %v2423_v2 }
 0x14b   : > { %5602 = vmatprep.subr.bf16.mxu0 %v5601_v7  ;;  %5734 = vmatprep.subr.bf16.mxu1 %v5733_v21  ;;  %v669_v7 = vshrl.u32 %v668_v6, 7  ;;  %v7605_v21 = vld [vmem:[#allocation7 + $0x448] sm:$0xff]  ;;  %v7685_v6 = vld [vmem:[#allocation7 + $0x4f8] sm:$0xff] }
 0x14c   : > { %5604 = vmatpush1.bf16.msra.mxu0 %v5603_v13  ;;  %10993 = vst [vmem:[#allocation39_spill] sm:$0xff] %v7685_v6 }
 0x14d   : > { %5606 = vmatprep.subr.bf16.mxu0 %v5605_v19  ;;  %v7574_v8 = vsub.s32 0, %v669_v7  ;;  %v7579_v10 = vsub.s32 2, %v669_v7  ;;  %v7581_v11 = vsub.s32 1, %v669_v7  ;;  %v7583_v12 = vsub.s32 3, %v669_v7  ;;  %v7601_v19 = vld [vmem:[#allocation7 + $0x410] sm:$0xff]  ;;  %v7687_v7 = vld [vmem:[#allocation7 + $0x4c0] sm:$0xff] }
 0x14e   : > { %5736 = vmatpush1.bf16.msra.mxu1 %v5735_v27  ;;  %10994 = vst [vmem:[#allocation40_spill] sm:$0xff] %v7687_v7  ;;  %v7732_v7 = vld [vmem:[#allocation7 + $0x520] sm:$0xff] }
 0x14f   : > { %5738 = vmatprep.subr.bf16.mxu1 %v5737_v33  ;;  %10970 = vst [vmem:[#allocation16_spill] sm:$0xff] %v7574_v8  ;;  %10971 = vst [vmem:[#allocation17_spill] sm:$0xff] %v7579_v10  ;;  %v7586_v13 = vrot.slane %v344_v9, %v7574_v8  ;;  %v7589_v14 = vrot.slane %v344_v9, %v7579_v10  ;;  %v7592_v15 = vrot.slane %v344_v9, %v7581_v11 }
 0x150   : > { %5608 = vmatpush1.bf16.msra.mxu0 %v5607_v25  ;;  %10972 = vst [vmem:[#allocation18_spill] sm:$0xff] %v7581_v11  ;;  %10973 = vst [vmem:[#allocation19_spill] sm:$0xff] %v7583_v12  ;;  %v7599_v18 = vrot.slane %v344_v9, %v7583_v12  ;;  %v7611_v25 = vld [vmem:[#allocation7 + $0x478] sm:$0xff]  ;;  %v7689_v9 = vld [vmem:[#allocation7 + $0x4e0] sm:$0xff] }
 0x151   : > { %5610 = vmatprep.subr.bf16.mxu0 %v5609_v31  ;;  %v7620_v31 = vld [vmem:[#allocation7 + $0x450] sm:$0xff]  ;;  %10995 = vst [vmem:[#allocation41_spill] sm:$0xff] %v7689_v9  ;;  %v7726_v11 = vld [vmem:[#allocation7 + $0x500] sm:$0xff]  ;;  %11005 = vst [vmem:[#allocation51_spill] sm:$0xff] %v7732_v7 }
 0x152   : > { %5740 = vmatpush1.bf16.msra.mxu1 %v5739_v39  ;;  %10976 = vst [vmem:[#allocation22_spill] sm:$0xff] %v7620_v31  ;;  %11003 = vst [vmem:[#allocation49_spill] sm:$0xff] %v7726_v11 }
 0x153   : > { %5742 = vmatprep.subr.bf16.mxu1 %v5741_v45 }
 0x154   : > { %5612 = vmatpush1.bf16.msra.mxu0 %v5611_v37  ;;  %v7632_v37 = vld [vmem:[#allocation7 + $0x4a8] sm:$0xff] }
 0x155   : > { %5614 = vmatprep.subr.bf16.mxu0 %v5613_v43  ;;  %10979 = vst [vmem:[#allocation25_spill] sm:$0xff] %v7632_v37  ;;  %v7644_v43 = vld [vmem:[#allocation7 + $0x480] sm:$0xff] }
 0x156   : > { %5744 = vmatpush1.bf16.msra.mxu1 %v5743_v51  ;;  %10983 = vst [vmem:[#allocation29_spill] sm:$0xff] %v7644_v43 }
 0x157   : > { %5746 = vmatprep.subr.bf16.mxu1 %v5745_v57  ;;  %v7664_v57 = vld [vmem:[#allocation7 + $0x4c8] sm:$0xff] }
 0x158   : > { %5616 = vmatpush1.bf16.msra.mxu0 %v5615_v49  ;;  %v7655_v49 = vld [vmem:[#allocation7 + $0x490] sm:$0xff]  ;;  %10987 = vst [vmem:[#allocation33_spill] sm:$0xff] %v7664_v57 }
 0x159   : > { %5618 = vmatprep.subr.bf16.mxu0 %v5617_v55  ;;  %10985 = vst [vmem:[#allocation31_spill] sm:$0xff] %v7655_v49 }
 0x15a   : > { %5748 = vmatpush1.bf16.msra.mxu1 %v5747_v63 }
 0x15b   : > { %5750 = vmatprep.subr.bf16.mxu1 %v5749_v5 }
 0x15c   : > { %5620 = vmatpush1.bf16.msra.mxu0 %v5619_v61 }
 0x15d   : > { %5622 = vmatprep.subr.bf16.mxu0 %v5621_v3 }
 0x1df   : > { %v915_v22 = vpop.f32.mrb[0].mxu0 }
 0x1e0   : > { %v7614_v26 = vadd.f32 %v915_v22, %v7586_v13  ;;  %v1237_v27 = vpop.f32.mrb[0].mxu1  ;;  %v917_v28 = vpop.f32.mrb[1].mxu0 }
 0x1e1   : > { %v7623_v32 = vadd.f32 %v1237_v27, %v7589_v14  ;;  %v7626_v33 = vadd.f32 %v917_v28, %v7592_v15  ;;  %v1239_v34 = vpop.f32.mrb[1].mxu1 }
 0x1e2   : > { %v1396_v38 = vand.u32 2147483647, %v7614_v26  ;;  %v7636_v39 = vadd.f32 %v1239_v34, %v7599_v18 }
 0x1e3   : > { %v1398_v44 = vand.u32 2147483647, %v7623_v32  ;;  %v1397_v52 = vand.u32 2147483647, %v7626_v33  ;;  %v921_v53 = vpop.f32.mrb[2].mxu0 }
 0x1e4   : > { %10980 = vst [vmem:[#allocation26_spill] sm:$0xff] %v7636_v39  ;;  %v1460_v51 = vsub.f32 0.0, %v1396_v38  ;;  %v1243_v54 = vpop.f32.mrb[2].mxu1  ;;  %v1399_v60 = vand.u32 2147483647, %v7636_v39  ;;  %v7670_v61 = vadd.f32 %v921_v53, %v7586_v13  ;;  %v923_v63 = vpop.f32.mrb[3].mxu0 }
 0x1e5   : > { %v1462_v59 = vsub.f32 0.0, %v1398_v44  ;;  %v7673_v62 = vadd.f32 %v1243_v54, %v7589_v14  ;;  %v1245_v0 = vpop.f32.mrb[3].mxu1  ;;  %v7678_v3 = vadd.f32 %v923_v63, %v7592_v15  ;;  %v7697_v38 = vld [vmem:[#allocation7 + $0x4d0] sm:$0xff]  ;;  %v1461_v53 = vsub.f32 0.0, %v1397_v52  ;;  %v7705_v63 = vld [vmem:[#allocation7 + $0x528] sm:$0xff] }
 0x1e6   : > { %10989 = vst [vmem:[#allocation35_spill] sm:$0xff] %v7670_v61  ;;  %v1524_v2 = vmul.f32 1.442695, %v1460_v51  ;;  %v7681_v4 = vadd.f32 %v1245_v0, %v7599_v18  ;;  %10996 = vst [vmem:[#allocation42_spill] sm:$0xff] %v7697_v38  ;;  %v7699_v44 = vld [vmem:[#allocation7 + $0x4f0] sm:$0xff]  ;;  %v7701_v51 = vld [vmem:[#allocation7 + $0x508] sm:$0xff] }
 0x1e7   : > { %10990 = vst [vmem:[#allocation36_spill] sm:$0xff] %v7673_v62  ;;  %v1528_v22 = vmul.f32 1.442695, %v1462_v59  ;;  %10997 = vst [vmem:[#allocation43_spill] sm:$0xff] %v7699_v44  ;;  %v1400_v54 = vand.u32 2147483647, %v7670_v61 }
 0x1e8   : > { %10992 = vst [vmem:[#allocation38_spill] sm:$0xff] %v7681_v4  ;;  %10998 = vst [vmem:[#allocation44_spill] sm:$0xff] %v7701_v51  ;;  %6534 = vpow2.f32 %v1524_v2  ;;  %v1402_v59 = vand.u32 2147483647, %v7673_v62  ;;  %v1463_v0 = vsub.f32 0.0, %v1399_v60  ;;  %v927_v27 = vpop.f32.mrb[4].mxu0 }
 0x1e9   : > { %10999 = vst [vmem:[#allocation45_spill] sm:$0xff] %v7705_v63  ;;  %6536 = vpow2.f32 %v1528_v22  ;;  %v1401_v28 = vand.u32 2147483647, %v7678_v3  ;;  %v1249_v34 = vpop.f32.mrb[4].mxu1  ;;  %v1464_v55 = vsub.f32 0.0, %v1400_v54  ;;  %v929_v2 = vpop.f32.mrb[5].mxu0  ;;  %v7720_v40 = vadd.f32 %v927_v27, %v7586_v13 }
 0x1ea   : > { %v1403_v52 = vand.u32 2147483647, %v7681_v4  ;;  %v1251_v47 = vpop.f32.mrb[5].mxu1  ;;  %v7717_v22 = vld [vmem:[#allocation7 + $0x538] sm:$0xff]  ;;  %v1466_v45 = vsub.f32 0.0, %v1402_v59  ;;  %v7730_v60 = vadd.f32 %v1249_v34, %v7589_v14 }
 0x1eb   : > { %11001 = vst [vmem:[#allocation47_spill] sm:$0xff] %v7717_v22  ;;  %11002 = vst [vmem:[#allocation48_spill] sm:$0xff] %v7720_v40  ;;  %v933_v5 = vpop.f32.mrb[6].mxu0  ;;  %v1526_v10 = vmul.f32 1.442695, %v1461_v53  ;;  %v1465_v8 = vsub.f32 0.0, %v1401_v28  ;;  %v7740_v28 = vadd.f32 %v929_v2, %v7592_v15 }
 0x1ec   : > { %11004 = vst [vmem:[#allocation50_spill] sm:$0xff] %v7730_v60  ;;  %v1255_v59 = vpop.f32.mrb[6].mxu1  ;;  %v1530_v54 = vmul.f32 1.442695, %v1463_v0  ;;  %v1532_v51 = vmul.f32 1.442695, %v1464_v55 }
 0x1ed   : > { %v1467_v63 = vsub.f32 0.0, %v1403_v52  ;;  %v1404_v46 = vand.u32 2147483647, %v7720_v40  ;;  %11006 = vst [vmem:[#allocation52_spill] sm:$0xff] %v7740_v28  ;;  %v935_v34 = vpop.f32.mrb[7].mxu0  ;;  %v1257_v27 = vpop.f32.mrb[7].mxu1  ;;  %6538 = vpow2.f32 %v1526_v10  ;;  %v7748_v52 = vadd.f32 %v1251_v47, %v7599_v18 }
 0x1ee   : > { %v1536_v44 = vmul.f32 1.442695, %v1466_v45  ;;  %v1534_v12 = vmul.f32 1.442695, %v1465_v8  ;;  %v1406_v55 = vand.u32 2147483647, %v7730_v60  ;;  %6540 = vpow2.f32 %v1530_v54 }
 0x1ef   : > { %v939_v1 = vpop.f32.mrb[8].mxu0  ;;  %11007 = vst [vmem:[#allocation53_spill] sm:$0xff] %v7748_v52  ;;  %6542 = vpow2.f32 %v1532_v51  ;;  %v1538_v8 = vmul.f32 1.442695, %v1467_v63  ;;  %v1468_v10 = vsub.f32 0.0, %v1404_v46  ;;  %v7762_v54 = vadd.f32 %v933_v5, %v7586_v13 }
 0x1f0   : > { %v1261_v2 = vpop.f32.mrb[8].mxu1  ;;  %v941_v9 = vpop.f32.mrb[9].mxu0  ;;  %v1405_v0 = vand.u32 2147483647, %v7740_v28  ;;  %6544 = vpow2.f32 %v1536_v44  ;;  %v7765_v53 = vadd.f32 %v1255_v59, %v7589_v14  ;;  %v1470_v51 = vsub.f32 0.0, %v1406_v55 }
 0x1f1   : > { %v7753_v39 = vpop.f32.mrb[9].mxu1  ;;  %11008 = vst [vmem:[#allocation54_spill] sm:$0xff] %v7762_v54  ;;  %6546 = vpow2.f32 %v1534_v12  ;;  %v1407_v46 = vand.u32 2147483647, %v7748_v52  ;;  %v1540_v12 = vmul.f32 1.442695, %v1468_v10  ;;  %v7787_v59 = vadd.f32 %v935_v34, %v7592_v15 }
 0x1f2   : > { %v7755_v56 = vpop.eup %6534  ;;  %11009 = vst [vmem:[#allocation55_spill] sm:$0xff] %v7765_v53  ;;  %v1469_v55 = vsub.f32 0.0, %v1405_v0  ;;  %v1408_v6 = vand.u32 2147483647, %v7762_v54  ;;  %v1544_v44 = vmul.f32 1.442695, %v1470_v51  ;;  %v7790_v60 = vadd.f32 %v1257_v27, %v7599_v18 }
 0x1f3   : > { %v7758_v47 = vpop.eup %6536  ;;  %v1652_v11 = vadd.f32 1.0, %v7755_v56  ;;  %v7767_v45 = vpop.f32.mrb[10].mxu0  ;;  %v1655_v7 = vmul.f32 -0.5, %v7755_v56  ;;  %v1471_v5 = vsub.f32 0.0, %v1407_v46  ;;  %11010 = vst [vmem:[#allocation56_spill] sm:$0xff] %v7787_v59  ;;  %v7800_v52 = vadd.f32 %v939_v1, %v7586_v13 }
 0x1f4   : > { %v1670_v38 = vadd.f32 1.0, %v7758_v47  ;;  %v7771_v63 = vpop.f32.mrb[10].mxu1  ;;  %v7773_v62 = vpop.f32.mrb[11].mxu0  ;;  %11011 = vst [vmem:[#allocation57_spill] sm:$0xff] %v7790_v60  ;;  %v1673_v10 = vmul.f32 -0.5, %v7758_v47  ;;  %v1472_v27 = vsub.f32 0.0, %v1408_v6  ;;  %v7808_v28 = vadd.f32 %v1261_v2, %v7589_v14 }
 0x1f5   : > { %6548 = vlog2.f32 %v1652_v11  ;;  %v7778_v4 = vpop.f32.mrb[11].mxu1  ;;  %v1410_v11 = vand.u32 2147483647, %v7765_v53  ;;  %v1676_v22 = vand.u32 2147483647, %v7758_v47  ;;  %11012 = vst [vmem:[#allocation58_spill] sm:$0xff] %v7800_v52  ;;  %v7814_v1 = vadd.f32 %v941_v9, %v7592_v15 }
 0x1f6   : > { %6550 = vpow2.f32 %v1538_v8  ;;  %v1656_v46 = vadd.f32 1.0, %v1655_v7  ;;  %v1409_v40 = vand.u32 2147483647, %v7787_v59  ;;  %11013 = vst [vmem:[#allocation59_spill] sm:$0xff] %v7808_v28  ;;  %v1542_v61 = vmul.f32 1.442695, %v1469_v55 }
 0x1f7   : > { %6552 = vlog2.f32 %v1670_v38  ;;  %v7784_v57 = vpop.f32.mrb[12].mxu0  ;;  %v1658_v38 = vand.u32 2147483647, %v7755_v56  ;;  %v7804_v34 = vpop.eup %6538  ;;  %v1474_v49 = vsub.f32 0.0, %v1410_v11  ;;  %v1411_v50 = vand.u32 2147483647, %v7790_v60 }
 0x1f8   : > { %v7792_v8 = vpop.f32.mrb[12].mxu1  ;;  %v7794_v0 = vpop.f32.mrb[13].mxu0  ;;  %11015 = vst [vmem:[#allocation61_spill] sm:$0xff] %v7814_v1  ;;  %6554 = vpow2.f32 %v1540_v12  ;;  %v1546_v48 = vmul.f32 1.442695, %v1471_v5  ;;  %v1473_v7 = vsub.f32 0.0, %v1409_v40  ;;  %v1657_v40 = vmul.f32 %v7755_v56, %v1656_v46 }
 0x1f9   : > { %v7802_v51 = vpop.f32.mrb[13].mxu1  ;;  %v7810_v58 = vpop.eup %6540  ;;  %vm7823_vm0 = vcmp.lt.f32.partialorder %v1658_v38, 0.0004427343  ;;  %v1674_v55 = vadd.f32 1.0, %v1673_v10  ;;  %6556 = vpow2.f32 %v1544_v44  ;;  %v1412_v11 = vand.u32 2147483647, %v7800_v52 }
 0x1fa   : > { %11014 = vst [vmem:[#allocation60_spill] sm:$0xff] %v7810_v58  ;;  %v7816_v43 = vpop.eup %6542  ;;  %v1548_v6 = vmul.f32 1.442695, %v1472_v27  ;;  %v1414_v38 = vand.u32 2147483647, %v7808_v28  ;;  %6558 = vpow2.f32 %v1542_v61  ;;  %v7846_v36 = vadd.f32 %v7753_v39, %v7599_v18 }
 0x1fb   : > { %v7819_v41 = vpop.f32.mrb[14].mxu0  ;;  %v7821_v2 = vpop.eup %6544  ;;  %vm7839_vm1 = vcmp.lt.f32.partialorder %v1676_v22, 0.0004427343  ;;  %v1552_v9 = vmul.f32 1.442695, %v1474_v49  ;;  %6560 = vpow2.f32 %v1546_v48  ;;  %v7855_v22 = vadd.f32 %v7767_v45, %v7586_v13 }
 0x1fc   : > { %11016 = vst [vmem:[#allocation62_spill] sm:$0xff] %v7821_v2  ;;  %v7829_v42 = vpop.f32.mrb[14].mxu1  ;;  %v7831_v5 = vpop.f32.mrb[15].mxu0  ;;  %v1475_v2 = vsub.f32 0.0, %v1411_v50  ;;  %v1413_v53 = vand.u32 2147483647, %v7814_v1  ;;  %6562 = vpow2.f32 %v1548_v6  ;;  %v7904_v28 = vadd.f32 %v7792_v8, %v7589_v14 }
 0x1fd   : > { %v7833_v12 = vpop.eup %6546  ;;  %v7837_v54 = vpop.f32.mrb[15].mxu1  ;;  %11021 = vst [vmem:[#allocation63_spill] sm:$0xff] %v7846_v36  ;;  %v1550_v27 = vmul.f32 1.442695, %v1473_v7  ;;  %11023 = vst [vmem:[#allocation65_spill] sm:$0xff] %v7855_v22  ;;  %v1476_v31 = vsub.f32 0.0, %v1412_v11  ;;  %6564 = vpow2.f32 %v1552_v9  ;;  %v1675_v11 = vmul.f32 %v7758_v47, %v1674_v55 }
 0x1fe   : > { %v1554_v46 = vmul.f32 1.442695, %v1475_v2  ;;  %v1478_v7 = vsub.f32 0.0, %v1414_v38  ;;  %v1477_v59 = vsub.f32 0.0, %v1413_v53  ;;  %v1415_v30 = vand.u32 2147483647, %v7846_v36 }
 0x1ff   : > { %v6549_v10 = vpop.eup %6548  ;;  %v7848_v56 = vpop.f32.mrb[16].mxu0  ;;  %6566 = vpow2.f32 %v1550_v27  ;;  %v1416_v35 = vand.u32 2147483647, %v7855_v22  ;;  %v1556_v2 = vmul.f32 1.442695, %v1476_v31  ;;  %v7878_v9 = vadd.f32 %v7771_v63, %v7589_v14  ;;  %11029 = vst [vmem:[#allocation71_spill] sm:$0xff] %v7904_v28 }
 0x200   : > { %v7850_v50 = vpop.eup %6550  ;;  %v7857_v61 = vpop.f32.mrb[16].mxu1  ;;  %v1654_v48 = vmul.f32 0.6931472, %v6549_v10  ;;  %v7882_v53 = vadd.f32 %v7773_v62, %v7592_v15  ;;  %v7886_v38 = vadd.f32 %v7778_v4, %v7599_v18  ;;  %6568 = vpow2.f32 %v1554_v46 }
 0x201   : > { %11022 = vst [vmem:[#allocation64_spill] sm:$0xff] %v7850_v50  ;;  %v6553_v49 = vpop.eup %6552  ;;  %v7862_v29 = vpop.f32.mrb[17].mxu0  ;;  %11024 = vst [vmem:[#allocation66_spill] sm:$0xff] %v7878_v9  ;;  %v1560_v31 = vmul.f32 1.442695, %v1478_v7  ;;  %v7896_v63 = vadd.f32 %v7784_v57, %v7586_v13  ;;  %v1479_v62 = vsub.f32 0.0, %v1415_v30  ;;  %6570 = vpow2.f32 %v1556_v2 }
 0x202   : > { %v7864_v50 = vpop.f32.mrb[17].mxu1  ;;  %v1672_v39 = vmul.f32 0.6931472, %v6553_v49  ;;  %11025 = vst [vmem:[#allocation67_spill] sm:$0xff] %v7882_v53  ;;  %11026 = vst [vmem:[#allocation68_spill] sm:$0xff] %v7886_v38  ;;  %v7890_v55 = vpop.eup %6554  ;;  %v1660_v27 = vsel %vm7823_vm0, %v1657_v40, %v1654_v48  ;;  %v1480_v48 = vsub.f32 0.0, %v1416_v35 }
 0x203   : > { %v7868_v37 = vpop.f32.mrb[18].mxu0  ;;  %11027 = vst [vmem:[#allocation69_spill] sm:$0xff] %v7896_v63  ;;  %v7898_v49 = vpop.eup %6556  ;;  %v1418_v45 = vand.u32 2147483647, %v7878_v9  ;;  %v1417_v4 = vand.u32 2147483647, %v7882_v53  ;;  %6572 = vpow2.f32 %v1560_v31 }
 0x204   : > { %v7872_v10 = vpop.f32.mrb[18].mxu1  ;;  %v7874_v6 = vpop.f32.mrb[19].mxu0  ;;  %11028 = vst [vmem:[#allocation70_spill] sm:$0xff] %v7898_v49  ;;  %v1678_v58 = vsel %vm7839_vm1, %v1675_v11, %v1672_v39  ;;  %v1558_v40 = vmul.f32 1.442695, %v1477_v59  ;;  %v11030_v30 = vmax.f32 %v7614_v26, 0.0  ;;  %v7926_v39 = vadd.f32 %v7794_v0, %v7592_v15 }
 0x205   : > { %v7888_v47 = vpop.f32.mrb[19].mxu1  ;;  %v7911_v7 = vpop.eup %6558  ;;  %v1482_v49 = vsub.f32 0.0, %v1418_v45  ;;  %v1419_v8 = vand.u32 2147483647, %v7886_v38  ;;  %v1420_v35 = vand.u32 2147483647, %v7896_v63  ;;  %v7942_v0 = vadd.f32 %v7802_v51, %v7599_v18 }
 0x206   : > { %v7915_v60 = vadd.f32 %v1660_v27, %v11030_v30  ;;  %v7920_v44 = vpop.eup %6560  ;;  %11032 = vst [vmem:[#allocation73_spill] sm:$0xff] %v7926_v39  ;;  %v11033_v45 = vmax.f32 %v7623_v32, 0.0  ;;  %v1562_v27 = vmul.f32 1.442695, %v1479_v62  ;;  %v1481_v30 = vsub.f32 0.0, %v1417_v4 }
 0x207   : > { %v7909_v57 = vpop.f32.mrb[20].mxu0  ;;  %11031 = vst [vmem:[#allocation72_spill] sm:$0xff] %v7920_v44  ;;  %v1422_v31 = vand.u32 2147483647, %v7904_v28  ;;  %v7937_v46 = vpop.eup %6562  ;;  %6574 = vpow2.f32 %v1558_v40  ;;  %v1564_v59 = vmul.f32 1.442695, %v1480_v48  ;;  %v7950_v62 = vadd.f32 %v7819_v41, %v7586_v13 }
 0x208   : > { %v7918_v52 = vpop.f32.mrb[20].mxu1  ;;  %v7928_v26 = vpop.f32.mrb[21].mxu0  ;;  %v7934_v2 = vadd.f32 %v1678_v58, %v11033_v45  ;;  %11035 = vst [vmem:[#allocation75_spill] sm:$0xff] %v7937_v46  ;;  %11036 = vst [vmem:[#allocation76_spill] sm:$0xff] %v7942_v0  ;;  %v1568_v32 = vmul.f32 1.442695, %v1482_v49  ;;  %v7954_v4 = vadd.f32 %v7829_v42, %v7589_v14  ;;  %6576 = vpow2.f32 %v1562_v27 }
 0x209   : > { %v7930_v11 = vpop.f32.mrb[21].mxu1  ;;  %v7946_v22 = vpop.eup %6564  ;;  %v1483_v58 = vsub.f32 0.0, %v1419_v8  ;;  %11038 = vst [vmem:[#allocation78_spill] sm:$0xff] %v7950_v62  ;;  %v1484_v49 = vsub.f32 0.0, %v1420_v35  ;;  %v1421_v8 = vand.u32 2147483647, %v7926_v39  ;;  %6578 = vpow2.f32 %v1564_v59 }
 0x20a   : > { %11034 = vst [vmem:[#allocation74_spill] sm:$0xff] %v7934_v2  ;;  %11037 = vst [vmem:[#allocation77_spill] sm:$0xff] %v7946_v22  ;;  %v7960_v51 = vpop.eup %6566  ;;  %v1566_v41 = vmul.f32 1.442695, %v1481_v30  ;;  %v1486_v2 = vsub.f32 0.0, %v1422_v31  ;;  %6580 = vpow2.f32 %v1568_v32  ;;  %v7980_v30 = vadd.f32 %v7831_v5, %v7592_v15 }
 0x20b   : > { %v7944_v44 = vpop.f32.mrb[22].mxu0  ;;  %11039 = vst [vmem:[#allocation79_spill] sm:$0xff] %v7954_v4  ;;  %11040 = vst [vmem:[#allocation80_spill] sm:$0xff] %v7960_v51  ;;  %v1423_v42 = vand.u32 2147483647, %v7942_v0  ;;  %v7970_v1 = vpop.eup %6568  ;;  %v1485_v46 = vsub.f32 0.0, %v1421_v8  ;;  %v7988_v45 = vadd.f32 %v7837_v54, %v7599_v18  ;;  %v7992_v32 = vadd.f32 %v7848_v56, %v7586_v13 }
 0x20c   : > { %v7956_v40 = vpop.f32.mrb[22].mxu1  ;;  %v7958_v48 = vpop.f32.mrb[23].mxu0  ;;  %11041 = vst [vmem:[#allocation81_spill] sm:$0xff] %v7970_v1  ;;  %v1424_v35 = vand.u32 2147483647, %v7950_v62  ;;  %11042 = vst [vmem:[#allocation82_spill] sm:$0xff] %v7980_v30  ;;  %6582 = vpow2.f32 %v1566_v41  ;;  %v8005_v56 = vadd.f32 %v7857_v61, %v7589_v14 }
 0x20d   : > { %v7965_v9 = vpop.f32.mrb[23].mxu1  ;;  %v1570_v38 = vmul.f32 1.442695, %v1483_v58  ;;  %v1426_v27 = vand.u32 2147483647, %v7954_v4  ;;  %11043 = vst [vmem:[#allocation83_spill] sm:$0xff] %v7988_v45  ;;  %v7994_v58 = vpop.eup %6570 }
 0x20e   : > { %v1572_v59 = vmul.f32 1.442695, %v1484_v49  ;;  %11044 = vst [vmem:[#allocation84_spill] sm:$0xff] %v7992_v32  ;;  %11045 = vst [vmem:[#allocation85_spill] sm:$0xff] %v7994_v58  ;;  %v1576_v28 = vmul.f32 1.442695, %v1486_v2  ;;  %v7999_v51 = vpop.eup %6572  ;;  %v8016_v49 = vadd.f32 %v7862_v29, %v7592_v15 }
 0x20f   : > { %v7968_v22 = vpop.f32.mrb[24].mxu0  ;;  %v1487_v63 = vsub.f32 0.0, %v1423_v42  ;;  %11046 = vst [vmem:[#allocation86_spill] sm:$0xff] %v7999_v51  ;;  %v1488_v8 = vsub.f32 0.0, %v1424_v35  ;;  %v1425_v54 = vand.u32 2147483647, %v7980_v30  ;;  %6584 = vpow2.f32 %v1570_v38 }
 0x210   : > { %v7975_v36 = vpop.f32.mrb[24].mxu1  ;;  %v7982_v31 = vpop.f32.mrb[25].mxu0  ;;  %11047 = vst [vmem:[#allocation87_spill] sm:$0xff] %v8005_v56  ;;  %v1490_v58 = vsub.f32 0.0, %v1426_v27  ;;  %v1427_v2 = vand.u32 2147483647, %v7988_v45  ;;  %6586 = vpow2.f32 %v1572_v59  ;;  %v8060_v45 = vadd.f32 %v7874_v6, %v7592_v15 }
 0x211   : > { %v7984_v1 = vpop.f32.mrb[25].mxu1  ;;  %v1428_v41 = vand.u32 2147483647, %v7992_v32  ;;  %v8011_v5 = vpop.eup %6574  ;;  %v1574_v51 = vmul.f32 1.442695, %v1485_v46  ;;  %v1489_v39 = vsub.f32 0.0, %v1425_v54  ;;  %6588 = vpow2.f32 %v1576_v28 }
 0x212   : > { %11049 = vst [vmem:[#allocation89_spill] sm:$0xff] %v8011_v5  ;;  %v1578_v27 = vmul.f32 1.442695, %v1487_v63  ;;  %v1580_v46 = vmul.f32 1.442695, %v1488_v8  ;;  %v1491_v35 = vsub.f32 0.0, %v1427_v2  ;;  %v8030_v62 = vpop.eup %6576  ;;  %v8035_v54 = vadd.f32 %v7868_v37, %v7586_v13 }
 0x213   : > { %v7997_v53 = vpop.f32.mrb[26].mxu0  ;;  %v1430_v29 = vand.u32 2147483647, %v8005_v56  ;;  %11052 = vst [vmem:[#allocation92_spill] sm:$0xff] %v8030_v62  ;;  %v1584_v5 = vmul.f32 1.442695, %v1490_v58  ;;  %6590 = vpow2.f32 %v1574_v51 }
 0x214   : > { %v8009_v42 = vpop.f32.mrb[26].mxu1  ;;  %v8018_v61 = vpop.f32.mrb[27].mxu0  ;;  %v1429_v63 = vand.u32 2147483647, %v8016_v49  ;;  %11053 = vst [vmem:[#allocation93_spill] sm:$0xff] %v8035_v54  ;;  %6592 = vpow2.f32 %v1578_v27 }
 0x215   : > { %11048 = vst [vmem:[#allocation88_spill] sm:$0xff] %v8009_v42  ;;  %11050 = vst [vmem:[#allocation90_spill] sm:$0xff] %v8018_v61  ;;  %v8020_v38 = vpop.f32.mrb[27].mxu1  ;;  %v8025_v42 = vadd.f32 %v7864_v50, %v7599_v18  ;;  %v1492_v61 = vsub.f32 0.0, %v1428_v41  ;;  %v8039_v50 = vpop.eup %6578  ;;  %v1582_v62 = vmul.f32 1.442695, %v1489_v39  ;;  %6594 = vpow2.f32 %v1580_v46 }
 0x216   : > { %11055 = vst [vmem:[#allocation95_spill] sm:$0xff] %v8039_v50  ;;  %v8047_v41 = vpop.eup %6580  ;;  %v1432_v37 = vand.u32 2147483647, %v8035_v54  ;;  %v1586_v8 = vmul.f32 1.442695, %v1491_v35  ;;  %v1494_v2 = vsub.f32 0.0, %v1430_v29  ;;  %6596 = vpow2.f32 %v1584_v5 }
 0x217   : > { %11051 = vst [vmem:[#allocation91_spill] sm:$0xff] %v8025_v42  ;;  %v8027_v59 = vpop.f32.mrb[28].mxu0  ;;  %v1431_v4 = vand.u32 2147483647, %v8025_v42  ;;  %11056 = vst [vmem:[#allocation96_spill] sm:$0xff] %v8047_v41  ;;  %v8066_v51 = vpop.eup %6582  ;;  %v1493_v32 = vsub.f32 0.0, %v1429_v63  ;;  %6598 = vpow2.f32 %v1582_v62 }
 0x218   : > { %v8037_v0 = vpop.f32.mrb[28].mxu1  ;;  %v8045_v58 = vpop.f32.mrb[29].mxu0  ;;  %v1496_v29 = vsub.f32 0.0, %v1432_v37  ;;  %6600 = vpow2.f32 %v1586_v8  ;;  %v1592_v63 = vmul.f32 1.442695, %v1494_v2  ;;  %v1664_v8 = vmul.f32 -0.5, %v7804_v34 }
 0x219   : > { %11054 = vst [vmem:[#allocation94_spill] sm:$0xff] %v8037_v0  ;;  %v8052_v0 = vadd.f32 %v7872_v10, %v7589_v14  ;;  %v8054_v50 = vpop.f32.mrb[29].mxu1  ;;  %v1588_v10 = vmul.f32 1.442695, %v1492_v61  ;;  %v1495_v27 = vsub.f32 0.0, %v1431_v4  ;;  %v8072_v6 = vpop.eup %6584  ;;  %v1661_v61 = vadd.f32 1.0, %v7804_v34 }
 0x21a   : > { %11058 = vst [vmem:[#allocation98_spill] sm:$0xff] %v8054_v50  ;;  %11063 = vst [vmem:[#allocation103_spill] sm:$0xff] %v8072_v6  ;;  %v8080_v46 = vpop.eup %6586  ;;  %v1590_v4 = vmul.f32 1.442695, %v1493_v32  ;;  %v8091_v2 = vadd.f32 %v7909_v57, %v7586_v13  ;;  %v1665_v62 = vadd.f32 1.0, %v1664_v8  ;;  %v1700_v5 = vmul.f32 -0.5, %v7833_v12 }
 0x21b   : > { %11057 = vst [vmem:[#allocation97_spill] sm:$0xff] %v8052_v0  ;;  %v8056_v28 = vpop.f32.mrb[30].mxu0  ;;  %v1434_v30 = vand.u32 2147483647, %v8052_v0  ;;  %6602 = vpow2.f32 %v1588_v10  ;;  %v8085_v56 = vpop.eup %6588  ;;  %v1594_v6 = vmul.f32 1.442695, %v1495_v27  ;;  %v8099_v10 = vadd.f32 %v7928_v26, %v7592_v15 }
 0x21c   : > { %11059 = vst [vmem:[#allocation99_spill] sm:$0xff] %v8056_v28  ;;  %v8062_v41 = vpop.f32.mrb[30].mxu1  ;;  %v8064_v39 = vpop.f32.mrb[31].mxu0  ;;  %11065 = vst [vmem:[#allocation105_spill] sm:$0xff] %v8085_v56  ;;  %6604 = vlog2.f32 %v1661_v61  ;;  %v8103_v27 = vadd.f32 %v7930_v11, %v7599_v18  ;;  %v11145_v56 = vld [vmem:[#allocation49_spill] sm:$0xff] }
 0x21d   : > { %11060 = vst [vmem:[#allocation100_spill] sm:$0xff] %v8062_v41  ;;  %11061 = vst [vmem:[#allocation101_spill] sm:$0xff] %v8064_v39  ;;  %v8069_v50 = vpop.f32.mrb[31].mxu1  ;;  %v1433_v41 = vand.u32 2147483647, %v8060_v45  ;;  %v8077_v39 = vadd.f32 %v7888_v47, %v7599_v18  ;;  %v1498_v35 = vsub.f32 0.0, %v1434_v30  ;;  %v8095_v30 = vadd.f32 %v7918_v52, %v7589_v14 }
 0x21e   : > { %11062 = vst [vmem:[#allocation102_spill] sm:$0xff] %v8069_v50  ;;  %v1596_v47 = vmul.f32 1.442695, %v1496_v29  ;;  %11066 = vst [vmem:[#allocation106_spill] sm:$0xff] %v8091_v2  ;;  %6606 = vpow2.f32 %v1592_v63  ;;  %v1667_v29 = vand.u32 2147483647, %v7804_v34 }
 0x21f   : > { %11064 = vst [vmem:[#allocation104_spill] sm:$0xff] %v8077_v39  ;;  %v1435_v50 = vand.u32 2147483647, %v8077_v39  ;;  %v1497_v28 = vsub.f32 0.0, %v1433_v41  ;;  %11067 = vst [vmem:[#allocation107_spill] sm:$0xff] %v8095_v30  ;;  %v8105_v41 = vpop.eup %6590  ;;  %6608 = vpow2.f32 %v1590_v4  ;;  %v1697_v4 = vadd.f32 1.0, %v7833_v12 }
 0x220   : > { %v1600_v32 = vmul.f32 1.442695, %v1498_v35  ;;  %11068 = vst [vmem:[#allocation108_spill] sm:$0xff] %v8103_v27  ;;  %v1436_v52 = vand.u32 2147483647, %v8091_v2  ;;  %v8110_v61 = vpop.eup %6592  ;;  %6610 = vpow2.f32 %v1594_v6  ;;  %v1701_v2 = vadd.f32 1.0, %v1700_v5 }
 0x221   : > { %11069 = vst [vmem:[#allocation109_spill] sm:$0xff] %v8110_v61  ;;  %v1499_v35 = vsub.f32 0.0, %v1435_v50  ;;  %v1438_v26 = vand.u32 2147483647, %v8095_v30  ;;  %v1437_v63 = vand.u32 2147483647, %v8099_v10  ;;  %v8114_v37 = vpop.eup %6594  ;;  %6612 = vpow2.f32 %v1596_v47 }
 0x222   : > { %v1598_v11 = vmul.f32 1.442695, %v1497_v28  ;;  %v8117_v57 = vpop.eup %6596  ;;  %6614 = vpow2.f32 %v1600_v32  ;;  %v1500_v0 = vsub.f32 0.0, %v1436_v52  ;;  %v1439_v6 = vand.u32 2147483647, %v8103_v27  ;;  %v2458_v30 = vld [vmem:[#allocation7 + $0x530] sm:$0xff] }
 0x223   : > { %11070 = vst [vmem:[#allocation110_spill] sm:$0xff] %v8117_v57  ;;  %v8121_v50 = vpop.eup %6598  ;;  %vm8124_vm2 = vcmp.lt.f32.partialorder %v1667_v29, 0.0004427343  ;;  %6616 = vlog2.f32 %v1697_v4  ;;  %v8130_v28 = vadd.f32 %v7944_v44, %v7586_v13  ;;  %v1602_v8 = vmul.f32 1.442695, %v1499_v35 }
 0x224   : > { %v8132_v47 = vpop.eup %6600  ;;  %v1502_v32 = vsub.f32 0.0, %v1438_v26  ;;  %v1501_v52 = vsub.f32 0.0, %v1437_v63  ;;  %6618 = vpow2.f32 %v1598_v11  ;;  %v1666_v29 = vmul.f32 %v7804_v34, %v1665_v62 }
 0x225   : > { %11073 = vst [vmem:[#allocation111_spill] sm:$0xff] %v8132_v47  ;;  %v8135_v57 = vpop.eup %6602  ;;  %v8141_v4 = vadd.f32 %v7956_v40, %v7589_v14  ;;  %v1604_v39 = vmul.f32 1.442695, %v1500_v0  ;;  %v1503_v35 = vsub.f32 0.0, %v1439_v6  ;;  %v1703_v26 = vand.u32 2147483647, %v7833_v12 }
 0x226   : > { %v6605_v44 = vpop.eup %6604  ;;  %v1440_v11 = vand.u32 2147483647, %v8130_v28  ;;  %v1688_v34 = vadd.f32 1.0, %v7816_v43  ;;  %6620 = vpow2.f32 %v1602_v8  ;;  %v1608_v42 = vmul.f32 1.442695, %v1502_v32 }
 0x227   : > { %11074 = vst [vmem:[#allocation112_spill] sm:$0xff] %v8141_v4  ;;  %v1663_v63 = vmul.f32 0.6931472, %v6605_v44  ;;  %v1606_v40 = vmul.f32 1.442695, %v1501_v52  ;;  %v8157_v44 = vadd.f32 %v7958_v48, %v7592_v15  ;;  %v11077_v61 = vmax.f32 %v7626_v33, 0.0 }
 0x228   : > { %v8148_v62 = vpop.eup %6606  ;;  %v1442_v6 = vand.u32 2147483647, %v8141_v4  ;;  %6622 = vlog2.f32 %v1688_v34  ;;  %v1610_v32 = vmul.f32 1.442695, %v1503_v35  ;;  %vm8166_vm3 = vcmp.lt.f32.partialorder %v1703_v26, 0.0004427343 }
 0x229   : > { %11075 = vst [vmem:[#allocation113_spill] sm:$0xff] %v8148_v62  ;;  %v8150_v54 = vpop.eup %6608  ;;  %v1669_v0 = vsel %vm8124_vm2, %v1666_v29, %v1663_v63  ;;  %6624 = vpow2.f32 %v1604_v39  ;;  %v1504_v29 = vsub.f32 0.0, %v1440_v11  ;;  %v1441_v63 = vand.u32 2147483647, %v8157_v44 }
 0x22a   : > { %v8159_v47 = vpop.eup %6610  ;;  %v2229_v8 = vadd.f32 %v1669_v0, %v11077_v61  ;;  %v8173_v48 = vadd.f32 %v7965_v9, %v7599_v18  ;;  %6626 = vpow2.f32 %v1608_v42  ;;  %v1691_v39 = vmul.f32 -0.5, %v7816_v43 }
 0x22b   : > { %11076 = vst [vmem:[#allocation114_spill] sm:$0xff] %v8159_v47  ;;  %v8164_v52 = vpop.eup %6612  ;;  %v1733_v61 = vadd.f32 1.0, %v7911_v7  ;;  %6628 = vpow2.f32 %v1606_v40  ;;  %v1702_v9 = vmul.f32 %v7833_v12, %v1701_v2  ;;  %v1506_v26 = vsub.f32 0.0, %v1442_v6 }
 0x22c   : > { %11080 = vst [vmem:[#allocation115_spill] sm:$0xff] %v8173_v48  ;;  %v8175_v34 = vpop.eup %6614  ;;  %2633 = vmatprep.mubr.f32.mxu0 %v2229_v8  ;;  %2955 = vmatprep.mubr.f32.mxu1 %v2229_v8  ;;  %v1694_v11 = vand.u32 2147483647, %v7816_v43  ;;  %v11082_v42 = vpack.c.bf16 %v7596_v17, %v7594_v16  ;;  %v11083_v0 = vpack.c.bf16 %v7603_v20, %v7601_v19  ;;  %v1612_v12 = vmul.f32 1.442695, %v1504_v29 }
 0x22d   : > { %11081 = vst [vmem:[#allocation116_spill] sm:$0xff] %v8175_v34  ;;  %v6617_v35 = vpop.eup %6616  ;;  %2634 = vmatmul.mubr.f32.vlgmr.msra.gmra.mrb[32].mxu0 %v7915_v60  ;;  %2956 = vmatmul.mubr.f32.vlgmr.msra.gmra.mrb[32].mxu1 %v7915_v60  ;;  %6630 = vlog2.f32 %v1733_v61  ;;  %v1736_v60 = vmul.f32 -0.5, %v7911_v7  ;;  %v11084_v2 = vpack.c.bf16 %v7607_v23, %v7605_v21  ;;  %v11085_v16 = vpack.c.bf16 %v7611_v25, %v7609_v24 }
 0x22e   : > { %5624 = vmatpush1.bf16.msra.mxu0 %v11082_v42  ;;  %5752 = vmatpush1.bf16.msra.mxu1 %v11083_v0  ;;  %v1699_v8 = vmul.f32 0.6931472, %v6617_v35  ;;  %v8192_v40 = vpop.eup %6618  ;;  %v1505_v17 = vsub.f32 0.0, %v1441_v63  ;;  %v1443_v19 = vand.u32 2147483647, %v8173_v48  ;;  %v8203_v20 = vadd.f32 %v7968_v22, %v7586_v13  ;;  %v11092_v35 = vld [vmem:[#allocation20_spill] sm:$0xff] }
 0x22f   : > { %5626 = vmatprep.subr.bf16.mxu0 %v11084_v2  ;;  %5754 = vmatprep.subr.bf16.mxu1 %v11085_v16  ;;  %v1692_v61 = vadd.f32 1.0, %v1691_v39  ;;  %v8209_v29 = vadd.f32 %v7975_v36, %v7589_v14  ;;  %v1724_v21 = vadd.f32 1.0, %v7890_v55  ;;  %6632 = vpow2.f32 %v1610_v32  ;;  %v11091_v39 = vld [vmem:[#allocation21_spill] sm:$0xff]  ;;  %v11094_v36 = vld [vmem:[#allocation23_spill] sm:$0xff]  ;;  %v11095_v42 = vld [vmem:[#allocation22_spill] sm:$0xff] }
 0x230   : > { %v1705_v6 = vsel %vm8166_vm3, %v1702_v9, %v1699_v8  ;;  %v11087_v23 = vmax.f32 %v7678_v3, 0.0  ;;  %v1616_v25 = vmul.f32 1.442695, %v1506_v26  ;;  %vm8214_vm4 = vcmp.lt.f32.partialorder %v1694_v11, 0.0004427343  ;;  %v8218_v22 = vpop.eup %6620  ;;  %v11111_v63 = vld [vmem:[#allocation35_spill] sm:$0xff] }
 0x231   : > { %11086 = vst [vmem:[#allocation117_spill] sm:$0xff] %v8209_v29  ;;  %11090 = vst [vmem:[#allocation118_spill] sm:$0xff] %v8218_v22  ;;  %v11093_v9 = vpack.c.bf16 %v11091_v39, %v11092_v35  ;;  %v11096_v0 = vpack.c.bf16 %v11094_v36, %v11095_v42  ;;  %v1737_v32 = vadd.f32 1.0, %v1736_v60  ;;  %v1444_v3 = vand.u32 2147483647, %v8203_v20  ;;  %v11098_v35 = vld [vmem:[#allocation24_spill] sm:$0xff] }
 0x232   : > { %v2233_v24 = vadd.f32 %v1705_v6, %v11087_v23  ;;  %6634 = vlog2.f32 %v1724_v21  ;;  %v6623_v26 = vpop.eup %6622  ;;  %v1614_v11 = vmul.f32 1.442695, %v1505_v17  ;;  %v1507_v8 = vsub.f32 0.0, %v1443_v19  ;;  %v11097_v21 = vld [vmem:[#allocation25_spill] sm:$0xff]  ;;  %v11100_v17 = vld [vmem:[#allocation28_spill] sm:$0xff]  ;;  %v11101_v19 = vld [vmem:[#allocation27_spill] sm:$0xff] }
 0x233   : > { %5628 = vmatpush1.bf16.msra.mxu0 %v11093_v9  ;;  %5756 = vmatpush1.bf16.msra.mxu1 %v11096_v0  ;;  %v1739_v2 = vand.u32 2147483647, %v7911_v7  ;;  %v8231_v16 = vadd.f32 %v7982_v31, %v7592_v15  ;;  %v8233_v6 = vpop.eup %6624  ;;  %6636 = vpow2.f32 %v1612_v12  ;;  %v1690_v23 = vmul.f32 0.6931472, %v6623_v26  ;;  %v11125_v31 = vld [vmem:[#allocation43_spill] sm:$0xff]  ;;  %v2480_v22 = vld [vmem:[#allocation7 + $0x5e0] sm:$0xff] }
 0x234   : > { %2639 = vmatprep.mubr.f32.mxu0 %v2233_v24  ;;  %2961 = vmatprep.mubr.f32.mxu1 %v2233_v24  ;;  %v1693_v60 = vmul.f32 %v7816_v43, %v1692_v61  ;;  %v1446_v39 = vand.u32 2147483647, %v8209_v29  ;;  %v11099_v9 = vpack.c.bf16 %v11097_v21, %v11098_v35  ;;  %v11102_v24 = vpack.c.bf16 %v11100_v17, %v11101_v19  ;;  %v8245_v12 = vpop.eup %6626  ;;  %v11105_v21 = vld [vmem:[#allocation30_spill] sm:$0xff] }
 0x235   : > { %6638 = vpow2.f32 %v1616_v25  ;;  %v1508_v36 = vsub.f32 0.0, %v1444_v3  ;;  %v1727_v42 = vmul.f32 -0.5, %v7890_v55  ;;  %11103 = vst [vmem:[#allocation21_spill] sm:$0xff] %v8245_v12  ;;  %v1738_v61 = vmul.f32 %v7911_v7, %v1737_v32  ;;  %v11106_v25 = vld [vmem:[#allocation29_spill] sm:$0xff]  ;;  %v11108_v3 = vld [vmem:[#allocation32_spill] sm:$0xff]  ;;  %v8261_v19 = vpop.eup %6628 }
 0x236   : > { %5630 = vmatprep.subr.bf16.mxu0 %v11099_v9  ;;  %5758 = vmatprep.subr.bf16.mxu1 %v11102_v24  ;;  %v1696_v43 = vsel %vm8214_vm4, %v1693_v60, %v1690_v23  ;;  %v1445_v0 = vand.u32 2147483647, %v8231_v16  ;;  %v8253_v26 = vadd.f32 %v7984_v1, %v7599_v18  ;;  %v11107_v35 = vpack.c.bf16 %v11105_v21, %v11106_v25  ;;  %v11109_v9 = vld [vmem:[#allocation31_spill] sm:$0xff]  ;;  %v11115_v1 = vld [vmem:[#allocation34_spill] sm:$0xff]  ;;  %v11116_v24 = vld [vmem:[#allocation33_spill] sm:$0xff] }
 0x237   : > { %v11110_v17 = vpack.c.bf16 %v11108_v3, %v11109_v9  ;;  %v11112_v23 = vmax.f32 %v11111_v63, 0.0  ;;  %6640 = vpow2.f32 %v1614_v11  ;;  %v1618_v7 = vmul.f32 1.442695, %v1507_v8  ;;  %v11118_v21 = vld [vmem:[#allocation39_spill] sm:$0xff]  ;;  %v11119_v25 = vld [vmem:[#allocation37_spill] sm:$0xff]  ;;  %v6631_v3 = vpop.eup %6630  ;;  %v11121_v11 = vld [vmem:[#allocation80_spill] sm:$0xff] }
 0x238   : > { %11104 = vst [vmem:[#allocation20_spill] sm:$0xff] %v8253_v26  ;;  %5632 = vmatpush1.bf16.msra.mxu0 %v11107_v35  ;;  %vm8265_vm5 = vcmp.lt.f32.partialorder %v1739_v2, 0.0004427343  ;;  %v11117_v5 = vpack.c.bf16 %v11115_v1, %v11116_v24  ;;  %v11120_v35 = vpack.c.bf16 %v11118_v21, %v11119_v25  ;;  %v1769_v8 = vadd.f32 1.0, %v11121_v11  ;;  %v11123_v25 = vld [vmem:[#allocation40_spill] sm:$0xff]  ;;  %v11126_v9 = vld [vmem:[#allocation42_spill] sm:$0xff] }
 0x239   : > { %5760 = vmatpush1.bf16.msra.mxu1 %v11110_v17  ;;  %v2232_v60 = vadd.f32 %v1696_v43, %v11112_v23  ;;  %v1510_v17 = vsub.f32 0.0, %v1446_v39  ;;  %v1730_v43 = vand.u32 2147483647, %v7890_v55  ;;  %v1735_v2 = vmul.f32 0.6931472, %v6631_v3  ;;  %v11122_v39 = vld [vmem:[#allocation41_spill] sm:$0xff] }
 0x23a   : > { %5634 = vmatprep.subr.bf16.mxu0 %v11117_v5  ;;  %5762 = vmatprep.subr.bf16.mxu1 %v11120_v35  ;;  %v1620_v63 = vmul.f32 1.442695, %v1508_v36  ;;  %v1728_v1 = vadd.f32 1.0, %v1727_v42  ;;  %v1509_v5 = vsub.f32 0.0, %v1445_v0  ;;  %v1447_v24 = vand.u32 2147483647, %v8253_v26  ;;  %v8290_v36 = vpop.eup %6632 }
 0x23b   : > { %2640 = vmatmul.mubr.f32.gmra.mrb[34].mxu0 %v2232_v60  ;;  %2962 = vmatmul.mubr.f32.gmra.mrb[34].mxu1 %v2232_v60  ;;  %6642 = vlog2.f32 %v1769_v8  ;;  %v8282_v21 = vadd.f32 %v7997_v53, %v7586_v13  ;;  %v11124_v35 = vpack.c.bf16 %v11122_v39, %v11123_v25  ;;  %v11127_v60 = vpack.c.bf16 %v11125_v31, %v11126_v9  ;;  %v11129_v3 = vld [vmem:[#allocation88_spill] sm:$0xff]  ;;  %v11131_v8 = vld [vmem:[#allocation45_spill] sm:$0xff]  ;;  %v11134_v25 = vld [vmem:[#allocation47_spill] sm:$0xff] }
 0x23c   : > { %11128 = vst [vmem:[#allocation23_spill] sm:$0xff] %v8290_v36  ;;  %6644 = vpow2.f32 %v1618_v7  ;;  %v1741_v42 = vsel %vm8265_vm5, %v1738_v61, %v1735_v2  ;;  %v1772_v0 = vmul.f32 -0.5, %v11121_v11  ;;  %v8297_v53 = vadd.f32 %v11129_v3, %v7589_v14  ;;  %v11132_v23 = vld [vmem:[#allocation44_spill] sm:$0xff]  ;;  %v6635_v9 = vpop.eup %6634 }
 0x23d   : > { %5636 = vmatpush1.bf16.msra.mxu0 %v11124_v35  ;;  %5764 = vmatpush1.bf16.msra.mxu1 %v11127_v60  ;;  %v11133_v39 = vpack.c.bf16 %v11131_v8, %v11132_v23  ;;  %v11135_v35 = vld [vmem:[#allocation46_spill] sm:$0xff]  ;;  %v11137_v60 = vld [vmem:[#allocation52_spill] sm:$0xff]  ;;  %v1624_v32 = vmul.f32 1.442695, %v1510_v17  ;;  %vm8307_vm6 = vcmp.lt.f32.partialorder %v1730_v43, 0.0004427343  ;;  %6646 = vpow2.f32 %v1620_v63 }
 0x23e   : > { %11130 = vst [vmem:[#allocation22_spill] sm:$0xff] %v8297_v53  ;;  %v11136_v31 = vpack.c.bf16 %v11134_v25, %v11135_v35  ;;  %v11138_v7 = vmax.f32 %v11137_v60, 0.0  ;;  %v1448_v2 = vand.u32 2147483647, %v8282_v21  ;;  %v1726_v3 = vmul.f32 0.6931472, %v6635_v9 }
 0x23f   : > { %5638 = vmatprep.subr.bf16.mxu0 %v11133_v39  ;;  %v1729_v23 = vmul.f32 %v7890_v55, %v1728_v1  ;;  %v1775_v8 = vand.u32 2147483647, %v11121_v11  ;;  %v8314_v39 = vpop.eup %6636  ;;  %v1622_v25 = vmul.f32 1.442695, %v1509_v5  ;;  %v1511_v35 = vsub.f32 0.0, %v1447_v24  ;;  %v11141_v43 = vld [vmem:[#allocation75_spill] sm:$0xff] }
 0x240   : > { %5766 = vmatprep.subr.bf16.mxu1 %v11136_v31  ;;  %v2237_v33 = vadd.f32 %v1741_v42, %v11138_v7  ;;  %v1450_v17 = vand.u32 2147483647, %v8297_v53  ;;  %v1760_v42 = vadd.f32 1.0, %v11141_v43  ;;  %v8318_v31 = vpop.eup %6638  ;;  %v1773_v9 = vadd.f32 1.0, %v1772_v0  ;;  %v11143_v55 = vld [vmem:[#allocation90_spill] sm:$0xff]  ;;  %v11144_v7 = vld [vmem:[#allocation51_spill] sm:$0xff] }
 0x241   : > { %11142 = vst [vmem:[#allocation25_spill] sm:$0xff] %v8318_v31  ;;  %v1732_v63 = vsel %vm8307_vm6, %v1729_v23, %v1726_v3  ;;  %v1512_v60 = vsub.f32 0.0, %v1448_v2  ;;  %v8324_v1 = vadd.f32 %v11143_v55, %v7592_v15  ;;  %v11147_v5 = vld [vmem:[#allocation48_spill] sm:$0xff]  ;;  %v1763_v4 = vmul.f32 -0.5, %v11141_v43  ;;  %v8336_v0 = vpop.eup %6640  ;;  %v2454_v53 = vld [vmem:[#allocation7 + $0x510] sm:$0xff] }
 0x242   : > { %2645 = vmatprep.mubr.f32.mxu0 %v2237_v33  ;;  %2967 = vmatprep.mubr.f32.mxu1 %v2237_v33  ;;  %v11146_v33 = vpack.c.bf16 %v11144_v7, %v11145_v56  ;;  %v11148_v24 = vmax.f32 %v11147_v5, 0.0  ;;  %6648 = vlog2.f32 %v1760_v42  ;;  %v8334_v61 = vadd.f32 %v8020_v38, %v7599_v18  ;;  %v11152_v7 = vld [vmem:[#allocation89_spill] sm:$0xff] }
 0x243   : > { %6650 = vpow2.f32 %v1624_v32  ;;  %vm8340_vm7 = vcmp.lt.f32.partialorder %v1775_v8, 0.0004427343  ;;  %v1626_v23 = vmul.f32 1.442695, %v1511_v35  ;;  %v1514_v42 = vsub.f32 0.0, %v1450_v17 }
 0x244   : > { %5640 = vmatpush1.bf16.msra.mxu0 %v11146_v33  ;;  %v2236_v29 = vadd.f32 %v1732_v63, %v11148_v24  ;;  %11149 = vst [vmem:[#allocation24_spill] sm:$0xff] %v8334_v61  ;;  %6652 = vpow2.f32 %v1622_v25  ;;  %v1449_v63 = vand.u32 2147483647, %v8324_v1  ;;  %v1774_v38 = vmul.f32 %v11121_v11, %v1773_v9 }
 0x245   : > { %v1628_v55 = vmul.f32 1.442695, %v1512_v60  ;;  %v1766_v32 = vand.u32 2147483647, %v11141_v43  ;;  %v1805_v33 = vadd.f32 1.0, %v11152_v7  ;;  %v6643_v5 = vpop.eup %6642  ;;  %v1764_v24 = vadd.f32 1.0, %v1763_v4 }
 0x246   : > { %2646 = vmatmul.mubr.f32.gmra.mrb[36].mxu0 %v2236_v29  ;;  %2968 = vmatmul.mubr.f32.gmra.mrb[36].mxu1 %v2236_v29  ;;  %v1451_v8 = vand.u32 2147483647, %v8334_v61  ;;  %v8351_v3 = vadd.f32 %v8027_v59, %v7586_v13  ;;  %v11153_v29 = vld [vmem:[#allocation94_spill] sm:$0xff]  ;;  %v8357_v35 = vpop.eup %6644  ;;  %v1771_v11 = vmul.f32 0.6931472, %v6643_v5  ;;  %v1513_v17 = vsub.f32 0.0, %v1449_v63 }
 0x247   : > { %v8355_v25 = vadd.f32 %v11153_v29, %v7589_v14  ;;  %11155 = vst [vmem:[#allocation27_spill] sm:$0xff] %v8357_v35  ;;  %6654 = vlog2.f32 %v1805_v33  ;;  %v1808_v9 = vmul.f32 -0.5, %v11152_v7  ;;  %v1632_v2 = vmul.f32 1.442695, %v1514_v42  ;;  %v8362_v26 = vpop.eup %6646  ;;  %v11158_v5 = vld [vmem:[#allocation56_spill] sm:$0xff]  ;;  %v11160_v42 = vld [vmem:[#allocation85_spill] sm:$0xff] }
 0x248   : > { %6656 = vpow2.f32 %v1626_v23  ;;  %v1777_v59 = vsel %vm8340_vm7, %v1774_v38, %v1771_v11  ;;  %vm8366_vm8 = vcmp.lt.f32.partialorder %v1766_v32, 0.0004427343  ;;  %v1452_v63 = vand.u32 2147483647, %v8351_v3  ;;  %v11166_v29 = vld [vmem:[#allocation99_spill] sm:$0xff] }
 0x249   : > { %11154 = vst [vmem:[#allocation28_spill] sm:$0xff] %v8355_v25  ;;  %v1454_v33 = vand.u32 2147483647, %v8355_v25  ;;  %v11159_v23 = vmax.f32 %v11158_v5, 0.0  ;;  %6658 = vpow2.f32 %v1628_v55  ;;  %v1796_v4 = vadd.f32 1.0, %v11160_v42 }
 0x24a   : > { %v1765_v56 = vmul.f32 %v11141_v43, %v1764_v24  ;;  %v1630_v38 = vmul.f32 1.442695, %v1513_v17  ;;  %v1515_v32 = vsub.f32 0.0, %v1451_v8  ;;  %v1809_v11 = vadd.f32 1.0, %v1808_v9 }
 0x24b   : > { %v2241_v48 = vadd.f32 %v1777_v59, %v11159_v23  ;;  %6660 = vlog2.f32 %v1796_v4  ;;  %v1799_v25 = vmul.f32 -0.5, %v11160_v42  ;;  %v8380_v55 = vadd.f32 %v8045_v58, %v7592_v15  ;;  %v11161_v59 = vld [vmem:[#allocation98_spill] sm:$0xff] }
 0x24c   : > { %v6649_v27 = vpop.eup %6648  ;;  %v8384_v5 = vadd.f32 %v11161_v59, %v7599_v18  ;;  %v1516_v24 = vsub.f32 0.0, %v1452_v63  ;;  %v1518_v8 = vsub.f32 0.0, %v1454_v33  ;;  %v5767_v17 = vpack.c.bf16 %v2458_v30, %v2454_v53  ;;  %v11164_v63 = vld [vmem:[#allocation54_spill] sm:$0xff] }
 0x24d   : > { %2651 = vmatprep.mubr.f32.mxu0 %v2241_v48  ;;  %2973 = vmatprep.mubr.f32.mxu1 %v2241_v48  ;;  %v8386_v23 = vpop.eup %6650  ;;  %v1762_v43 = vmul.f32 0.6931472, %v6649_v27  ;;  %6662 = vpow2.f32 %v1632_v2  ;;  %v1811_v4 = vand.u32 2147483647, %v11152_v7  ;;  %v1453_v58 = vand.u32 2147483647, %v8380_v55 }
 0x24e   : > { %11162 = vst [vmem:[#allocation30_spill] sm:$0xff] %v8384_v5  ;;  %11163 = vst [vmem:[#allocation29_spill] sm:$0xff] %v8386_v23  ;;  %v8388_v9 = vpop.eup %6652  ;;  %v1634_v59 = vmul.f32 1.442695, %v1515_v32  ;;  %v1810_v31 = vmul.f32 %v11152_v7, %v1809_v11  ;;  %v1455_v27 = vand.u32 2147483647, %v8384_v5  ;;  %5768 = vmatpush1.bf16.msra.mxu1 %v5767_v17  ;;  %6664 = vpow2.f32 %v1630_v38 }
 0x24f   : > { %v1768_v60 = vsel %vm8366_vm8, %v1765_v56, %v1762_v43  ;;  %v11165_v30 = vmax.f32 %v11164_v63, 0.0  ;;  %v1800_v2 = vadd.f32 1.0, %v1799_v25  ;;  %v1841_v33 = vadd.f32 1.0, %v8066_v51  ;;  %v11168_v25 = vld [vmem:[#allocation100_spill] sm:$0xff] }
 0x250   : > { %v1636_v61 = vmul.f32 1.442695, %v1516_v24  ;;  %v1640_v23 = vmul.f32 1.442695, %v1518_v8  ;;  %v1802_v35 = vand.u32 2147483647, %v11160_v42  ;;  %v8403_v56 = vadd.f32 %v11166_v29, %v7586_v13 }
 0x251   : > { %v2240_v53 = vadd.f32 %v1768_v60, %v11165_v30  ;;  %v6655_v48 = vpop.eup %6654  ;;  %v1517_v11 = vsub.f32 0.0, %v1453_v58  ;;  %6666 = vlog2.f32 %v1841_v33  ;;  %v8409_v60 = vadd.f32 %v11168_v25, %v7589_v14  ;;  %v2461_v24 = vld [vmem:[#allocation7 + $0x548] sm:$0xff]  ;;  %v2463_v30 = vld [vmem:[#allocation7 + $0x558] sm:$0xff] }
 0x252   : > { %v8405_v7 = vpop.eup %6656  ;;  %v1807_v32 = vmul.f32 0.6931472, %v6655_v48  ;;  %6668 = vpow2.f32 %v1634_v59  ;;  %vm1812_vm9 = vcmp.lt.f32.partialorder %v1811_v4, 0.0004427343  ;;  %v1519_v43 = vsub.f32 0.0, %v1455_v27  ;;  %v2465_v58 = vld [vmem:[#allocation7 + $0x568] sm:$0xff] }
 0x253   : > { %11167 = vst [vmem:[#allocation32_spill] sm:$0xff] %v8405_v7  ;;  %2652 = vmatmul.mubr.f32.gmra.mrb[38].mxu0 %v2240_v53  ;;  %2974 = vmatmul.mubr.f32.gmra.mrb[38].mxu1 %v2240_v53  ;;  %11169 = vst [vmem:[#allocation31_spill] sm:$0xff] %v8409_v60  ;;  %v8412_v8 = vpop.eup %6658  ;;  %v1801_v17 = vmul.f32 %v11160_v42, %v1800_v2  ;;  %v1844_v63 = vmul.f32 -0.5, %v8066_v51  ;;  %v1456_v48 = vand.u32 2147483647, %v8403_v56  ;;  %v2467_v53 = vld [vmem:[#allocation7 + $0x578] sm:$0xff]  ;;  %6670 = vpow2.f32 %v1636_v61 }
 0x254   : > { %v1813_v13 = vsel %vm1812_vm9, %v1810_v31, %v1807_v32  ;;  %v11170_v14 = vld [vmem:[#allocation61_spill] sm:$0xff]  ;;  %vm8419_vm10 = vcmp.lt.f32.partialorder %v1802_v35, 0.0004427343  ;;  %v1847_v27 = vand.u32 2147483647, %v8066_v51  ;;  %6672 = vpow2.f32 %v1640_v23  ;;  %v11174_v29 = vld [vmem:[#allocation95_spill] sm:$0xff] }
 0x255   : > { %v11171_v33 = vmax.f32 %v11170_v14, 0.0  ;;  %v6661_v31 = vpop.eup %6660  ;;  %v1638_v42 = vmul.f32 1.442695, %v1517_v11  ;;  %v1458_v2 = vand.u32 2147483647, %v8409_v60  ;;  %v1832_v32 = vadd.f32 1.0, %v11174_v29 }
 0x256   : > { %v1798_v25 = vmul.f32 0.6931472, %v6661_v31  ;;  %v1642_v38 = vmul.f32 1.442695, %v1519_v43  ;;  %v5641_v14 = vpack.c.bf16 %v2465_v58, %v2461_v24  ;;  %v2460_v61 = vld [vmem:[#allocation7 + $0x540] sm:$0xff]  ;;  %v1845_v7 = vadd.f32 1.0, %v1844_v63 }
 0x257   : > { %v2245_v59 = vadd.f32 %v1813_v13, %v11171_v33  ;;  %v5769_v13 = vpack.c.bf16 %v2467_v53, %v2463_v30  ;;  %v2464_v35 = vld [vmem:[#allocation7 + $0x560] sm:$0xff]  ;;  %v8426_v33 = vpop.eup %6662  ;;  %v1520_v12 = vsub.f32 0.0, %v1456_v48  ;;  %6674 = vlog2.f32 %v1832_v32  ;;  %v11176_v43 = vld [vmem:[#allocation101_spill] sm:$0xff]  ;;  %v11177_v58 = vld [vmem:[#allocation102_spill] sm:$0xff] }
 0x258   : > { %11175 = vst [vmem:[#allocation35_spill] sm:$0xff] %v8426_v33  ;;  %v1804_v23 = vsel %vm8419_vm10, %v1801_v17, %v1798_v25  ;;  %v1835_v11 = vmul.f32 -0.5, %v11174_v29  ;;  %5642 = vmatprep.subr.bf16.mxu0 %v5641_v14  ;;  %v8434_v24 = vadd.f32 %v11176_v43, %v7592_v15  ;;  %v8438_v30 = vadd.f32 %v11177_v58, %v7599_v18  ;;  %v2462_v53 = vld [vmem:[#allocation7 + $0x550] sm:$0xff]  ;;  %v8440_v63 = vpop.eup %6664 }
 0x259   : > { %2657 = vmatprep.mubr.f32.mxu0 %v2245_v59  ;;  %2979 = vmatprep.mubr.f32.mxu1 %v2245_v59  ;;  %v2466_v59 = vld [vmem:[#allocation7 + $0x570] sm:$0xff]  ;;  %6676 = vpow2.f32 %v1638_v42  ;;  %v1522_v17 = vsub.f32 0.0, %v1458_v2  ;;  %v5643_v32 = vpack.c.bf16 %v2464_v35, %v2460_v61  ;;  %vm8444_vm11 = vcmp.lt.f32.partialorder %v1847_v27, 0.0004427343  ;;  %v2469_v2 = vld [vmem:[#allocation7 + $0x588] sm:$0xff]  ;;  %v2471_v27 = vld [vmem:[#allocation7 + $0x598] sm:$0xff] }
 0x25a   : > { %5770 = vmatprep.subr.bf16.mxu1 %v5769_v13  ;;  %11178 = vst [vmem:[#allocation34_spill] sm:$0xff] %v8438_v30  ;;  %v11179_v48 = vld [vmem:[#allocation58_spill] sm:$0xff]  ;;  %6678 = vpow2.f32 %v1642_v38  ;;  %v1838_v15 = vand.u32 2147483647, %v11174_v29  ;;  %v1457_v18 = vand.u32 2147483647, %v8434_v24  ;;  %v1846_v13 = vmul.f32 %v8066_v51, %v1845_v7 }
 0x25b   : > { %v11180_v31 = vmax.f32 %v11179_v48, 0.0  ;;  %v6667_v14 = vpop.eup %6666  ;;  %v1459_v43 = vand.u32 2147483647, %v8438_v30  ;;  %v1877_v42 = vadd.f32 1.0, %v8105_v41  ;;  %v2473_v38 = vld [vmem:[#allocation7 + $0x5a8] sm:$0xff]  ;;  %v1836_v48 = vadd.f32 1.0, %v1835_v11  ;;  %5644 = vmatpush1.bf16.msra.mxu0 %v5643_v32 }
 0x25c   : > { %v8453_v61 = vpop.eup %6668  ;;  %v1843_v35 = vmul.f32 0.6931472, %v6667_v14  ;;  %v1644_v58 = vmul.f32 1.442695, %v1520_v12  ;;  %v1648_v5 = vmul.f32 1.442695, %v1522_v17 }
 0x25d   : > { %v2244_v4 = vadd.f32 %v1804_v23, %v11180_v31  ;;  %v5771_v23 = vpack.c.bf16 %v2466_v59, %v2462_v53  ;;  %11183 = vst [vmem:[#allocation33_spill] sm:$0xff] %v8453_v61  ;;  %v1868_v31 = vadd.f32 1.0, %v8080_v46  ;;  %6680 = vlog2.f32 %v1877_v42  ;;  %v2475_v7 = vld [vmem:[#allocation7 + $0x5b8] sm:$0xff]  ;;  %v2468_v53 = vld [vmem:[#allocation7 + $0x580] sm:$0xff]  ;;  %v8458_v59 = vpop.eup %6670  ;;  %v2470_v14 = vld [vmem:[#allocation7 + $0x590] sm:$0xff] }
 0x25e   : > { %v1880_v51 = vmul.f32 -0.5, %v8105_v41  ;;  %v1849_v60 = vsel %vm8444_vm11, %v1846_v13, %v1843_v35  ;;  %vm8462_vm12 = vcmp.lt.f32.partialorder %v1838_v15, 0.0004427343  ;;  %v1521_v11 = vsub.f32 0.0, %v1457_v18  ;;  %v2472_v32 = vld [vmem:[#allocation7 + $0x5a0] sm:$0xff]  ;;  %v2474_v17 = vld [vmem:[#allocation7 + $0x5b0] sm:$0xff] }
 0x25f   : > { %2658 = vmatmul.mubr.f32.gmra.mrb[40].mxu0 %v2244_v4  ;;  %2980 = vmatmul.mubr.f32.gmra.mrb[40].mxu1 %v2244_v4  ;;  %6682 = vlog2.f32 %v1868_v31  ;;  %v11187_v42 = vld [vmem:[#allocation67_spill] sm:$0xff]  ;;  %v1523_v33 = vsub.f32 0.0, %v1459_v43  ;;  %v1883_v61 = vand.u32 2147483647, %v8105_v41  ;;  %v1871_v25 = vmul.f32 -0.5, %v8080_v46  ;;  %v2477_v18 = vld [vmem:[#allocation7 + $0x5c8] sm:$0xff] }
 0x260   : > { %5772 = vmatpush1.bf16.msra.mxu1 %v5771_v23  ;;  %v8466_v23 = vpop.eup %6672  ;;  %v11188_v4 = vmax.f32 %v11187_v42, 0.0  ;;  %6684 = vpow2.f32 %v1644_v58  ;;  %v1837_v15 = vmul.f32 %v11174_v29, %v1836_v48  ;;  %v5645_v13 = vpack.c.bf16 %v2473_v38, %v2469_v2  ;;  %v2481_v31 = vld [vmem:[#allocation7 + $0x5e8] sm:$0xff]  ;;  %v2483_v43 = vld [vmem:[#allocation7 + $0x5f8] sm:$0xff] }
 0x261   : > { %11186 = vst [vmem:[#allocation39_spill] sm:$0xff] %v8466_v23  ;;  %v5773_v35 = vpack.c.bf16 %v2475_v7, %v2471_v27  ;;  %v6675_v36 = vpop.eup %6674  ;;  %6686 = vpow2.f32 %v1648_v5  ;;  %v1881_v23 = vadd.f32 1.0, %v1880_v51  ;;  %v5647_v34 = vpack.c.bf16 %v2472_v32, %v2468_v53  ;;  %v2482_v53 = vld [vmem:[#allocation7 + $0x5f0] sm:$0xff]  ;;  %v2497_v58 = vld [vmem:[#allocation7 + $0x668] sm:$0xff] }
 0x262   : > { %v2249_v30 = vadd.f32 %v1849_v60, %v11188_v4  ;;  %v5775_v42 = vpack.c.bf16 %v2474_v17, %v2470_v14  ;;  %v2479_v60 = vld [vmem:[#allocation7 + $0x5d8] sm:$0xff]  ;;  %v2476_v4 = vld [vmem:[#allocation7 + $0x5c0] sm:$0xff]  ;;  %v1834_v62 = vmul.f32 0.6931472, %v6675_v36  ;;  %v1646_v47 = vmul.f32 1.442695, %v1521_v11  ;;  %5646 = vmatprep.subr.bf16.mxu0 %v5645_v13 }
 0x263   : > { %5774 = vmatprep.subr.bf16.mxu1 %v5773_v35  ;;  %v1913_v29 = vadd.f32 1.0, %v8121_v50  ;;  %v8475_v2 = vpop.eup %6676  ;;  %v8477_v38 = vmul.f32 1.442695, %v1523_v33  ;;  %vm8479_vm13 = vcmp.lt.f32.partialorder %v1883_v61, 0.0004427343  ;;  %5648 = vmatpush1.bf16.msra.mxu0 %v5647_v34  ;;  %v1904_v36 = vadd.f32 1.0, %v8114_v37 }
 0x264   : > { %2663 = vmatprep.mubr.f32.mxu0 %v2249_v30  ;;  %2985 = vmatprep.mubr.f32.mxu1 %v2249_v30  ;;  %v1872_v30 = vadd.f32 1.0, %v1871_v25  ;;  %v8484_v27 = vpop.eup %6678  ;;  %v1840_v48 = vsel %vm8462_vm12, %v1837_v15, %v1834_v62  ;;  %v1874_v51 = vand.u32 2147483647, %v8080_v46  ;;  %v5649_v7 = vpack.c.bf16 %v2481_v31, %v2477_v18  ;;  %v2478_v33 = vld [vmem:[#allocation7 + $0x5d0] sm:$0xff]  ;;  %v11191_v61 = vld [vmem:[#allocation65_spill] sm:$0xff]  ;;  %v2487_v31 = vld [vmem:[#allocation7 + $0x618] sm:$0xff] }
 0x265   : > { %5776 = vmatpush1.bf16.msra.mxu1 %v5775_v42  ;;  %6688 = vlog2.f32 %v1913_v29  ;;  %v11192_v11 = vmax.f32 %v11191_v61, 0.0  ;;  %v1882_v14 = vmul.f32 %v8105_v41, %v1881_v23  ;;  %v1916_v34 = vmul.f32 -0.5, %v8121_v50  ;;  %v2485_v41 = vld [vmem:[#allocation7 + $0x608] sm:$0xff]  ;;  %v2491_v42 = vld [vmem:[#allocation7 + $0x638] sm:$0xff]  ;;  %v2486_v61 = vld [vmem:[#allocation7 + $0x610] sm:$0xff] }
 0x266   : > { %6690 = vlog2.f32 %v1904_v36  ;;  %v1919_v17 = vand.u32 2147483647, %v8121_v50  ;;  %v1907_v25 = vmul.f32 -0.5, %v8114_v37  ;;  %5650 = vmatprep.subr.bf16.mxu0 %v5649_v7  ;;  %v5777_v62 = vpack.c.bf16 %v2483_v43, %v2479_v60  ;;  %v2489_v23 = vld [vmem:[#allocation7 + $0x628] sm:$0xff] }
 0x267   : > { %v2248_v32 = vadd.f32 %v1840_v48, %v11192_v11  ;;  %v5651_v12 = vpack.c.bf16 %v2480_v22, %v2476_v4  ;;  %v6681_v15 = vpop.eup %6680  ;;  %6692 = vpow2.f32 %v1646_v47  ;;  %v1873_v13 = vmul.f32 %v8080_v46, %v1872_v30  ;;  %v2484_v4 = vld [vmem:[#allocation7 + $0x600] sm:$0xff]  ;;  %v2490_v11 = vld [vmem:[#allocation7 + $0x630] sm:$0xff]  ;;  %v2495_v48 = vld [vmem:[#allocation7 + $0x658] sm:$0xff] }
 0x268   : > { %v5779_v35 = vpack.c.bf16 %v2482_v53, %v2478_v33  ;;  %v1949_v18 = vadd.f32 1.0, %v8150_v54  ;;  %v1879_v36 = vmul.f32 0.6931472, %v6681_v15  ;;  %vm8497_vm14 = vcmp.lt.f32.partialorder %v1874_v51, 0.0004427343  ;;  %5778 = vmatprep.subr.bf16.mxu1 %v5777_v62  ;;  %v2488_v53 = vld [vmem:[#allocation7 + $0x620] sm:$0xff] }
 0x269   : > { %2664 = vmatmul.mubr.f32.gmra.mrb[42].mxu0 %v2248_v32  ;;  %2986 = vmatmul.mubr.f32.gmra.mrb[42].mxu1 %v2248_v32  ;;  %v6683_v29 = vpop.eup %6682  ;;  %v1952_v22 = vmul.f32 -0.5, %v8150_v54  ;;  %v1940_v47 = vadd.f32 1.0, %v8135_v57  ;;  %v1917_v60 = vadd.f32 1.0, %v1916_v34  ;;  %v1910_v43 = vand.u32 2147483647, %v8114_v37  ;;  %v11197_v34 = vld [vmem:[#allocation73_spill] sm:$0xff] }
 0x26a   : > { %5652 = vmatpush1.bf16.msra.mxu0 %v5651_v12  ;;  %v1870_v46 = vmul.f32 0.6931472, %v6683_v29  ;;  %5780 = vmatpush1.bf16.msra.mxu1 %v5779_v35  ;;  %6694 = vlog2.f32 %v1949_v18  ;;  %v8504_v30 = vpop.eup %6684  ;;  %v1885_v51 = vsel %vm8479_vm13, %v1882_v14, %v1879_v36  ;;  %vm8508_vm15 = vcmp.lt.f32.partialorder %v1919_v17, 0.0004427343  ;;  %v11199_v17 = vld [vmem:[#allocation69_spill] sm:$0xff] }
 0x26b   : > { %v1908_v33 = vadd.f32 1.0, %v1907_v25  ;;  %6696 = vlog2.f32 %v1940_v47  ;;  %v8512_v32 = vpop.eup %6686  ;;  %v11198_v62 = vmax.f32 %v11197_v34, 0.0  ;;  %v1955_v5 = vand.u32 2147483647, %v8150_v54  ;;  %v2493_v47 = vld [vmem:[#allocation7 + $0x648] sm:$0xff] }
 0x26c   : > { %v1876_v15 = vsel %vm8497_vm14, %v1873_v13, %v1870_v46  ;;  %v1943_v14 = vmul.f32 -0.5, %v8135_v57  ;;  %v11200_v35 = vmax.f32 %v11199_v17, 0.0  ;;  %v1953_v25 = vadd.f32 1.0, %v1952_v22 }
 0x26d   : > { %v2253_v12 = vadd.f32 %v1885_v51, %v11198_v62  ;;  %v5653_v29 = vpack.c.bf16 %v2489_v23, %v2485_v41  ;;  %v5781_v36 = vpack.c.bf16 %v2491_v42, %v2487_v31  ;;  %v1918_v34 = vmul.f32 %v8121_v50, %v1917_v60  ;;  %v2499_v31 = vld [vmem:[#allocation7 + $0x678] sm:$0xff] }
 0x26e   : > { %v2252_v18 = vadd.f32 %v1876_v15, %v11200_v35  ;;  %v5655_v51 = vpack.c.bf16 %v2488_v53, %v2484_v4  ;;  %v5783_v62 = vpack.c.bf16 %v2490_v11, %v2486_v61  ;;  %v1985_v13 = vadd.f32 1.0, %v8192_v40  ;;  %v2494_v11 = vld [vmem:[#allocation7 + $0x650] sm:$0xff] }
 0x26f   : > { %2669 = vmatprep.mubr.f32.mxu0 %v2253_v12  ;;  %2991 = vmatprep.mubr.f32.mxu1 %v2253_v12  ;;  %v6689_v46 = vpop.eup %6688  ;;  %v1909_v17 = vmul.f32 %v8114_v37, %v1908_v33  ;;  %vm8525_vm0 = vcmp.lt.f32.partialorder %v1910_v43, 0.0004427343  ;;  %v1946_v41 = vand.u32 2147483647, %v8135_v57  ;;  %v1976_v23 = vadd.f32 1.0, %v8164_v52  ;;  %v2492_v37 = vld [vmem:[#allocation7 + $0x640] sm:$0xff] }
 0x270   : > { %2670 = vmatmul.mubr.f32.gmra.mrb[44].mxu0 %v2252_v18  ;;  %2992 = vmatmul.mubr.f32.gmra.mrb[44].mxu1 %v2252_v18  ;;  %v6691_v50 = vpop.eup %6690  ;;  %v1915_v42 = vmul.f32 0.6931472, %v6689_v46  ;;  %vm8531_vm1 = vcmp.lt.f32.partialorder %v1955_v5, 0.0004427343  ;;  %6698 = vlog2.f32 %v1985_v13  ;;  %v5657_v4 = vpack.c.bf16 %v2497_v58, %v2493_v47  ;;  %v2496_v43 = vld [vmem:[#allocation7 + $0x660] sm:$0xff]  ;;  %v2498_v12 = vld [vmem:[#allocation7 + $0x670] sm:$0xff] }
 0x271   : > { %5654 = vmatprep.subr.bf16.mxu0 %v5653_v29  ;;  %5782 = vmatprep.subr.bf16.mxu1 %v5781_v36  ;;  %v1906_v33 = vmul.f32 0.6931472, %v6691_v50  ;;  %v1954_v53 = vmul.f32 %v8150_v54, %v1953_v25  ;;  %v1944_v61 = vadd.f32 1.0, %v1943_v14  ;;  %6700 = vlog2.f32 %v1976_v23  ;;  %v8536_v15 = vpop.eup %6692  ;;  %v11205_v29 = vld [vmem:[#allocation82_spill] sm:$0xff]  ;;  %v2501_v23 = vld [vmem:[#allocation7 + $0x688] sm:$0xff] }
 0x272   : > { %5656 = vmatpush1.bf16.msra.mxu0 %v5655_v51  ;;  %5784 = vmatpush1.bf16.msra.mxu1 %v5783_v62  ;;  %v1921_v5 = vsel %vm8508_vm15, %v1918_v34, %v1915_v42  ;;  %v1988_v35 = vmul.f32 -0.5, %v8192_v40  ;;  %v1991_v58 = vand.u32 2147483647, %v8192_v40  ;;  %v5785_v18 = vpack.c.bf16 %v2499_v31, %v2495_v48  ;;  %v11207_v62 = vld [vmem:[#allocation78_spill] sm:$0xff]  ;;  %v2505_v31 = vld [vmem:[#allocation7 + $0x6a8] sm:$0xff] }
 0x273   : > { %5658 = vmatprep.subr.bf16.mxu0 %v5657_v4  ;;  %v11206_v36 = vmax.f32 %v11205_v29, 0.0  ;;  %v1912_v14 = vsel %vm8525_vm0, %v1909_v17, %v1906_v33  ;;  %v1979_v25 = vmul.f32 -0.5, %v8164_v52  ;;  %v5659_v47 = vpack.c.bf16 %v2496_v43, %v2492_v37  ;;  %v2507_v37 = vld [vmem:[#allocation7 + $0x6b8] sm:$0xff]  ;;  %v2502_v29 = vld [vmem:[#allocation7 + $0x690] sm:$0xff] }
 0x274   : > { %v6695_v51 = vpop.eup %6694  ;;  %v11208_v13 = vmax.f32 %v11207_v62, 0.0  ;;  %vm8549_vm2 = vcmp.lt.f32.partialorder %v1946_v41, 0.0004427343  ;;  %5786 = vmatprep.subr.bf16.mxu1 %v5785_v18  ;;  %v5787_v46 = vpack.c.bf16 %v2498_v12, %v2494_v11  ;;  %v2021_v48 = vadd.f32 1.0, %v8261_v19  ;;  %v2503_v41 = vld [vmem:[#allocation7 + $0x698] sm:$0xff]  ;;  %v2500_v12 = vld [vmem:[#allocation7 + $0x680] sm:$0xff] }
 0x275   : > { %v2257_v54 = vadd.f32 %v1921_v5, %v11206_v36  ;;  %v6697_v50 = vpop.eup %6696  ;;  %v1951_v17 = vmul.f32 0.6931472, %v6695_v51  ;;  %v1945_v22 = vmul.f32 %v8135_v57, %v1944_v61  ;;  %v2024_v42 = vmul.f32 -0.5, %v8261_v19  ;;  %v2504_v61 = vld [vmem:[#allocation7 + $0x6a0] sm:$0xff]  ;;  %v2506_v36 = vld [vmem:[#allocation7 + $0x6b0] sm:$0xff] }
 0x276   : > { %v2256_v7 = vadd.f32 %v1912_v14, %v11208_v13  ;;  %v2012_v4 = vadd.f32 1.0, %v8233_v6  ;;  %v1942_v43 = vmul.f32 0.6931472, %v6697_v50  ;;  %v1989_v33 = vadd.f32 1.0, %v1988_v35  ;;  %5660 = vmatpush1.bf16.msra.mxu0 %v5659_v47  ;;  %5788 = vmatpush1.bf16.msra.mxu1 %v5787_v46  ;;  %v2509_v50 = vld [vmem:[#allocation7 + $0x6c8] sm:$0xff] }
 0x277   : > { %2675 = vmatprep.mubr.f32.mxu0 %v2257_v54  ;;  %2997 = vmatprep.mubr.f32.mxu1 %v2257_v54  ;;  %v1982_v11 = vand.u32 2147483647, %v8164_v52  ;;  %6702 = vlog2.f32 %v2021_v48  ;;  %v1957_v5 = vsel %vm8531_vm1, %v1954_v53, %v1951_v17  ;;  %vm8560_vm3 = vcmp.lt.f32.partialorder %v1991_v58, 0.0004427343  ;;  %v11214_v58 = vld [vmem:[#allocation84_spill] sm:$0xff]  ;;  %v2513_v17 = vld [vmem:[#allocation7 + $0x6e8] sm:$0xff] }
 0x278   : > { %2676 = vmatmul.mubr.f32.gmra.mrb[46].mxu0 %v2256_v7  ;;  %2998 = vmatmul.mubr.f32.gmra.mrb[46].mxu1 %v2256_v7  ;;  %v1980_v57 = vadd.f32 1.0, %v1979_v25  ;;  %6704 = vlog2.f32 %v2012_v4  ;;  %v11213_v35 = vmax.f32 %v8016_v49, 0.0  ;;  %v1948_v14 = vsel %vm8549_vm2, %v1945_v22, %v1942_v43  ;;  %v2511_v22 = vld [vmem:[#allocation7 + $0x6d8] sm:$0xff] }
 0x279   : > { %v2027_v60 = vand.u32 2147483647, %v8261_v19  ;;  %v2015_v53 = vmul.f32 -0.5, %v8233_v6  ;;  %v11215_v51 = vmax.f32 %v11214_v58, 0.0  ;;  %v2025_v25 = vadd.f32 1.0, %v2024_v42  ;;  %v2515_v4 = vld [vmem:[#allocation7 + $0x6f8] sm:$0xff] }
 0x27a   : > { %v2261_v54 = vadd.f32 %v1957_v5, %v11213_v35  ;;  %v5661_v47 = vpack.c.bf16 %v2505_v31, %v2501_v23  ;;  %v5789_v13 = vpack.c.bf16 %v2507_v37, %v2503_v41  ;;  %v6699_v7 = vpop.eup %6698  ;;  %v1990_v46 = vmul.f32 %v8192_v40, %v1989_v33  ;;  %v2508_v42 = vld [vmem:[#allocation7 + $0x6c0] sm:$0xff] }
 0x27b   : > { %v2260_v62 = vadd.f32 %v1948_v14, %v11215_v51  ;;  %v5663_v49 = vpack.c.bf16 %v2504_v61, %v2500_v12  ;;  %v5791_v48 = vpack.c.bf16 %v2506_v36, %v2502_v29  ;;  %v2057_v34 = vadd.f32 1.0, %v8336_v0  ;;  %v6701_v43 = vpop.eup %6700  ;;  %v2510_v61 = vld [vmem:[#allocation7 + $0x6d0] sm:$0xff] }
 0x27c   : > { %2681 = vmatprep.mubr.f32.mxu0 %v2261_v54  ;;  %3003 = vmatprep.mubr.f32.mxu1 %v2261_v54  ;;  %v1987_v5 = vmul.f32 0.6931472, %v6699_v7  ;;  %v1981_v23 = vmul.f32 %v8164_v52, %v1980_v57  ;;  %vm8575_vm4 = vcmp.lt.f32.partialorder %v1982_v11, 0.0004427343  ;;  %v2048_v40 = vadd.f32 1.0, %v8314_v39  ;;  %v2512_v57 = vld [vmem:[#allocation7 + $0x6e0] sm:$0xff] }
 0x27d   : > { %2682 = vmatmul.mubr.f32.gmra.mrb[48].mxu0 %v2260_v62  ;;  %3004 = vmatmul.mubr.f32.gmra.mrb[48].mxu1 %v2260_v62  ;;  %v1978_v41 = vmul.f32 0.6931472, %v6701_v43  ;;  %vm8580_vm5 = vcmp.lt.f32.partialorder %v2027_v60, 0.0004427343  ;;  %v2018_v33 = vand.u32 2147483647, %v8233_v6  ;;  %6706 = vlog2.f32 %v2057_v34 }
 0x27e   : > { %5662 = vmatprep.subr.bf16.mxu0 %v5661_v47  ;;  %5790 = vmatprep.subr.bf16.mxu1 %v5789_v13  ;;  %v1993_v52 = vsel %vm8560_vm3, %v1990_v46, %v1987_v5  ;;  %v2026_v11 = vmul.f32 %v8261_v19, %v2025_v25  ;;  %v2016_v12 = vadd.f32 1.0, %v2015_v53  ;;  %6708 = vlog2.f32 %v2048_v40  ;;  %v2514_v29 = vld [vmem:[#allocation7 + $0x6f0] sm:$0xff]  ;;  %v11221_v60 = vld [vmem:[#allocation93_spill] sm:$0xff]  ;;  %v2523_v43 = vld [vmem:[#allocation7 + $0x738] sm:$0xff] }
 0x27f   : > { %5664 = vmatpush1.bf16.msra.mxu0 %v5663_v49  ;;  %5792 = vmatpush1.bf16.msra.mxu1 %v5791_v48  ;;  %v11220_v36 = vmax.f32 %v8060_v45, 0.0  ;;  %v1984_v54 = vsel %vm8575_vm4, %v1981_v23, %v1978_v41  ;;  %v2060_v14 = vmul.f32 -0.5, %v8336_v0  ;;  %v2063_v18 = vand.u32 2147483647, %v8336_v0  ;;  %v2517_v46 = vld [vmem:[#allocation7 + $0x708] sm:$0xff]  ;;  %v2516_v40 = vld [vmem:[#allocation7 + $0x700] sm:$0xff] }
 0x280   : > { %v11222_v58 = vmax.f32 %v11221_v60, 0.0  ;;  %v2051_v53 = vmul.f32 -0.5, %v8314_v39  ;;  %v5665_v51 = vpack.c.bf16 %v2513_v17, %v2509_v50  ;;  %v5793_v62 = vpack.c.bf16 %v2515_v4, %v2511_v22  ;;  %v2521_v49 = vld [vmem:[#allocation7 + $0x728] sm:$0xff]  ;;  %v2519_v4 = vld [vmem:[#allocation7 + $0x718] sm:$0xff] }
 0x281   : > { %v2265_v35 = vadd.f32 %v1993_v52, %v11220_v36  ;;  %v6703_v25 = vpop.eup %6702  ;;  %vm8597_vm6 = vcmp.lt.f32.partialorder %v2018_v33, 0.0004427343  ;;  %v5667_v47 = vpack.c.bf16 %v2512_v57, %v2508_v42  ;;  %v5795_v13 = vpack.c.bf16 %v2514_v29, %v2510_v61  ;;  %v2520_v33 = vld [vmem:[#allocation7 + $0x720] sm:$0xff]  ;;  %v2518_v52 = vld [vmem:[#allocation7 + $0x710] sm:$0xff]  ;;  %v2527_v45 = vld [vmem:[#allocation7 + $0x758] sm:$0xff] }
 0x282   : > { %v2264_v19 = vadd.f32 %v1984_v54, %v11222_v58  ;;  %v2093_v7 = vadd.f32 1.0, %v8388_v9  ;;  %v6705_v48 = vpop.eup %6704  ;;  %v2023_v34 = vmul.f32 0.6931472, %v6703_v25  ;;  %v2017_v50 = vmul.f32 %v8233_v6, %v2016_v12  ;;  %5666 = vmatprep.subr.bf16.mxu0 %v5665_v51  ;;  %5794 = vmatprep.subr.bf16.mxu1 %v5793_v62  ;;  %v2522_v12 = vld [vmem:[#allocation7 + $0x730] sm:$0xff]  ;;  %v2525_v62 = vld [vmem:[#allocation7 + $0x748] sm:$0xff] }
 0x283   : > { %2687 = vmatprep.mubr.f32.mxu0 %v2265_v35  ;;  %3009 = vmatprep.mubr.f32.mxu1 %v2265_v35  ;;  %v2096_v17 = vmul.f32 -0.5, %v8388_v9  ;;  %v2084_v22 = vadd.f32 1.0, %v8362_v26  ;;  %v2014_v5 = vmul.f32 0.6931472, %v6705_v48  ;;  %v2061_v23 = vadd.f32 1.0, %v2060_v14  ;;  %v11228_v36 = vld [vmem:[#allocation106_spill] sm:$0xff] }
 0x284   : > { %2688 = vmatmul.mubr.f32.gmra.mrb[50].mxu0 %v2264_v19  ;;  %3010 = vmatmul.mubr.f32.gmra.mrb[50].mxu1 %v2264_v19  ;;  %v2054_v31 = vand.u32 2147483647, %v8314_v39  ;;  %6710 = vlog2.f32 %v2093_v7  ;;  %v2029_v42 = vsel %vm8580_vm5, %v2026_v11, %v2023_v34  ;;  %vm8608_vm7 = vcmp.lt.f32.partialorder %v2063_v18, 0.0004427343  ;;  %v2529_v25 = vld [vmem:[#allocation7 + $0x768] sm:$0xff]  ;;  %v2524_v48 = vld [vmem:[#allocation7 + $0x740] sm:$0xff] }
 0x285   : > { %v2052_v6 = vadd.f32 1.0, %v2051_v53  ;;  %5668 = vmatpush1.bf16.msra.mxu0 %v5667_v47  ;;  %5796 = vmatpush1.bf16.msra.mxu1 %v5795_v13  ;;  %6712 = vlog2.f32 %v2084_v22  ;;  %v11227_v57 = vmax.f32 %v8099_v10, 0.0  ;;  %v2020_v29 = vsel %vm8597_vm6, %v2017_v50, %v2014_v5  ;;  %v2531_v47 = vld [vmem:[#allocation7 + $0x778] sm:$0xff]  ;;  %v2526_v5 = vld [vmem:[#allocation7 + $0x750] sm:$0xff] }
 0x286   : > { %v2099_v37 = vand.u32 2147483647, %v8388_v9  ;;  %v2087_v11 = vmul.f32 -0.5, %v8362_v26  ;;  %v11229_v35 = vmax.f32 %v11228_v36, 0.0  ;;  %v2097_v14 = vadd.f32 1.0, %v2096_v17  ;;  %v2533_v36 = vld [vmem:[#allocation7 + $0x788] sm:$0xff] }
 0x287   : > { %v2269_v61 = vadd.f32 %v2029_v42, %v11227_v57  ;;  %v5669_v18 = vpack.c.bf16 %v2521_v49, %v2517_v46  ;;  %v5797_v60 = vpack.c.bf16 %v2523_v43, %v2519_v4  ;;  %v6707_v58 = vpop.eup %6706  ;;  %v2062_v19 = vmul.f32 %v8336_v0, %v2061_v23  ;;  %v2528_v43 = vld [vmem:[#allocation7 + $0x760] sm:$0xff]  ;;  %v2530_v23 = vld [vmem:[#allocation7 + $0x770] sm:$0xff] }
 0x288   : > { %v2268_v54 = vadd.f32 %v2020_v29, %v11229_v35  ;;  %v5671_v10 = vpack.c.bf16 %v2520_v33, %v2516_v40  ;;  %v5799_v53 = vpack.c.bf16 %v2522_v12, %v2518_v52  ;;  %v2129_v51 = vadd.f32 1.0, %v8440_v63  ;;  %v6709_v13 = vpop.eup %6708  ;;  %v2537_v35 = vld [vmem:[#allocation7 + $0x7a8] sm:$0xff] }
 0x289   : > { %2693 = vmatprep.mubr.f32.mxu0 %v2269_v61  ;;  %3015 = vmatprep.mubr.f32.mxu1 %v2269_v61  ;;  %v2059_v7 = vmul.f32 0.6931472, %v6707_v58  ;;  %v2053_v46 = vmul.f32 %v8314_v39, %v2052_v6  ;;  %vm8623_vm8 = vcmp.lt.f32.partialorder %v2054_v31, 0.0004427343  ;;  %v2120_v0 = vadd.f32 1.0, %v8412_v8  ;;  %v2535_v58 = vld [vmem:[#allocation7 + $0x798] sm:$0xff] }
 0x28a   : > { %2694 = vmatmul.mubr.f32.gmra.mrb[52].mxu0 %v2268_v54  ;;  %3016 = vmatmul.mubr.f32.gmra.mrb[52].mxu1 %v2268_v54  ;;  %v2050_v34 = vmul.f32 0.6931472, %v6709_v13  ;;  %vm8628_vm9 = vcmp.lt.f32.partialorder %v2099_v37, 0.0004427343  ;;  %v2090_v17 = vand.u32 2147483647, %v8362_v26  ;;  %6714 = vlog2.f32 %v2129_v51 }
 0x28b   : > { %5670 = vmatprep.subr.bf16.mxu0 %v5669_v18  ;;  %5798 = vmatprep.subr.bf16.mxu1 %v5797_v60  ;;  %v2065_v39 = vsel %vm8608_vm7, %v2062_v19, %v2059_v7  ;;  %v2098_v22 = vmul.f32 %v8388_v9, %v2097_v14  ;;  %v2088_v4 = vadd.f32 1.0, %v2087_v11  ;;  %6716 = vlog2.f32 %v2120_v0  ;;  %v2539_v19 = vld [vmem:[#allocation7 + $0x7b8] sm:$0xff]  ;;  %v2534_v13 = vld [vmem:[#allocation7 + $0x790] sm:$0xff] }
 0x28c   : > { %5672 = vmatpush1.bf16.msra.mxu0 %v5671_v10  ;;  %5800 = vmatpush1.bf16.msra.mxu1 %v5799_v53  ;;  %v11234_v31 = vmax.f32 %v8157_v44, 0.0  ;;  %v2056_v42 = vsel %vm8623_vm8, %v2053_v46, %v2050_v34  ;;  %v2132_v6 = vmul.f32 -0.5, %v8440_v63  ;;  %v2135_v41 = vand.u32 2147483647, %v8440_v63  ;;  %v2538_v7 = vld [vmem:[#allocation7 + $0x7b0] sm:$0xff]  ;;  %v2547_v44 = vld [vmem:[#allocation7 + $0x7f8] sm:$0xff] }
 0x28d   : > { %v11235_v33 = vmax.f32 %v8130_v28, 0.0  ;;  %v2123_v52 = vmul.f32 -0.5, %v8412_v8  ;;  %v5673_v12 = vpack.c.bf16 %v2529_v25, %v2525_v62  ;;  %v5801_v57 = vpack.c.bf16 %v2531_v47, %v2527_v45  ;;  %v2532_v62 = vld [vmem:[#allocation7 + $0x780] sm:$0xff] }
 0x28e   : > { %v2273_v40 = vadd.f32 %v2065_v39, %v11234_v31  ;;  %v6711_v61 = vpop.eup %6710  ;;  %vm8645_vm10 = vcmp.lt.f32.partialorder %v2090_v17, 0.0004427343  ;;  %v5675_v29 = vpack.c.bf16 %v2528_v43, %v2524_v48  ;;  %v5803_v37 = vpack.c.bf16 %v2530_v23, %v2526_v5  ;;  %v2536_v47 = vld [vmem:[#allocation7 + $0x7a0] sm:$0xff] }
 0x28f   : > { %v2272_v9 = vadd.f32 %v2056_v42, %v11235_v33  ;;  %v2165_v11 = vadd.f32 1.0, %v8475_v2  ;;  %v6713_v54 = vpop.eup %6712  ;;  %v2095_v28 = vmul.f32 0.6931472, %v6711_v61  ;;  %v2089_v14 = vmul.f32 %v8362_v26, %v2088_v4  ;;  %5674 = vmatprep.subr.bf16.mxu0 %v5673_v12  ;;  %5802 = vmatprep.subr.bf16.mxu1 %v5801_v57  ;;  %v2541_v33 = vld [vmem:[#allocation7 + $0x7c8] sm:$0xff]  ;;  %v2543_v61 = vld [vmem:[#allocation7 + $0x7d8] sm:$0xff]  ;;  %v11250_v45 = vld [vmem:[#allocation60_spill] sm:$0xff] }
 0x290   : > { %2699 = vmatprep.mubr.f32.mxu0 %v2273_v40  ;;  %3021 = vmatprep.mubr.f32.mxu1 %v2273_v40  ;;  %v2168_v18 = vmul.f32 -0.5, %v8475_v2  ;;  %v2156_v60 = vadd.f32 1.0, %v8458_v59  ;;  %v2086_v10 = vmul.f32 0.6931472, %v6713_v54  ;;  %v2133_v53 = vadd.f32 1.0, %v2132_v6  ;;  %v2545_v57 = vld [vmem:[#allocation7 + $0x7e8] sm:$0xff] }
 0x291   : > { %2700 = vmatmul.mubr.f32.gmra.mrb[54].mxu0 %v2272_v9  ;;  %3022 = vmatmul.mubr.f32.gmra.mrb[54].mxu1 %v2272_v9  ;;  %v2126_v51 = vand.u32 2147483647, %v8412_v8  ;;  %6718 = vlog2.f32 %v2165_v11  ;;  %v2101_v25 = vsel %vm8628_vm9, %v2098_v22, %v2095_v28  ;;  %vm8656_vm11 = vcmp.lt.f32.partialorder %v2135_v41, 0.0004427343  ;;  %v2544_v11 = vld [vmem:[#allocation7 + $0x7e0] sm:$0xff] }
 0x292   : > { %v2124_v26 = vadd.f32 1.0, %v2123_v52  ;;  %5676 = vmatpush1.bf16.msra.mxu0 %v5675_v29  ;;  %5804 = vmatpush1.bf16.msra.mxu1 %v5803_v37  ;;  %6720 = vlog2.f32 %v2156_v60  ;;  %v11240_v46 = vmax.f32 %v8231_v16, 0.0  ;;  %v2092_v0 = vsel %vm8645_vm10, %v2089_v14, %v2086_v10  ;;  %v2546_v60 = vld [vmem:[#allocation7 + $0x7f0] sm:$0xff] }
 0x293   : > { %v2171_v48 = vand.u32 2147483647, %v8475_v2  ;;  %v2159_v34 = vmul.f32 -0.5, %v8458_v59  ;;  %v11241_v50 = vmax.f32 %v8203_v20, 0.0  ;;  %v2169_v39 = vadd.f32 1.0, %v2168_v18  ;;  %v2542_v18 = vld [vmem:[#allocation7 + $0x7d0] sm:$0xff] }
 0x294   : > { %v2277_v49 = vadd.f32 %v2101_v25, %v11240_v46  ;;  %v5677_v22 = vpack.c.bf16 %v2537_v35, %v2533_v36  ;;  %v5805_v4 = vpack.c.bf16 %v2539_v19, %v2535_v58  ;;  %v6715_v43 = vpop.eup %6714  ;;  %v2162_v5 = vand.u32 2147483647, %v8458_v59  ;;  %v11251_v46 = vld [vmem:[#allocation64_spill] sm:$0xff] }
 0x295   : > { %v2276_v17 = vadd.f32 %v2092_v0, %v11241_v50  ;;  %v5679_v16 = vpack.c.bf16 %v2536_v47, %v2532_v62  ;;  %v5807_v23 = vpack.c.bf16 %v2538_v7, %v2534_v13  ;;  %v2201_v31 = vadd.f32 1.0, %v8536_v15  ;;  %v6717_v40 = vpop.eup %6716  ;;  %v11259_v20 = vld [vmem:[#allocation72_spill] sm:$0xff] }
 0x296   : > { %2705 = vmatprep.mubr.f32.mxu0 %v2277_v49  ;;  %3027 = vmatprep.mubr.f32.mxu1 %v2277_v49  ;;  %v2131_v42 = vmul.f32 0.6931472, %v6715_v43  ;;  %v2134_v6 = vmul.f32 %v8440_v63, %v2133_v53  ;;  %vm8671_vm12 = vcmp.lt.f32.partialorder %v2126_v51, 0.0004427343  ;;  %v2192_v41 = vadd.f32 1.0, %v8504_v30  ;;  %v11253_v43 = vld [vmem:[#allocation62_spill] sm:$0xff] }
 0x297   : > { %2706 = vmatmul.mubr.f32.gmra.mrb[56].mxu0 %v2276_v17  ;;  %3028 = vmatmul.mubr.f32.gmra.mrb[56].mxu1 %v2276_v17  ;;  %v2122_v9 = vmul.f32 0.6931472, %v6717_v40  ;;  %v2125_v52 = vmul.f32 %v8412_v8, %v2124_v26  ;;  %v2160_v12 = vadd.f32 1.0, %v2159_v34  ;;  %6722 = vlog2.f32 %v2201_v31  ;;  %v2540_v8 = vld [vmem:[#allocation7 + $0x7c0] sm:$0xff]  ;;  %v11276_v40 = vld [vmem:[#allocation38_spill] sm:$0xff] }
 0x298   : > { %5678 = vmatprep.subr.bf16.mxu0 %v5677_v22  ;;  %5806 = vmatprep.subr.bf16.mxu1 %v5805_v4  ;;  %v2137_v63 = vsel %vm8656_vm11, %v2134_v6, %v2131_v42  ;;  %vm8679_vm13 = vcmp.lt.f32.partialorder %v2171_v48, 0.0004427343  ;;  %v2204_v37 = vmul.f32 -0.5, %v8536_v15  ;;  %6724 = vlog2.f32 %v2192_v41 }
 0x299   : > { %5680 = vmatpush1.bf16.msra.mxu0 %v5679_v16  ;;  %5808 = vmatpush1.bf16.msra.mxu1 %v5807_v23  ;;  %v11246_v36 = vmax.f32 %v8324_v1, 0.0  ;;  %v2128_v54 = vsel %vm8671_vm12, %v2125_v52, %v2122_v9  ;;  %v2170_v28 = vmul.f32 %v8475_v2, %v2169_v39  ;;  %vm8689_vm14 = vcmp.lt.f32.partialorder %v2162_v5, 0.0004427343  ;;  %v11260_v52 = vld [vmem:[#allocation70_spill] sm:$0xff] }
 0x29a   : > { %v11249_v58 = vmax.f32 %v8282_v21, 0.0  ;;  %v2195_v10 = vmul.f32 -0.5, %v8504_v30  ;;  %v5681_v53 = vpack.c.bf16 %v2545_v57, %v2541_v33  ;;  %v5809_v51 = vpack.c.bf16 %v2547_v44, %v2543_v61 }
 0x29b   : > { %v2281_v35 = vadd.f32 %v2137_v63, %v11246_v36  ;;  %v6719_v1 = vpop.eup %6718  ;;  %v2161_v62 = vmul.f32 %v8458_v59, %v2160_v12  ;;  %v2207_v2 = vand.u32 2147483647, %v8536_v15  ;;  %v5683_v25 = vpack.c.bf16 %v2544_v11, %v2540_v8 }
 0x29c   : > { %v2280_v19 = vadd.f32 %v2128_v54, %v11249_v58  ;;  %v1679_v26 = vadd.f32 1.0, %v11250_v45  ;;  %v6721_v47 = vpop.eup %6720  ;;  %v2167_v13 = vmul.f32 0.6931472, %v6719_v1  ;;  %v2205_v21 = vadd.f32 1.0, %v2204_v37  ;;  %5682 = vmatprep.subr.bf16.mxu0 %v5681_v53  ;;  %5810 = vmatprep.subr.bf16.mxu1 %v5809_v51  ;;  %v11268_v51 = vld [vmem:[#allocation77_spill] sm:$0xff] }
 0x29d   : > { %2711 = vmatprep.mubr.f32.mxu0 %v2281_v35  ;;  %3033 = vmatprep.mubr.f32.mxu1 %v2281_v35  ;;  %v5811_v7 = vpack.c.bf16 %v2546_v60, %v2542_v18  ;;  %v1715_v49 = vadd.f32 1.0, %v11251_v46  ;;  %v2158_v0 = vmul.f32 0.6931472, %v6721_v47  ;;  %v2198_v48 = vand.u32 2147483647, %v8504_v30  ;;  %v11265_v60 = vld [vmem:[#allocation81_spill] sm:$0xff] }
 0x29e   : > { %2712 = vmatmul.mubr.f32.gmra.mrb[58].mxu0 %v2280_v19  ;;  %3034 = vmatmul.mubr.f32.gmra.mrb[58].mxu1 %v2280_v19  ;;  %6726 = vlog2.f32 %v1679_v26  ;;  %v1682_v59 = vmul.f32 -0.5, %v11250_v45  ;;  %v2173_v34 = vsel %vm8679_vm13, %v2170_v28, %v2167_v13  ;;  %v2196_v50 = vadd.f32 1.0, %v2195_v10 }
 0x29f   : > { %5684 = vmatpush1.bf16.msra.mxu0 %v5683_v25  ;;  %5812 = vmatpush1.bf16.msra.mxu1 %v5811_v7  ;;  %6728 = vlog2.f32 %v1715_v49  ;;  %v1718_v17 = vmul.f32 -0.5, %v11251_v46  ;;  %v11252_v39 = vmax.f32 %v8380_v55, 0.0  ;;  %v2164_v4 = vsel %vm8689_vm14, %v2161_v62, %v2158_v0 }
 0x2a0   : > { %6730 = vpow2.f32 %v8477_v38  ;;  %v1706_v5 = vadd.f32 1.0, %v11253_v43  ;;  %v11254_v16 = vmax.f32 %v8351_v3, 0.0  ;;  %v2206_v31 = vmul.f32 %v8536_v15, %v2205_v21 }
 0x2a1   : > { %v2285_v22 = vadd.f32 %v2173_v34, %v11252_v39  ;;  %vm8714_vm15 = vcmp.lt.f32.partialorder %v2207_v2, 0.0004427343  ;;  %v1685_v42 = vand.u32 2147483647, %v11250_v45  ;;  %v6723_v38 = vpop.eup %6722  ;;  %vm8719_vm0 = vcmp.lt.f32.partialorder %v2198_v48, 0.0004427343 }
 0x2a2   : > { %v2284_v23 = vadd.f32 %v2164_v4, %v11254_v16  ;;  %v1683_v6 = vadd.f32 1.0, %v1682_v59  ;;  %6732 = vlog2.f32 %v1706_v5  ;;  %v1751_v3 = vadd.f32 1.0, %v11259_v20  ;;  %v6725_v41 = vpop.eup %6724  ;;  %v11271_v48 = vld [vmem:[#allocation26_spill] sm:$0xff]  ;;  %v11273_v39 = vld [vmem:[#allocation92_spill] sm:$0xff] }
 0x2a3   : > { %2717 = vmatprep.mubr.f32.mxu0 %v2285_v22  ;;  %3039 = vmatprep.mubr.f32.mxu1 %v2285_v22  ;;  %v2203_v15 = vmul.f32 0.6931472, %v6723_v38  ;;  %v2197_v33 = vmul.f32 %v8504_v30, %v2196_v50  ;;  %v1719_v9 = vadd.f32 1.0, %v1718_v17  ;;  %v1742_v12 = vadd.f32 1.0, %v11260_v52 }
 0x2a4   : > { %2718 = vmatmul.mubr.f32.gmra.mrb[60].mxu0 %v2284_v23  ;;  %3040 = vmatmul.mubr.f32.gmra.mrb[60].mxu1 %v2284_v23  ;;  %v2194_v57 = vmul.f32 0.6931472, %v6725_v41  ;;  %v1721_v61 = vand.u32 2147483647, %v11251_v46  ;;  %v1709_v44 = vmul.f32 -0.5, %v11253_v43  ;;  %6734 = vlog2.f32 %v1751_v3  ;;  %v11281_v41 = vld [vmem:[#allocation74_spill] sm:$0xff] }
 0x2a5   : > { %v2209_v63 = vsel %vm8714_vm15, %v2206_v31, %v2203_v15  ;;  %vm8730_vm1 = vcmp.lt.f32.partialorder %v1685_v42, 0.0004427343  ;;  %v1754_v37 = vmul.f32 -0.5, %v11259_v20  ;;  %6736 = vlog2.f32 %v1742_v12  ;;  %v11301_v23 = vld [vmem:[#allocation55_spill] sm:$0xff] }
 0x2a6   : > { %v11263_v30 = vmax.f32 %v8434_v24, 0.0  ;;  %v2200_v11 = vsel %vm8719_vm0, %v2197_v33, %v2194_v57  ;;  %v1684_v36 = vmul.f32 %v11250_v45, %v1683_v6  ;;  %v1712_v35 = vand.u32 2147483647, %v11253_v43  ;;  %v11280_v6 = vld [vmem:[#allocation86_spill] sm:$0xff]  ;;  %v11289_v24 = vld [vmem:[#allocation96_spill] sm:$0xff] }
 0x2a7   : > { %v11264_v54 = vmax.f32 %v8403_v56, 0.0  ;;  %v1720_v14 = vmul.f32 %v11251_v46, %v1719_v9  ;;  %v1745_v18 = vmul.f32 -0.5, %v11260_v52  ;;  %v1787_v58 = vadd.f32 1.0, %v11265_v60 }
 0x2a8   : > { %v2289_v8 = vadd.f32 %v2209_v63, %v11263_v30  ;;  %v6727_v19 = vpop.eup %6726  ;;  %vm8746_vm2 = vcmp.lt.f32.partialorder %v1721_v61, 0.0004427343  ;;  %v1710_v10 = vadd.f32 1.0, %v1709_v44  ;;  %v1790_v53 = vmul.f32 -0.5, %v11265_v60  ;;  %v11284_v63 = vld [vmem:[#allocation36_spill] sm:$0xff] }
 0x2a9   : > { %v2288_v28 = vadd.f32 %v2200_v11, %v11264_v54  ;;  %v1778_v1 = vadd.f32 1.0, %v11268_v51  ;;  %v6729_v56 = vpop.eup %6728  ;;  %v1681_v62 = vmul.f32 0.6931472, %v6727_v19  ;;  %v1755_v2 = vadd.f32 1.0, %v1754_v37  ;;  %v11286_v11 = vld [vmem:[#allocation53_spill] sm:$0xff] }
 0x2aa   : > { %2723 = vmatprep.mubr.f32.mxu0 %v2289_v8  ;;  %3045 = vmatprep.mubr.f32.mxu1 %v2289_v8  ;;  %v1757_v25 = vand.u32 2147483647, %v11259_v20  ;;  %6738 = vlog2.f32 %v1787_v58  ;;  %v8753_v45 = vpop.eup %6730  ;;  %v1717_v26 = vmul.f32 0.6931472, %v6729_v56  ;;  %vm8755_vm3 = vcmp.lt.f32.partialorder %v1712_v35, 0.0004427343 }
 0x2ab   : > { %2724 = vmatmul.mubr.f32.gmra.mrb[62].mxu0 %v2288_v28  ;;  %3046 = vmatmul.mubr.f32.gmra.mrb[62].mxu1 %v2288_v28  ;;  %v1748_v13 = vand.u32 2147483647, %v11260_v52  ;;  %6740 = vlog2.f32 %v1778_v1  ;;  %v1687_v21 = vsel %vm8730_vm1, %v1684_v36, %v1681_v62  ;;  %v1746_v7 = vadd.f32 1.0, %v1745_v18  ;;  %v11288_v28 = vld [vmem:[#allocation103_spill] sm:$0xff] }
 0x2ac   : > { %v1793_v46 = vand.u32 2147483647, %v11265_v60  ;;  %v1781_v49 = vmul.f32 -0.5, %v11268_v51  ;;  %v6733_v0 = vpop.eup %6732  ;;  %v11272_v59 = vmax.f32 %v11271_v48, 0.0  ;;  %v1723_v50 = vsel %vm8746_vm2, %v1720_v14, %v1717_v26 }
 0x2ad   : > { %v1791_v17 = vadd.f32 1.0, %v1790_v53  ;;  %v1823_v22 = vadd.f32 1.0, %v11273_v39  ;;  %v1708_v4 = vmul.f32 0.6931472, %v6733_v0  ;;  %v1711_v5 = vmul.f32 %v11253_v43, %v1710_v10  ;;  %v11295_v0 = vld [vmem:[#allocation57_spill] sm:$0xff] }
 0x2ae   : > { %v2231_v34 = vadd.f32 %v1687_v21, %v11272_v59  ;;  %v1756_v16 = vmul.f32 %v11259_v20, %v1755_v2  ;;  %vm8771_vm4 = vcmp.lt.f32.partialorder %v1757_v25, 0.0004427343  ;;  %v6735_v31 = vpop.eup %6734  ;;  %v11277_v42 = vmax.f32 %v11276_v40, 0.0  ;;  %v11290_v2 = vld [vmem:[#allocation50_spill] sm:$0xff] }
 0x2af   : > { %vm8777_vm5 = vcmp.lt.f32.partialorder %v1748_v13, 0.0004427343  ;;  %6742 = vlog2.f32 %v1823_v22  ;;  %v1814_v3 = vadd.f32 1.0, %v11280_v6  ;;  %v6737_v43 = vpop.eup %6736  ;;  %v1714_v20 = vsel %vm8755_vm3, %v1711_v5, %v1708_v4 }
 0x2b0   : > { %2794 = vmatprep.mubr.f32.mxu0 %v2231_v34  ;;  %3116 = vmatprep.mubr.f32.mxu1 %v2231_v34  ;;  %v2235_v38 = vadd.f32 %v1723_v50, %v11277_v42  ;;  %v1753_v15 = vmul.f32 0.6931472, %v6735_v31  ;;  %v1782_v33 = vadd.f32 1.0, %v1781_v49  ;;  %v1826_v9 = vmul.f32 -0.5, %v11273_v39 }
 0x2b1   : > { %2795 = vmatmul.mubr.f32.vlgmr.msra.gmra.mrb[32].mxu0 %v11281_v41  ;;  %3117 = vmatmul.mubr.f32.vlgmr.msra.gmra.mrb[32].mxu1 %v11281_v41  ;;  %v1744_v12 = vmul.f32 0.6931472, %v6737_v43  ;;  %v1747_v57 = vmul.f32 %v11260_v52, %v1746_v7  ;;  %v1792_v61 = vmul.f32 %v11265_v60, %v1791_v17  ;;  %vm8789_vm6 = vcmp.lt.f32.partialorder %v1793_v46, 0.0004427343  ;;  %v11294_v46 = vld [vmem:[#allocation109_spill] sm:$0xff] }
 0x2b2   : > { %2800 = vmatprep.mubr.f32.mxu0 %v2235_v38  ;;  %3122 = vmatprep.mubr.f32.mxu1 %v2235_v38  ;;  %v11285_v29 = vmax.f32 %v11284_v63, 0.0  ;;  %v1759_v30 = vsel %vm8771_vm4, %v1756_v16, %v1753_v15  ;;  %v1784_v8 = vand.u32 2147483647, %v11268_v51  ;;  %6744 = vlog2.f32 %v1814_v3  ;;  %v11303_v38 = vld [vmem:[#allocation105_spill] sm:$0xff] }
 0x2b3   : > { %v11287_v36 = vmax.f32 %v11286_v11, 0.0  ;;  %v1750_v52 = vsel %vm8777_vm5, %v1747_v57, %v1744_v12  ;;  %v1817_v54 = vmul.f32 -0.5, %v11280_v6  ;;  %v1859_v14 = vadd.f32 1.0, %v11288_v28  ;;  %v11311_v11 = vld [vmem:[#allocation110_spill] sm:$0xff] }
 0x2b4   : > { %v2234_v37 = vadd.f32 %v1714_v20, %v11285_v29  ;;  %v6739_v18 = vpop.eup %6738  ;;  %v1783_v60 = vmul.f32 %v11268_v51, %v1782_v33  ;;  %v1827_v58 = vadd.f32 1.0, %v1826_v9  ;;  %v1829_v19 = vand.u32 2147483647, %v11273_v39  ;;  %v11304_v20 = vld [vmem:[#allocation111_spill] sm:$0xff] }
 0x2b5   : > { %v2239_v35 = vadd.f32 %v1759_v30, %v11287_v36  ;;  %v1850_v10 = vadd.f32 1.0, %v11289_v24  ;;  %v6741_v53 = vpop.eup %6740  ;;  %v1789_v1 = vmul.f32 0.6931472, %v6739_v18  ;;  %v1820_v56 = vand.u32 2147483647, %v11280_v6  ;;  %v11312_v18 = vld [vmem:[#allocation114_spill] sm:$0xff] }
 0x2b6   : > { %2801 = vmatmul.mubr.f32.gmra.mrb[34].mxu0 %v2234_v37  ;;  %3123 = vmatmul.mubr.f32.gmra.mrb[34].mxu1 %v2234_v37  ;;  %6746 = vlog2.f32 %v1859_v14  ;;  %v1862_v62 = vmul.f32 -0.5, %v11288_v28  ;;  %v11291_v25 = vmax.f32 %v11290_v2, 0.0  ;;  %v1780_v47 = vmul.f32 0.6931472, %v6741_v53  ;;  %v11332_v30 = vld [vmem:[#allocation71_spill] sm:$0xff] }
 0x2b7   : > { %2806 = vmatprep.mubr.f32.mxu0 %v2239_v35  ;;  %3128 = vmatprep.mubr.f32.mxu1 %v2239_v35  ;;  %vm8811_vm7 = vcmp.lt.f32.partialorder %v1784_v8, 0.0004427343  ;;  %6748 = vlog2.f32 %v1850_v10  ;;  %v1795_v13 = vsel %vm8789_vm6, %v1792_v61, %v1789_v1  ;;  %v1818_v21 = vadd.f32 1.0, %v1817_v54  ;;  %v11307_v61 = vld [vmem:[#allocation63_spill] sm:$0xff] }
 0x2b8   : > { %v2238_v26 = vadd.f32 %v1750_v52, %v11291_v25  ;;  %v1853_v7 = vmul.f32 -0.5, %v11289_v24  ;;  %v1895_v49 = vadd.f32 1.0, %v11294_v46  ;;  %v11296_v48 = vmax.f32 %v11295_v0, 0.0 }
 0x2b9   : > { %v1786_v34 = vsel %vm8811_vm7, %v1783_v60, %v1780_v47  ;;  %v1828_v50 = vmul.f32 %v11273_v39, %v1827_v58  ;;  %v1865_v17 = vand.u32 2147483647, %v11288_v28  ;;  %v6743_v22 = vpop.eup %6742  ;;  %vm8825_vm8 = vcmp.lt.f32.partialorder %v1829_v19, 0.0004427343  ;;  %v11313_v58 = vld [vmem:[#allocation59_spill] sm:$0xff] }
 0x2ba   : > { %2807 = vmatmul.mubr.f32.gmra.mrb[36].mxu0 %v2238_v26  ;;  %3129 = vmatmul.mubr.f32.gmra.mrb[36].mxu1 %v2238_v26  ;;  %v2243_v59 = vadd.f32 %v1795_v13, %v11296_v48  ;;  %vm8829_vm9 = vcmp.lt.f32.partialorder %v1820_v56, 0.0004427343  ;;  %v1863_v16 = vadd.f32 1.0, %v1862_v62  ;;  %6750 = vlog2.f32 %v1895_v49  ;;  %v11317_v13 = vld [vmem:[#allocation68_spill] sm:$0xff]  ;;  %v11319_v48 = vld [vmem:[#allocation113_spill] sm:$0xff] }
 0x2bb   : > { %v11302_v31 = vmax.f32 %v11301_v23, 0.0  ;;  %v1825_v42 = vmul.f32 0.6931472, %v6743_v22  ;;  %v1856_v39 = vand.u32 2147483647, %v11289_v24  ;;  %v1886_v55 = vadd.f32 1.0, %v11303_v38 }
 0x2bc   : > { %2812 = vmatprep.mubr.f32.mxu0 %v2243_v59  ;;  %3134 = vmatprep.mubr.f32.mxu1 %v2243_v59  ;;  %v1819_v3 = vmul.f32 %v11280_v6, %v1818_v21  ;;  %v1854_v43 = vadd.f32 1.0, %v1853_v7  ;;  %v1898_v41 = vmul.f32 -0.5, %v11294_v46  ;;  %v1931_v15 = vadd.f32 1.0, %v11304_v20  ;;  %v6745_v33 = vpop.eup %6744 }
 0x2bd   : > { %v2242_v40 = vadd.f32 %v1786_v34, %v11302_v31  ;;  %v1831_v9 = vsel %vm8825_vm8, %v1828_v50, %v1825_v42  ;;  %vm8842_vm10 = vcmp.lt.f32.partialorder %v1865_v17, 0.0004427343  ;;  %v1901_v57 = vand.u32 2147483647, %v11294_v46  ;;  %v11320_v34 = vld [vmem:[#allocation66_spill] sm:$0xff] }
 0x2be   : > { %6752 = vlog2.f32 %v1886_v55  ;;  %v11308_v6 = vmax.f32 %v11307_v61, 0.0  ;;  %v1816_v63 = vmul.f32 0.6931472, %v6745_v33  ;;  %v1889_v29 = vmul.f32 -0.5, %v11303_v38  ;;  %v11324_v31 = vld [vmem:[#allocation118_spill] sm:$0xff] }
 0x2bf   : > { %2813 = vmatmul.mubr.f32.gmra.mrb[38].mxu0 %v2242_v40  ;;  %3135 = vmatmul.mubr.f32.gmra.mrb[38].mxu1 %v2242_v40  ;;  %6754 = vlog2.f32 %v1931_v15  ;;  %v1864_v37 = vmul.f32 %v11288_v28, %v1863_v16  ;;  %vm8851_vm11 = vcmp.lt.f32.partialorder %v1856_v39, 0.0004427343  ;;  %v1934_v8 = vmul.f32 -0.5, %v11304_v20 }
 0x2c0   : > { %v2247_v44 = vadd.f32 %v1831_v9, %v11308_v6  ;;  %v1922_v36 = vadd.f32 1.0, %v11311_v11  ;;  %v6747_v35 = vpop.eup %6746  ;;  %v1822_v52 = vsel %vm8829_vm9, %v1819_v3, %v1816_v63  ;;  %v1855_v54 = vmul.f32 %v11289_v24, %v1854_v43 }
 0x2c1   : > { %v1899_v14 = vadd.f32 1.0, %v1898_v41  ;;  %v1967_v60 = vadd.f32 1.0, %v11312_v18  ;;  %v6749_v28 = vpop.eup %6748  ;;  %v11314_v19 = vmax.f32 %v11313_v58, 0.0  ;;  %v1861_v53 = vmul.f32 0.6931472, %v6747_v35  ;;  %v11325_v41 = vld [vmem:[#allocation76_spill] sm:$0xff] }
 0x2c2   : > { %2818 = vmatprep.mubr.f32.mxu0 %v2247_v44  ;;  %3140 = vmatprep.mubr.f32.mxu1 %v2247_v44  ;;  %vm8863_vm12 = vcmp.lt.f32.partialorder %v1901_v57, 0.0004427343  ;;  %v1925_v56 = vmul.f32 -0.5, %v11311_v11  ;;  %v1852_v62 = vmul.f32 0.6931472, %v6749_v28  ;;  %v1890_v2 = vadd.f32 1.0, %v1889_v29 }
 0x2c3   : > { %v2246_v10 = vadd.f32 %v1822_v52, %v11314_v19  ;;  %v1892_v25 = vand.u32 2147483647, %v11303_v38  ;;  %6756 = vlog2.f32 %v1922_v36  ;;  %v1867_v24 = vsel %vm8842_vm10, %v1864_v37, %v1861_v53  ;;  %v11331_v29 = vld [vmem:[#allocation116_spill] sm:$0xff]  ;;  %v11338_v19 = vld [vmem:[#allocation23_spill] sm:$0xff] }
 0x2c4   : > { %v1935_v26 = vadd.f32 1.0, %v1934_v8  ;;  %v1937_v47 = vand.u32 2147483647, %v11304_v20  ;;  %6758 = vlog2.f32 %v1967_v60  ;;  %v6751_v51 = vpop.eup %6750  ;;  %v11318_v21 = vmax.f32 %v11317_v13, 0.0 }
 0x2c5   : > { %2819 = vmatmul.mubr.f32.gmra.mrb[40].mxu0 %v2246_v10  ;;  %3141 = vmatmul.mubr.f32.gmra.mrb[40].mxu1 %v2246_v10  ;;  %v1858_v49 = vsel %vm8851_vm11, %v1855_v54, %v1852_v62  ;;  %v1928_v0 = vand.u32 2147483647, %v11311_v11  ;;  %v1958_v59 = vadd.f32 1.0, %v11319_v48  ;;  %v11321_v50 = vmax.f32 %v11320_v34, 0.0 }
 0x2c6   : > { %v2251_v7 = vadd.f32 %v1867_v24, %v11318_v21  ;;  %v1897_v22 = vmul.f32 0.6931472, %v6751_v51  ;;  %v1900_v4 = vmul.f32 %v11294_v46, %v1899_v14  ;;  %v1926_v5 = vadd.f32 1.0, %v1925_v56  ;;  %v11336_v14 = vld [vmem:[#allocation83_spill] sm:$0xff] }
 0x2c7   : > { %v2250_v17 = vadd.f32 %v1858_v49, %v11321_v50  ;;  %vm8881_vm13 = vcmp.lt.f32.partialorder %v1892_v25, 0.0004427343  ;;  %v1970_v23 = vmul.f32 -0.5, %v11312_v18  ;;  %6760 = vlog2.f32 %v1958_v59  ;;  %v11340_v49 = vld [vmem:[#allocation79_spill] sm:$0xff] }
 0x2c8   : > { %2824 = vmatprep.mubr.f32.mxu0 %v2251_v7  ;;  %3146 = vmatprep.mubr.f32.mxu1 %v2251_v7  ;;  %v2003_v40 = vadd.f32 1.0, %v11324_v31  ;;  %v6753_v42 = vpop.eup %6752  ;;  %v1903_v39 = vsel %vm8863_vm12, %v1900_v4, %v1897_v22  ;;  %v1891_v46 = vmul.f32 %v11303_v38, %v1890_v2  ;;  %v1936_v55 = vmul.f32 %v11304_v20, %v1935_v26  ;;  %v11339_v2 = vld [vmem:[#allocation21_spill] sm:$0xff] }
 0x2c9   : > { %2825 = vmatmul.mubr.f32.gmra.mrb[42].mxu0 %v2250_v17  ;;  %3147 = vmatmul.mubr.f32.gmra.mrb[42].mxu1 %v2250_v17  ;;  %v1973_v3 = vand.u32 2147483647, %v11312_v18  ;;  %v6755_v43 = vpop.eup %6754  ;;  %v11326_v15 = vmax.f32 %v11325_v41, 0.0  ;;  %v1888_v9 = vmul.f32 0.6931472, %v6753_v42  ;;  %v1927_v38 = vmul.f32 %v11311_v11, %v1926_v5  ;;  %v11346_v17 = vld [vmem:[#allocation91_spill] sm:$0xff] }
 0x2ca   : > { %vm8894_vm14 = vcmp.lt.f32.partialorder %v1937_v47, 0.0004427343  ;;  %vm8898_vm15 = vcmp.lt.f32.partialorder %v1928_v0, 0.0004427343  ;;  %v1933_v61 = vmul.f32 0.6931472, %v6755_v43  ;;  %6762 = vlog2.f32 %v2003_v40 }
 0x2cb   : > { %v2255_v33 = vadd.f32 %v1903_v39, %v11326_v15  ;;  %v1961_v20 = vmul.f32 -0.5, %v11319_v48  ;;  %v1894_v6 = vsel %vm8881_vm13, %v1891_v46, %v1888_v9  ;;  %v1971_v44 = vadd.f32 1.0, %v1970_v23  ;;  %v11348_v46 = vld [vmem:[#allocation27_spill] sm:$0xff]  ;;  %v11351_v15 = vld [vmem:[#allocation25_spill] sm:$0xff] }
 0x2cc   : > { %v2006_v63 = vmul.f32 -0.5, %v11324_v31  ;;  %v1994_v37 = vadd.f32 1.0, %v11331_v29  ;;  %v11333_v8 = vmax.f32 %v11332_v30, 0.0  ;;  %v1939_v35 = vsel %vm8894_vm14, %v1936_v55, %v1933_v61 }
 0x2cd   : > { %2830 = vmatprep.mubr.f32.mxu0 %v2255_v33  ;;  %3152 = vmatprep.mubr.f32.mxu1 %v2255_v33  ;;  %vm8912_vm0 = vcmp.lt.f32.partialorder %v1973_v3, 0.0004427343  ;;  %v1964_v52 = vand.u32 2147483647, %v11319_v48  ;;  %v6757_v54 = vpop.eup %6756  ;;  %v11337_v60 = vmax.f32 %v11336_v14, 0.0  ;;  %v2039_v10 = vadd.f32 1.0, %v11338_v19 }
 0x2ce   : > { %v2254_v36 = vadd.f32 %v1894_v6, %v11333_v8  ;;  %v2009_v58 = vand.u32 2147483647, %v11324_v31  ;;  %6764 = vlog2.f32 %v1994_v37  ;;  %v6759_v53 = vpop.eup %6758  ;;  %v1924_v1 = vmul.f32 0.6931472, %v6757_v54  ;;  %v11356_v8 = vld [vmem:[#allocation32_spill] sm:$0xff] }
 0x2cf   : > { %v2259_v28 = vadd.f32 %v1939_v35, %v11337_v60  ;;  %v1962_v56 = vadd.f32 1.0, %v1961_v20  ;;  %v1997_v62 = vmul.f32 -0.5, %v11331_v29  ;;  %v2030_v25 = vadd.f32 1.0, %v11339_v2  ;;  %v11357_v35 = vld [vmem:[#allocation104_spill] sm:$0xff] }
 0x2d0   : > { %2831 = vmatmul.mubr.f32.gmra.mrb[44].mxu0 %v2254_v36  ;;  %3153 = vmatmul.mubr.f32.gmra.mrb[44].mxu1 %v2254_v36  ;;  %v1969_v24 = vmul.f32 0.6931472, %v6759_v53  ;;  %v1972_v26 = vmul.f32 %v11312_v18, %v1971_v44  ;;  %v2007_v47 = vadd.f32 1.0, %v2006_v63  ;;  %6766 = vlog2.f32 %v2039_v10  ;;  %v11361_v10 = vld [vmem:[#allocation29_spill] sm:$0xff] }
 0x2d1   : > { %2836 = vmatprep.mubr.f32.mxu0 %v2259_v28  ;;  %3158 = vmatprep.mubr.f32.mxu1 %v2259_v28  ;;  %v1930_v51 = vsel %vm8898_vm15, %v1927_v38, %v1924_v1  ;;  %v2000_v13 = vand.u32 2147483647, %v11331_v29  ;;  %v2042_v21 = vmul.f32 -0.5, %v11338_v19  ;;  %6768 = vlog2.f32 %v2030_v25  ;;  %v6761_v7 = vpop.eup %6760 }
 0x2d2   : > { %v11341_v0 = vmax.f32 %v11340_v49, 0.0  ;;  %v1975_v34 = vsel %vm8912_vm0, %v1972_v26, %v1969_v24  ;;  %vm8932_vm1 = vcmp.lt.f32.partialorder %v1964_v52, 0.0004427343  ;;  %vm8936_vm2 = vcmp.lt.f32.partialorder %v2009_v58, 0.0004427343  ;;  %v11362_v26 = vld [vmem:[#allocation97_spill] sm:$0xff] }
 0x2d3   : > { %v11347_v22 = vmax.f32 %v11346_v17, 0.0  ;;  %v1960_v5 = vmul.f32 0.6931472, %v6761_v7  ;;  %v1963_v16 = vmul.f32 %v11319_v48, %v1962_v56  ;;  %v1998_v23 = vadd.f32 1.0, %v1997_v62  ;;  %v11368_v17 = vld [vmem:[#allocation33_spill] sm:$0xff] }
 0x2d4   : > { %v2258_v59 = vadd.f32 %v1930_v51, %v11341_v0  ;;  %v2008_v40 = vmul.f32 %v11324_v31, %v2007_v47  ;;  %v2045_v42 = vand.u32 2147483647, %v11338_v19  ;;  %v2033_v39 = vmul.f32 -0.5, %v11339_v2  ;;  %v6763_v3 = vpop.eup %6762  ;;  %v11352_v31 = vld [vmem:[#allocation87_spill] sm:$0xff]  ;;  %v4174_v49 = vld [vmem:[#allocation8 + $0x8] sm:$0xff] }
 0x2d5   : > { %v2263_v4 = vadd.f32 %v1975_v34, %v11347_v22  ;;  %v2075_v55 = vadd.f32 1.0, %v11348_v46  ;;  %v1966_v43 = vsel %vm8932_vm1, %v1963_v16, %v1960_v5  ;;  %vm8949_vm3 = vcmp.lt.f32.partialorder %v2000_v13, 0.0004427343 }
 0x2d6   : > { %2837 = vmatmul.mubr.f32.gmra.mrb[46].mxu0 %v2258_v59  ;;  %3159 = vmatmul.mubr.f32.gmra.mrb[46].mxu1 %v2258_v59  ;;  %v2043_v48 = vadd.f32 1.0, %v2042_v21  ;;  %v2066_v33 = vadd.f32 1.0, %v11351_v15  ;;  %v11353_v9 = vmax.f32 %v11352_v31, 0.0  ;;  %v2005_v57 = vmul.f32 0.6931472, %v6763_v3  ;;  %v11366_v59 = vld [vmem:[#allocation108_spill] sm:$0xff] }
 0x2d7   : > { %2842 = vmatprep.mubr.f32.mxu0 %v2263_v4  ;;  %3164 = vmatprep.mubr.f32.mxu1 %v2263_v4  ;;  %v2036_v61 = vand.u32 2147483647, %v11339_v2  ;;  %6770 = vlog2.f32 %v2075_v55  ;;  %v1999_v38 = vmul.f32 %v11331_v29, %v1998_v23  ;;  %v2078_v20 = vmul.f32 -0.5, %v11348_v46  ;;  %v11369_v23 = vld [vmem:[#allocation35_spill] sm:$0xff] }
 0x2d8   : > { %v2262_v12 = vadd.f32 %v1966_v43, %v11353_v9  ;;  %6772 = vlog2.f32 %v2066_v33  ;;  %v2069_v6 = vmul.f32 -0.5, %v11351_v15  ;;  %v6765_v44 = vpop.eup %6764  ;;  %v2011_v63 = vsel %vm8936_vm2, %v2008_v40, %v2005_v57 }
 0x2d9   : > { %vm8962_vm4 = vcmp.lt.f32.partialorder %v2045_v42, 0.0004427343  ;;  %v2034_v30 = vadd.f32 1.0, %v2033_v39  ;;  %v2111_v36 = vadd.f32 1.0, %v11356_v8  ;;  %v11358_v29 = vmax.f32 %v11357_v35, 0.0  ;;  %v11370_v39 = vld [vmem:[#allocation107_spill] sm:$0xff] }
 0x2da   : > { %2843 = vmatmul.mubr.f32.gmra.mrb[48].mxu0 %v2262_v12  ;;  %3165 = vmatmul.mubr.f32.gmra.mrb[48].mxu1 %v2262_v12  ;;  %v1996_v52 = vmul.f32 0.6931472, %v6765_v44  ;;  %v2081_v54 = vand.u32 2147483647, %v11348_v46  ;;  %v2114_v14 = vmul.f32 -0.5, %v11356_v8  ;;  %v6767_v60 = vpop.eup %6766  ;;  %v2044_v28 = vmul.f32 %v11338_v19, %v2043_v48  ;;  %v11376_v44 = vld [vmem:[#allocation115_spill] sm:$0xff] }
 0x2db   : > { %v2267_v11 = vadd.f32 %v2011_v63, %v11358_v29  ;;  %vm8972_vm5 = vcmp.lt.f32.partialorder %v2036_v61, 0.0004427343  ;;  %6774 = vlog2.f32 %v2111_v36  ;;  %v2102_v53 = vadd.f32 1.0, %v11361_v10  ;;  %v6769_v1 = vpop.eup %6768  ;;  %v11378_v36 = vld [vmem:[#allocation39_spill] sm:$0xff]  ;;  %v11379_v29 = vld [vmem:[#allocation112_spill] sm:$0xff]  ;;  %v4186_v12 = vld [vmem:[#allocation8 + $0x68] sm:$0xff] }
 0x2dc   : > { %v2002_v56 = vsel %vm8949_vm3, %v1999_v38, %v1996_v52  ;;  %v2041_v62 = vmul.f32 0.6931472, %v6767_v60  ;;  %v2079_v25 = vadd.f32 1.0, %v2078_v20  ;;  %v2070_v24 = vadd.f32 1.0, %v2069_v6 }
 0x2dd   : > { %2848 = vmatprep.mubr.f32.mxu0 %v2267_v11  ;;  %3170 = vmatprep.mubr.f32.mxu1 %v2267_v11  ;;  %v11363_v47 = vmax.f32 %v11362_v26, 0.0  ;;  %v2032_v19 = vmul.f32 0.6931472, %v6769_v1  ;;  %v2035_v13 = vmul.f32 %v11339_v2, %v2034_v30  ;;  %v2072_v21 = vand.u32 2147483647, %v11351_v15 }
 0x2de   : > { %v2047_v7 = vsel %vm8962_vm4, %v2044_v28, %v2041_v62  ;;  %vm8985_vm6 = vcmp.lt.f32.partialorder %v2081_v54, 0.0004427343  ;;  %v2115_v0 = vadd.f32 1.0, %v2114_v14  ;;  %6776 = vlog2.f32 %v2102_v53 }
 0x2df   : > { %v2266_v51 = vadd.f32 %v2002_v56, %v11363_v47  ;;  %v11367_v34 = vmax.f32 %v11366_v59, 0.0  ;;  %v2038_v18 = vsel %vm8972_vm5, %v2035_v13, %v2032_v19  ;;  %v2117_v2 = vand.u32 2147483647, %v11356_v8  ;;  %v11381_v56 = vld [vmem:[#allocation30_spill] sm:$0xff]  ;;  %v11384_v47 = vld [vmem:[#allocation20_spill] sm:$0xff] }
 0x2e0   : > { %v2147_v22 = vadd.f32 1.0, %v11368_v17  ;;  %v2080_v4 = vmul.f32 %v11348_v46, %v2079_v25  ;;  %v2071_v5 = vmul.f32 %v11351_v15, %v2070_v24  ;;  %v2105_v16 = vmul.f32 -0.5, %v11361_v10 }
 0x2e1   : > { %2849 = vmatmul.mubr.f32.gmra.mrb[50].mxu0 %v2266_v51  ;;  %3171 = vmatmul.mubr.f32.gmra.mrb[50].mxu1 %v2266_v51  ;;  %v2271_v50 = vadd.f32 %v2047_v7, %v11367_v34  ;;  %v2138_v40 = vadd.f32 1.0, %v11369_v23  ;;  %v6771_v42 = vpop.eup %6770  ;;  %v11371_v55 = vmax.f32 %v11370_v39, 0.0  ;;  %vm9001_vm7 = vcmp.lt.f32.partialorder %v2072_v21, 0.0004427343  ;;  %v4178_v34 = vld [vmem:[#allocation8 + $0x28] sm:$0xff]  ;;  %v4187_v21 = vld [vmem:[#allocation8 + $0x70] sm:$0xff] }
 0x2e2   : > { %v2108_v41 = vand.u32 2147483647, %v11361_v10  ;;  %6778 = vlog2.f32 %v2147_v22  ;;  %v6773_v46 = vpop.eup %6772  ;;  %v2077_v48 = vmul.f32 0.6931472, %v6771_v42  ;;  %v2150_v15 = vmul.f32 -0.5, %v11368_v17  ;;  %v11392_v39 = vld [vmem:[#allocation117_spill] sm:$0xff] }
 0x2e3   : > { %2854 = vmatprep.mubr.f32.mxu0 %v2271_v50  ;;  %3176 = vmatprep.mubr.f32.mxu1 %v2271_v50  ;;  %v2270_v3 = vadd.f32 %v2038_v18, %v11371_v55  ;;  %6780 = vlog2.f32 %v2138_v40  ;;  %v2183_v33 = vadd.f32 1.0, %v8484_v27  ;;  %v2068_v31 = vmul.f32 0.6931472, %v6773_v46  ;;  %v4176_v50 = vld [vmem:[#allocation8 + $0x18] sm:$0xff]  ;;  %v4177_v40 = vld [vmem:[#allocation8 + $0x20] sm:$0xff]  ;;  %v4175_v46 = vld [vmem:[#allocation8 + $0x10] sm:$0xff] }
 0x2e4   : > { %v2116_v9 = vmul.f32 %v11356_v8, %v2115_v0  ;;  %vm9009_vm8 = vcmp.lt.f32.partialorder %v2117_v2, 0.0004427343  ;;  %v2141_v57 = vmul.f32 -0.5, %v11369_v23  ;;  %v2083_v61 = vsel %vm8985_vm6, %v2080_v4, %v2077_v48  ;;  %v4180_v18 = vld [vmem:[#allocation8 + $0x38] sm:$0xff]  ;;  %v4182_v48 = vld [vmem:[#allocation8 + $0x48] sm:$0xff] }
 0x2e5   : > { %2855 = vmatmul.mubr.f32.gmra.mrb[52].mxu0 %v2270_v3  ;;  %3177 = vmatmul.mubr.f32.gmra.mrb[52].mxu1 %v2270_v3  ;;  %v2106_v38 = vadd.f32 1.0, %v2105_v16  ;;  %v2153_v20 = vand.u32 2147483647, %v11368_v17  ;;  %6782 = vlog2.f32 %v2183_v33  ;;  %v6775_v6 = vpop.eup %6774  ;;  %v11377_v63 = vmax.f32 %v11376_v44, 0.0  ;;  %v4173_v16 = vld [vmem:[#allocation8] sm:$0xff] }
 0x2e6   : > { %v2074_v30 = vsel %vm9001_vm7, %v2071_v5, %v2068_v31  ;;  %v2186_v8 = vmul.f32 -0.5, %v8484_v27  ;;  %v2174_v35 = vadd.f32 1.0, %v11378_v36  ;;  %v11380_v11 = vmax.f32 %v11379_v29, 0.0 }
 0x2e7   : > { %v2275_v37 = vadd.f32 %v2083_v61, %v11377_v63  ;;  %v2113_v54 = vmul.f32 0.6931472, %v6775_v6  ;;  %v2151_v14 = vadd.f32 1.0, %v2150_v15  ;;  %v2144_v60 = vand.u32 2147483647, %v11369_v23  ;;  %v4188_v63 = vld [vmem:[#allocation8 + $0x78] sm:$0xff] }
 0x2e8   : > { %v2274_v52 = vadd.f32 %v2074_v30, %v11380_v11  ;;  %v2142_v28 = vadd.f32 1.0, %v2141_v57  ;;  %v2189_v58 = vand.u32 2147483647, %v8484_v27  ;;  %6784 = vlog2.f32 %v2174_v35  ;;  %v6777_v1 = vpop.eup %6776  ;;  %v4184_v57 = vld [vmem:[#allocation8 + $0x58] sm:$0xff]  ;;  %v4185_v30 = vld [vmem:[#allocation8 + $0x60] sm:$0xff] }
 0x2e9   : > { %2860 = vmatprep.mubr.f32.mxu0 %v2275_v37  ;;  %3182 = vmatprep.mubr.f32.mxu1 %v2275_v37  ;;  %v2219_v53 = vadd.f32 1.0, %v8753_v45  ;;  %v1391_v62 = vmax.f32 %v11381_v56, 0.0  ;;  %v2119_v25 = vsel %vm9009_vm8, %v2116_v9, %v2113_v54  ;;  %v2107_v24 = vmul.f32 %v11361_v10, %v2106_v38  ;;  %v4181_v37 = vld [vmem:[#allocation8 + $0x40] sm:$0xff]  ;;  %v4190_v54 = vld [vmem:[#allocation8 + $0x88] sm:$0xff] }
 0x2ea   : > { %2861 = vmatmul.mubr.f32.gmra.mrb[54].mxu0 %v2274_v52  ;;  %3183 = vmatmul.mubr.f32.gmra.mrb[54].mxu1 %v2274_v52  ;;  %vm9032_vm9 = vcmp.lt.f32.partialorder %v2108_v41, 0.0004427343  ;;  %v11385_v51 = vmax.f32 %v11384_v47, 0.0  ;;  %v2104_v13 = vmul.f32 0.6931472, %v6777_v1  ;;  %v2187_v7 = vadd.f32 1.0, %v2186_v8 }
 0x2eb   : > { %vm9038_vm10 = vcmp.lt.f32.partialorder %v2153_v20, 0.0004427343  ;;  %v2152_v0 = vmul.f32 %v11368_v17, %v2151_v14  ;;  %v2177_v59 = vmul.f32 -0.5, %v11378_v36  ;;  %6786 = vlog2.f32 %v2219_v53  ;;  %v11394_v8 = vld [vmem:[#allocation24_spill] sm:$0xff]  ;;  %v4194_v14 = vld [vmem:[#allocation8 + $0xa8] sm:$0xff] }
 0x2ec   : > { %v2279_v19 = vadd.f32 %v2119_v25, %v11385_v51  ;;  %v2210_v10 = vadd.f32 1.0, %v8512_v32  ;;  %v6779_v2 = vpop.eup %6778  ;;  %v2110_v22 = vsel %vm9032_vm9, %v2107_v24, %v2104_v13  ;;  %v2143_v4 = vmul.f32 %v11369_v23, %v2142_v28  ;;  %v4179_v23 = vld [vmem:[#allocation8 + $0x30] sm:$0xff] }
 0x2ed   : > { %vm9048_vm11 = vcmp.lt.f32.partialorder %v2144_v60, 0.0004427343  ;;  %vm9052_vm12 = vcmp.lt.f32.partialorder %v2189_v58, 0.0004427343  ;;  %v6781_v42 = vpop.eup %6780  ;;  %v11393_v55 = vmax.f32 %v11392_v39, 0.0  ;;  %v2222_v41 = vmul.f32 -0.5, %v8753_v45 }
 0x2ee   : > { %2866 = vmatprep.mubr.f32.mxu0 %v2279_v19  ;;  %3188 = vmatprep.mubr.f32.mxu1 %v2279_v19  ;;  %v2149_v43 = vmul.f32 0.6931472, %v6779_v2  ;;  %6788 = vlog2.f32 %v2210_v10  ;;  %v2140_v15 = vmul.f32 0.6931472, %v6781_v42  ;;  %v2188_v33 = vmul.f32 %v8484_v27, %v2187_v7  ;;  %v11396_v60 = vld [vmem:[#allocation22_spill] sm:$0xff]  ;;  %v4192_v7 = vld [vmem:[#allocation8 + $0x98] sm:$0xff] }
 0x2ef   : > { %v2278_v3 = vadd.f32 %v2110_v22, %v11393_v55  ;;  %v2180_v31 = vand.u32 2147483647, %v11378_v36  ;;  %v5813_v9 = vpack.c.bf16 %v4178_v34, %v4174_v49  ;;  %v6783_v61 = vpop.eup %6782  ;;  %v2178_v20 = vadd.f32 1.0, %v2177_v59  ;;  %v4183_v13 = vld [vmem:[#allocation8 + $0x50] sm:$0xff]  ;;  %v4196_v34 = vld [vmem:[#allocation8 + $0xb8] sm:$0xff]  ;;  %v11398_v2 = vld [vmem:[#allocation28_spill] sm:$0xff] }
 0x2f0   : > { %v2155_v38 = vsel %vm9038_vm10, %v2152_v0, %v2149_v43  ;;  %v5941_v6 = vpack.c.bf16 %v4180_v18, %v4176_v50  ;;  %v5815_v44 = vpack.c.bf16 %v4177_v40, %v4173_v16  ;;  %v11395_v35 = vmax.f32 %v11394_v8, 0.0  ;;  %v4189_v50 = vld [vmem:[#allocation8 + $0x80] sm:$0xff]  ;;  %v4202_v40 = vld [vmem:[#allocation8 + $0xe8] sm:$0xff]  ;;  %v4191_v43 = vld [vmem:[#allocation8 + $0x90] sm:$0xff] }
 0x2f1   : > { %2867 = vmatmul.mubr.f32.gmra.mrb[56].mxu0 %v2278_v3  ;;  %3189 = vmatmul.mubr.f32.gmra.mrb[56].mxu1 %v2278_v3  ;;  %v2146_v29 = vsel %vm9048_vm11, %v2143_v4, %v2140_v15  ;;  %v2185_v11 = vmul.f32 0.6931472, %v6783_v61  ;;  %v2213_v52 = vmul.f32 -0.5, %v8512_v32  ;;  %v11397_v28 = vmax.f32 %v11396_v60, 0.0  ;;  %v4193_v18 = vld [vmem:[#allocation8 + $0xa0] sm:$0xff]  ;;  %v4200_v15 = vld [vmem:[#allocation8 + $0xd8] sm:$0xff] }
 0x2f2   : > { %v2283_v27 = vadd.f32 %v2155_v38, %v11395_v35  ;;  %5814 = vmatprep.subr.bf16.mxu0 %v5813_v9  ;;  %v2223_v53 = vadd.f32 1.0, %v2222_v41  ;;  %5942 = vmatprep.subr.bf16.mxu1 %v5941_v6  ;;  %v5943_v1 = vpack.c.bf16 %v4179_v23, %v4175_v46  ;;  %v5817_v25 = vpack.c.bf16 %v4186_v12, %v4182_v48  ;;  %v6785_v24 = vpop.eup %6784  ;;  %v4195_v41 = vld [vmem:[#allocation8 + $0xb0] sm:$0xff]  ;;  %v4204_v61 = vld [vmem:[#allocation8 + $0xf8] sm:$0xff]  ;;  %v4206_v38 = vld [vmem:[#allocation8 + $0x108] sm:$0xff] }
 0x2f3   : > { %v2282_v58 = vadd.f32 %v2146_v29, %v11397_v28  ;;  %5816 = vmatpush1.bf16.msra.mxu0 %v5815_v44  ;;  %v2191_v26 = vsel %vm9052_vm12, %v2188_v33, %v2185_v11  ;;  %v2225_v47 = vand.u32 2147483647, %v8753_v45  ;;  %v5945_v51 = vpack.c.bf16 %v4188_v63, %v4184_v57  ;;  %v11399_v23 = vld [vmem:[#allocation34_spill] sm:$0xff]  ;;  %v4201_v33 = vld [vmem:[#allocation8 + $0xe0] sm:$0xff]  ;;  %v11400_v6 = vld [vmem:[#allocation31_spill] sm:$0xff] }
 0x2f4   : > { %2872 = vmatprep.mubr.f32.mxu0 %v2283_v27  ;;  %3194 = vmatprep.mubr.f32.mxu1 %v2283_v27  ;;  %v5819_v19 = vpack.c.bf16 %v4185_v30, %v4181_v37  ;;  %v2287_v49 = vadd.f32 %v2191_v26, %v1391_v62  ;;  %v2176_v0 = vmul.f32 0.6931472, %v6785_v24  ;;  %v2179_v59 = vmul.f32 %v11378_v36, %v2178_v20  ;;  %v4198_v36 = vld [vmem:[#allocation8 + $0xc8] sm:$0xff]  ;;  %v4199_v35 = vld [vmem:[#allocation8 + $0xd0] sm:$0xff]  ;;  %v4212_v60 = vld [vmem:[#allocation8 + $0x138] sm:$0xff] }
 0x2f5   : > { %2873 = vmatmul.mubr.f32.gmra.mrb[58].mxu0 %v2282_v58  ;;  %3195 = vmatmul.mubr.f32.gmra.mrb[58].mxu1 %v2282_v58  ;;  %v5821_v10 = vpack.c.bf16 %v4194_v14, %v4190_v54  ;;  %v1390_v22 = vmax.f32 %v11398_v2, 0.0  ;;  %vm2181_vm13 = vcmp.lt.f32.partialorder %v2180_v31, 0.0004427343  ;;  %v2214_v4 = vadd.f32 1.0, %v2213_v52  ;;  %v6787_v5 = vpop.eup %6786  ;;  %v4210_v20 = vld [vmem:[#allocation8 + $0x128] sm:$0xff]  ;;  %v4203_v27 = vld [vmem:[#allocation8 + $0xf0] sm:$0xff] }
 0x2f6   : > { %5944 = vmatpush1.bf16.msra.mxu1 %v5943_v1  ;;  %5818 = vmatprep.subr.bf16.mxu0 %v5817_v25  ;;  %v2182_v17 = vsel %vm2181_vm13, %v2179_v59, %v2176_v0  ;;  %v2224_v56 = vmul.f32 %v8753_v45, %v2223_v53  ;;  %v2216_v62 = vand.u32 2147483647, %v8512_v32  ;;  %v5947_v16 = vpack.c.bf16 %v4187_v21, %v4183_v13  ;;  %v4197_v45 = vld [vmem:[#allocation8 + $0xc0] sm:$0xff]  ;;  %v4208_v52 = vld [vmem:[#allocation8 + $0x118] sm:$0xff]  ;;  %v4214_v28 = vld [vmem:[#allocation8 + $0x148] sm:$0xff] }
 0x2f7   : > { %2878 = vmatprep.mubr.f32.mxu0 %v2287_v49  ;;  %3200 = vmatprep.mubr.f32.mxu1 %v2287_v49  ;;  %v2286_v42 = vadd.f32 %v2182_v17, %v1390_v22  ;;  %v2221_v39 = vmul.f32 0.6931472, %v6787_v5  ;;  %v5949_v55 = vpack.c.bf16 %v4196_v34, %v4192_v7  ;;  %v5823_v3 = vpack.c.bf16 %v4193_v18, %v4189_v50  ;;  %v4205_v54 = vld [vmem:[#allocation8 + $0x100] sm:$0xff]  ;;  %v4218_v58 = vld [vmem:[#allocation8 + $0x168] sm:$0xff]  ;;  %v4207_v25 = vld [vmem:[#allocation8 + $0x110] sm:$0xff] }
 0x2f8   : > { %5946 = vmatprep.subr.bf16.mxu1 %v5945_v51  ;;  %5820 = vmatpush1.bf16.msra.mxu0 %v5819_v19  ;;  %v6789_v46 = vpop.eup %6788  ;;  %v1395_v48 = vmax.f32 %v11399_v23, 0.0  ;;  %vm2226_vm14 = vcmp.lt.f32.partialorder %v2225_v47, 0.0004427343  ;;  %v2215_v12 = vmul.f32 %v8512_v32, %v2214_v4  ;;  %v5825_v57 = vpack.c.bf16 %v4202_v40, %v4198_v36  ;;  %v4209_v14 = vld [vmem:[#allocation8 + $0x120] sm:$0xff]  ;;  %v4211_v26 = vld [vmem:[#allocation8 + $0x130] sm:$0xff]  ;;  %v4216_v13 = vld [vmem:[#allocation8 + $0x158] sm:$0xff] }
 0x2f9   : > { %5822 = vmatprep.subr.bf16.mxu0 %v5821_v10  ;;  %2879 = vmatmul.mubr.f32.gmra.mrb[60].mxu0 %v2286_v42  ;;  %v2227_v31 = vsel %vm2226_vm14, %v2224_v56, %v2221_v39  ;;  %v2212_v9 = vmul.f32 0.6931472, %v6789_v46  ;;  %v1394_v44 = vmax.f32 %v11400_v6, 0.0  ;;  %vm2217_vm15 = vcmp.lt.f32.partialorder %v2216_v62, 0.0004427343  ;;  %v4213_v51 = vld [vmem:[#allocation8 + $0x140] sm:$0xff] }
 0x2fa   : > { %3201 = vmatmul.mubr.f32.gmra.mrb[60].mxu1 %v2286_v42  ;;  %v2291_v63 = vadd.f32 %v2227_v31, %v1395_v48  ;;  %v5951_v30 = vpack.c.bf16 %v4195_v41, %v4191_v43  ;;  %v5827_v8 = vpack.c.bf16 %v4201_v33, %v4197_v45  ;;  %v5953_v32 = vpack.c.bf16 %v4204_v61, %v4200_v15  ;;  %v4217_v19 = vld [vmem:[#allocation8 + $0x160] sm:$0xff]  ;;  %v4220_v21 = vld [vmem:[#allocation8 + $0x178] sm:$0xff]  ;;  %v4215_v59 = vld [vmem:[#allocation8 + $0x150] sm:$0xff] }
 0x2fb   : > { %5948 = vmatpush1.bf16.msra.mxu1 %v5947_v16  ;;  %v2218_v37 = vsel %vm2217_vm15, %v2215_v12, %v2212_v9  ;;  %v5829_v11 = vpack.c.bf16 %v4210_v20, %v4206_v38  ;;  %v5955_v53 = vpack.c.bf16 %v4203_v27, %v4199_v35  ;;  %v5831_v1 = vpack.c.bf16 %v4209_v14, %v4205_v54  ;;  %v4219_v10 = vld [vmem:[#allocation8 + $0x170] sm:$0xff]  ;;  %v4222_v50 = vld [vmem:[#allocation8 + $0x188] sm:$0xff]  ;;  %v4224_v2 = vld [vmem:[#allocation8 + $0x198] sm:$0xff] }
 0x2fc   : > { %5950 = vmatprep.subr.bf16.mxu1 %v5949_v55  ;;  %5824 = vmatpush1.bf16.msra.mxu0 %v5823_v3  ;;  %v2290_v29 = vadd.f32 %v2218_v37, %v1394_v44  ;;  %v5957_v24 = vpack.c.bf16 %v4212_v60, %v4208_v52  ;;  %v5833_v47 = vpack.c.bf16 %v4218_v58, %v4214_v28  ;;  %v4226_v18 = vld [vmem:[#allocation8 + $0x1a8] sm:$0xff]  ;;  %v4228_v4 = vld [vmem:[#allocation8 + $0x1b8] sm:$0xff]  ;;  %v4221_v5 = vld [vmem:[#allocation8 + $0x180] sm:$0xff] }
 0x2fd   : > { %2884 = vmatprep.mubr.f32.mxu0 %v2291_v63  ;;  %3206 = vmatprep.mubr.f32.mxu1 %v2291_v63  ;;  %v5959_v7 = vpack.c.bf16 %v4211_v26, %v4207_v25  ;;  %v5835_v49 = vpack.c.bf16 %v4217_v19, %v4213_v51  ;;  %v5961_v0 = vpack.c.bf16 %v4220_v21, %v4216_v13  ;;  %v4225_v17 = vld [vmem:[#allocation8 + $0x1a0] sm:$0xff]  ;;  %v4223_v16 = vld [vmem:[#allocation8 + $0x190] sm:$0xff]  ;;  %v4230_v40 = vld [vmem:[#allocation8 + $0x1c8] sm:$0xff] }
 0x2fe   : > { %5826 = vmatprep.subr.bf16.mxu0 %v5825_v57  ;;  %2885 = vmatmul.mubr.f32.gmra.mrb[62].mxu0 %v2290_v29  ;;  %v5963_v34 = vpack.c.bf16 %v4219_v10, %v4215_v59  ;;  %v5837_v22 = vpack.c.bf16 %v4226_v18, %v4222_v50  ;;  %v5965_v56 = vpack.c.bf16 %v4228_v4, %v4224_v2  ;;  %v4227_v36 = vld [vmem:[#allocation8 + $0x1b0] sm:$0xff]  ;;  %v4234_v39 = vld [vmem:[#allocation8 + $0x1e8] sm:$0xff]  ;;  %v4232_v55 = vld [vmem:[#allocation8 + $0x1d8] sm:$0xff] }
 0x2ff   : > { %3207 = vmatmul.mubr.f32.gmra.mrb[62].mxu1 %v2290_v29  ;;  %v5839_v62 = vpack.c.bf16 %v4225_v17, %v4221_v5  ;;  %v5967_v42 = vpack.c.bf16 %v4227_v36, %v4223_v16  ;;  %v4236_v3 = vld [vmem:[#allocation8 + $0x1f8] sm:$0xff]  ;;  %v5841_v43 = vpack.c.bf16 %v4234_v39, %v4230_v40  ;;  %v4229_v46 = vld [vmem:[#allocation8 + $0x1c0] sm:$0xff]  ;;  %v4231_v48 = vld [vmem:[#allocation8 + $0x1d0] sm:$0xff] }
 0x300   : > { %5952 = vmatpush1.bf16.msra.mxu1 %v5951_v30  ;;  %5828 = vmatpush1.bf16.msra.mxu0 %v5827_v8  ;;  %v5969_v41 = vpack.c.bf16 %v4236_v3, %v4232_v55  ;;  %v4233_v23 = vld [vmem:[#allocation8 + $0x1e0] sm:$0xff]  ;;  %v4235_v45 = vld [vmem:[#allocation8 + $0x1f0] sm:$0xff]  ;;  %v4238_v33 = vld [vmem:[#allocation8 + $0x208] sm:$0xff] }
 0x301   : > { %5954 = vmatprep.subr.bf16.mxu1 %v5953_v32  ;;  %5830 = vmatprep.subr.bf16.mxu0 %v5829_v11  ;;  %v5843_v15 = vpack.c.bf16 %v4233_v23, %v4229_v46  ;;  %v4242_v31 = vld [vmem:[#allocation8 + $0x228] sm:$0xff]  ;;  %v5971_v9 = vpack.c.bf16 %v4235_v45, %v4231_v48  ;;  %v4240_v57 = vld [vmem:[#allocation8 + $0x218] sm:$0xff]  ;;  %v4237_v38 = vld [vmem:[#allocation8 + $0x200] sm:$0xff] }
 0x302   : > { %v5845_v12 = vpack.c.bf16 %v4242_v31, %v4238_v33  ;;  %v4244_v61 = vld [vmem:[#allocation8 + $0x238] sm:$0xff]  ;;  %v4241_v6 = vld [vmem:[#allocation8 + $0x220] sm:$0xff]  ;;  %v4239_v44 = vld [vmem:[#allocation8 + $0x210] sm:$0xff] }
 0x303   : > { %v5973_v20 = vpack.c.bf16 %v4244_v61, %v4240_v57  ;;  %v4243_v63 = vld [vmem:[#allocation8 + $0x230] sm:$0xff]  ;;  %v5847_v37 = vpack.c.bf16 %v4241_v6, %v4237_v38  ;;  %v4246_v30 = vld [vmem:[#allocation8 + $0x248] sm:$0xff]  ;;  %v4248_v35 = vld [vmem:[#allocation8 + $0x258] sm:$0xff] }
 0x304   : > { %5956 = vmatpush1.bf16.msra.mxu1 %v5955_v53  ;;  %5832 = vmatpush1.bf16.msra.mxu0 %v5831_v1  ;;  %v4250_v8 = vld [vmem:[#allocation8 + $0x268] sm:$0xff]  ;;  %v5975_v27 = vpack.c.bf16 %v4243_v63, %v4239_v44  ;;  %v4252_v32 = vld [vmem:[#allocation8 + $0x278] sm:$0xff]  ;;  %v4245_v11 = vld [vmem:[#allocation8 + $0x240] sm:$0xff] }
 0x305   : > { %5958 = vmatprep.subr.bf16.mxu1 %v5957_v24  ;;  %5834 = vmatprep.subr.bf16.mxu0 %v5833_v47  ;;  %v5849_v29 = vpack.c.bf16 %v4250_v8, %v4246_v30  ;;  %v4249_v52 = vld [vmem:[#allocation8 + $0x260] sm:$0xff]  ;;  %v5977_v54 = vpack.c.bf16 %v4252_v32, %v4248_v35  ;;  %v4247_v14 = vld [vmem:[#allocation8 + $0x250] sm:$0xff]  ;;  %v4254_v28 = vld [vmem:[#allocation8 + $0x288] sm:$0xff] }
 0x306   : > { %v4251_v60 = vld [vmem:[#allocation8 + $0x270] sm:$0xff]  ;;  %v4258_v58 = vld [vmem:[#allocation8 + $0x2a8] sm:$0xff]  ;;  %v4256_v53 = vld [vmem:[#allocation8 + $0x298] sm:$0xff]  ;;  %v5851_v25 = vpack.c.bf16 %v4249_v52, %v4245_v11 }
 0x307   : > { %v4260_v1 = vld [vmem:[#allocation8 + $0x2b8] sm:$0xff]  ;;  %v5979_v24 = vpack.c.bf16 %v4251_v60, %v4247_v14  ;;  %v5853_v26 = vpack.c.bf16 %v4258_v58, %v4254_v28  ;;  %v4253_v47 = vld [vmem:[#allocation8 + $0x280] sm:$0xff]  ;;  %v4255_v19 = vld [vmem:[#allocation8 + $0x290] sm:$0xff] }
 0x308   : > { %5960 = vmatpush1.bf16.msra.mxu1 %v5959_v7  ;;  %5836 = vmatpush1.bf16.msra.mxu0 %v5835_v49  ;;  %v4257_v51 = vld [vmem:[#allocation8 + $0x2a0] sm:$0xff]  ;;  %v5981_v13 = vpack.c.bf16 %v4260_v1, %v4256_v53  ;;  %v4259_v21 = vld [vmem:[#allocation8 + $0x2b0] sm:$0xff]  ;;  %v4262_v7 = vld [vmem:[#allocation8 + $0x2c8] sm:$0xff] }
 0x309   : > { %5962 = vmatprep.subr.bf16.mxu1 %v5961_v0  ;;  %5838 = vmatprep.subr.bf16.mxu0 %v5837_v22  ;;  %v4266_v49 = vld [vmem:[#allocation8 + $0x2e8] sm:$0xff]  ;;  %v4264_v0 = vld [vmem:[#allocation8 + $0x2d8] sm:$0xff]  ;;  %v5855_v10 = vpack.c.bf16 %v4257_v51, %v4253_v47  ;;  %v4261_v18 = vld [vmem:[#allocation8 + $0x2c0] sm:$0xff] }
 0x30a   : > { %v4268_v59 = vld [vmem:[#allocation8 + $0x2f8] sm:$0xff]  ;;  %v5857_v50 = vpack.c.bf16 %v4266_v49, %v4262_v7  ;;  %v4265_v2 = vld [vmem:[#allocation8 + $0x2e0] sm:$0xff]  ;;  %v4263_v22 = vld [vmem:[#allocation8 + $0x2d0] sm:$0xff] }
 0x30b   : > { %v5985_v4 = vpack.c.bf16 %v4268_v59, %v4264_v0  ;;  %v4267_v5 = vld [vmem:[#allocation8 + $0x2f0] sm:$0xff]  ;;  %v4270_v17 = vld [vmem:[#allocation8 + $0x308] sm:$0xff]  ;;  %v4276_v16 = vld [vmem:[#allocation8 + $0x338] sm:$0xff]  ;;  %v5859_v36 = vpack.c.bf16 %v4265_v2, %v4261_v18 }
 0x30c   : > { %5964 = vmatpush1.bf16.msra.mxu1 %v5963_v34  ;;  %5840 = vmatpush1.bf16.msra.mxu0 %v5839_v62  ;;  %v5983_v34 = vpack.c.bf16 %v4259_v21, %v4255_v19  ;;  %v4272_v62 = vld [vmem:[#allocation8 + $0x318] sm:$0xff]  ;;  %v5987_v40 = vpack.c.bf16 %v4267_v5, %v4263_v22  ;;  %v4269_v39 = vld [vmem:[#allocation8 + $0x300] sm:$0xff]  ;;  %v4271_v3 = vld [vmem:[#allocation8 + $0x310] sm:$0xff] }
 0x30d   : > { %5966 = vmatprep.subr.bf16.mxu1 %v5965_v56  ;;  %5842 = vmatprep.subr.bf16.mxu0 %v5841_v43  ;;  %v4274_v56 = vld [vmem:[#allocation8 + $0x328] sm:$0xff]  ;;  %v4273_v55 = vld [vmem:[#allocation8 + $0x320] sm:$0xff]  ;;  %v5989_v43 = vpack.c.bf16 %v4276_v16, %v4272_v62  ;;  %v4280_v48 = vld [vmem:[#allocation8 + $0x358] sm:$0xff] }
 0x30e   : > { %v4278_v46 = vld [vmem:[#allocation8 + $0x348] sm:$0xff]  ;;  %v5863_v45 = vpack.c.bf16 %v4273_v55, %v4269_v39  ;;  %v4279_v57 = vld [vmem:[#allocation8 + $0x350] sm:$0xff]  ;;  %v4288_v44 = vld [vmem:[#allocation8 + $0x398] sm:$0xff] }
 0x30f   : > { %v4282_v23 = vld [vmem:[#allocation8 + $0x368] sm:$0xff]  ;;  %v4283_v38 = vld [vmem:[#allocation8 + $0x370] sm:$0xff]  ;;  %v4292_v63 = vld [vmem:[#allocation8 + $0x3b8] sm:$0xff] }
 0x310   : > { %5968 = vmatpush1.bf16.msra.mxu1 %v5967_v42  ;;  %5844 = vmatpush1.bf16.msra.mxu0 %v5843_v15  ;;  %v5861_v42 = vpack.c.bf16 %v4274_v56, %v4270_v17  ;;  %v4284_v15 = vld [vmem:[#allocation8 + $0x378] sm:$0xff]  ;;  %v5865_v31 = vpack.c.bf16 %v4282_v23, %v4278_v46  ;;  %v4290_v6 = vld [vmem:[#allocation8 + $0x3a8] sm:$0xff]  ;;  %v5995_v30 = vpack.c.bf16 %v4283_v38, %v4279_v57  ;;  %v4285_v35 = vld [vmem:[#allocation8 + $0x380] sm:$0xff] }
 0x311   : > { %5970 = vmatprep.subr.bf16.mxu1 %v5969_v41  ;;  %5846 = vmatprep.subr.bf16.mxu0 %v5845_v12  ;;  %v4275_v41 = vld [vmem:[#allocation8 + $0x330] sm:$0xff]  ;;  %v4281_v12 = vld [vmem:[#allocation8 + $0x360] sm:$0xff]  ;;  %v5993_v61 = vpack.c.bf16 %v4284_v15, %v4280_v48  ;;  %v5997_v32 = vpack.c.bf16 %v4292_v63, %v4288_v44  ;;  %v4294_v52 = vld [vmem:[#allocation8 + $0x3c8] sm:$0xff] }
 0x312   : > { %v5991_v33 = vpack.c.bf16 %v4275_v41, %v4271_v3  ;;  %v4291_v11 = vld [vmem:[#allocation8 + $0x3b0] sm:$0xff]  ;;  %v4296_v14 = vld [vmem:[#allocation8 + $0x3d8] sm:$0xff]  ;;  %v4306_v21 = vld [vmem:[#allocation8 + $0x428] sm:$0xff] }
 0x313   : > { %v4300_v60 = vld [vmem:[#allocation8 + $0x3f8] sm:$0xff]  ;;  %v4299_v47 = vld [vmem:[#allocation8 + $0x3f0] sm:$0xff]  ;;  %v11402_v18 = vld [vmem:[#allocation17_spill] sm:$0xff] }
 0x314   : > { %5972 = vmatpush1.bf16.msra.mxu1 %v5971_v9  ;;  %5848 = vmatpush1.bf16.msra.mxu0 %v5847_v37  ;;  %v4277_v9 = vld [vmem:[#allocation8 + $0x340] sm:$0xff]  ;;  %v6001_v1 = vpack.c.bf16 %v4300_v60, %v4296_v14  ;;  %v4304_v7 = vld [vmem:[#allocation8 + $0x418] sm:$0xff]  ;;  %v11403_v22 = vld [vmem:[#allocation18_spill] sm:$0xff] }
 0x315   : > { %5974 = vmatprep.subr.bf16.mxu1 %v5973_v20  ;;  %5850 = vmatprep.subr.bf16.mxu0 %v5849_v29  ;;  %v4286_v20 = vld [vmem:[#allocation8 + $0x388] sm:$0xff]  ;;  %v5867_v37 = vpack.c.bf16 %v4281_v12, %v4277_v9  ;;  %v4287_v29 = vld [vmem:[#allocation8 + $0x390] sm:$0xff]  ;;  %v4308_v0 = vld [vmem:[#allocation8 + $0x438] sm:$0xff] }
 0x316   : > { %v5869_v8 = vpack.c.bf16 %v4290_v6, %v4286_v20  ;;  %v5999_v58 = vpack.c.bf16 %v4291_v11, %v4287_v29  ;;  %v6005_v59 = vpack.c.bf16 %v4308_v0, %v4304_v7  ;;  %v11404_v5 = vld [vmem:[#allocation19_spill] sm:$0xff]  ;;  %v9097_v16 = vld [vmem:[#allocation8 + $0x400] sm:$0xff]  ;;  %v9107_v3 = vld [vmem:[#allocation8 + $0x410] sm:$0xff] }
 0x317   : > { %v9111_v41 = vld [vmem:[#allocation8 + $0x448] sm:$0xff]  ;;  %v9118_v48 = vld [vmem:[#allocation8 + $0x458] sm:$0xff]  ;;  %v9127_v9 = vld [vmem:[#allocation8 + $0x440] sm:$0xff] }
 0x318   : > { %5976 = vmatpush1.bf16.msra.mxu1 %v5975_v27  ;;  %5852 = vmatpush1.bf16.msra.mxu0 %v5851_v25  ;;  %v4289_v27 = vld [vmem:[#allocation8 + $0x3a0] sm:$0xff]  ;;  %v9116_v23 = vld [vmem:[#allocation8 + $0x468] sm:$0xff]  ;;  %v9120_v15 = vld [vmem:[#allocation8 + $0x478] sm:$0xff]  ;;  %11406 = vst [vmem:[#allocation80_spill] sm:$0xff] %v9127_v9 }
 0x319   : > { %5978 = vmatprep.subr.bf16.mxu1 %v5977_v54  ;;  %5854 = vmatprep.subr.bf16.mxu0 %v5853_v26  ;;  %v4298_v54 = vld [vmem:[#allocation8 + $0x3e8] sm:$0xff]  ;;  %v5871_v28 = vpack.c.bf16 %v4289_v27, %v4285_v35  ;;  %v4293_v25 = vld [vmem:[#allocation8 + $0x3c0] sm:$0xff]  ;;  %v4295_v26 = vld [vmem:[#allocation8 + $0x3d0] sm:$0xff] }
 0x31a   : > { %v5873_v53 = vpack.c.bf16 %v4298_v54, %v4294_v52  ;;  %v6003_v19 = vpack.c.bf16 %v4299_v47, %v4295_v26  ;;  %v9129_v12 = vld [vmem:[#allocation8 + $0x460] sm:$0xff]  ;;  %v9131_v57 = vld [vmem:[#allocation8 + $0x450] sm:$0xff]  ;;  %v9135_v38 = vld [vmem:[#allocation8 + $0x488] sm:$0xff] }
 0x31b   : > { %11407 = vst [vmem:[#allocation41_spill] sm:$0xff] %v9129_v12  ;;  %11408 = vst [vmem:[#allocation40_spill] sm:$0xff] %v9131_v57  ;;  %v9137_v20 = vld [vmem:[#allocation8 + $0x4a8] sm:$0xff]  ;;  %v9141_v44 = vld [vmem:[#allocation8 + $0x498] sm:$0xff] }
 0x31c   : > { %5980 = vmatpush1.bf16.msra.mxu1 %v5979_v24  ;;  %5856 = vmatpush1.bf16.msra.mxu0 %v5855_v10  ;;  %v4297_v24 = vld [vmem:[#allocation8 + $0x3e0] sm:$0xff]  ;;  %11410 = vst [vmem:[#allocation42_spill] sm:$0xff] %v9135_v38  ;;  %11411 = vst [vmem:[#allocation88_spill] sm:$0xff] %v9137_v20  ;;  %v9143_v63 = vld [vmem:[#allocation8 + $0x4b8] sm:$0xff] }
 0x31d   : > { %5982 = vmatprep.subr.bf16.mxu1 %v5981_v13  ;;  %5858 = vmatprep.subr.bf16.mxu0 %v5857_v50  ;;  %v5875_v51 = vpack.c.bf16 %v4297_v24, %v4293_v25  ;;  %v4302_v13 = vld [vmem:[#allocation8 + $0x408] sm:$0xff]  ;;  %v345_v10 = vld [vmem:[%s10719_s4] sm:$0xf]  ;;  %11412 = vst [vmem:[#allocation45_spill] sm:$0xff] %v9141_v44  ;;  %11413 = vst [vmem:[#allocation44_spill] sm:$0xff] %v9143_v63 }
 0x31e   : > { %v5877_v49 = vpack.c.bf16 %v4306_v21, %v4302_v13  ;;  %v9089_v2 = vrot.slane %v345_v10, %v11402_v18  ;;  %v9095_v17 = vrot.slane %v345_v10, %v11404_v5  ;;  %v9153_v52 = vld [vmem:[#allocation8 + $0x490] sm:$0xff]  ;;  %v9166_v25 = vld [vmem:[#allocation8 + $0x4c8] sm:$0xff]  ;;  %v9183_v0 = vld [vmem:[#allocation8 + $0x4d8] sm:$0xff] }
 0x31f   : > { %11416 = vst [vmem:[#allocation52_spill] sm:$0xff] %v9153_v52  ;;  %v9155_v54 = vld [vmem:[#allocation8 + $0x4b0] sm:$0xff]  ;;  %11420 = vst [vmem:[#allocation49_spill] sm:$0xff] %v9166_v25  ;;  %v9168_v24 = vld [vmem:[#allocation8 + $0x4e8] sm:$0xff] }
 0x320   : > { %5984 = vmatpush1.bf16.msra.mxu1 %v5983_v34  ;;  %5860 = vmatpush1.bf16.msra.mxu0 %v5859_v36  ;;  %v11401_v34 = vld [vmem:[#allocation16_spill] sm:$0xff]  ;;  %11417 = vst [vmem:[#allocation75_spill] sm:$0xff] %v9155_v54  ;;  %11421 = vst [vmem:[#allocation48_spill] sm:$0xff] %v9168_v24  ;;  %v9230_v18 = vld [vmem:[#allocation8 + $0x538] sm:$0xff] }
 0x321   : > { %5986 = vmatprep.subr.bf16.mxu1 %v5985_v4  ;;  %5862 = vmatprep.subr.bf16.mxu0 %v5861_v42  ;;  %v9086_v50 = vrot.slane %v345_v10, %v11401_v34  ;;  %v9092_v4 = vrot.slane %v345_v10, %v11403_v22  ;;  %v9099_v36 = vld [vmem:[#allocation8 + $0x420] sm:$0xff]  ;;  %11423 = vst [vmem:[#allocation94_spill] sm:$0xff] %v9183_v0  ;;  %v9228_v22 = vld [vmem:[#allocation8 + $0x518] sm:$0xff]  ;;  %11434 = vst [vmem:[#allocation58_spill] sm:$0xff] %v9230_v18 }
 0x322   : > { %v9187_v10 = vld [vmem:[#allocation8 + $0x4c0] sm:$0xff]  ;;  %11433 = vst [vmem:[#allocation102_spill] sm:$0xff] %v9228_v22 }
 0x323   : > { %11425 = vst [vmem:[#allocation85_spill] sm:$0xff] %v9187_v10 }
 0x324   : > { %5988 = vmatpush1.bf16.msra.mxu1 %v5987_v40  ;;  %5864 = vmatpush1.bf16.msra.mxu0 %v5863_v45 }
 0x325   : > { %5990 = vmatprep.subr.bf16.mxu1 %v5989_v43  ;;  %5866 = vmatprep.subr.bf16.mxu0 %v5865_v31  ;;  %v9109_v43 = vld [vmem:[#allocation8 + $0x430] sm:$0xff] }
 0x328   : > { %5992 = vmatpush1.bf16.msra.mxu1 %v5991_v33  ;;  %5868 = vmatpush1.bf16.msra.mxu0 %v5867_v37  ;;  %v9145_v37 = vld [vmem:[#allocation8 + $0x480] sm:$0xff] }
 0x329   : > { %5994 = vmatprep.subr.bf16.mxu1 %v5993_v61  ;;  %5870 = vmatprep.subr.bf16.mxu0 %v5869_v8  ;;  %v9133_v61 = vld [vmem:[#allocation8 + $0x470] sm:$0xff]  ;;  %11414 = vst [vmem:[#allocation47_spill] sm:$0xff] %v9145_v37 }
 0x32a   : > { %11409 = vst [vmem:[#allocation43_spill] sm:$0xff] %v9133_v61 }
 0x32c   : > { %5996 = vmatpush1.bf16.msra.mxu1 %v5995_v30  ;;  %5872 = vmatpush1.bf16.msra.mxu0 %v5871_v28  ;;  %v9147_v30 = vld [vmem:[#allocation8 + $0x4a0] sm:$0xff] }
 0x32d   : > { %5998 = vmatprep.subr.bf16.mxu1 %v5997_v32  ;;  %5874 = vmatprep.subr.bf16.mxu0 %v5873_v53  ;;  %11415 = vst [vmem:[#allocation46_spill] sm:$0xff] %v9147_v30 }
 0x330   : > { %6000 = vmatpush1.bf16.msra.mxu1 %v5999_v58  ;;  %5876 = vmatpush1.bf16.msra.mxu0 %v5875_v51 }
 0x331   : > { %6002 = vmatprep.subr.bf16.mxu1 %v6001_v1  ;;  %5878 = vmatprep.subr.bf16.mxu0 %v5877_v49 }
 0x334   : > { %6004 = vmatpush1.bf16.msra.mxu1 %v6003_v19 }
 0x335   : > { %6006 = vmatprep.subr.bf16.mxu1 %v6005_v59  ;;  %v9185_v59 = vld [vmem:[#allocation8 + $0x4f8] sm:$0xff] }
 0x336   : > { %11424 = vst [vmem:[#allocation56_spill] sm:$0xff] %v9185_v59 }
 0x384   : > { %v2796_v56 = vpop.f32.mrb[32].mxu0  ;;  %v3118_v62 = vpop.f32.mrb[32].mxu1 }
 0x385   : > { %v9102_v40 = vadd.f32 %v2796_v56, %v9086_v50  ;;  %v9105_v42 = vadd.f32 %v3118_v62, %v9089_v2  ;;  %v2798_v39 = vpop.f32.mrb[33].mxu0  ;;  %v3120_v55 = vpop.f32.mrb[33].mxu1 }
 0x386   : > { %v9114_v46 = vadd.f32 %v2798_v39, %v9092_v4  ;;  %v9125_v31 = vadd.f32 %v3120_v55, %v9095_v17 }
 0x387   : > { %v3277_v45 = vand.u32 2147483647, %v9102_v40  ;;  %v3279_v33 = vand.u32 2147483647, %v9105_v42 }
 0x388   : > { %11405 = vst [vmem:[#allocation37_spill] sm:$0xff] %v9125_v31  ;;  %v3278_v14 = vand.u32 2147483647, %v9114_v46  ;;  %v3280_v51 = vand.u32 2147483647, %v9125_v31  ;;  %v9263_v31 = vld [vmem:[#allocation8 + $0x500] sm:$0xff] }
 0x389   : > { %v3341_v8 = vsub.f32 0.0, %v3277_v45  ;;  %v3343_v35 = vsub.f32 0.0, %v3279_v33  ;;  %v2802_v27 = vpop.f32.mrb[34].mxu0  ;;  %v3124_v29 = vpop.f32.mrb[34].mxu1  ;;  %v9194_v45 = vld [vmem:[#allocation8 + $0x4e0] sm:$0xff]  ;;  %v9196_v33 = vld [vmem:[#allocation8 + $0x4d0] sm:$0xff] }
 0x38a   : > { %v9159_v60 = vadd.f32 %v2802_v27, %v9086_v50  ;;  %v9162_v28 = vadd.f32 %v3124_v29, %v9089_v2  ;;  %v2804_v58 = vpop.f32.mrb[35].mxu0  ;;  %v3126_v53 = vpop.f32.mrb[35].mxu1  ;;  %11426 = vst [vmem:[#allocation98_spill] sm:$0xff] %v9194_v45  ;;  %11427 = vst [vmem:[#allocation54_spill] sm:$0xff] %v9196_v33  ;;  %v3344_v39 = vsub.f32 0.0, %v3280_v51 }
 0x38b   : > { %v3405_v26 = vmul.f32 1.442695, %v3341_v8  ;;  %v3409_v47 = vmul.f32 1.442695, %v3343_v35  ;;  %v9172_v19 = vadd.f32 %v2804_v58, %v9092_v4  ;;  %v9175_v13 = vadd.f32 %v3126_v53, %v9095_v17  ;;  %v9198_v8 = vld [vmem:[#allocation8 + $0x4f0] sm:$0xff]  ;;  %v9203_v53 = vld [vmem:[#allocation8 + $0x508] sm:$0xff] }
 0x38c   : > { %11418 = vst [vmem:[#allocation90_spill] sm:$0xff] %v9159_v60  ;;  %11419 = vst [vmem:[#allocation51_spill] sm:$0xff] %v9162_v28  ;;  %v3281_v56 = vand.u32 2147483647, %v9159_v60  ;;  %v3342_v35 = vsub.f32 0.0, %v3278_v14 }
 0x38d   : > { %11422 = vst [vmem:[#allocation89_spill] sm:$0xff] %v9175_v13  ;;  %6790 = vpow2.f32 %v3405_v26  ;;  %v2808_v62 = vpop.f32.mrb[36].mxu0  ;;  %11428 = vst [vmem:[#allocation99_spill] sm:$0xff] %v9198_v8  ;;  %v3283_v27 = vand.u32 2147483647, %v9162_v28  ;;  %v3130_v29 = vpop.f32.mrb[36].mxu1 }
 0x38e   : > { %6792 = vpow2.f32 %v3409_v47  ;;  %11429 = vst [vmem:[#allocation100_spill] sm:$0xff] %v9203_v53  ;;  %v9205_v26 = vld [vmem:[#allocation8 + $0x528] sm:$0xff]  ;;  %v3282_v55 = vand.u32 2147483647, %v9172_v19  ;;  %v2810_v49 = vpop.f32.mrb[37].mxu0  ;;  %v3132_v7 = vpop.f32.mrb[37].mxu1  ;;  %v9214_v1 = vadd.f32 %v2808_v62, %v9086_v50  ;;  %v9222_v21 = vadd.f32 %v3130_v29, %v9089_v2 }
 0x38f   : > { %11430 = vst [vmem:[#allocation61_spill] sm:$0xff] %v9205_v26  ;;  %v3284_v47 = vand.u32 2147483647, %v9175_v13  ;;  %v3345_v5 = vsub.f32 0.0, %v3281_v56  ;;  %v3407_v32 = vmul.f32 1.442695, %v3342_v35  ;;  %v9236_v8 = vadd.f32 %v2810_v49, %v9092_v4 }
 0x390   : > { %11431 = vst [vmem:[#allocation95_spill] sm:$0xff] %v9214_v1  ;;  %11432 = vst [vmem:[#allocation101_spill] sm:$0xff] %v9222_v21  ;;  %v3347_v33 = vsub.f32 0.0, %v3283_v27  ;;  %v3411_v6 = vmul.f32 1.442695, %v3344_v39  ;;  %v3346_v29 = vsub.f32 0.0, %v3282_v55  ;;  %v9245_v39 = vadd.f32 %v3132_v7, %v9095_v17 }
 0x391   : > { %11435 = vst [vmem:[#allocation67_spill] sm:$0xff] %v9236_v8  ;;  %v3348_v53 = vsub.f32 0.0, %v3284_v47  ;;  %v3285_v26 = vand.u32 2147483647, %v9214_v1  ;;  %v3413_v45 = vmul.f32 1.442695, %v3345_v5  ;;  %6794 = vpow2.f32 %v3407_v32 }
 0x392   : > { %v2814_v58 = vpop.f32.mrb[38].mxu0  ;;  %v3136_v11 = vpop.f32.mrb[38].mxu1  ;;  %v3287_v27 = vand.u32 2147483647, %v9222_v21  ;;  %11436 = vst [vmem:[#allocation65_spill] sm:$0xff] %v9245_v39  ;;  %6796 = vpow2.f32 %v3411_v6  ;;  %11438 = vst [vmem:[#allocation69_spill] sm:$0xff] %v9263_v31 }
 0x393   : > { %v9224_v14 = vpop.f32.mrb[39].mxu0  ;;  %v3138_v10 = vpop.f32.mrb[39].mxu1  ;;  %v3417_v49 = vmul.f32 1.442695, %v3347_v33  ;;  %v3415_v51 = vmul.f32 1.442695, %v3346_v29  ;;  %v9257_v55 = vadd.f32 %v2814_v58, %v9086_v50  ;;  %6798 = vpow2.f32 %v3413_v45 }
 0x394   : > { %v3286_v35 = vand.u32 2147483647, %v9236_v8  ;;  %v3419_v32 = vmul.f32 1.442695, %v3348_v53  ;;  %v3349_v33 = vsub.f32 0.0, %v3285_v26  ;;  %v3351_v29 = vsub.f32 0.0, %v3287_v27 }
 0x395   : > { %11437 = vst [vmem:[#allocation73_spill] sm:$0xff] %v9257_v55  ;;  %v3288_v5 = vand.u32 2147483647, %v9245_v39  ;;  %v9265_v1 = vld [vmem:[#allocation8 + $0x520] sm:$0xff]  ;;  %6800 = vpow2.f32 %v3417_v49  ;;  %v9270_v58 = vadd.f32 %v3136_v11, %v9089_v2  ;;  %v3289_v49 = vand.u32 2147483647, %v9257_v55 }
 0x396   : > { %11439 = vst [vmem:[#allocation82_spill] sm:$0xff] %v9265_v1  ;;  %v3350_v6 = vsub.f32 0.0, %v3286_v35  ;;  %v3421_v18 = vmul.f32 1.442695, %v3349_v33  ;;  %v3425_v26 = vmul.f32 1.442695, %v3351_v29  ;;  %v9286_v35 = vadd.f32 %v9224_v14, %v9092_v4 }
 0x397   : > { %v9249_v34 = vpop.eup %6790  ;;  %11440 = vst [vmem:[#allocation78_spill] sm:$0xff] %v9270_v58  ;;  %v3352_v39 = vsub.f32 0.0, %v3288_v5  ;;  %v3291_v33 = vand.u32 2147483647, %v9270_v58  ;;  %v9291_v8 = vadd.f32 %v3138_v10, %v9095_v17  ;;  %v3353_v31 = vsub.f32 0.0, %v3289_v49 }
 0x398   : > { %v2820_v47 = vpop.f32.mrb[40].mxu0  ;;  %v3142_v62 = vpop.f32.mrb[40].mxu1  ;;  %v3533_v7 = vadd.f32 1.0, %v9249_v34  ;;  %v3536_v45 = vmul.f32 -0.5, %v9249_v34  ;;  %11441 = vst [vmem:[#allocation84_spill] sm:$0xff] %v9286_v35 }
 0x399   : > { %v9253_v28 = vpop.eup %6792  ;;  %v2822_v56 = vpop.f32.mrb[41].mxu0  ;;  %11442 = vst [vmem:[#allocation93_spill] sm:$0xff] %v9291_v8  ;;  %v9294_v59 = vadd.f32 %v2820_v47, %v9086_v50  ;;  %v3423_v11 = vmul.f32 1.442695, %v3350_v6  ;;  %v3290_v29 = vand.u32 2147483647, %v9286_v35  ;;  %v9309_v6 = vadd.f32 %v3142_v62, %v9089_v2 }
 0x39a   : > { %v9259_v13 = vpop.f32.mrb[41].mxu1  ;;  %6802 = vlog2.f32 %v3533_v7  ;;  %v3551_v27 = vadd.f32 1.0, %v9253_v28  ;;  %v3539_v7 = vand.u32 2147483647, %v9249_v34  ;;  %v3537_v25 = vadd.f32 1.0, %v3536_v45 }
 0x39b   : > { %6804 = vpow2.f32 %v3415_v51  ;;  %v3554_v51 = vmul.f32 -0.5, %v9253_v28  ;;  %11443 = vst [vmem:[#allocation106_spill] sm:$0xff] %v9294_v59  ;;  %v9297_v5 = vpop.eup %6794  ;;  %v3292_v1 = vand.u32 2147483647, %v9291_v8  ;;  %v3557_v47 = vand.u32 2147483647, %v9253_v28 }
 0x39c   : > { %v2826_v22 = vpop.f32.mrb[42].mxu0  ;;  %v9274_v21 = vpop.f32.mrb[42].mxu1  ;;  %6806 = vlog2.f32 %v3551_v27  ;;  %11445 = vst [vmem:[#allocation64_spill] sm:$0xff] %v9309_v6  ;;  %v9312_v45 = vadd.f32 %v2822_v56, %v9092_v4  ;;  %v3355_v27 = vsub.f32 0.0, %v3291_v33  ;;  %v3293_v49 = vand.u32 2147483647, %v9294_v59 }
 0x39d   : > { %v9277_v0 = vpop.f32.mrb[43].mxu0  ;;  %v9279_v53 = vpop.f32.mrb[43].mxu1  ;;  %6808 = vpow2.f32 %v3419_v32  ;;  %v3555_v32 = vadd.f32 1.0, %v3554_v51  ;;  %v9318_v55 = vmul.f32 %v9249_v34, %v3537_v25  ;;  %vm9320_vm0 = vcmp.lt.f32.partialorder %v3539_v7, 0.0004427343 }
 0x39e   : > { %v9305_v52 = vpop.eup %6796  ;;  %6810 = vpow2.f32 %v3421_v18  ;;  %11446 = vst [vmem:[#allocation62_spill] sm:$0xff] %v9312_v45  ;;  %v3427_v18 = vmul.f32 1.442695, %v3352_v39  ;;  %v3354_v62 = vsub.f32 0.0, %v3290_v29  ;;  %v3356_v54 = vsub.f32 0.0, %v3292_v1 }
 0x39f   : > { %11444 = vst [vmem:[#allocation60_spill] sm:$0xff] %v9305_v52  ;;  %6812 = vpow2.f32 %v3425_v26  ;;  %v9315_v14 = vpop.eup %6798  ;;  %v3429_v51 = vmul.f32 1.442695, %v3353_v31  ;;  %v9333_v34 = vadd.f32 %v9259_v13, %v9095_v17  ;;  %v3295_v39 = vand.u32 2147483647, %v9309_v6 }
 0x3a0   : > { %v9328_v26 = vpop.eup %6800  ;;  %6814 = vpow2.f32 %v3423_v11  ;;  %v3294_v1 = vand.u32 2147483647, %v9312_v45  ;;  %v9339_v29 = vadd.f32 %v2826_v22, %v9086_v50  ;;  %v3433_v31 = vmul.f32 1.442695, %v3355_v27 }
 0x3a1   : > { %11449 = vst [vmem:[#allocation72_spill] sm:$0xff] %v9328_v26  ;;  %11450 = vst [vmem:[#allocation70_spill] sm:$0xff] %v9333_v34  ;;  %v3357_v58 = vsub.f32 0.0, %v3293_v49  ;;  %v9348_v26 = vmul.f32 %v9253_v28, %v3555_v32  ;;  %vm9350_vm1 = vcmp.lt.f32.partialorder %v3557_v47, 0.0004427343  ;;  %6816 = vpow2.f32 %v3427_v18 }
 0x3a2   : > { %11451 = vst [vmem:[#allocation81_spill] sm:$0xff] %v9339_v29  ;;  %v3431_v22 = vmul.f32 1.442695, %v3354_v62  ;;  %v3435_v35 = vmul.f32 1.442695, %v3356_v54  ;;  %6818 = vpow2.f32 %v3429_v51  ;;  %v3359_v47 = vsub.f32 0.0, %v3295_v39 }
 0x3a3   : > { %v9301_v24 = vpop.f32.mrb[44].mxu0  ;;  %v9303_v10 = vpop.f32.mrb[44].mxu1  ;;  %v3296_v49 = vand.u32 2147483647, %v9333_v34  ;;  %v3358_v32 = vsub.f32 0.0, %v3294_v1  ;;  %v9365_v54 = vadd.f32 %v9274_v21, %v9089_v2  ;;  %6820 = vpow2.f32 %v3433_v31 }
 0x3a4   : > { %v9324_v37 = vpop.f32.mrb[45].mxu0  ;;  %v9326_v56 = vpop.f32.mrb[45].mxu1  ;;  %v3297_v8 = vand.u32 2147483647, %v9339_v29  ;;  %v9376_v39 = vadd.f32 %v9277_v0, %v9092_v4  ;;  %6822 = vpow2.f32 %v3431_v22  ;;  %v9399_v22 = vadd.f32 %v9301_v24, %v9086_v50 }
 0x3a5   : > { %v6803_v25 = vpop.eup %6802  ;;  %11454 = vst [vmem:[#allocation77_spill] sm:$0xff] %v9365_v54  ;;  %v3299_v63 = vand.u32 2147483647, %v9365_v54  ;;  %6824 = vpow2.f32 %v3435_v35  ;;  %v3441_v59 = vmul.f32 1.442695, %v3359_v47  ;;  %v9407_v52 = vadd.f32 %v9303_v10, %v9089_v2 }
 0x3a6   : > { %v9343_v11 = vpop.eup %6804  ;;  %v3535_v27 = vmul.f32 0.6931472, %v6803_v25  ;;  %v3437_v25 = vmul.f32 1.442695, %v3357_v58  ;;  %11456 = vst [vmem:[#allocation92_spill] sm:$0xff] %v9376_v39  ;;  %v9388_v58 = vadd.f32 %v9279_v53, %v9095_v17  ;;  %11460 = vst [vmem:[#allocation36_spill] sm:$0xff] %v9399_v22 }
 0x3a7   : > { %v6807_v28 = vpop.eup %6806  ;;  %v3439_v34 = vmul.f32 1.442695, %v3358_v32  ;;  %v3361_v45 = vsub.f32 0.0, %v3297_v8  ;;  %11461 = vst [vmem:[#allocation53_spill] sm:$0xff] %v9407_v52  ;;  %v3363_v24 = vsub.f32 0.0, %v3299_v63  ;;  %v9416_v8 = vadd.f32 %v9324_v37, %v9092_v4 }
 0x3a8   : > { %v9371_v51 = vpop.eup %6808  ;;  %11458 = vst [vmem:[#allocation86_spill] sm:$0xff] %v9388_v58  ;;  %v3541_v0 = vsel %vm9320_vm0, %v9318_v55, %v3535_v27  ;;  %v9395_v33 = vmul.f32 0.6931472, %v6807_v28  ;;  %6826 = vpow2.f32 %v3437_v25  ;;  %v11462_v55 = vmax.f32 %v9102_v40, 0.0 }
 0x3a9   : > { %v9341_v30 = vpop.f32.mrb[46].mxu0  ;;  %v9354_v60 = vpop.f32.mrb[46].mxu1  ;;  %11455 = vst [vmem:[#allocation26_spill] sm:$0xff] %v9371_v51  ;;  %v3360_v51 = vsub.f32 0.0, %v3296_v49  ;;  %v3300_v35 = vand.u32 2147483647, %v9388_v58  ;;  %v9427_v40 = vadd.f32 %v9326_v56, %v9095_v17  ;;  %6828 = vpow2.f32 %v3441_v59 }
 0x3aa   : > { %v9356_v44 = vpop.f32.mrb[47].mxu0  ;;  %v9360_v13 = vpop.f32.mrb[47].mxu1  ;;  %v9411_v27 = vadd.f32 %v3541_v0, %v11462_v55  ;;  %11463 = vst [vmem:[#allocation103_spill] sm:$0xff] %v9416_v8  ;;  %v3301_v47 = vand.u32 2147483647, %v9399_v22  ;;  %v9438_v55 = vadd.f32 %v9341_v30, %v9086_v50  ;;  %6830 = vpow2.f32 %v3439_v34 }
 0x3ab   : > { %v9382_v21 = vpop.eup %6810  ;;  %v3443_v10 = vmul.f32 1.442695, %v3360_v51  ;;  %11464 = vst [vmem:[#allocation96_spill] sm:$0xff] %v9427_v40  ;;  %v3445_v25 = vmul.f32 1.442695, %v3361_v45  ;;  %v3364_v45 = vsub.f32 0.0, %v3300_v35 }
 0x3ac   : > { %11457 = vst [vmem:[#allocation38_spill] sm:$0xff] %v9382_v21  ;;  %v9390_v31 = vpop.eup %6812  ;;  %11466 = vst [vmem:[#allocation109_spill] sm:$0xff] %v9438_v55  ;;  %v3303_v20 = vand.u32 2147483647, %v9407_v52  ;;  %v3449_v59 = vmul.f32 1.442695, %v3363_v24 }
 0x3ad   : > { %v9367_v18 = vpop.f32.mrb[48].mxu0  ;;  %v9369_v62 = vpop.f32.mrb[48].mxu1  ;;  %11459 = vst [vmem:[#allocation74_spill] sm:$0xff] %v9390_v31  ;;  %v3298_v31 = vand.u32 2147483647, %v9376_v39  ;;  %6832 = vpow2.f32 %v3443_v10  ;;  %v9467_v10 = vadd.f32 %v9356_v44, %v9092_v4  ;;  %v3542_v7 = vadd.f32 1.0, %v9297_v5 }
 0x3ae   : > { %v9378_v1 = vpop.f32.mrb[49].mxu0  ;;  %v9380_v6 = vpop.f32.mrb[49].mxu1  ;;  %v3302_v0 = vand.u32 2147483647, %v9416_v8  ;;  %v3305_v35 = vand.u32 2147483647, %v9438_v55  ;;  %6834 = vpow2.f32 %v3445_v25 }
 0x3af   : > { %v9401_v38 = vpop.eup %6814  ;;  %v3362_v28 = vsub.f32 0.0, %v3298_v31  ;;  %v9455_v31 = vadd.f32 %v9354_v60, %v9089_v2  ;;  %11471 = vst [vmem:[#allocation63_spill] sm:$0xff] %v9467_v10  ;;  %v3367_v39 = vsub.f32 0.0, %v3303_v20  ;;  %v3451_v24 = vmul.f32 1.442695, %v3364_v45 }
 0x3b0   : > { %v9433_v37 = vpop.eup %6816  ;;  %v3366_v57 = vsub.f32 0.0, %v3302_v0  ;;  %6836 = vpow2.f32 %v3449_v59  ;;  %v3306_v12 = vand.u32 2147483647, %v9467_v10  ;;  %v9488_v45 = vadd.f32 %v9367_v18, %v9086_v50 }
 0x3b1   : > { %11465 = vst [vmem:[#allocation50_spill] sm:$0xff] %v9433_v37  ;;  %v9442_v53 = vpop.eup %6818  ;;  %v3365_v37 = vsub.f32 0.0, %v3301_v47  ;;  %11469 = vst [vmem:[#allocation105_spill] sm:$0xff] %v9455_v31  ;;  %v9471_v47 = vadd.f32 %v9360_v13, %v9095_v17  ;;  %v3447_v58 = vmul.f32 1.442695, %v3362_v28  ;;  %v3369_v28 = vsub.f32 0.0, %v3305_v35 }
 0x3b2   : > { %11467 = vst [vmem:[#allocation57_spill] sm:$0xff] %v9442_v53  ;;  %v9450_v30 = vpop.eup %6820  ;;  %v3304_v53 = vand.u32 2147483647, %v9427_v40  ;;  %v3307_v44 = vand.u32 2147483647, %v9455_v31  ;;  %11475 = vst [vmem:[#allocation68_spill] sm:$0xff] %v9488_v45  ;;  %v9492_v0 = vadd.f32 %v9369_v62, %v9089_v2  ;;  %v9501_v35 = vadd.f32 %v9378_v1, %v9092_v4 }
 0x3b3   : > { %11468 = vst [vmem:[#allocation55_spill] sm:$0xff] %v9450_v30  ;;  %v9461_v34 = vpop.eup %6822  ;;  %11472 = vst [vmem:[#allocation110_spill] sm:$0xff] %v9471_v47  ;;  %v3453_v13 = vmul.f32 1.442695, %v3365_v37  ;;  %v3308_v20 = vand.u32 2147483647, %v9471_v47  ;;  %6838 = vpow2.f32 %v3447_v58  ;;  %v9514_v21 = vadd.f32 %v9380_v6, %v9095_v17 }
 0x3b4   : > { %v9418_v49 = vpop.f32.mrb[50].mxu0  ;;  %v9429_v63 = vpop.f32.mrb[50].mxu1  ;;  %11470 = vst [vmem:[#allocation111_spill] sm:$0xff] %v9461_v34  ;;  %v3368_v9 = vsub.f32 0.0, %v3304_v53  ;;  %11476 = vst [vmem:[#allocation113_spill] sm:$0xff] %v9492_v0  ;;  %6840 = vpow2.f32 %v3451_v24  ;;  %v3371_v62 = vsub.f32 0.0, %v3307_v44 }
 0x3b5   : > { %v9431_v32 = vpop.f32.mrb[51].mxu0  ;;  %v9440_v51 = vpop.f32.mrb[51].mxu1  ;;  %v3457_v53 = vmul.f32 1.442695, %v3367_v39  ;;  %11477 = vst [vmem:[#allocation66_spill] sm:$0xff] %v9501_v35  ;;  %6842 = vpow2.f32 %v3453_v13  ;;  %v3370_v39 = vsub.f32 0.0, %v3306_v12  ;;  %v9522_v12 = vadd.f32 %v9418_v49, %v9086_v50 }
 0x3b6   : > { %v9476_v34 = vpop.eup %6824  ;;  %v3455_v52 = vmul.f32 1.442695, %v3366_v57  ;;  %v3459_v8 = vmul.f32 1.442695, %v3368_v9  ;;  %v3461_v37 = vmul.f32 1.442695, %v3369_v28  ;;  %v9530_v6 = vadd.f32 %v9429_v63, %v9089_v2 }
 0x3b7   : > { %11473 = vst [vmem:[#allocation114_spill] sm:$0xff] %v9476_v34  ;;  %v9480_v61 = vpop.eup %6826  ;;  %v3309_v34 = vand.u32 2147483647, %v9488_v45  ;;  %v3372_v40 = vsub.f32 0.0, %v3308_v20  ;;  %v3311_v1 = vand.u32 2147483647, %v9492_v0  ;;  %6844 = vpow2.f32 %v3457_v53 }
 0x3b8   : > { %v9448_v54 = vpop.f32.mrb[52].mxu0  ;;  %v9457_v29 = vpop.f32.mrb[52].mxu1  ;;  %11474 = vst [vmem:[#allocation59_spill] sm:$0xff] %v9480_v61  ;;  %11479 = vst [vmem:[#allocation76_spill] sm:$0xff] %v9514_v21  ;;  %v3310_v9 = vand.u32 2147483647, %v9501_v35  ;;  %6846 = vpow2.f32 %v3455_v52 }
 0x3b9   : > { %v9459_v56 = vpop.f32.mrb[53].mxu0  ;;  %v9473_v60 = vpop.f32.mrb[53].mxu1  ;;  %11481 = vst [vmem:[#allocation71_spill] sm:$0xff] %v9522_v12  ;;  %v3465_v28 = vmul.f32 1.442695, %v3371_v62  ;;  %v3373_v20 = vsub.f32 0.0, %v3309_v34  ;;  %6848 = vpow2.f32 %v3459_v8  ;;  %v9544_v8 = vadd.f32 %v9431_v32, %v9092_v4 }
 0x3ba   : > { %v9505_v18 = vpop.eup %6828  ;;  %11482 = vst [vmem:[#allocation83_spill] sm:$0xff] %v9530_v6  ;;  %v3463_v58 = vmul.f32 1.442695, %v3370_v39  ;;  %v3312_v49 = vand.u32 2147483647, %v9514_v21  ;;  %6850 = vpow2.f32 %v3461_v37  ;;  %v3374_v62 = vsub.f32 0.0, %v3310_v9 }
 0x3bb   : > { %11478 = vst [vmem:[#allocation118_spill] sm:$0xff] %v9505_v18  ;;  %v9509_v61 = vpop.eup %6830  ;;  %v3467_v18 = vmul.f32 1.442695, %v3372_v40  ;;  %v3313_v63 = vand.u32 2147483647, %v9522_v12  ;;  %11484 = vst [vmem:[#allocation21_spill] sm:$0xff] %v9544_v8  ;;  %v9548_v39 = vadd.f32 %v9440_v51, %v9095_v17  ;;  %6852 = vpow2.f32 %v3465_v28 }
 0x3bc   : > { %v9516_v24 = vpop.eup %6832  ;;  %v11486_v40 = vmax.f32 %v9105_v42, 0.0  ;;  %v3469_v32 = vmul.f32 1.442695, %v3373_v20  ;;  %v3315_v57 = vand.u32 2147483647, %v9530_v6  ;;  %6854 = vpow2.f32 %v3463_v58 }
 0x3bd   : > { %v9483_v25 = vpop.f32.mrb[54].mxu0  ;;  %v9494_v30 = vpop.f32.mrb[54].mxu1  ;;  %11480 = vst [vmem:[#allocation116_spill] sm:$0xff] %v9516_v24  ;;  %v3375_v24 = vsub.f32 0.0, %v3311_v1  ;;  %11485 = vst [vmem:[#allocation79_spill] sm:$0xff] %v9548_v39  ;;  %v11487_v1 = vsel %vm9350_vm1, %v9348_v26, %v9395_v33  ;;  %v3376_v55 = vsub.f32 0.0, %v3312_v49  ;;  %6856 = vpow2.f32 %v3467_v18 }
 0x3be   : > { %v9496_v59 = vpop.f32.mrb[55].mxu0  ;;  %v9503_v22 = vpop.f32.mrb[55].mxu1  ;;  %v9561_v9 = vadd.f32 %v11487_v1, %v11486_v40  ;;  %v3314_v28 = vand.u32 2147483647, %v9544_v8  ;;  %v3471_v1 = vmul.f32 1.442695, %v3374_v62  ;;  %v9583_v49 = vadd.f32 %v9448_v54, %v9086_v50 }
 0x3bf   : > { %v9532_v53 = vpop.eup %6834  ;;  %v3473_v33 = vmul.f32 1.442695, %v3375_v24  ;;  %v3316_v58 = vand.u32 2147483647, %v9548_v39  ;;  %6858 = vpow2.f32 %v3469_v32  ;;  %v3379_v24 = vsub.f32 0.0, %v3315_v57 }
 0x3c0   : > { %v9539_v34 = vpop.eup %6836  ;;  %11488 = vst [vmem:[#allocation91_spill] sm:$0xff] %v9561_v9  ;;  %v3377_v9 = vsub.f32 0.0, %v3313_v63  ;;  %11491 = vst [vmem:[#allocation87_spill] sm:$0xff] %v9583_v49  ;;  %v3475_v62 = vmul.f32 1.442695, %v3376_v55  ;;  %6860 = vlog2.f32 %v3542_v7  ;;  %v3545_v63 = vmul.f32 -0.5, %v9297_v5 }
 0x3c1   : > { %11483 = vst [vmem:[#allocation23_spill] sm:$0xff] %v9539_v34  ;;  %v9568_v34 = vpop.eup %6838  ;;  %v9596_v54 = vadd.f32 %v9457_v29, %v9089_v2  ;;  %6862 = vpow2.f32 %v3473_v33  ;;  %v3378_v21 = vsub.f32 0.0, %v3314_v28  ;;  %v3317_v29 = vand.u32 2147483647, %v9583_v49 }
 0x3c2   : > { %v9572_v10 = vpop.eup %6840  ;;  %6864 = vpow2.f32 %v3471_v1  ;;  %v3477_v7 = vmul.f32 1.442695, %v3377_v9  ;;  %v9614_v33 = vadd.f32 %v9459_v56, %v9092_v4  ;;  %v3578_v28 = vadd.f32 1.0, %v9343_v11 }
 0x3c3   : > { %11489 = vst [vmem:[#allocation27_spill] sm:$0xff] %v9572_v10  ;;  %v9578_v40 = vpop.eup %6842  ;;  %11493 = vst [vmem:[#allocation104_spill] sm:$0xff] %v9596_v54  ;;  %6866 = vpow2.f32 %v3475_v62  ;;  %v3546_v57 = vadd.f32 1.0, %v3545_v63  ;;  %v3319_v9 = vand.u32 2147483647, %v9596_v54  ;;  %v3381_v26 = vsub.f32 0.0, %v3317_v29 }
 0x3c4   : > { %v9524_v44 = vpop.f32.mrb[56].mxu0  ;;  %v9526_v13 = vpop.f32.mrb[56].mxu1  ;;  %11490 = vst [vmem:[#allocation25_spill] sm:$0xff] %v9578_v40  ;;  %v3481_v40 = vmul.f32 1.442695, %v3379_v24  ;;  %11497 = vst [vmem:[#allocation33_spill] sm:$0xff] %v9614_v33  ;;  %6868 = vlog2.f32 %v3578_v28  ;;  %v9634_v12 = vadd.f32 %v9483_v25, %v9086_v50  ;;  %v9652_v39 = vadd.f32 %v9494_v30, %v9089_v2 }
 0x3c5   : > { %v9537_v52 = vpop.f32.mrb[57].mxu0  ;;  %v9550_v37 = vpop.f32.mrb[57].mxu1  ;;  %v3479_v6 = vmul.f32 1.442695, %v3378_v21  ;;  %6870 = vpow2.f32 %v3477_v7  ;;  %v3318_v28 = vand.u32 2147483647, %v9614_v33 }
 0x3c6   : > { %v9591_v10 = vpop.eup %6844  ;;  %6872 = vpow2.f32 %v3481_v40  ;;  %v3581_v24 = vmul.f32 -0.5, %v9343_v11  ;;  %v3383_v29 = vsub.f32 0.0, %v3319_v9  ;;  %11505 = vst [vmem:[#allocation30_spill] sm:$0xff] %v9652_v39  ;;  %v3569_v8 = vadd.f32 1.0, %v9315_v14 }
 0x3c7   : > { %11492 = vst [vmem:[#allocation32_spill] sm:$0xff] %v9591_v10  ;;  %v9600_v18 = vpop.eup %6846  ;;  %v3380_v10 = vsub.f32 0.0, %v3316_v58  ;;  %6874 = vpow2.f32 %v3479_v6  ;;  %v3382_v25 = vsub.f32 0.0, %v3318_v28  ;;  %v9665_v6 = vadd.f32 %v9496_v59, %v9092_v4 }
 0x3c8   : > { %v9552_v31 = vpop.f32.mrb[58].mxu0  ;;  %v9564_v47 = vpop.f32.mrb[58].mxu1  ;;  %11494 = vst [vmem:[#allocation29_spill] sm:$0xff] %v9600_v18  ;;  %v3548_v18 = vand.u32 2147483647, %v9297_v5  ;;  %v3582_v49 = vadd.f32 1.0, %v3581_v24 }
 0x3c9   : > { %v9566_v51 = vpop.f32.mrb[59].mxu0  ;;  %v9576_v20 = vpop.f32.mrb[59].mxu1  ;;  %v3483_v63 = vmul.f32 1.442695, %v3380_v10  ;;  %v3547_v10 = vmul.f32 %v9297_v5, %v3546_v57  ;;  %v3321_v57 = vand.u32 2147483647, %v9634_v12 }
 0x3ca   : > { %v9606_v55 = vpop.eup %6848  ;;  %vm9640_vm2 = vcmp.lt.f32.partialorder %v3548_v18, 0.0004427343  ;;  %v3489_v54 = vmul.f32 1.442695, %v3383_v29  ;;  %v3572_v24 = vmul.f32 -0.5, %v9315_v14  ;;  %v11509_v59 = vmax.f32 %v9114_v46, 0.0 }
 0x3cb   : > { %11495 = vst [vmem:[#allocation97_spill] sm:$0xff] %v9606_v55  ;;  %v9609_v35 = vpop.eup %6850  ;;  %v9626_v55 = vadd.f32 %v9473_v60, %v9095_v17  ;;  %6876 = vpow2.f32 %v3483_v63  ;;  %v3385_v29 = vsub.f32 0.0, %v3321_v57  ;;  %v3322_v33 = vand.u32 2147483647, %v9665_v6 }
 0x3cc   : > { %v9587_v42 = vpop.f32.mrb[60].mxu0  ;;  %11496 = vst [vmem:[#allocation108_spill] sm:$0xff] %v9609_v35  ;;  %v9621_v58 = vpop.eup %6852  ;;  %6878 = vlog2.f32 %v3569_v8  ;;  %v3583_v8 = vmul.f32 %v9343_v11, %v3582_v49  ;;  %v9683_v60 = vadd.f32 %v9503_v22, %v9095_v17  ;;  %v3573_v22 = vadd.f32 1.0, %v3572_v24 }
 0x3cd   : > { %v9589_v0 = vpop.f32.mrb[60].mxu1  ;;  %v9598_v32 = vpop.f32.mrb[61].mxu0  ;;  %11498 = vst [vmem:[#allocation35_spill] sm:$0xff] %v9621_v58  ;;  %11499 = vst [vmem:[#allocation107_spill] sm:$0xff] %v9626_v55  ;;  %v3575_v49 = vand.u32 2147483647, %v9315_v14 }
 0x3ce   : > { %v9604_v45 = vpop.f32.mrb[61].mxu1  ;;  %v9630_v62 = vpop.eup %6854  ;;  %11510 = vst [vmem:[#allocation22_spill] sm:$0xff] %v9683_v60 }
 0x3cf   : > { %11500 = vst [vmem:[#allocation115_spill] sm:$0xff] %v9630_v62  ;;  %v9638_v21 = vpop.eup %6856  ;;  %v3485_v62 = vmul.f32 1.442695, %v3381_v26  ;;  %v3323_v26 = vand.u32 2147483647, %v9652_v39 }
 0x3d0   : > { %11501 = vst [vmem:[#allocation39_spill] sm:$0xff] %v9638_v21  ;;  %v9654_v40 = vpop.eup %6858  ;;  %v3320_v21 = vand.u32 2147483647, %v9626_v55  ;;  %vm9730_vm4 = vcmp.lt.f32.partialorder %v3575_v49, 0.0004427343 }
 0x3d1   : > { %v9619_v1 = vpop.f32.mrb[62].mxu0  ;;  %11506 = vst [vmem:[#allocation20_spill] sm:$0xff] %v9654_v40  ;;  %v6861_v35 = vpop.eup %6860  ;;  %v3584_v40 = vand.u32 2147483647, %v9343_v11  ;;  %6880 = vpow2.f32 %v3485_v62  ;;  %v3387_v57 = vsub.f32 0.0, %v3323_v26  ;;  %v11526_v62 = vld [vmem:[#allocation40_spill] sm:$0xff] }
 0x3d2   : > { %v9628_v56 = vpop.f32.mrb[62].mxu1  ;;  %v9636_v58 = vpop.f32.mrb[63].mxu0  ;;  %v3544_v30 = vmul.f32 0.6931472, %v6861_v35  ;;  %v3384_v35 = vsub.f32 0.0, %v3320_v21  ;;  %v3614_v21 = vadd.f32 1.0, %v9401_v38  ;;  %6882 = vpow2.f32 %v3489_v54 }
 0x3d3   : > { %v9646_v7 = vpop.f32.mrb[63].mxu1  ;;  %v9661_v9 = vpop.eup %6862  ;;  %vm9688_vm3 = vcmp.lt.f32.partialorder %v3584_v40, 0.0004427343  ;;  %v11513_v54 = vpack.c.bf16 %v9099_v36, %v9097_v16  ;;  %v11514_v40 = vpack.c.bf16 %v9109_v43, %v9107_v3  ;;  %v11516_v16 = vpack.c.bf16 %v9116_v23, %v9111_v41 }
 0x3d4   : > { %11504 = vst [vmem:[#allocation112_spill] sm:$0xff] %v9646_v7  ;;  %11507 = vst [vmem:[#allocation117_spill] sm:$0xff] %v9661_v9  ;;  %v9667_v18 = vpop.eup %6864  ;;  %v3550_v63 = vsel %vm9640_vm2, %v3547_v10, %v3544_v30  ;;  %v3487_v7 = vmul.f32 1.442695, %v3382_v25  ;;  %v3491_v11 = vmul.f32 1.442695, %v3384_v35  ;;  %6884 = vlog2.f32 %v3614_v21 }
 0x3d5   : > { %11508 = vst [vmem:[#allocation24_spill] sm:$0xff] %v9667_v18  ;;  %v9675_v28 = vpop.eup %6866  ;;  %v4110_v9 = vadd.f32 %v3550_v63, %v11509_v59  ;;  %v3386_v30 = vsub.f32 0.0, %v3322_v33  ;;  %v11515_v63 = vmax.f32 %v9172_v19, 0.0  ;;  %v11517_v36 = vpack.c.bf16 %v9120_v15, %v9118_v48  ;;  %v11521_v15 = vld [vmem:[#allocation38_spill] sm:$0xff]  ;;  %v11523_v21 = vld [vmem:[#allocation80_spill] sm:$0xff] }
 0x3d6   : > { %v6869_v18 = vpop.eup %6868  ;;  %v3324_v3 = vand.u32 2147483647, %v9683_v60  ;;  %v9720_v43 = vadd.f32 %v9524_v44, %v9086_v50  ;;  %6886 = vpow2.f32 %v3487_v7  ;;  %v3497_v59 = vmul.f32 1.442695, %v3387_v57 }
 0x3d7   : > { %v9686_v10 = vpop.eup %6870  ;;  %4514 = vmatprep.mubr.f32.mxu0 %v4110_v9  ;;  %4836 = vmatprep.mubr.f32.mxu1 %v4110_v9  ;;  %v3580_v46 = vmul.f32 0.6931472, %v6869_v18  ;;  %v3493_v9 = vmul.f32 1.442695, %v3385_v29  ;;  %v9727_v41 = vadd.f32 %v9526_v13, %v9089_v2  ;;  %6888 = vpow2.f32 %v3491_v11  ;;  %v11525_v13 = vld [vmem:[#allocation43_spill] sm:$0xff] }
 0x3d8   : > { %v9692_v25 = vpop.eup %6872  ;;  %4515 = vmatmul.mubr.f32.vlgmr.msra.gmra.mrb[64].mxu0 %v9411_v27  ;;  %4837 = vmatmul.mubr.f32.vlgmr.msra.gmra.mrb[64].mxu1 %v9411_v27  ;;  %v3617_v27 = vmul.f32 -0.5, %v9401_v38  ;;  %v3574_v23 = vmul.f32 %v9315_v14, %v3573_v22  ;;  %v3605_v44 = vadd.f32 1.0, %v11521_v15  ;;  %v3495_v7 = vmul.f32 1.442695, %v3386_v30  ;;  %v11531_v30 = vld [vmem:[#allocation44_spill] sm:$0xff] }
 0x3d9   : > { %5880 = vmatpush1.bf16.msra.mxu0 %v11513_v54  ;;  %6008 = vmatpush1.bf16.msra.mxu1 %v11514_v40  ;;  %v3586_v18 = vsel %vm9688_vm3, %v3583_v8, %v3580_v46  ;;  %v9706_v26 = vpop.eup %6874  ;;  %11518 = vst [vmem:[#allocation28_spill] sm:$0xff] %v9727_v41  ;;  %6890 = vpow2.f32 %v3493_v9  ;;  %v11522_v8 = vld [vmem:[#allocation41_spill] sm:$0xff]  ;;  %v11527_v57 = vpack.c.bf16 %v11525_v13, %v11526_v62  ;;  %v3388_v49 = vsub.f32 0.0, %v3324_v3  ;;  %v11528_v40 = vld [vmem:[#allocation88_spill] sm:$0xff] }
 0x3da   : > { %v4114_v35 = vadd.f32 %v3586_v18, %v11515_v63  ;;  %5882 = vmatprep.subr.bf16.mxu0 %v11516_v16  ;;  %6010 = vmatprep.subr.bf16.mxu1 %v11517_v36  ;;  %v9722_v33 = vpop.eup %6876  ;;  %v11524_v46 = vpack.c.bf16 %v11522_v8, %v11523_v21  ;;  %v3618_v11 = vadd.f32 1.0, %v3617_v27  ;;  %v9743_v14 = vadd.f32 %v9537_v52, %v9092_v4  ;;  %v11529_v18 = vld [vmem:[#allocation42_spill] sm:$0xff]  ;;  %v11532_v63 = vld [vmem:[#allocation45_spill] sm:$0xff]  ;;  %v11548_v52 = vld [vmem:[#allocation56_spill] sm:$0xff] }
 0x3db   : > { %v6879_v29 = vpop.eup %6878  ;;  %v3325_v54 = vand.u32 2147483647, %v9720_v43  ;;  %6892 = vlog2.f32 %v3605_v44  ;;  %v11530_v9 = vpack.c.bf16 %v11528_v40, %v11529_v18  ;;  %v3327_v36 = vand.u32 2147483647, %v9727_v41  ;;  %v11539_v40 = vld [vmem:[#allocation47_spill] sm:$0xff]  ;;  %v4341_v41 = vld [vmem:[#allocation8 + $0x540] sm:$0xff] }
 0x3dc   : > { %4520 = vmatprep.mubr.f32.mxu0 %v4114_v35  ;;  %4842 = vmatprep.mubr.f32.mxu1 %v4114_v35  ;;  %v3571_v22 = vmul.f32 0.6931472, %v6879_v29  ;;  %v11533_v35 = vpack.c.bf16 %v11531_v30, %v11532_v63  ;;  %v9752_v16 = vpop.eup %6880  ;;  %6894 = vpow2.f32 %v3497_v59  ;;  %v3620_v44 = vand.u32 2147483647, %v9401_v38  ;;  %v11536_v59 = vld [vmem:[#allocation90_spill] sm:$0xff] }
 0x3dd   : > { %5884 = vmatpush1.bf16.msra.mxu0 %v11524_v46  ;;  %6012 = vmatpush1.bf16.msra.mxu1 %v11527_v57  ;;  %v3608_v29 = vmul.f32 -0.5, %v11521_v15  ;;  %v9763_v8 = vadd.f32 %v9550_v37, %v9095_v17  ;;  %v9765_v21 = vpop.eup %6882  ;;  %v11537_v46 = vmax.f32 %v11536_v59, 0.0  ;;  %6896 = vpow2.f32 %v3495_v7  ;;  %v11538_v57 = vld [vmem:[#allocation46_spill] sm:$0xff]  ;;  %v11545_v7 = vld [vmem:[#allocation48_spill] sm:$0xff]  ;;  %v11546_v59 = vld [vmem:[#allocation49_spill] sm:$0xff] }
 0x3de   : > { %5886 = vmatprep.subr.bf16.mxu0 %v11530_v9  ;;  %6014 = vmatprep.subr.bf16.mxu1 %v11533_v35  ;;  %v3577_v3 = vsel %vm9730_vm4, %v3574_v23, %v3571_v22  ;;  %11535 = vst [vmem:[#allocation31_spill] sm:$0xff] %v9765_v21  ;;  %v3326_v62 = vand.u32 2147483647, %v9743_v14  ;;  %v11540_v48 = vpack.c.bf16 %v11538_v57, %v11539_v40  ;;  %v11541_v23 = vld [vmem:[#allocation75_spill] sm:$0xff]  ;;  %v11542_v22 = vld [vmem:[#allocation52_spill] sm:$0xff]  ;;  %v6885_v37 = vpop.eup %6884  ;;  %v3389_v19 = vsub.f32 0.0, %v3325_v54 }
 0x3df   : > { %11534 = vst [vmem:[#allocation34_spill] sm:$0xff] %v9763_v8  ;;  %v4113_v13 = vadd.f32 %v3577_v3, %v11537_v46  ;;  %v11543_v18 = vpack.c.bf16 %v11541_v23, %v11542_v22  ;;  %v11544_v9 = vld [vmem:[#allocation111_spill] sm:$0xff]  ;;  %v3499_v63 = vmul.f32 1.442695, %v3388_v49  ;;  %v3619_v35 = vmul.f32 %v9401_v38, %v3618_v11  ;;  %v11549_v57 = vld [vmem:[#allocation94_spill] sm:$0xff] }
 0x3e0   : > { %v3650_v30 = vadd.f32 1.0, %v11544_v9  ;;  %v3611_v3 = vand.u32 2147483647, %v11521_v15  ;;  %v11547_v46 = vpack.c.bf16 %v11545_v7, %v11546_v59  ;;  %v11550_v40 = vpack.c.bf16 %v11548_v52, %v11549_v57  ;;  %v9791_v22 = vpop.eup %6886  ;;  %v11563_v52 = vld [vmem:[#allocation100_spill] sm:$0xff] }
 0x3e1   : > { %5888 = vmatpush1.bf16.msra.mxu0 %v11540_v48  ;;  %6016 = vmatpush1.bf16.msra.mxu1 %v11543_v18  ;;  %v3616_v48 = vmul.f32 0.6931472, %v6885_v37  ;;  %v3391_v23 = vsub.f32 0.0, %v3327_v36  ;;  %v9787_v49 = vadd.f32 %v9552_v31, %v9086_v50  ;;  %vm3621_vm5 = vcmp.lt.f32.partialorder %v3620_v44, 0.0004427343  ;;  %v11555_v44 = vld [vmem:[#allocation99_spill] sm:$0xff] }
 0x3e2   : > { %5890 = vmatprep.subr.bf16.mxu0 %v11547_v46  ;;  %6018 = vmatprep.subr.bf16.mxu1 %v11550_v40  ;;  %6898 = vlog2.f32 %v3650_v30  ;;  %v3609_v11 = vadd.f32 1.0, %v3608_v29  ;;  %v3328_v54 = vand.u32 2147483647, %v9763_v8  ;;  %v3390_v7 = vsub.f32 0.0, %v3326_v62  ;;  %v11553_v30 = vld [vmem:[#allocation85_spill] sm:$0xff]  ;;  %v11556_v37 = vld [vmem:[#allocation54_spill] sm:$0xff]  ;;  %v9804_v29 = vpop.eup %6888 }
 0x3e3   : > { %4521 = vmatmul.mubr.f32.gmra.mrb[66].mxu0 %v4113_v13  ;;  %4843 = vmatmul.mubr.f32.gmra.mrb[66].mxu1 %v4113_v13  ;;  %v3622_v18 = vsel %vm3621_vm5, %v3619_v35, %v3616_v48  ;;  %v9796_v36 = vadd.f32 %v9564_v47, %v9089_v2  ;;  %v11552_v13 = vld [vmem:[#allocation98_spill] sm:$0xff]  ;;  %v11557_v59 = vpack.c.bf16 %v11555_v44, %v11556_v37  ;;  %v11558_v46 = vld [vmem:[#allocation67_spill] sm:$0xff]  ;;  %v3501_v40 = vmul.f32 1.442695, %v3389_v19  ;;  %v11562_v48 = vld [vmem:[#allocation61_spill] sm:$0xff]  ;;  %v9819_v37 = vpop.eup %6890 }
 0x3e4   : > { %v11554_v31 = vpack.c.bf16 %v11552_v13, %v11553_v30  ;;  %v11559_v57 = vmax.f32 %v11558_v46, 0.0  ;;  %vm9808_vm6 = vcmp.lt.f32.partialorder %v3611_v3, 0.0004427343  ;;  %v3653_v47 = vmul.f32 -0.5, %v11544_v9  ;;  %v11565_v30 = vld [vmem:[#allocation58_spill] sm:$0xff]  ;;  %v11568_v3 = vld [vmem:[#allocation57_spill] sm:$0xff] }
 0x3e5   : > { %11551 = vst [vmem:[#allocation38_spill] sm:$0xff] %v9796_v36  ;;  %6020 = vmatpush1.bf16.msra.mxu1 %v11557_v59  ;;  %v11564_v13 = vpack.c.bf16 %v11562_v48, %v11563_v52  ;;  %6900 = vpow2.f32 %v3499_v63  ;;  %v3505_v59 = vmul.f32 1.442695, %v3391_v23  ;;  %v3329_v19 = vand.u32 2147483647, %v9787_v49  ;;  %v6893_v46 = vpop.eup %6892  ;;  %v4345_v8 = vld [vmem:[#allocation8 + $0x560] sm:$0xff] }
 0x3e6   : > { %5892 = vmatpush1.bf16.msra.mxu0 %v11554_v31  ;;  %v4118_v35 = vadd.f32 %v3622_v18, %v11559_v57  ;;  %v11566_v31 = vld [vmem:[#allocation102_spill] sm:$0xff]  ;;  %v3641_v18 = vadd.f32 1.0, %v11568_v3  ;;  %v3610_v57 = vmul.f32 %v11521_v15, %v3609_v11  ;;  %v3392_v5 = vsub.f32 0.0, %v3328_v54 }
 0x3e7   : > { %5894 = vmatprep.subr.bf16.mxu0 %v11564_v13  ;;  %v11567_v44 = vpack.c.bf16 %v11565_v30, %v11566_v31  ;;  %v3656_v52 = vand.u32 2147483647, %v11544_v9  ;;  %v9827_v48 = vadd.f32 %v9566_v51, %v9092_v4  ;;  %v9829_v13 = vpop.eup %6894  ;;  %v3607_v63 = vmul.f32 0.6931472, %v6893_v46  ;;  %v11570_v31 = vld [vmem:[#allocation82_spill] sm:$0xff] }
 0x3e8   : > { %4526 = vmatprep.mubr.f32.mxu0 %v4118_v35  ;;  %4848 = vmatprep.mubr.f32.mxu1 %v4118_v35  ;;  %11569 = vst [vmem:[#allocation41_spill] sm:$0xff] %v9829_v13  ;;  %v3503_v23 = vmul.f32 1.442695, %v3390_v7  ;;  %v3331_v30 = vand.u32 2147483647, %v9796_v36  ;;  %6902 = vlog2.f32 %v3641_v18  ;;  %v3654_v54 = vadd.f32 1.0, %v3653_v47  ;;  %v9841_v35 = vpop.eup %6896 }
 0x3e9   : > { %6022 = vmatprep.subr.bf16.mxu1 %v11567_v44  ;;  %v11571_v44 = vld [vmem:[#allocation69_spill] sm:$0xff]  ;;  %v9839_v51 = vadd.f32 %v9576_v20, %v9095_v17  ;;  %6904 = vpow2.f32 %v3501_v40  ;;  %v3613_v7 = vsel %vm9808_vm6, %v3610_v57, %v3607_v63  ;;  %v3393_v18 = vsub.f32 0.0, %v3329_v19 }
 0x3ea   : > { %v11572_v38 = vpack.c.bf16 %v11570_v31, %v11571_v44  ;;  %v3644_v46 = vmul.f32 -0.5, %v11568_v3  ;;  %6906 = vpow2.f32 %v3505_v59  ;;  %v3507_v15 = vmul.f32 1.442695, %v3392_v5 }
 0x3eb   : > { %11573 = vst [vmem:[#allocation80_spill] sm:$0xff] %v9839_v51  ;;  %v3330_v47 = vand.u32 2147483647, %v9827_v48  ;;  %6908 = vpow2.f32 %v3503_v23  ;;  %vm9849_vm7 = vcmp.lt.f32.partialorder %v3656_v52, 0.0004427343  ;;  %v3395_v40 = vsub.f32 0.0, %v3331_v30 }
 0x3ec   : > { %5896 = vmatpush1.bf16.msra.mxu0 %v11572_v38  ;;  %v11574_v38 = vld [vmem:[#allocation95_spill] sm:$0xff]  ;;  %v6899_v11 = vpop.eup %6898  ;;  %v3686_v62 = vadd.f32 1.0, %v9509_v61  ;;  %v3655_v59 = vmul.f32 %v11544_v9, %v3654_v54  ;;  %v3647_v57 = vand.u32 2147483647, %v11568_v3  ;;  %v3332_v5 = vand.u32 2147483647, %v9839_v51 }
 0x3ed   : > { %v11575_v31 = vmax.f32 %v11574_v38, 0.0  ;;  %v3652_v19 = vmul.f32 0.6931472, %v6899_v11  ;;  %v3509_v63 = vmul.f32 1.442695, %v3393_v18  ;;  %v9859_v52 = vadd.f32 %v9587_v42, %v9086_v50  ;;  %v11579_v9 = vld [vmem:[#allocation84_spill] sm:$0xff] }
 0x3ee   : > { %6910 = vlog2.f32 %v3686_v62  ;;  %v3394_v11 = vsub.f32 0.0, %v3330_v47  ;;  %v11580_v54 = vmax.f32 %v11579_v9, 0.0  ;;  %v3689_v18 = vmul.f32 -0.5, %v9509_v61  ;;  %v11584_v47 = vld [vmem:[#allocation59_spill] sm:$0xff] }
 0x3ef   : > { %v4117_v44 = vadd.f32 %v3613_v7, %v11575_v31  ;;  %v3645_v7 = vadd.f32 1.0, %v3644_v46  ;;  %6912 = vpow2.f32 %v3507_v15  ;;  %v3658_v23 = vsel %vm9849_vm7, %v3655_v59, %v3652_v19  ;;  %v9864_v38 = vpop.eup %6900 }
 0x3f0   : > { %11578 = vst [vmem:[#allocation43_spill] sm:$0xff] %v9864_v38  ;;  %v4122_v31 = vadd.f32 %v3658_v23, %v11580_v54  ;;  %v9871_v46 = vadd.f32 %v9589_v0, %v9089_v2  ;;  %vm9873_vm8 = vcmp.lt.f32.partialorder %v3647_v57, 0.0004427343  ;;  %v3396_v20 = vsub.f32 0.0, %v3332_v5  ;;  %v4335_v57 = vld [vmem:[#allocation8 + $0x510] sm:$0xff] }
 0x3f1   : > { %4527 = vmatmul.mubr.f32.gmra.mrb[68].mxu0 %v4117_v44  ;;  %4849 = vmatmul.mubr.f32.gmra.mrb[68].mxu1 %v4117_v44  ;;  %v3513_v44 = vmul.f32 1.442695, %v3395_v40  ;;  %v3677_v62 = vadd.f32 1.0, %v11584_v47  ;;  %6914 = vpow2.f32 %v3509_v63  ;;  %v3646_v40 = vmul.f32 %v11568_v3, %v3645_v7  ;;  %v4339_v23 = vld [vmem:[#allocation8 + $0x530] sm:$0xff] }
 0x3f2   : > { %11581 = vst [vmem:[#allocation40_spill] sm:$0xff] %v9871_v46  ;;  %v6903_v19 = vpop.eup %6902  ;;  %4532 = vmatprep.mubr.f32.mxu0 %v4122_v31  ;;  %4854 = vmatprep.mubr.f32.mxu1 %v4122_v31  ;;  %v3333_v59 = vand.u32 2147483647, %v9859_v52  ;;  %v9883_v0 = vadd.f32 %v9598_v32, %v9092_v4  ;;  %v3511_v54 = vmul.f32 1.442695, %v3394_v11  ;;  %v3690_v31 = vadd.f32 1.0, %v3689_v18 }
 0x3f3   : > { %v3643_v9 = vmul.f32 0.6931472, %v6903_v19  ;;  %v3692_v5 = vand.u32 2147483647, %v9509_v61  ;;  %6916 = vlog2.f32 %v3677_v62  ;;  %v9886_v30 = vpop.eup %6904  ;;  %v3335_v63 = vand.u32 2147483647, %v9871_v46 }
 0x3f4   : > { %6918 = vpow2.f32 %v3513_v44  ;;  %v9891_v3 = vadd.f32 %v9604_v45, %v9095_v17  ;;  %v9893_v7 = vpop.eup %6906  ;;  %v3515_v19 = vmul.f32 1.442695, %v3396_v20  ;;  %v3680_v11 = vmul.f32 -0.5, %v11584_v47  ;;  %v11587_v44 = vld [vmem:[#allocation73_spill] sm:$0xff] }
 0x3f5   : > { %11586 = vst [vmem:[#allocation42_spill] sm:$0xff] %v9893_v7  ;;  %v3649_v32 = vsel %vm9873_vm8, %v3646_v40, %v3643_v9  ;;  %v3334_v62 = vand.u32 2147483647, %v9883_v0  ;;  %v9899_v15 = vpop.eup %6908  ;;  %v11588_v18 = vmax.f32 %v11587_v44, 0.0  ;;  %v3397_v27 = vsub.f32 0.0, %v3333_v59  ;;  %v11622_v7 = vld [vmem:[#allocation103_spill] sm:$0xff] }
 0x3f6   : > { %11585 = vst [vmem:[#allocation88_spill] sm:$0xff] %v9891_v3  ;;  %v3683_v46 = vand.u32 2147483647, %v11584_v47  ;;  %v6023_v45 = vpack.c.bf16 %v4339_v23, %v4335_v57  ;;  %6920 = vpow2.f32 %v3511_v54  ;;  %vm9904_vm9 = vcmp.lt.f32.partialorder %v3692_v5, 0.0004427343 }
 0x3f7   : > { %v4121_v24 = vadd.f32 %v3649_v32, %v11588_v18  ;;  %v3722_v20 = vadd.f32 1.0, %v9568_v34  ;;  %v3691_v9 = vmul.f32 %v9509_v61, %v3690_v31  ;;  %v3399_v44 = vsub.f32 0.0, %v3335_v63  ;;  %v4342_v31 = vld [vmem:[#allocation8 + $0x548] sm:$0xff] }
 0x3f8   : > { %v6911_v40 = vpop.eup %6910  ;;  %v3336_v59 = vand.u32 2147483647, %v9891_v3  ;;  %v9914_v57 = vadd.f32 %v9619_v1, %v9086_v50  ;;  %v3681_v5 = vadd.f32 1.0, %v3680_v11  ;;  %v3398_v32 = vsub.f32 0.0, %v3334_v62  ;;  %6024 = vmatpush1.bf16.msra.mxu1 %v6023_v45  ;;  %v4346_v50 = vld [vmem:[#allocation8 + $0x568] sm:$0xff]  ;;  %v11595_v45 = vld [vmem:[#allocation62_spill] sm:$0xff] }
 0x3f9   : > { %4533 = vmatmul.mubr.f32.gmra.mrb[70].mxu0 %v4121_v24  ;;  %4855 = vmatmul.mubr.f32.gmra.mrb[70].mxu1 %v4121_v24  ;;  %v9916_v23 = vpop.eup %6912  ;;  %v3688_v54 = vmul.f32 0.6931472, %v6911_v40  ;;  %6922 = vlog2.f32 %v3722_v20  ;;  %v3517_v18 = vmul.f32 1.442695, %v3397_v27  ;;  %vm9918_vm10 = vcmp.lt.f32.partialorder %v3683_v46, 0.0004427343 }
 0x3fa   : > { %11591 = vst [vmem:[#allocation44_spill] sm:$0xff] %v9916_v23  ;;  %6924 = vpow2.f32 %v3515_v19  ;;  %v9924_v61 = vadd.f32 %v9628_v56, %v9089_v2  ;;  %v3725_v11 = vmul.f32 -0.5, %v9568_v34  ;;  %v3337_v19 = vand.u32 2147483647, %v9914_v57  ;;  %v4344_v27 = vld [vmem:[#allocation8 + $0x558] sm:$0xff] }
 0x3fb   : > { %v3694_v1 = vsel %vm9904_vm9, %v3691_v9, %v3688_v54  ;;  %v4348_v46 = vld [vmem:[#allocation8 + $0x578] sm:$0xff]  ;;  %v9931_v62 = vpop.eup %6914  ;;  %v11596_v20 = vmax.f32 %v11595_v45, 0.0  ;;  %v3521_v2 = vmul.f32 1.442695, %v3399_v44  ;;  %v3400_v56 = vsub.f32 0.0, %v3336_v59 }
 0x3fc   : > { %11594 = vst [vmem:[#allocation45_spill] sm:$0xff] %v9924_v61  ;;  %v3713_v42 = vadd.f32 1.0, %v9532_v53  ;;  %v3682_v36 = vmul.f32 %v11584_v47, %v3681_v5  ;;  %v3519_v9 = vmul.f32 1.442695, %v3398_v32  ;;  %v3728_v54 = vand.u32 2147483647, %v9568_v34 }
 0x3fd   : > { %v4126_v40 = vadd.f32 %v3694_v1, %v11596_v20  ;;  %v6917_v3 = vpop.eup %6916  ;;  %v5897_v63 = vpack.c.bf16 %v4346_v50, %v4342_v31  ;;  %v3339_v1 = vand.u32 2147483647, %v9924_v61  ;;  %v6025_v44 = vpack.c.bf16 %v4348_v46, %v4344_v27  ;;  %v4347_v50 = vld [vmem:[#allocation8 + $0x570] sm:$0xff] }
 0x3fe   : > { %v9938_v51 = vpop.eup %6918  ;;  %v3679_v39 = vmul.f32 0.6931472, %v6917_v3  ;;  %6926 = vlog2.f32 %v3713_v42  ;;  %v3726_v59 = vadd.f32 1.0, %v3725_v11  ;;  %v3401_v45 = vsub.f32 0.0, %v3337_v19  ;;  %v4343_v3 = vld [vmem:[#allocation8 + $0x550] sm:$0xff] }
 0x3ff   : > { %11597 = vst [vmem:[#allocation90_spill] sm:$0xff] %v9938_v51  ;;  %4538 = vmatprep.mubr.f32.mxu0 %v4126_v40  ;;  %4860 = vmatprep.mubr.f32.mxu1 %v4126_v40  ;;  %6928 = vpow2.f32 %v3517_v18  ;;  %v9943_v47 = vadd.f32 %v9636_v58, %v9092_v4  ;;  %v3523_v32 = vmul.f32 1.442695, %v3400_v56  ;;  %v5899_v31 = vpack.c.bf16 %v4345_v8, %v4341_v41  ;;  %v11598_v42 = vld [vmem:[#allocation106_spill] sm:$0xff]  ;;  %v11602_v40 = vld [vmem:[#allocation29_spill] sm:$0xff] }
 0x400   : > { %5898 = vmatprep.subr.bf16.mxu0 %v5897_v63  ;;  %6930 = vpow2.f32 %v3521_v2  ;;  %v3685_v5 = vsel %vm9918_vm10, %v3682_v36, %v3679_v39  ;;  %6026 = vmatprep.subr.bf16.mxu1 %v6025_v44  ;;  %v9947_v20 = vpop.eup %6920  ;;  %v11599_v18 = vmax.f32 %v11598_v42, 0.0  ;;  %vm9951_vm11 = vcmp.lt.f32.partialorder %v3728_v54, 0.0004427343  ;;  %v4350_v56 = vld [vmem:[#allocation8 + $0x588] sm:$0xff]  ;;  %v4352_v42 = vld [vmem:[#allocation8 + $0x598] sm:$0xff]  ;;  %v11609_v39 = vld [vmem:[#allocation112_spill] sm:$0xff] }
 0x401   : > { %v3716_v4 = vmul.f32 -0.5, %v9532_v53  ;;  %v3719_v58 = vand.u32 2147483647, %v9532_v53  ;;  %6932 = vpow2.f32 %v3519_v9  ;;  %v3403_v24 = vsub.f32 0.0, %v3339_v1  ;;  %5900 = vmatpush1.bf16.msra.mxu0 %v5899_v31  ;;  %v4354_v36 = vld [vmem:[#allocation8 + $0x5a8] sm:$0xff]  ;;  %v4356_v31 = vld [vmem:[#allocation8 + $0x5b8] sm:$0xff] }
 0x402   : > { %v4125_v11 = vadd.f32 %v3685_v5, %v11599_v18  ;;  %v3338_v41 = vand.u32 2147483647, %v9943_v47  ;;  %v3727_v19 = vmul.f32 %v9568_v34, %v3726_v59  ;;  %v3525_v27 = vmul.f32 1.442695, %v3401_v45  ;;  %v11604_v1 = vld [vmem:[#allocation25_spill] sm:$0xff]  ;;  %v4349_v59 = vld [vmem:[#allocation8 + $0x580] sm:$0xff] }
 0x403   : > { %v6923_v8 = vpop.eup %6922  ;;  %v6027_v46 = vpack.c.bf16 %v4347_v50, %v4343_v3  ;;  %v3758_v2 = vadd.f32 1.0, %v11602_v40  ;;  %6934 = vpow2.f32 %v3523_v32  ;;  %v3749_v5 = vadd.f32 1.0, %v11604_v1  ;;  %v4353_v45 = vld [vmem:[#allocation8 + $0x5a0] sm:$0xff]  ;;  %v4355_v61 = vld [vmem:[#allocation8 + $0x5b0] sm:$0xff] }
 0x404   : > { %4539 = vmatmul.mubr.f32.gmra.mrb[72].mxu0 %v4125_v11  ;;  %4861 = vmatmul.mubr.f32.gmra.mrb[72].mxu1 %v4125_v11  ;;  %v9961_v54 = vpop.eup %6924  ;;  %v3724_v9 = vmul.f32 0.6931472, %v6923_v8  ;;  %v3402_v44 = vsub.f32 0.0, %v3338_v41  ;;  %v3717_v18 = vadd.f32 1.0, %v3716_v4  ;;  %vm9964_vm12 = vcmp.lt.f32.partialorder %v3719_v58, 0.0004427343 }
 0x405   : > { %11603 = vst [vmem:[#allocation46_spill] sm:$0xff] %v9961_v54  ;;  %6028 = vmatpush1.bf16.msra.mxu1 %v6027_v46  ;;  %6936 = vlog2.f32 %v3758_v2  ;;  %v3761_v34 = vmul.f32 -0.5, %v11602_v40  ;;  %v3529_v3 = vmul.f32 1.442695, %v3403_v24  ;;  %v3752_v50 = vmul.f32 -0.5, %v11604_v1  ;;  %v11607_v41 = vld [vmem:[#allocation92_spill] sm:$0xff] }
 0x406   : > { %v3730_v32 = vsel %vm9951_vm11, %v3727_v19, %v3724_v9  ;;  %6938 = vlog2.f32 %v3749_v5  ;;  %v11608_v8 = vmax.f32 %v11607_v41, 0.0  ;;  %v3527_v58 = vmul.f32 1.442695, %v3402_v44  ;;  %v4351_v2 = vld [vmem:[#allocation8 + $0x590] sm:$0xff] }
 0x407   : > { %6940 = vpow2.f32 %v3525_v27  ;;  %v9976_v46 = vadd.f32 %v11609_v39, %v9095_v17  ;;  %v3764_v55 = vand.u32 2147483647, %v11602_v40  ;;  %v5901_v63 = vpack.c.bf16 %v4354_v36, %v4350_v56  ;;  %v11611_v56 = vld [vmem:[#allocation115_spill] sm:$0xff]  ;;  %v4359_v11 = vld [vmem:[#allocation8 + $0x5d0] sm:$0xff] }
 0x408   : > { %v4130_v4 = vadd.f32 %v3730_v32, %v11608_v8  ;;  %v6927_v60 = vpop.eup %6926  ;;  %v6029_v19 = vpack.c.bf16 %v4356_v31, %v4352_v42  ;;  %v5903_v24 = vpack.c.bf16 %v4353_v45, %v4349_v59  ;;  %v3718_v27 = vmul.f32 %v9532_v53, %v3717_v18  ;;  %v4358_v42 = vld [vmem:[#allocation8 + $0x5c8] sm:$0xff]  ;;  %v4360_v59 = vld [vmem:[#allocation8 + $0x5d8] sm:$0xff]  ;;  %v11612_v18 = vld [vmem:[#allocation108_spill] sm:$0xff] }
 0x409   : > { %v9979_v9 = vpop.eup %6928  ;;  %v3715_v5 = vmul.f32 0.6931472, %v6927_v60  ;;  %v3762_v32 = vadd.f32 1.0, %v3761_v34  ;;  %6942 = vpow2.f32 %v3529_v3  ;;  %v3753_v39 = vadd.f32 1.0, %v3752_v50  ;;  %5902 = vmatprep.subr.bf16.mxu0 %v5901_v63  ;;  %v4362_v31 = vld [vmem:[#allocation8 + $0x5e8] sm:$0xff]  ;;  %v4364_v45 = vld [vmem:[#allocation8 + $0x5f8] sm:$0xff] }
 0x40a   : > { %4544 = vmatprep.mubr.f32.mxu0 %v4130_v4  ;;  %4866 = vmatprep.mubr.f32.mxu1 %v4130_v4  ;;  %v9983_v17 = vpop.eup %6930  ;;  %v6031_v41 = vpack.c.bf16 %v4355_v61, %v4351_v2  ;;  %v3794_v36 = vadd.f32 1.0, %v11611_v56  ;;  %6944 = vpow2.f32 %v3527_v58  ;;  %v3755_v53 = vand.u32 2147483647, %v11604_v1  ;;  %v4357_v3 = vld [vmem:[#allocation8 + $0x5c0] sm:$0xff]  ;;  %v11613_v61 = vld [vmem:[#allocation81_spill] sm:$0xff]  ;;  %v4363_v58 = vld [vmem:[#allocation8 + $0x5f0] sm:$0xff] }
 0x40b   : > { %11610 = vst [vmem:[#allocation47_spill] sm:$0xff] %v9983_v17  ;;  %6030 = vmatprep.subr.bf16.mxu1 %v6029_v19  ;;  %v3721_v60 = vsel %vm9964_vm12, %v3718_v27, %v3715_v5  ;;  %5904 = vmatpush1.bf16.msra.mxu0 %v5903_v24  ;;  %v3785_v34 = vadd.f32 1.0, %v11612_v18  ;;  %v4361_v50 = vld [vmem:[#allocation8 + $0x5e0] sm:$0xff]  ;;  %v9990_v8 = vpop.eup %6932  ;;  %v11614_v4 = vmax.f32 %v11613_v61, 0.0  ;;  %vm9995_vm13 = vcmp.lt.f32.partialorder %v3764_v55, 0.0004427343 }
 0x40c   : > { %6032 = vmatpush1.bf16.msra.mxu1 %v6031_v41  ;;  %6946 = vlog2.f32 %v3794_v36  ;;  %v3763_v24 = vmul.f32 %v11602_v40, %v3762_v32  ;;  %v3797_v5 = vmul.f32 -0.5, %v11611_v56  ;;  %v5905_v27 = vpack.c.bf16 %v4362_v31, %v4358_v42  ;;  %v4366_v41 = vld [vmem:[#allocation8 + $0x608] sm:$0xff]  ;;  %v4368_v31 = vld [vmem:[#allocation8 + $0x618] sm:$0xff] }
 0x40d   : > { %v4129_v2 = vadd.f32 %v3721_v60, %v11614_v4  ;;  %6948 = vlog2.f32 %v3785_v34  ;;  %v10001_v44 = vpop.eup %6934  ;;  %v3788_v60 = vmul.f32 -0.5, %v11612_v18  ;;  %v6033_v55 = vpack.c.bf16 %v4364_v45, %v4360_v59  ;;  %v11618_v4 = vld [vmem:[#allocation24_spill] sm:$0xff]  ;;  %v4370_v36 = vld [vmem:[#allocation8 + $0x628] sm:$0xff] }
 0x40e   : > { %11617 = vst [vmem:[#allocation75_spill] sm:$0xff] %v10001_v44  ;;  %v5907_v61 = vpack.c.bf16 %v4361_v50, %v4357_v3  ;;  %v3830_v63 = vadd.f32 1.0, %v11618_v4  ;;  %v3754_v51 = vmul.f32 %v11604_v1, %v3753_v39  ;;  %vm10006_vm14 = vcmp.lt.f32.partialorder %v3755_v53, 0.0004427343  ;;  %5906 = vmatprep.subr.bf16.mxu0 %v5905_v27  ;;  %v11621_v45 = vld [vmem:[#allocation20_spill] sm:$0xff]  ;;  %v4372_v50 = vld [vmem:[#allocation8 + $0x638] sm:$0xff] }
 0x40f   : > { %4545 = vmatmul.mubr.f32.gmra.mrb[74].mxu0 %v4129_v2  ;;  %4867 = vmatmul.mubr.f32.gmra.mrb[74].mxu1 %v4129_v2  ;;  %v6937_v17 = vpop.eup %6936  ;;  %v3800_v32 = vand.u32 2147483647, %v11611_v56  ;;  %v6035_v42 = vpack.c.bf16 %v4363_v58, %v4359_v11  ;;  %v3791_v59 = vand.u32 2147483647, %v11612_v18  ;;  %v3821_v3 = vadd.f32 1.0, %v11621_v45  ;;  %v4365_v11 = vld [vmem:[#allocation8 + $0x600] sm:$0xff] }
 0x410   : > { %v6939_v34 = vpop.eup %6938  ;;  %v3760_v2 = vmul.f32 0.6931472, %v6937_v17  ;;  %6034 = vmatprep.subr.bf16.mxu1 %v6033_v55  ;;  %5908 = vmatpush1.bf16.msra.mxu0 %v5907_v61  ;;  %6950 = vlog2.f32 %v3830_v63  ;;  %v3798_v53 = vadd.f32 1.0, %v3797_v5  ;;  %v3833_v44 = vmul.f32 -0.5, %v11618_v4  ;;  %v4369_v58 = vld [vmem:[#allocation8 + $0x620] sm:$0xff]  ;;  %v4367_v63 = vld [vmem:[#allocation8 + $0x610] sm:$0xff] }
 0x411   : > { %v10013_v1 = vpop.eup %6940  ;;  %v3751_v39 = vmul.f32 0.6931472, %v6939_v34  ;;  %6036 = vmatpush1.bf16.msra.mxu1 %v6035_v42  ;;  %v5909_v27 = vpack.c.bf16 %v4370_v36, %v4366_v41  ;;  %v3789_v54 = vadd.f32 1.0, %v3788_v60  ;;  %v3836_v55 = vand.u32 2147483647, %v11618_v4  ;;  %v4371_v61 = vld [vmem:[#allocation8 + $0x630] sm:$0xff] }
 0x412   : > { %v3766_v17 = vsel %vm9995_vm13, %v3763_v24, %v3760_v2  ;;  %6952 = vlog2.f32 %v3821_v3  ;;  %v11623_v23 = vmax.f32 %v11622_v7, 0.0  ;;  %v3824_v42 = vmul.f32 -0.5, %v11621_v45  ;;  %v4374_v36 = vld [vmem:[#allocation8 + $0x648] sm:$0xff]  ;;  %v11625_v24 = vld [vmem:[#allocation36_spill] sm:$0xff] }
 0x413   : > { %v3757_v5 = vsel %vm10006_vm14, %v3754_v51, %v3751_v39  ;;  %5910 = vmatprep.subr.bf16.mxu0 %v5909_v27  ;;  %v6037_v41 = vpack.c.bf16 %v4372_v50, %v4368_v31  ;;  %v4378_v34 = vld [vmem:[#allocation8 + $0x668] sm:$0xff]  ;;  %v10024_v19 = vpop.eup %6942  ;;  %v11626_v60 = vmax.f32 %v11625_v24, 0.0  ;;  %vm10028_vm15 = vcmp.lt.f32.partialorder %v3800_v32, 0.0004427343  ;;  %v4376_v27 = vld [vmem:[#allocation8 + $0x658] sm:$0xff]  ;;  %v4375_v24 = vld [vmem:[#allocation8 + $0x650] sm:$0xff] }
 0x414   : > { %v4134_v13 = vadd.f32 %v3766_v17, %v11623_v23  ;;  %11624 = vst [vmem:[#allocation52_spill] sm:$0xff] %v10024_v19  ;;  %vm10032_vm0 = vcmp.lt.f32.partialorder %v3791_v59, 0.0004427343  ;;  %v5911_v51 = vpack.c.bf16 %v4369_v58, %v4365_v11  ;;  %v10036_v23 = vpop.eup %6944  ;;  %v3799_v40 = vmul.f32 %v11611_v56, %v3798_v53  ;;  %v4377_v56 = vld [vmem:[#allocation8 + $0x660] sm:$0xff]  ;;  %v11635_v19 = vld [vmem:[#allocation109_spill] sm:$0xff]  ;;  %v4383_v17 = vld [vmem:[#allocation8 + $0x690] sm:$0xff] }
 0x415   : > { %v4133_v2 = vadd.f32 %v3757_v5, %v11626_v60  ;;  %v3834_v31 = vadd.f32 1.0, %v3833_v44  ;;  %v6039_v50 = vpack.c.bf16 %v4371_v61, %v4367_v63  ;;  %v3866_v39 = vadd.f32 1.0, %v9706_v26  ;;  %v4373_v5 = vld [vmem:[#allocation8 + $0x640] sm:$0xff]  ;;  %6038 = vmatprep.subr.bf16.mxu1 %v6037_v41 }
 0x416   : > { %4550 = vmatprep.mubr.f32.mxu0 %v4134_v13  ;;  %4872 = vmatprep.mubr.f32.mxu1 %v4134_v13  ;;  %v6947_v32 = vpop.eup %6946  ;;  %v3790_v59 = vmul.f32 %v11612_v18, %v3789_v54  ;;  %vm10041_vm1 = vcmp.lt.f32.partialorder %v3836_v55, 0.0004427343  ;;  %v3857_v11 = vadd.f32 1.0, %v9686_v10  ;;  %v5913_v58 = vpack.c.bf16 %v4378_v34, %v4374_v36  ;;  %v4380_v13 = vld [vmem:[#allocation8 + $0x678] sm:$0xff]  ;;  %v4379_v54 = vld [vmem:[#allocation8 + $0x670] sm:$0xff] }
 0x417   : > { %4551 = vmatmul.mubr.f32.gmra.mrb[76].mxu0 %v4133_v2  ;;  %4873 = vmatmul.mubr.f32.gmra.mrb[76].mxu1 %v4133_v2  ;;  %v6949_v44 = vpop.eup %6948  ;;  %v3796_v53 = vmul.f32 0.6931472, %v6947_v32  ;;  %v3825_v63 = vadd.f32 1.0, %v3824_v42  ;;  %6954 = vlog2.f32 %v3866_v39  ;;  %v3869_v61 = vmul.f32 -0.5, %v9706_v26 }
 0x418   : > { %5912 = vmatpush1.bf16.msra.mxu0 %v5911_v51  ;;  %v3787_v18 = vmul.f32 0.6931472, %v6949_v44  ;;  %v3827_v55 = vand.u32 2147483647, %v11621_v45  ;;  %6040 = vmatpush1.bf16.msra.mxu1 %v6039_v50  ;;  %6956 = vlog2.f32 %v3857_v11  ;;  %v3860_v36 = vmul.f32 -0.5, %v9686_v10  ;;  %v11633_v51 = vld [vmem:[#allocation63_spill] sm:$0xff] }
 0x419   : > { %5914 = vmatprep.subr.bf16.mxu0 %v5913_v58  ;;  %v3802_v34 = vsel %vm10028_vm15, %v3799_v40, %v3796_v53  ;;  %v3835_v42 = vmul.f32 %v11618_v4, %v3834_v31  ;;  %v6041_v41 = vpack.c.bf16 %v4380_v13, %v4376_v27  ;;  %v5915_v60 = vpack.c.bf16 %v4377_v56, %v4373_v5  ;;  %v4382_v40 = vld [vmem:[#allocation8 + $0x688] sm:$0xff]  ;;  %v4384_v13 = vld [vmem:[#allocation8 + $0x698] sm:$0xff] }
 0x41a   : > { %v6951_v2 = vpop.eup %6950  ;;  %v11634_v39 = vmax.f32 %v11633_v51, 0.0  ;;  %v3793_v44 = vsel %vm10032_vm0, %v3790_v59, %v3787_v18  ;;  %v3872_v50 = vand.u32 2147483647, %v9706_v26  ;;  %v6043_v11 = vpack.c.bf16 %v4379_v54, %v4375_v24  ;;  %v11639_v24 = vld [vmem:[#allocation66_spill] sm:$0xff] }
 0x41b   : > { %v11636_v38 = vmax.f32 %v11635_v19, 0.0  ;;  %v3832_v21 = vmul.f32 0.6931472, %v6951_v2  ;;  %v3870_v3 = vadd.f32 1.0, %v3869_v61  ;;  %6042 = vmatprep.subr.bf16.mxu1 %v6041_v41  ;;  %v3902_v4 = vadd.f32 1.0, %v9791_v22  ;;  %v4388_v61 = vld [vmem:[#allocation8 + $0x6b8] sm:$0xff] }
 0x41c   : > { %v4138_v32 = vadd.f32 %v3802_v34, %v11634_v39  ;;  %5916 = vmatpush1.bf16.msra.mxu0 %v5915_v60  ;;  %v6953_v31 = vpop.eup %6952  ;;  %v3826_v27 = vmul.f32 %v11621_v45, %v3825_v63  ;;  %vm10061_vm2 = vcmp.lt.f32.partialorder %v3827_v55, 0.0004427343  ;;  %v3861_v59 = vadd.f32 1.0, %v3860_v36  ;;  %v4381_v45 = vld [vmem:[#allocation8 + $0x680] sm:$0xff]  ;;  %6044 = vmatpush1.bf16.msra.mxu1 %v6043_v11  ;;  %v4390_v11 = vld [vmem:[#allocation8 + $0x6c8] sm:$0xff] }
 0x41d   : > { %v4137_v58 = vadd.f32 %v3793_v44, %v11636_v38  ;;  %v3893_v19 = vadd.f32 1.0, %v9752_v16  ;;  %v4386_v38 = vld [vmem:[#allocation8 + $0x6a8] sm:$0xff]  ;;  %v3838_v5 = vsel %vm10041_vm1, %v3835_v42, %v3832_v21  ;;  %v3823_v56 = vmul.f32 0.6931472, %v6953_v31  ;;  %v4385_v63 = vld [vmem:[#allocation8 + $0x6a0] sm:$0xff]  ;;  %v4387_v21 = vld [vmem:[#allocation8 + $0x6b0] sm:$0xff] }
 0x41e   : > { %4556 = vmatprep.mubr.f32.mxu0 %v4138_v32  ;;  %4878 = vmatprep.mubr.f32.mxu1 %v4138_v32  ;;  %6958 = vlog2.f32 %v3902_v4  ;;  %v3905_v53 = vmul.f32 -0.5, %v9791_v22  ;;  %v11640_v54 = vmax.f32 %v11639_v24, 0.0  ;;  %vm10071_vm3 = vcmp.lt.f32.partialorder %v3872_v50, 0.0004427343  ;;  %v11643_v2 = vld [vmem:[#allocation68_spill] sm:$0xff] }
 0x41f   : > { %4557 = vmatmul.mubr.f32.gmra.mrb[78].mxu0 %v4137_v58  ;;  %4879 = vmatmul.mubr.f32.gmra.mrb[78].mxu1 %v4137_v58  ;;  %v3863_v36 = vand.u32 2147483647, %v9686_v10  ;;  %6960 = vlog2.f32 %v3893_v19  ;;  %v3829_v34 = vsel %vm10061_vm2, %v3826_v27, %v3823_v56  ;;  %v3871_v42 = vmul.f32 %v9706_v26, %v3870_v3  ;;  %v4394_v58 = vld [vmem:[#allocation8 + $0x6e8] sm:$0xff] }
 0x420   : > { %v4142_v18 = vadd.f32 %v3838_v5, %v11640_v54  ;;  %v3896_v41 = vmul.f32 -0.5, %v9752_v16  ;;  %v5917_v60 = vpack.c.bf16 %v4386_v38, %v4382_v40  ;;  %v11644_v51 = vmax.f32 %v11643_v2, 0.0  ;;  %v4392_v40 = vld [vmem:[#allocation8 + $0x6d8] sm:$0xff]  ;;  %v4391_v54 = vld [vmem:[#allocation8 + $0x6d0] sm:$0xff] }
 0x421   : > { %v3862_v32 = vmul.f32 %v9686_v10, %v3861_v59  ;;  %v6045_v44 = vpack.c.bf16 %v4388_v61, %v4384_v13  ;;  %v3938_v50 = vadd.f32 1.0, %v9841_v35  ;;  %v6955_v4 = vpop.eup %6954  ;;  %v3906_v31 = vadd.f32 1.0, %v3905_v53  ;;  %v4396_v38 = vld [vmem:[#allocation8 + $0x6f8] sm:$0xff]  ;;  %v4389_v13 = vld [vmem:[#allocation8 + $0x6c0] sm:$0xff] }
 0x422   : > { %4562 = vmatprep.mubr.f32.mxu0 %v4142_v18  ;;  %4884 = vmatprep.mubr.f32.mxu1 %v4142_v18  ;;  %v4141_v39 = vadd.f32 %v3829_v34, %v11644_v51  ;;  %v3908_v27 = vand.u32 2147483647, %v9791_v22  ;;  %v5919_v26 = vpack.c.bf16 %v4385_v63, %v4381_v45  ;;  %v6047_v3 = vpack.c.bf16 %v4387_v21, %v4383_v17  ;;  %v6957_v7 = vpop.eup %6956  ;;  %v4393_v45 = vld [vmem:[#allocation8 + $0x6e0] sm:$0xff]  ;;  %v4395_v18 = vld [vmem:[#allocation8 + $0x6f0] sm:$0xff]  ;;  %v11645_v17 = vld [vmem:[#allocation21_spill] sm:$0xff] }
 0x423   : > { %5918 = vmatprep.subr.bf16.mxu0 %v5917_v60  ;;  %v3868_v19 = vmul.f32 0.6931472, %v6955_v4  ;;  %6962 = vlog2.f32 %v3938_v50  ;;  %v3941_v10 = vmul.f32 -0.5, %v9841_v35  ;;  %v3929_v59 = vadd.f32 1.0, %v9819_v37  ;;  %6046 = vmatprep.subr.bf16.mxu1 %v6045_v44  ;;  %v11649_v51 = vld [vmem:[#allocation71_spill] sm:$0xff]  ;;  %v4398_v50 = vld [vmem:[#allocation8 + $0x708] sm:$0xff] }
 0x424   : > { %4563 = vmatmul.mubr.f32.gmra.mrb[80].mxu0 %v4141_v39  ;;  %4885 = vmatmul.mubr.f32.gmra.mrb[80].mxu1 %v4141_v39  ;;  %v3859_v5 = vmul.f32 0.6931472, %v6957_v7  ;;  %v3897_v56 = vadd.f32 1.0, %v3896_v41  ;;  %v3899_v53 = vand.u32 2147483647, %v9752_v16  ;;  %v5921_v61 = vpack.c.bf16 %v4394_v58, %v4390_v11  ;;  %v4402_v11 = vld [vmem:[#allocation8 + $0x728] sm:$0xff] }
 0x425   : > { %5920 = vmatpush1.bf16.msra.mxu0 %v5919_v26  ;;  %v3874_v63 = vsel %vm10071_vm3, %v3871_v42, %v3868_v19  ;;  %vm3864_vm4 = vcmp.lt.f32.partialorder %v3863_v36, 0.0004427343  ;;  %6048 = vmatpush1.bf16.msra.mxu1 %v6047_v3  ;;  %6964 = vlog2.f32 %v3929_v59  ;;  %v3932_v24 = vmul.f32 -0.5, %v9819_v37  ;;  %v4400_v3 = vld [vmem:[#allocation8 + $0x718] sm:$0xff]  ;;  %v4397_v7 = vld [vmem:[#allocation8 + $0x700] sm:$0xff]  ;;  %v4406_v4 = vld [vmem:[#allocation8 + $0x748] sm:$0xff] }
 0x426   : > { %v11646_v21 = vmax.f32 %v11645_v17, 0.0  ;;  %v3865_v41 = vsel %vm3864_vm4, %v3862_v32, %v3859_v5  ;;  %vm10093_vm5 = vcmp.lt.f32.partialorder %v3908_v27, 0.0004427343  ;;  %5922 = vmatprep.subr.bf16.mxu0 %v5921_v61  ;;  %v6049_v2 = vpack.c.bf16 %v4396_v38, %v4392_v40  ;;  %v4404_v40 = vld [vmem:[#allocation8 + $0x738] sm:$0xff]  ;;  %v4401_v5 = vld [vmem:[#allocation8 + $0x720] sm:$0xff] }
 0x427   : > { %v11650_v55 = vmax.f32 %v11649_v51, 0.0  ;;  %v3907_v36 = vmul.f32 %v9791_v22, %v3906_v31  ;;  %v3942_v39 = vadd.f32 1.0, %v3941_v10  ;;  %v5923_v44 = vpack.c.bf16 %v4393_v45, %v4389_v13  ;;  %v4399_v45 = vld [vmem:[#allocation8 + $0x710] sm:$0xff]  ;;  %v11655_v60 = vld [vmem:[#allocation87_spill] sm:$0xff] }
 0x428   : > { %v4146_v34 = vadd.f32 %v3874_v63, %v11646_v21  ;;  %v6959_v58 = vpop.eup %6958  ;;  %v3898_v32 = vmul.f32 %v9752_v16, %v3897_v56  ;;  %vm10101_vm6 = vcmp.lt.f32.partialorder %v3899_v53, 0.0004427343  ;;  %v6051_v27 = vpack.c.bf16 %v4395_v18, %v4391_v54  ;;  %6050 = vmatprep.subr.bf16.mxu1 %v6049_v2  ;;  %v4403_v63 = vld [vmem:[#allocation8 + $0x730] sm:$0xff] }
 0x429   : > { %v4145_v42 = vadd.f32 %v3865_v41, %v11650_v55  ;;  %v3974_v26 = vadd.f32 1.0, %v9899_v15  ;;  %v6961_v22 = vpop.eup %6960  ;;  %v3904_v31 = vmul.f32 0.6931472, %v6959_v58  ;;  %v3944_v19 = vand.u32 2147483647, %v9841_v35  ;;  %5924 = vmatpush1.bf16.msra.mxu0 %v5923_v44 }
 0x42a   : > { %4568 = vmatprep.mubr.f32.mxu0 %v4146_v34  ;;  %4890 = vmatprep.mubr.f32.mxu1 %v4146_v34  ;;  %v3933_v10 = vadd.f32 1.0, %v3932_v24  ;;  %v3965_v59 = vadd.f32 1.0, %v9886_v30  ;;  %v3895_v16 = vmul.f32 0.6931472, %v6961_v22  ;;  %v3935_v38 = vand.u32 2147483647, %v9819_v37 }
 0x42b   : > { %4569 = vmatmul.mubr.f32.gmra.mrb[82].mxu0 %v4145_v42  ;;  %4891 = vmatmul.mubr.f32.gmra.mrb[82].mxu1 %v4145_v42  ;;  %6966 = vlog2.f32 %v3974_v26  ;;  %v3977_v13 = vmul.f32 -0.5, %v9899_v15  ;;  %v3910_v56 = vsel %vm10093_vm5, %v3907_v36, %v3904_v31  ;;  %v3943_v53 = vmul.f32 %v9841_v35, %v3942_v39  ;;  %v11653_v24 = vld [vmem:[#allocation33_spill] sm:$0xff]  ;;  %v4412_v31 = vld [vmem:[#allocation8 + $0x778] sm:$0xff] }
 0x42c   : > { %6052 = vmatpush1.bf16.msra.mxu1 %v6051_v27  ;;  %v3980_v61 = vand.u32 2147483647, %v9899_v15  ;;  %6968 = vlog2.f32 %v3965_v59  ;;  %v11654_v54 = vmax.f32 %v11653_v24, 0.0  ;;  %v3901_v17 = vsel %vm10101_vm6, %v3898_v32, %v3895_v16  ;;  %v4410_v32 = vld [vmem:[#allocation8 + $0x768] sm:$0xff]  ;;  %v4405_v59 = vld [vmem:[#allocation8 + $0x740] sm:$0xff] }
 0x42d   : > { %v3968_v21 = vmul.f32 -0.5, %v9886_v30  ;;  %v5925_v34 = vpack.c.bf16 %v4402_v11, %v4398_v50  ;;  %v6963_v41 = vpop.eup %6962  ;;  %v11656_v2 = vmax.f32 %v11655_v60, 0.0  ;;  %v3971_v35 = vand.u32 2147483647, %v9886_v30  ;;  %v4409_v16 = vld [vmem:[#allocation8 + $0x760] sm:$0xff] }
 0x42e   : > { %v4150_v18 = vadd.f32 %v3910_v56, %v11654_v54  ;;  %v6053_v55 = vpack.c.bf16 %v4404_v40, %v4400_v3  ;;  %v5927_v42 = vpack.c.bf16 %v4401_v5, %v4397_v7  ;;  %v3940_v36 = vmul.f32 0.6931472, %v6963_v41  ;;  %v4408_v3 = vld [vmem:[#allocation8 + $0x758] sm:$0xff]  ;;  %v4411_v5 = vld [vmem:[#allocation8 + $0x770] sm:$0xff] }
 0x42f   : > { %v4149_v51 = vadd.f32 %v3901_v17, %v11656_v2  ;;  %v3978_v39 = vadd.f32 1.0, %v3977_v13  ;;  %v6055_v44 = vpack.c.bf16 %v4403_v63, %v4399_v45  ;;  %v4010_v58 = vadd.f32 1.0, %v9947_v20  ;;  %v6965_v27 = vpop.eup %6964  ;;  %5926 = vmatprep.subr.bf16.mxu0 %v5925_v34  ;;  %v4414_v17 = vld [vmem:[#allocation8 + $0x788] sm:$0xff] }
 0x430   : > { %4574 = vmatprep.mubr.f32.mxu0 %v4150_v18  ;;  %4896 = vmatprep.mubr.f32.mxu1 %v4150_v18  ;;  %vm3945_vm7 = vcmp.lt.f32.partialorder %v3944_v19, 0.0004427343  ;;  %v3934_v50 = vmul.f32 %v9819_v37, %v3933_v10  ;;  %vm10124_vm8 = vcmp.lt.f32.partialorder %v3935_v38, 0.0004427343  ;;  %v4001_v26 = vadd.f32 1.0, %v9931_v62  ;;  %v4407_v38 = vld [vmem:[#allocation8 + $0x750] sm:$0xff] }
 0x431   : > { %4575 = vmatmul.mubr.f32.gmra.mrb[84].mxu0 %v4149_v51  ;;  %4897 = vmatmul.mubr.f32.gmra.mrb[84].mxu1 %v4149_v51  ;;  %v3946_v40 = vsel %vm3945_vm7, %v3943_v53, %v3940_v36  ;;  %v3931_v7 = vmul.f32 0.6931472, %v6965_v27  ;;  %v3969_v22 = vadd.f32 1.0, %v3968_v21  ;;  %6970 = vlog2.f32 %v4010_v58  ;;  %v4418_v21 = vld [vmem:[#allocation8 + $0x7a8] sm:$0xff]  ;;  %v4416_v51 = vld [vmem:[#allocation8 + $0x798] sm:$0xff] }
 0x432   : > { %6054 = vmatprep.subr.bf16.mxu1 %v6053_v55  ;;  %v11659_v19 = vmax.f32 %v9665_v6, 0.0  ;;  %vm10131_vm9 = vcmp.lt.f32.partialorder %v3980_v61, 0.0004427343  ;;  %vm10135_vm10 = vcmp.lt.f32.partialorder %v3971_v35, 0.0004427343  ;;  %5928 = vmatpush1.bf16.msra.mxu0 %v5927_v42  ;;  %6972 = vlog2.f32 %v4001_v26  ;;  %v4420_v36 = vld [vmem:[#allocation8 + $0x7b8] sm:$0xff] }
 0x433   : > { %6056 = vmatpush1.bf16.msra.mxu1 %v6055_v44  ;;  %v3937_v56 = vsel %vm10124_vm8, %v3934_v50, %v3931_v7  ;;  %v3979_v53 = vmul.f32 %v9899_v15, %v3978_v39  ;;  %v4013_v6 = vmul.f32 -0.5, %v9947_v20  ;;  %v5929_v61 = vpack.c.bf16 %v4410_v32, %v4406_v4  ;;  %v4413_v4 = vld [vmem:[#allocation8 + $0x780] sm:$0xff]  ;;  %v4415_v26 = vld [vmem:[#allocation8 + $0x790] sm:$0xff] }
 0x434   : > { %v4154_v13 = vadd.f32 %v3946_v40, %v11659_v19  ;;  %v11664_v45 = vmax.f32 %v9634_v12, 0.0  ;;  %v4004_v24 = vmul.f32 -0.5, %v9931_v62  ;;  %v6057_v54 = vpack.c.bf16 %v4412_v31, %v4408_v3  ;;  %v4417_v32 = vld [vmem:[#allocation8 + $0x7a0] sm:$0xff]  ;;  %v4419_v3 = vld [vmem:[#allocation8 + $0x7b0] sm:$0xff] }
 0x435   : > { %v4046_v18 = vadd.f32 1.0, %v9990_v8  ;;  %v6967_v34 = vpop.eup %6966  ;;  %v3970_v41 = vmul.f32 %v9886_v30, %v3969_v22  ;;  %v4016_v15 = vand.u32 2147483647, %v9947_v20  ;;  %5930 = vmatprep.subr.bf16.mxu0 %v5929_v61  ;;  %v5931_v60 = vpack.c.bf16 %v4409_v16, %v4405_v59 }
 0x436   : > { %4580 = vmatprep.mubr.f32.mxu0 %v4154_v13  ;;  %4902 = vmatprep.mubr.f32.mxu1 %v4154_v13  ;;  %v4153_v63 = vadd.f32 %v3937_v56, %v11664_v45  ;;  %v6059_v2 = vpack.c.bf16 %v4411_v5, %v4407_v38  ;;  %v6969_v35 = vpop.eup %6968  ;;  %v3976_v12 = vmul.f32 0.6931472, %v6967_v34  ;;  %v4007_v55 = vand.u32 2147483647, %v9931_v62  ;;  %v4422_v5 = vld [vmem:[#allocation8 + $0x7c8] sm:$0xff] }
 0x437   : > { %6974 = vlog2.f32 %v4046_v18  ;;  %v4037_v42 = vadd.f32 1.0, %v9979_v9  ;;  %v3967_v39 = vmul.f32 0.6931472, %v6969_v35  ;;  %v4014_v44 = vadd.f32 1.0, %v4013_v6  ;;  %6058 = vmatprep.subr.bf16.mxu1 %v6057_v54  ;;  %5932 = vmatpush1.bf16.msra.mxu0 %v5931_v60  ;;  %v4426_v45 = vld [vmem:[#allocation8 + $0x7e8] sm:$0xff]  ;;  %v4425_v60 = vld [vmem:[#allocation8 + $0x7e0] sm:$0xff] }
 0x438   : > { %4581 = vmatmul.mubr.f32.gmra.mrb[86].mxu0 %v4153_v63  ;;  %4903 = vmatmul.mubr.f32.gmra.mrb[86].mxu1 %v4153_v63  ;;  %v4049_v30 = vmul.f32 -0.5, %v9990_v8  ;;  %v5933_v58 = vpack.c.bf16 %v4418_v21, %v4414_v17  ;;  %v3982_v27 = vsel %vm10131_vm9, %v3979_v53, %v3976_v12  ;;  %v4005_v50 = vadd.f32 1.0, %v4004_v24  ;;  %v4424_v63 = vld [vmem:[#allocation8 + $0x7d8] sm:$0xff] }
 0x439   : > { %6060 = vmatpush1.bf16.msra.mxu1 %v6059_v2  ;;  %v4052_v11 = vand.u32 2147483647, %v9990_v8  ;;  %6976 = vlog2.f32 %v4037_v42  ;;  %v11665_v40 = vmax.f32 %v9743_v14, 0.0  ;;  %v3973_v22 = vsel %vm10135_vm10, %v3970_v41, %v3967_v39  ;;  %v4428_v24 = vld [vmem:[#allocation8 + $0x7f8] sm:$0xff]  ;;  %v4423_v39 = vld [vmem:[#allocation8 + $0x7d0] sm:$0xff] }
 0x43a   : > { %v4040_v31 = vmul.f32 -0.5, %v9979_v9  ;;  %5934 = vmatprep.subr.bf16.mxu0 %v5933_v58  ;;  %v6061_v59 = vpack.c.bf16 %v4420_v36, %v4416_v51  ;;  %v11666_v16 = vand.u32 2147483647, %v9976_v46  ;;  %v11667_v13 = vmax.f32 %v9720_v43, 0.0 }
 0x43b   : > { %v4158_v7 = vadd.f32 %v3982_v27, %v11665_v40  ;;  %vm10166_vm11 = vcmp.lt.f32.partialorder %v4016_v15, 0.0004427343  ;;  %v5935_v14 = vpack.c.bf16 %v4417_v32, %v4413_v4  ;;  %v6971_v56 = vpop.eup %6970  ;;  %v4015_v10 = vmul.f32 %v9947_v20, %v4014_v44  ;;  %v4421_v20 = vld [vmem:[#allocation8 + $0x7c0] sm:$0xff]  ;;  %v4427_v44 = vld [vmem:[#allocation8 + $0x7f0] sm:$0xff] }
 0x43c   : > { %v10162_v19 = vsub.f32 0.0, %v11666_v16  ;;  %v4157_v37 = vadd.f32 %v3973_v22, %v11667_v13  ;;  %v4050_v53 = vadd.f32 1.0, %v4049_v30  ;;  %v6063_v6 = vpack.c.bf16 %v4419_v3, %v4415_v26  ;;  %v6973_v43 = vpop.eup %6972  ;;  %6062 = vmatprep.subr.bf16.mxu1 %v6061_v59  ;;  %v11676_v3 = vld [vmem:[#allocation60_spill] sm:$0xff] }
 0x43d   : > { %4586 = vmatprep.mubr.f32.mxu0 %v4158_v7  ;;  %4908 = vmatprep.mubr.f32.mxu1 %v4158_v7  ;;  %v4082_v61 = vadd.f32 1.0, %v10036_v23  ;;  %v4012_v54 = vmul.f32 0.6931472, %v6971_v56  ;;  %v4006_v18 = vmul.f32 %v9931_v62, %v4005_v50  ;;  %vm10173_vm12 = vcmp.lt.f32.partialorder %v4007_v55, 0.0004427343 }
 0x43e   : > { %4587 = vmatmul.mubr.f32.gmra.mrb[88].mxu0 %v4157_v37  ;;  %4909 = vmatmul.mubr.f32.gmra.mrb[88].mxu1 %v4157_v37  ;;  %v4073_v21 = vadd.f32 1.0, %v10013_v1  ;;  %v4003_v34 = vmul.f32 0.6931472, %v6973_v43  ;;  %vm10178_vm13 = vcmp.lt.f32.partialorder %v4052_v11, 0.0004427343  ;;  %v4041_v15 = vadd.f32 1.0, %v4040_v31 }
 0x43f   : > { %5936 = vmatpush1.bf16.msra.mxu0 %v5935_v14  ;;  %6978 = vlog2.f32 %v4082_v61  ;;  %v4018_v62 = vsel %vm10166_vm11, %v4015_v10, %v4012_v54  ;;  %v4043_v2 = vand.u32 2147483647, %v9979_v9  ;;  %6064 = vmatpush1.bf16.msra.mxu1 %v6063_v6  ;;  %v4085_v51 = vmul.f32 -0.5, %v10036_v23  ;;  %v11677_v31 = vld [vmem:[#allocation26_spill] sm:$0xff] }
 0x440   : > { %6980 = vlog2.f32 %v4073_v21  ;;  %v11674_v35 = vmax.f32 %v9827_v48, 0.0  ;;  %v4009_v55 = vsel %vm10173_vm12, %v4006_v18, %v4003_v34  ;;  %v4051_v42 = vmul.f32 %v9990_v8, %v4050_v53  ;;  %v11679_v53 = vld [vmem:[#allocation72_spill] sm:$0xff]  ;;  %v11685_v18 = vld [vmem:[#allocation50_spill] sm:$0xff] }
 0x441   : > { %v5937_v36 = vpack.c.bf16 %v4426_v45, %v4422_v5  ;;  %v6975_v30 = vpop.eup %6974  ;;  %v11675_v58 = vmax.f32 %v9787_v49, 0.0  ;;  %v4076_v32 = vmul.f32 -0.5, %v10013_v1  ;;  %v6065_v27 = vpack.c.bf16 %v4428_v24, %v4424_v63  ;;  %v11686_v34 = vld [vmem:[#allocation74_spill] sm:$0xff] }
 0x442   : > { %v4162_v12 = vadd.f32 %v4018_v62, %v11674_v35  ;;  %v5939_v50 = vpack.c.bf16 %v4425_v60, %v4421_v20  ;;  %v4048_v48 = vmul.f32 0.6931472, %v6975_v30  ;;  %v4042_v11 = vmul.f32 %v9979_v9, %v4041_v15 }
 0x443   : > { %v4161_v4 = vadd.f32 %v4009_v55, %v11675_v58  ;;  %v4088_v26 = vand.u32 2147483647, %v10036_v23  ;;  %v3560_v8 = vadd.f32 1.0, %v11676_v3  ;;  %v6977_v40 = vpop.eup %6976  ;;  %v4086_v7 = vadd.f32 1.0, %v4085_v51  ;;  %5938 = vmatprep.subr.bf16.mxu0 %v5937_v36  ;;  %6066 = vmatprep.subr.bf16.mxu1 %v6065_v27 }
 0x444   : > { %4592 = vmatprep.mubr.f32.mxu0 %v4162_v12  ;;  %4914 = vmatprep.mubr.f32.mxu1 %v4162_v12  ;;  %v4079_v49 = vand.u32 2147483647, %v10013_v1  ;;  %v6067_v22 = vpack.c.bf16 %v4427_v44, %v4423_v39  ;;  %v3596_v59 = vadd.f32 1.0, %v11677_v31  ;;  %v4054_v16 = vsel %vm10178_vm13, %v4051_v42, %v4048_v48 }
 0x445   : > { %4593 = vmatmul.mubr.f32.gmra.mrb[90].mxu0 %v4161_v4  ;;  %4915 = vmatmul.mubr.f32.gmra.mrb[90].mxu1 %v4161_v4  ;;  %v4039_v13 = vmul.f32 0.6931472, %v6977_v40  ;;  %6982 = vlog2.f32 %v3560_v8  ;;  %v3563_v9 = vmul.f32 -0.5, %v11676_v3  ;;  %v11678_v37 = vmax.f32 %v9883_v0, 0.0  ;;  %v11691_v4 = vld [vmem:[#allocation114_spill] sm:$0xff] }
 0x446   : > { %vm4044_vm14 = vcmp.lt.f32.partialorder %v4043_v2, 0.0004427343  ;;  %v4077_v14 = vadd.f32 1.0, %v4076_v32  ;;  %5940 = vmatpush1.bf16.msra.mxu0 %v5939_v50  ;;  %6068 = vmatpush1.bf16.msra.mxu1 %v6067_v22  ;;  %6984 = vlog2.f32 %v3596_v59  ;;  %v10205_v5 = vmul.f32 1.442695, %v10162_v19 }
 0x447   : > { %v4166_v38 = vadd.f32 %v4054_v16, %v11678_v37  ;;  %v4045_v56 = vsel %vm4044_vm14, %v4042_v11, %v4039_v13  ;;  %v3599_v10 = vmul.f32 -0.5, %v11677_v31  ;;  %v3587_v6 = vadd.f32 1.0, %v11679_v53  ;;  %v11694_v11 = vld [vmem:[#allocation55_spill] sm:$0xff]  ;;  %v11699_v13 = vld [vmem:[#allocation116_spill] sm:$0xff] }
 0x448   : > { %v11680_v61 = vmax.f32 %v9859_v52, 0.0  ;;  %v4087_v0 = vmul.f32 %v10036_v23, %v4086_v7  ;;  %vm10212_vm15 = vcmp.lt.f32.partialorder %v4088_v26, 0.0004427343  ;;  %vm10216_vm0 = vcmp.lt.f32.partialorder %v4079_v49, 0.0004427343 }
 0x449   : > { %4598 = vmatprep.mubr.f32.mxu0 %v4166_v38  ;;  %4920 = vmatprep.mubr.f32.mxu1 %v4166_v38  ;;  %v6979_v19 = vpop.eup %6978  ;;  %v3564_v43 = vadd.f32 1.0, %v3563_v9  ;;  %v3566_v54 = vand.u32 2147483647, %v11676_v3  ;;  %6986 = vlog2.f32 %v3587_v6  ;;  %v3632_v17 = vadd.f32 1.0, %v11685_v18  ;;  %v11700_v38 = vld [vmem:[#allocation37_spill] sm:$0xff] }
 0x44a   : > { %v4165_v45 = vadd.f32 %v4045_v56, %v11680_v61  ;;  %v6981_v21 = vpop.eup %6980  ;;  %v4084_v52 = vmul.f32 0.6931472, %v6979_v19  ;;  %v4078_v23 = vmul.f32 %v10013_v1, %v4077_v14  ;;  %v3602_v20 = vand.u32 2147483647, %v11677_v31  ;;  %v11702_v19 = vld [vmem:[#allocation89_spill] sm:$0xff] }
 0x44b   : > { %v3623_v41 = vadd.f32 1.0, %v11686_v34  ;;  %v4075_v15 = vmul.f32 0.6931472, %v6981_v21  ;;  %v3600_v60 = vadd.f32 1.0, %v3599_v10  ;;  %v3590_v62 = vmul.f32 -0.5, %v11679_v53 }
 0x44c   : > { %4599 = vmatmul.mubr.f32.gmra.mrb[92].mxu0 %v4165_v45  ;;  %4921 = vmatmul.mubr.f32.gmra.mrb[92].mxu1 %v4165_v45  ;;  %6988 = vlog2.f32 %v3632_v17  ;;  %v4090_v2 = vsel %vm10212_vm15, %v4087_v0, %v4084_v52  ;;  %v3593_v51 = vand.u32 2147483647, %v11679_v53  ;;  %v3635_v35 = vmul.f32 -0.5, %v11685_v18  ;;  %v11706_v52 = vld [vmem:[#allocation118_spill] sm:$0xff]  ;;  %v11725_v17 = vld [vmem:[#allocation32_spill] sm:$0xff] }
 0x44d   : > { %6990 = vlog2.f32 %v3623_v41  ;;  %v11687_v12 = vmax.f32 %v9943_v47, 0.0  ;;  %v4081_v55 = vsel %vm10216_vm0, %v4078_v23, %v4075_v15  ;;  %v3565_v42 = vmul.f32 %v11676_v3, %v3564_v43  ;;  %v11707_v41 = vld [vmem:[#allocation91_spill] sm:$0xff] }
 0x44e   : > { %vm10235_vm1 = vcmp.lt.f32.partialorder %v3566_v54, 0.0004427343  ;;  %v11690_v39 = vmax.f32 %v9914_v57, 0.0  ;;  %v3638_v30 = vand.u32 2147483647, %v11685_v18  ;;  %v3626_v58 = vmul.f32 -0.5, %v11686_v34 }
 0x44f   : > { %v4170_v1 = vadd.f32 %v4090_v2, %v11687_v12  ;;  %v3668_v32 = vadd.f32 1.0, %v11691_v4  ;;  %v6983_v47 = vpop.eup %6982  ;;  %v3601_v27 = vmul.f32 %v11677_v31, %v3600_v60  ;;  %vm10245_vm2 = vcmp.lt.f32.partialorder %v3602_v20, 0.0004427343  ;;  %v11708_v60 = vld [vmem:[#allocation27_spill] sm:$0xff] }
 0x450   : > { %v4169_v44 = vadd.f32 %v4081_v55, %v11690_v39  ;;  %v3591_v48 = vadd.f32 1.0, %v3590_v62  ;;  %v3659_v26 = vadd.f32 1.0, %v11694_v11  ;;  %v6985_v57 = vpop.eup %6984  ;;  %v3562_v3 = vmul.f32 0.6931472, %v6983_v47 }
 0x451   : > { %4604 = vmatprep.mubr.f32.mxu0 %v4170_v1  ;;  %4926 = vmatprep.mubr.f32.mxu1 %v4170_v1  ;;  %vm10250_vm3 = vcmp.lt.f32.partialorder %v3593_v51, 0.0004427343  ;;  %v3636_v40 = vadd.f32 1.0, %v3635_v35  ;;  %6992 = vlog2.f32 %v3668_v32  ;;  %v3598_v7 = vmul.f32 0.6931472, %v6985_v57  ;;  %v11711_v1 = vld [vmem:[#allocation51_spill] sm:$0xff] }
 0x452   : > { %4605 = vmatmul.mubr.f32.gmra.mrb[94].mxu0 %v4169_v44  ;;  %4927 = vmatmul.mubr.f32.gmra.mrb[94].mxu1 %v4169_v44  ;;  %v3629_v49 = vand.u32 2147483647, %v11686_v34  ;;  %v3671_v22 = vmul.f32 -0.5, %v11691_v4  ;;  %6994 = vlog2.f32 %v3659_v26  ;;  %v3568_v31 = vsel %vm10235_vm1, %v3565_v42, %v3562_v3  ;;  %v11713_v44 = vld [vmem:[#allocation65_spill] sm:$0xff]  ;;  %v11715_v26 = vld [vmem:[#allocation23_spill] sm:$0xff] }
 0x453   : > { %vm10258_vm4 = vcmp.lt.f32.partialorder %v3638_v30, 0.0004427343  ;;  %v3627_v16 = vadd.f32 1.0, %v3626_v58  ;;  %v3704_v9 = vadd.f32 1.0, %v11699_v13  ;;  %v6987_v37 = vpop.eup %6986  ;;  %v11701_v14 = vmax.f32 %v11700_v38, 0.0 }
 0x454   : > { %v3604_v10 = vsel %vm10245_vm2, %v3601_v27, %v3598_v7  ;;  %v3674_v6 = vand.u32 2147483647, %v11691_v4  ;;  %v3662_v61 = vmul.f32 -0.5, %v11694_v11  ;;  %v3589_v45 = vmul.f32 0.6931472, %v6987_v37 }
 0x455   : > { %v4112_v56 = vadd.f32 %v3568_v31, %v11701_v14  ;;  %v3592_v0 = vmul.f32 %v11679_v53, %v3591_v48  ;;  %v3637_v63 = vmul.f32 %v11685_v18, %v3636_v40  ;;  %6996 = vlog2.f32 %v3704_v9 }
 0x456   : > { %v6989_v24 = vpop.eup %6988  ;;  %v11703_v43 = vmax.f32 %v11702_v19, 0.0  ;;  %vm10273_vm5 = vcmp.lt.f32.partialorder %v3629_v49, 0.0004427343  ;;  %v3672_v21 = vadd.f32 1.0, %v3671_v22  ;;  %v3695_v23 = vadd.f32 1.0, %v11706_v52  ;;  %v11716_v22 = vld [vmem:[#allocation101_spill] sm:$0xff] }
 0x457   : > { %4675 = vmatprep.mubr.f32.mxu0 %v4112_v56  ;;  %4997 = vmatprep.mubr.f32.mxu1 %v4112_v56  ;;  %v6991_v20 = vpop.eup %6990  ;;  %v3595_v53 = vsel %vm10250_vm3, %v3592_v0, %v3589_v45  ;;  %v3634_v18 = vmul.f32 0.6931472, %v6989_v24  ;;  %v3707_v15 = vmul.f32 -0.5, %v11699_v13  ;;  %v3740_v62 = vadd.f32 1.0, %v11708_v60  ;;  %v11721_v24 = vld [vmem:[#allocation78_spill] sm:$0xff] }
 0x458   : > { %v4116_v54 = vadd.f32 %v3604_v10, %v11703_v43  ;;  %4676 = vmatmul.mubr.f32.vlgmr.msra.gmra.mrb[64].mxu0 %v11707_v41  ;;  %4998 = vmatmul.mubr.f32.vlgmr.msra.gmra.mrb[64].mxu1 %v11707_v41  ;;  %v3625_v2 = vmul.f32 0.6931472, %v6991_v20  ;;  %v3628_v51 = vmul.f32 %v11686_v34, %v3627_v16  ;;  %vm10285_vm6 = vcmp.lt.f32.partialorder %v3674_v6, 0.0004427343  ;;  %v11726_v41 = vld [vmem:[#allocation39_spill] sm:$0xff] }
 0x459   : > { %v3663_v12 = vadd.f32 1.0, %v3662_v61  ;;  %v11712_v55 = vmax.f32 %v11711_v1, 0.0  ;;  %v3640_v36 = vsel %vm10258_vm4, %v3637_v63, %v3634_v18  ;;  %v3665_v39 = vand.u32 2147483647, %v11694_v11 }
 0x45a   : > { %4681 = vmatprep.mubr.f32.mxu0 %v4116_v54  ;;  %5003 = vmatprep.mubr.f32.mxu1 %v4116_v54  ;;  %6998 = vlog2.f32 %v3695_v23  ;;  %v11714_v30 = vmax.f32 %v11713_v44, 0.0  ;;  %v3631_v34 = vsel %vm10273_vm5, %v3628_v51, %v3625_v2  ;;  %v3698_v32 = vmul.f32 -0.5, %v11706_v52 }
 0x45b   : > { %v4115_v42 = vadd.f32 %v3595_v53, %v11712_v55  ;;  %7000 = vlog2.f32 %v3740_v62  ;;  %v6993_v47 = vpop.eup %6992  ;;  %v3673_v27 = vmul.f32 %v11691_v4, %v3672_v21  ;;  %v3708_v50 = vadd.f32 1.0, %v3707_v15  ;;  %v11718_v4 = vld [vmem:[#allocation97_spill] sm:$0xff]  ;;  %v11727_v15 = vld [vmem:[#allocation70_spill] sm:$0xff] }
 0x45c   : > { %v4120_v58 = vadd.f32 %v3640_v36, %v11714_v30  ;;  %v3743_v48 = vmul.f32 -0.5, %v11708_v60  ;;  %v3731_v57 = vadd.f32 1.0, %v11715_v26  ;;  %v6995_v3 = vpop.eup %6994  ;;  %v3670_v8 = vmul.f32 0.6931472, %v6993_v47  ;;  %v11729_v30 = vld [vmem:[#allocation35_spill] sm:$0xff]  ;;  %v11732_v47 = vld [vmem:[#allocation64_spill] sm:$0xff] }
 0x45d   : > { %4682 = vmatmul.mubr.f32.gmra.mrb[66].mxu0 %v4115_v42  ;;  %5004 = vmatmul.mubr.f32.gmra.mrb[66].mxu1 %v4115_v42  ;;  %v3664_v40 = vmul.f32 %v11694_v11, %v3663_v12  ;;  %v3710_v7 = vand.u32 2147483647, %v11699_v13  ;;  %v3701_v49 = vand.u32 2147483647, %v11706_v52  ;;  %v11717_v31 = vmax.f32 %v11716_v22, 0.0  ;;  %v11719_v11 = vld [vmem:[#allocation93_spill] sm:$0xff] }
 0x45e   : > { %4687 = vmatprep.mubr.f32.mxu0 %v4120_v58  ;;  %5009 = vmatprep.mubr.f32.mxu1 %v4120_v58  ;;  %v3661_v16 = vmul.f32 0.6931472, %v6995_v3  ;;  %7002 = vlog2.f32 %v3731_v57  ;;  %v3776_v9 = vadd.f32 1.0, %v11718_v4  ;;  %v3676_v37 = vsel %vm10285_vm6, %v3673_v27, %v3670_v8  ;;  %v11734_v8 = vld [vmem:[#allocation86_spill] sm:$0xff] }
 0x45f   : > { %v4119_v59 = vadd.f32 %v3631_v34, %v11717_v31  ;;  %7004 = vpow2.f32 %v10205_v5  ;;  %vm3666_vm7 = vcmp.lt.f32.partialorder %v3665_v39, 0.0004427343  ;;  %v3699_v38 = vadd.f32 1.0, %v3698_v32  ;;  %v6997_v14 = vpop.eup %6996 }
 0x460   : > { %v11720_v56 = vmax.f32 %v11719_v11, 0.0  ;;  %v3667_v6 = vsel %vm3666_vm7, %v3664_v40, %v3661_v16  ;;  %v3744_v61 = vadd.f32 1.0, %v3743_v48  ;;  %7006 = vlog2.f32 %v3776_v9 }
 0x461   : > { %4688 = vmatmul.mubr.f32.gmra.mrb[68].mxu0 %v4119_v59  ;;  %5010 = vmatmul.mubr.f32.gmra.mrb[68].mxu1 %v4119_v59  ;;  %v3706_v45 = vmul.f32 0.6931472, %v6997_v14  ;;  %v3709_v0 = vmul.f32 %v11699_v13, %v3708_v50  ;;  %v3734_v63 = vmul.f32 -0.5, %v11715_v26  ;;  %v3779_v5 = vmul.f32 -0.5, %v11718_v4 }
 0x462   : > { %v4124_v10 = vadd.f32 %v3676_v37, %v11720_v56  ;;  %v11722_v19 = vmax.f32 %v11721_v24, 0.0  ;;  %vm3711_vm8 = vcmp.lt.f32.partialorder %v3710_v7, 0.0004427343  ;;  %vm10318_vm9 = vcmp.lt.f32.partialorder %v3701_v49, 0.0004427343 }
 0x463   : > { %v3767_v21 = vadd.f32 1.0, %v11725_v17  ;;  %v3712_v23 = vsel %vm3711_vm8, %v3709_v0, %v3706_v45  ;;  %v3746_v20 = vand.u32 2147483647, %v11708_v60  ;;  %v3737_v13 = vand.u32 2147483647, %v11715_v26 }
 0x464   : > { %4693 = vmatprep.mubr.f32.mxu0 %v4124_v10  ;;  %5015 = vmatprep.mubr.f32.mxu1 %v4124_v10  ;;  %v4123_v43 = vadd.f32 %v3667_v6, %v11722_v19  ;;  %v3812_v53 = vadd.f32 1.0, %v11726_v41  ;;  %v6999_v18 = vpop.eup %6998  ;;  %v11728_v62 = vmax.f32 %v11727_v15, 0.0  ;;  %v3700_v51 = vmul.f32 %v11706_v52, %v3699_v38  ;;  %v11736_v38 = vld [vmem:[#allocation117_spill] sm:$0xff]  ;;  %v11741_v19 = vld [vmem:[#allocation96_spill] sm:$0xff] }
 0x465   : > { %v3745_v35 = vmul.f32 %v11708_v60, %v3744_v61  ;;  %7008 = vlog2.f32 %v3767_v21  ;;  %v7001_v12 = vpop.eup %7000  ;;  %v3697_v1 = vmul.f32 0.6931472, %v6999_v18  ;;  %v3735_v55 = vadd.f32 1.0, %v3734_v63 }
 0x466   : > { %4694 = vmatmul.mubr.f32.gmra.mrb[70].mxu0 %v4123_v43  ;;  %5016 = vmatmul.mubr.f32.gmra.mrb[70].mxu1 %v4123_v43  ;;  %v4128_v2 = vadd.f32 %v3712_v23, %v11728_v62  ;;  %v3780_v42 = vadd.f32 1.0, %v3779_v5  ;;  %7010 = vlog2.f32 %v3812_v53  ;;  %v3742_v36 = vmul.f32 0.6931472, %v7001_v12 }
 0x467   : > { %v3770_v39 = vmul.f32 -0.5, %v11725_v17  ;;  %v3815_v44 = vmul.f32 -0.5, %v11726_v41  ;;  %v3803_v58 = vadd.f32 1.0, %v11729_v30  ;;  %v3703_v52 = vsel %vm10318_vm9, %v3700_v51, %v3697_v1 }
 0x468   : > { %4699 = vmatprep.mubr.f32.mxu0 %v4128_v2  ;;  %5021 = vmatprep.mubr.f32.mxu1 %v4128_v2  ;;  %vm3747_vm10 = vcmp.lt.f32.partialorder %v3746_v20, 0.0004427343  ;;  %vm10335_vm11 = vcmp.lt.f32.partialorder %v3737_v13, 0.0004427343  ;;  %v3782_v34 = vand.u32 2147483647, %v11718_v4  ;;  %v7003_v32 = vpop.eup %7002  ;;  %v3736_v22 = vmul.f32 %v11715_v26, %v3735_v55 }
 0x469   : > { %v11733_v27 = vmax.f32 %v11732_v47, 0.0  ;;  %v3748_v48 = vsel %vm3747_vm10, %v3745_v35, %v3742_v36  ;;  %v3773_v57 = vand.u32 2147483647, %v11725_v17  ;;  %7012 = vlog2.f32 %v3803_v58  ;;  %v10343_v3 = vpop.eup %7004 }
 0x46a   : > { %v11735_v40 = vmax.f32 %v11734_v8, 0.0  ;;  %v3733_v49 = vmul.f32 0.6931472, %v7003_v32  ;;  %v3781_v31 = vmul.f32 %v11718_v4, %v3780_v42  ;;  %v7007_v59 = vpop.eup %7006  ;;  %v3771_v16 = vadd.f32 1.0, %v3770_v39  ;;  %v11737_v4 = vld [vmem:[#allocation77_spill] sm:$0xff] }
 0x46b   : > { %v4127_v50 = vadd.f32 %v3703_v52, %v11733_v27  ;;  %v3816_v9 = vadd.f32 1.0, %v3815_v44  ;;  %v3848_v37 = vadd.f32 1.0, %v9675_v28  ;;  %v3839_v14 = vadd.f32 1.0, %v11736_v38  ;;  %v11745_v42 = vld [vmem:[#allocation53_spill] sm:$0xff]  ;;  %v11747_v52 = vld [vmem:[#allocation110_spill] sm:$0xff] }
 0x46c   : > { %v4132_v7 = vadd.f32 %v3748_v48, %v11735_v40  ;;  %v3739_v11 = vsel %vm10335_vm11, %v3736_v22, %v3733_v49  ;;  %v3778_v56 = vmul.f32 0.6931472, %v7007_v59  ;;  %v3818_v10 = vand.u32 2147483647, %v11726_v41 }
 0x46d   : > { %4700 = vmatmul.mubr.f32.gmra.mrb[72].mxu0 %v4127_v50  ;;  %5022 = vmatmul.mubr.f32.gmra.mrb[72].mxu1 %v4127_v50  ;;  %v3806_v26 = vmul.f32 -0.5, %v11729_v30  ;;  %v11738_v6 = vmax.f32 %v11737_v4, 0.0  ;;  %vm3783_vm12 = vcmp.lt.f32.partialorder %v3782_v34, 0.0004427343  ;;  %vm10357_vm13 = vcmp.lt.f32.partialorder %v3773_v57, 0.0004427343 }
 0x46e   : > { %4705 = vmatprep.mubr.f32.mxu0 %v4132_v7  ;;  %5027 = vmatprep.mubr.f32.mxu1 %v4132_v7  ;;  %7014 = vlog2.f32 %v3848_v37  ;;  %v3784_v0 = vsel %vm3783_vm12, %v3781_v31, %v3778_v56  ;;  %v3851_v63 = vmul.f32 -0.5, %v9675_v28  ;;  %v3842_v5 = vmul.f32 -0.5, %v11736_v38  ;;  %v11749_v57 = vld [vmem:[#allocation31_spill] sm:$0xff]  ;;  %v11752_v31 = vld [vmem:[#allocation105_spill] sm:$0xff] }
 0x46f   : > { %v4131_v61 = vadd.f32 %v3739_v11, %v11738_v6  ;;  %7016 = vlog2.f32 %v3839_v14  ;;  %v7009_v24 = vpop.eup %7008  ;;  %v11742_v43 = vmax.f32 %v11741_v19, 0.0  ;;  %v3772_v21 = vmul.f32 %v11725_v17, %v3771_v16  ;;  %v11758_v4 = vld [vmem:[#allocation43_spill] sm:$0xff]  ;;  %v11760_v19 = vld [vmem:[#allocation76_spill] sm:$0xff] }
 0x470   : > { %v3809_v23 = vand.u32 2147483647, %v11729_v30  ;;  %v3884_v20 = vadd.f32 1.0, %v9722_v33  ;;  %v7011_v13 = vpop.eup %7010  ;;  %v3769_v53 = vmul.f32 0.6931472, %v7009_v24  ;;  %v3817_v18 = vmul.f32 %v11726_v41, %v3816_v9 }
 0x471   : > { %4706 = vmatmul.mubr.f32.gmra.mrb[74].mxu0 %v4131_v61  ;;  %5028 = vmatmul.mubr.f32.gmra.mrb[74].mxu1 %v4131_v61  ;;  %v4136_v54 = vadd.f32 %v3784_v0, %v11742_v43  ;;  %vm10369_vm14 = vcmp.lt.f32.partialorder %v3818_v10, 0.0004427343  ;;  %v3807_v62 = vadd.f32 1.0, %v3806_v26  ;;  %v3814_v2 = vmul.f32 0.6931472, %v7011_v13 }
 0x472   : > { %7018 = vlog2.f32 %v3884_v20  ;;  %v3887_v51 = vmul.f32 -0.5, %v9722_v33  ;;  %v3875_v17 = vadd.f32 1.0, %v9692_v25  ;;  %v3775_v35 = vsel %vm10357_vm13, %v3772_v21, %v3769_v53 }
 0x473   : > { %4711 = vmatprep.mubr.f32.mxu0 %v4136_v54  ;;  %5033 = vmatprep.mubr.f32.mxu1 %v4136_v54  ;;  %v3852_v12 = vadd.f32 1.0, %v3851_v63  ;;  %v3854_v1 = vand.u32 2147483647, %v9675_v28  ;;  %v3843_v41 = vadd.f32 1.0, %v3842_v5  ;;  %v7013_v55 = vpop.eup %7012  ;;  %v11746_v36 = vmax.f32 %v11745_v42, 0.0  ;;  %v11759_v63 = vld [vmem:[#allocation41_spill] sm:$0xff] }
 0x474   : > { %v3820_v44 = vsel %vm10369_vm14, %v3817_v18, %v3814_v2  ;;  %v3845_v58 = vand.u32 2147483647, %v11736_v38  ;;  %7020 = vlog2.f32 %v3875_v17  ;;  %v11748_v60 = vmax.f32 %v11747_v52, 0.0  ;;  %v11766_v17 = vld [vmem:[#allocation44_spill] sm:$0xff]  ;;  %v11767_v42 = vld [vmem:[#allocation79_spill] sm:$0xff] }
 0x475   : > { %v4135_v39 = vadd.f32 %v3775_v35, %v11746_v36  ;;  %v3805_v32 = vmul.f32 0.6931472, %v7013_v55  ;;  %v3808_v47 = vmul.f32 %v11729_v30, %v3807_v62  ;;  %v3890_v27 = vand.u32 2147483647, %v9722_v33  ;;  %v11785_v62 = vld [vmem:[#allocation22_spill] sm:$0xff] }
 0x476   : > { %v4140_v34 = vadd.f32 %v3820_v44, %v11748_v60  ;;  %vm3810_vm15 = vcmp.lt.f32.partialorder %v3809_v23, 0.0004427343  ;;  %v3888_v50 = vadd.f32 1.0, %v3887_v51  ;;  %v3920_v48 = vadd.f32 1.0, %v9804_v29  ;;  %v11762_v23 = vld [vmem:[#allocation113_spill] sm:$0xff] }
 0x477   : > { %4712 = vmatmul.mubr.f32.gmra.mrb[76].mxu0 %v4135_v39  ;;  %5034 = vmatmul.mubr.f32.gmra.mrb[76].mxu1 %v4135_v39  ;;  %v3911_v8 = vadd.f32 1.0, %v11749_v57  ;;  %v3811_v40 = vsel %vm3810_vm15, %v3808_v47, %v3805_v32  ;;  %v3853_v7 = vmul.f32 %v9675_v28, %v3852_v12  ;;  %vm10390_vm0 = vcmp.lt.f32.partialorder %v3854_v1, 0.0004427343  ;;  %v11771_v32 = vld [vmem:[#allocation42_spill] sm:$0xff] }
 0x478   : > { %4717 = vmatprep.mubr.f32.mxu0 %v4140_v34  ;;  %5039 = vmatprep.mubr.f32.mxu1 %v4140_v34  ;;  %v3878_v30 = vmul.f32 -0.5, %v9692_v25  ;;  %v7015_v22 = vpop.eup %7014  ;;  %v11753_v59 = vmax.f32 %v11752_v31, 0.0  ;;  %v3844_v9 = vmul.f32 %v11736_v38, %v3843_v41  ;;  %vm10398_vm1 = vcmp.lt.f32.partialorder %v3845_v58, 0.0004427343  ;;  %v11778_v31 = vld [vmem:[#allocation46_spill] sm:$0xff] }
 0x479   : > { %7022 = vlog2.f32 %v3920_v48  ;;  %v7017_v14 = vpop.eup %7016  ;;  %v3850_v11 = vmul.f32 0.6931472, %v7015_v22  ;;  %vm10402_vm2 = vcmp.lt.f32.partialorder %v3890_v27, 0.0004427343  ;;  %v3881_v56 = vand.u32 2147483647, %v9692_v25 }
 0x47a   : > { %v4139_v16 = vadd.f32 %v3811_v40, %v11753_v59  ;;  %7024 = vlog2.f32 %v3911_v8  ;;  %v3841_v10 = vmul.f32 0.6931472, %v7017_v14  ;;  %v3889_v26 = vmul.f32 %v9722_v33, %v3888_v50  ;;  %v11772_v27 = vld [vmem:[#allocation83_spill] sm:$0xff]  ;;  %v11779_v28 = vld [vmem:[#allocation90_spill] sm:$0xff] }
 0x47b   : > { %v3923_v38 = vmul.f32 -0.5, %v9804_v29  ;;  %v3956_v6 = vadd.f32 1.0, %v11758_v4  ;;  %v3856_v61 = vsel %vm10390_vm0, %v3853_v7, %v3850_v11  ;;  %v3879_v45 = vadd.f32 1.0, %v3878_v30 }
 0x47c   : > { %4718 = vmatmul.mubr.f32.gmra.mrb[78].mxu0 %v4139_v16  ;;  %5040 = vmatmul.mubr.f32.gmra.mrb[78].mxu1 %v4139_v16  ;;  %v3926_v0 = vand.u32 2147483647, %v9804_v29  ;;  %v3947_v5 = vadd.f32 1.0, %v11759_v63  ;;  %v7019_v24 = vpop.eup %7018  ;;  %v11761_v43 = vmax.f32 %v11760_v19, 0.0  ;;  %v3847_v21 = vsel %vm10398_vm1, %v3844_v9, %v3841_v10 }
 0x47d   : > { %v3914_v33 = vmul.f32 -0.5, %v11749_v57  ;;  %7026 = vlog2.f32 %v3956_v6  ;;  %v11763_v20 = vmax.f32 %v11762_v23, 0.0  ;;  %v3886_v53 = vmul.f32 0.6931472, %v7019_v24 }
 0x47e   : > { %v4144_v54 = vadd.f32 %v3856_v61, %v11761_v43  ;;  %v3959_v18 = vmul.f32 -0.5, %v11758_v4  ;;  %7028 = vlog2.f32 %v3947_v5  ;;  %v7021_v15 = vpop.eup %7020  ;;  %vm10422_vm3 = vcmp.lt.f32.partialorder %v3881_v56, 0.0004427343  ;;  %v11782_v5 = vld [vmem:[#allocation104_spill] sm:$0xff] }
 0x47f   : > { %v4143_v13 = vadd.f32 %v3847_v21, %v11763_v20  ;;  %v3924_v2 = vadd.f32 1.0, %v3923_v38  ;;  %v3917_v51 = vand.u32 2147483647, %v11749_v57  ;;  %v3992_v35 = vadd.f32 1.0, %v11766_v17 }
 0x480   : > { %4723 = vmatprep.mubr.f32.mxu0 %v4144_v54  ;;  %5045 = vmatprep.mubr.f32.mxu1 %v4144_v54  ;;  %v3892_v12 = vsel %vm10402_vm2, %v3889_v26, %v3886_v53  ;;  %v3877_v1 = vmul.f32 0.6931472, %v7021_v15  ;;  %v3880_v41 = vmul.f32 %v9692_v25, %v3879_v45  ;;  %v3962_v55 = vand.u32 2147483647, %v11758_v4  ;;  %v11780_v26 = vld [vmem:[#allocation107_spill] sm:$0xff] }
 0x481   : > { %4724 = vmatmul.mubr.f32.gmra.mrb[80].mxu0 %v4143_v13  ;;  %5046 = vmatmul.mubr.f32.gmra.mrb[80].mxu1 %v4143_v13  ;;  %v11768_v36 = vmax.f32 %v11767_v42, 0.0  ;;  %v3915_v44 = vadd.f32 1.0, %v3914_v33  ;;  %v3950_v58 = vmul.f32 -0.5, %v11759_v63  ;;  %7030 = vlog2.f32 %v3992_v35  ;;  %v11784_v53 = vld [vmem:[#allocation75_spill] sm:$0xff] }
 0x482   : > { %v3883_v52 = vsel %vm10422_vm3, %v3880_v41, %v3877_v1  ;;  %vm10437_vm4 = vcmp.lt.f32.partialorder %v3926_v0, 0.0004427343  ;;  %v3960_v34 = vadd.f32 1.0, %v3959_v18  ;;  %v3983_v47 = vadd.f32 1.0, %v11771_v32  ;;  %v11787_v1 = vld [vmem:[#allocation30_spill] sm:$0xff] }
 0x483   : > { %v4148_v39 = vadd.f32 %v3892_v12, %v11768_v36  ;;  %v7023_v25 = vpop.eup %7022  ;;  %v11773_v50 = vmax.f32 %v11772_v27, 0.0  ;;  %v3925_v8 = vmul.f32 %v9804_v29, %v3924_v2  ;;  %vm10445_vm5 = vcmp.lt.f32.partialorder %v3917_v51, 0.0004427343 }
 0x484   : > { %v3995_v7 = vmul.f32 -0.5, %v11766_v17  ;;  %v7025_v49 = vpop.eup %7024  ;;  %v3922_v30 = vmul.f32 0.6931472, %v7023_v25  ;;  %vm10450_vm6 = vcmp.lt.f32.partialorder %v3962_v55, 0.0004427343  ;;  %7032 = vlog2.f32 %v3983_v47 }
 0x485   : > { %4729 = vmatprep.mubr.f32.mxu0 %v4148_v39  ;;  %5051 = vmatprep.mubr.f32.mxu1 %v4148_v39  ;;  %v4147_v48 = vadd.f32 %v3883_v52, %v11773_v50  ;;  %v4028_v59 = vadd.f32 1.0, %v11778_v31  ;;  %v3913_v16 = vmul.f32 0.6931472, %v7025_v49  ;;  %v3916_v29 = vmul.f32 %v11749_v57, %v3915_v44  ;;  %v11789_v39 = vld [vmem:[#allocation80_spill] sm:$0xff]  ;;  %v11790_v52 = vld [vmem:[#allocation47_spill] sm:$0xff]  ;;  %v11791_v50 = vld [vmem:[#allocation34_spill] sm:$0xff] }
 0x486   : > { %v3951_v9 = vadd.f32 1.0, %v3950_v58  ;;  %v3953_v37 = vand.u32 2147483647, %v11759_v63  ;;  %v3928_v14 = vsel %vm10437_vm4, %v3925_v8, %v3922_v30  ;;  %v3961_v11 = vmul.f32 %v11758_v4, %v3960_v34  ;;  %v11805_v30 = vld [vmem:[#allocation19_spill] sm:$0xff] }
 0x487   : > { %4730 = vmatmul.mubr.f32.gmra.mrb[82].mxu0 %v4147_v48  ;;  %5052 = vmatmul.mubr.f32.gmra.mrb[82].mxu1 %v4147_v48  ;;  %7034 = vlog2.f32 %v4028_v59  ;;  %v4019_v56 = vadd.f32 1.0, %v11779_v28  ;;  %v7027_v10 = vpop.eup %7026  ;;  %v11781_v38 = vmax.f32 %v11780_v26, 0.0  ;;  %v3919_v61 = vsel %vm10445_vm5, %v3916_v29, %v3913_v16 }
 0x488   : > { %v3996_v45 = vadd.f32 1.0, %v3995_v7  ;;  %v3986_v57 = vmul.f32 -0.5, %v11771_v32  ;;  %v7029_v0 = vpop.eup %7028  ;;  %v11783_v24 = vmax.f32 %v11782_v5, 0.0  ;;  %v3958_v43 = vmul.f32 0.6931472, %v7027_v10 }
 0x489   : > { %v4152_v6 = vadd.f32 %v3928_v14, %v11781_v38  ;;  %v3998_v4 = vand.u32 2147483647, %v11766_v17  ;;  %7036 = vlog2.f32 %v4019_v56  ;;  %v3949_v54 = vmul.f32 0.6931472, %v7029_v0 }
 0x48a   : > { %v4151_v19 = vadd.f32 %v3919_v61, %v11783_v24  ;;  %v3952_v21 = vmul.f32 %v11759_v63, %v3951_v9  ;;  %vm3954_vm7 = vcmp.lt.f32.partialorder %v3953_v37, 0.0004427343  ;;  %v4031_v33 = vmul.f32 -0.5, %v11778_v31  ;;  %v11795_v9 = vld [vmem:[#allocation52_spill] sm:$0xff] }
 0x48b   : > { %4735 = vmatprep.mubr.f32.mxu0 %v4152_v6  ;;  %5057 = vmatprep.mubr.f32.mxu1 %v4152_v6  ;;  %v3964_v23 = vsel %vm10450_vm6, %v3961_v11, %v3958_v43  ;;  %v3989_v20 = vand.u32 2147483647, %v11771_v32  ;;  %v4022_v13 = vmul.f32 -0.5, %v11779_v28  ;;  %v4064_v18 = vadd.f32 1.0, %v11784_v53  ;;  %v7031_v15 = vpop.eup %7030 }
 0x48c   : > { %4736 = vmatmul.mubr.f32.gmra.mrb[84].mxu0 %v4151_v19  ;;  %5058 = vmatmul.mubr.f32.gmra.mrb[84].mxu1 %v4151_v19  ;;  %v11786_v2 = vmax.f32 %v11785_v62, 0.0  ;;  %v3955_v35 = vsel %vm3954_vm7, %v3952_v21, %v3949_v54  ;;  %v3997_v63 = vmul.f32 %v11766_v17, %v3996_v45  ;;  %v3987_v12 = vadd.f32 1.0, %v3986_v57  ;;  %v11798_v57 = vld [vmem:[#allocation38_spill] sm:$0xff]  ;;  %v11800_v62 = vld [vmem:[#allocation40_spill] sm:$0xff] }
 0x48d   : > { %v11788_v41 = vmax.f32 %v11787_v1, 0.0  ;;  %v3994_v42 = vmul.f32 0.6931472, %v7031_v15  ;;  %v4034_v36 = vand.u32 2147483647, %v11778_v31  ;;  %7038 = vlog2.f32 %v4064_v18 }
 0x48e   : > { %v4156_v51 = vadd.f32 %v3964_v23, %v11786_v2  ;;  %v3268_v44 = vmax.f32 %v11789_v39, 0.0  ;;  %vm3999_vm8 = vcmp.lt.f32.partialorder %v3998_v4, 0.0004427343  ;;  %v4032_v58 = vadd.f32 1.0, %v4031_v33  ;;  %v7033_v34 = vpop.eup %7032 }
 0x48f   : > { %v4155_v55 = vadd.f32 %v3955_v35, %v11788_v41  ;;  %v4055_v60 = vadd.f32 1.0, %v11790_v52  ;;  %v4000_v17 = vsel %vm3999_vm8, %v3997_v63, %v3994_v42  ;;  %v4023_v47 = vadd.f32 1.0, %v4022_v13 }
 0x490   : > { %4741 = vmatprep.mubr.f32.mxu0 %v4156_v51  ;;  %5063 = vmatprep.mubr.f32.mxu1 %v4156_v51  ;;  %v4067_v25 = vmul.f32 -0.5, %v11784_v53  ;;  %v4100_v27 = vadd.f32 1.0, %v10343_v3  ;;  %v11792_v48 = vmax.f32 %v11791_v50, 0.0  ;;  %v3985_v40 = vmul.f32 0.6931472, %v7033_v34  ;;  %v11802_v50 = vld [vmem:[#allocation16_spill] sm:$0xff] }
 0x491   : > { %4742 = vmatmul.mubr.f32.gmra.mrb[86].mxu0 %v4155_v55  ;;  %5064 = vmatmul.mubr.f32.gmra.mrb[86].mxu1 %v4155_v55  ;;  %v3988_v7 = vmul.f32 %v11771_v32, %v3987_v12  ;;  %7040 = vlog2.f32 %v4055_v60  ;;  %v7035_v49 = vpop.eup %7034  ;;  %vm3990_vm9 = vcmp.lt.f32.partialorder %v3989_v20, 0.0004427343  ;;  %vm10489_vm10 = vcmp.lt.f32.partialorder %v4034_v36, 0.0004427343  ;;  %v11796_v32 = vld [vmem:[#allocation28_spill] sm:$0xff] }
 0x492   : > { %v4160_v8 = vadd.f32 %v4000_v17, %v11792_v48  ;;  %v4025_v22 = vand.u32 2147483647, %v11779_v28  ;;  %7042 = vlog2.f32 %v4100_v27  ;;  %v4030_v16 = vmul.f32 0.6931472, %v7035_v49  ;;  %v11799_v20 = vld [vmem:[#allocation88_spill] sm:$0xff] }
 0x493   : > { %v3991_v59 = vsel %vm3990_vm9, %v3988_v7, %v3985_v40  ;;  %v4033_v29 = vmul.f32 %v11778_v31, %v4032_v58  ;;  %v4091_v37 = vadd.f32 1.0, %v11795_v9  ;;  %v7037_v14 = vpop.eup %7036  ;;  %v11797_v11 = vmax.f32 %v11796_v32, 0.0  ;;  %v346_v27 = vld [vmem:[%s10721_s6] sm:$0xf]  ;;  %v11804_v7 = vld [vmem:[#allocation18_spill] sm:$0xff] }
 0x494   : > { %4747 = vmatprep.mubr.f32.mxu0 %v4160_v8  ;;  %5069 = vmatprep.mubr.f32.mxu1 %v4160_v8  ;;  %v4024_v10 = vmul.f32 %v11779_v28, %v4023_v47  ;;  %v4068_v26 = vadd.f32 1.0, %v4067_v25  ;;  %v4058_v38 = vmul.f32 -0.5, %v11790_v52  ;;  %v4021_v61 = vmul.f32 0.6931472, %v7037_v14  ;;  %v11801_v47 = vld [vmem:[#allocation45_spill] sm:$0xff] }
 0x495   : > { %v4159_v56 = vadd.f32 %v3991_v59, %v11797_v11  ;;  %v4036_v6 = vsel %vm10489_vm10, %v4033_v29, %v4030_v16  ;;  %v4103_v45 = vmul.f32 -0.5, %v10343_v3  ;;  %7044 = vlog2.f32 %v4091_v37  ;;  %v11803_v8 = vld [vmem:[#allocation17_spill] sm:$0xff] }
 0x496   : > { %v3267_v31 = vmax.f32 %v11798_v57, 0.0  ;;  %v4164_v0 = vadd.f32 %v4036_v6, %v3268_v44  ;;  %vm4026_vm11 = vcmp.lt.f32.partialorder %v4025_v22, 0.0004427343  ;;  %v4070_v5 = vand.u32 2147483647, %v11784_v53 }
 0x497   : > { %4748 = vmatmul.mubr.f32.gmra.mrb[88].mxu0 %v4159_v56  ;;  %5070 = vmatmul.mubr.f32.gmra.mrb[88].mxu1 %v4159_v56  ;;  %v4027_v24 = vsel %vm4026_vm11, %v4024_v10, %v4021_v61  ;;  %v7039_v28 = vpop.eup %7038  ;;  %v4059_v43 = vadd.f32 1.0, %v4058_v38  ;;  %v4094_v4 = vmul.f32 -0.5, %v11795_v9  ;;  %v4069_v21 = vmul.f32 %v11784_v53, %v4068_v26 }
 0x498   : > { %4753 = vmatprep.mubr.f32.mxu0 %v4164_v0  ;;  %5075 = vmatprep.mubr.f32.mxu1 %v4164_v0  ;;  %v4163_v19 = vadd.f32 %v4027_v24, %v3267_v31  ;;  %v4066_v54 = vmul.f32 0.6931472, %v7039_v28  ;;  %v4061_v33 = vand.u32 2147483647, %v11790_v52  ;;  %v4104_v23 = vadd.f32 1.0, %v4103_v45 }
 0x499   : > { %v3272_v13 = vmax.f32 %v11799_v20, 0.0  ;;  %vm4071_vm12 = vcmp.lt.f32.partialorder %v4070_v5, 0.0004427343  ;;  %v4106_v18 = vand.u32 2147483647, %v10343_v3  ;;  %v3271_v2 = vmax.f32 %v11800_v62, 0.0 }
 0x49a   : > { %v4072_v51 = vsel %vm4071_vm12, %v4069_v21, %v4066_v54  ;;  %v4060_v1 = vmul.f32 %v11790_v52, %v4059_v43  ;;  %v4095_v53 = vadd.f32 1.0, %v4094_v4  ;;  %vm4062_vm13 = vcmp.lt.f32.partialorder %v4061_v33, 0.0004427343 }
 0x49b   : > { %4754 = vmatmul.mubr.f32.gmra.mrb[90].mxu0 %v4163_v19  ;;  %5076 = vmatmul.mubr.f32.gmra.mrb[90].mxu1 %v4163_v19  ;;  %v7041_v15 = vpop.eup %7040  ;;  %v4168_v63 = vadd.f32 %v4072_v51, %v3272_v13  ;;  %v4105_v55 = vmul.f32 %v10343_v3, %v4104_v23  ;;  %v4097_v42 = vand.u32 2147483647, %v11795_v9  ;;  %v3276_v36 = vmax.f32 %v9976_v46, 0.0 }
 0x49c   : > { %v7043_v35 = vpop.eup %7042  ;;  %v4057_v12 = vmul.f32 0.6931472, %v7041_v15  ;;  %vm4107_vm14 = vcmp.lt.f32.partialorder %v4106_v18, 0.0004427343  ;;  %v4096_v52 = vmul.f32 %v11795_v9, %v4095_v53  ;;  %v3275_v25 = vmax.f32 %v11801_v47, 0.0 }
 0x49d   : > { %v4102_v41 = vmul.f32 0.6931472, %v7043_v35  ;;  %4759 = vmatprep.mubr.f32.mxu0 %v4168_v63  ;;  %5081 = vmatprep.mubr.f32.mxu1 %v4168_v63  ;;  %vm4098_vm15 = vcmp.lt.f32.partialorder %v4097_v42, 0.0004427343  ;;  %v10521_v48 = vrot.slane %v346_v27, %v11802_v50  ;;  %v10524_v40 = vrot.slane %v346_v27, %v11803_v8 }
 0x49e   : > { %v4063_v39 = vsel %vm4062_vm13, %v4060_v1, %v4057_v12  ;;  %v10527_v49 = vrot.slane %v346_v27, %v11804_v7  ;;  %v10530_v22 = vrot.slane %v346_v27, %v11805_v30 }
 0x49f   : > { %v7045_v44 = vpop.eup %7044  ;;  %v4167_v58 = vadd.f32 %v4063_v39, %v3271_v2  ;;  %v4108_v60 = vsel %vm4107_vm14, %v4105_v55, %v4102_v41 }
 0x4a0   : > { %v4172_v34 = vadd.f32 %v4108_v60, %v3276_v36  ;;  %v4093_v17 = vmul.f32 0.6931472, %v7045_v44 }
 0x4a1   : > { %4760 = vmatmul.mubr.f32.gmra.mrb[92].mxu0 %v4167_v58  ;;  %5082 = vmatmul.mubr.f32.gmra.mrb[92].mxu1 %v4167_v58 }
 0x4a2   : > { %4765 = vmatprep.mubr.f32.mxu0 %v4172_v34  ;;  %5087 = vmatprep.mubr.f32.mxu1 %v4172_v34  ;;  %v4099_v3 = vsel %vm4098_vm15, %v4096_v52, %v4093_v17 }
 0x4a3   : > { %v4171_v46 = vadd.f32 %v4099_v3, %v3275_v25 }
 0x4a5   : > { %4766 = vmatmul.mubr.f32.gmra.mrb[94].mxu0 %v4171_v46  ;;  %5088 = vmatmul.mubr.f32.gmra.mrb[94].mxu1 %v4171_v46 }
 0x52b   : > { %v4677_v59 = vpop.f32.mrb[64].mxu0  ;;  %v4999_v16 = vpop.f32.mrb[64].mxu1 }
 0x52c   : > { %v6197_v29 = vadd.f32 %v4677_v59, %v10521_v48  ;;  %v6229_v9 = vadd.f32 %v4999_v16, %v10524_v40  ;;  %v4679_v37 = vpop.f32.mrb[65].mxu0  ;;  %v5001_v14 = vpop.f32.mrb[65].mxu1 }
 0x52d   : > { %v6198_v32 = vadd.f32 %v4679_v37, %v10527_v49  ;;  %v6230_v11 = vadd.f32 %v5001_v14, %v10530_v22 }
 0x52e   : > { %5094 = vst [vmem:[%s10538_s12] sm:$0xff] %v6197_v29  ;;  %5096 = vst [vmem:[%s10538_s12 + $0x10] sm:$0xff] %v6229_v9 }
 0x52f   : > { %5095 = vst [vmem:[%s10538_s12 + $0x8] sm:$0xff] %v6198_v32  ;;  %5097 = vst [vmem:[%s10538_s12 + $0x18] sm:$0xff] %v6230_v11 }
 0x530   : > { %v4683_v56 = vpop.f32.mrb[66].mxu0  ;;  %v5005_v10 = vpop.f32.mrb[66].mxu1 }
 0x531   : > { %v6199_v26 = vadd.f32 %v4683_v56, %v10521_v48  ;;  %v6231_v38 = vadd.f32 %v5005_v10, %v10524_v40  ;;  %v4685_v6 = vpop.f32.mrb[67].mxu0  ;;  %v5007_v61 = vpop.f32.mrb[67].mxu1 }
 0x532   : > { %v6200_v45 = vadd.f32 %v4685_v6, %v10527_v49  ;;  %v6232_v57 = vadd.f32 %v5007_v61, %v10530_v22 }
 0x533   : > { %5098 = vst [vmem:[%s10538_s12 + $0x20] sm:$0xff] %v6199_v26  ;;  %5100 = vst [vmem:[%s10538_s12 + $0x30] sm:$0xff] %v6231_v38 }
 0x534   : > { %5099 = vst [vmem:[%s10538_s12 + $0x28] sm:$0xff] %v6200_v45  ;;  %5101 = vst [vmem:[%s10538_s12 + $0x38] sm:$0xff] %v6232_v57  ;;  %v4689_v31 = vpop.f32.mrb[68].mxu0  ;;  %v5011_v0 = vpop.f32.mrb[68].mxu1 }
 0x535   : > { %v6201_v5 = vadd.f32 %v4689_v31, %v10521_v48  ;;  %v6233_v24 = vadd.f32 %v5011_v0, %v10524_v40  ;;  %v4691_v28 = vpop.f32.mrb[69].mxu0  ;;  %v5013_v19 = vpop.f32.mrb[69].mxu1 }
 0x536   : > { %v6202_v43 = vadd.f32 %v4691_v28, %v10527_v49  ;;  %v6234_v4 = vadd.f32 %v5013_v19, %v10530_v22 }
 0x537   : > { %5102 = vst [vmem:[%s10538_s12 + $0x40] sm:$0xff] %v6201_v5  ;;  %5104 = vst [vmem:[%s10538_s12 + $0x50] sm:$0xff] %v6233_v24 }
 0x538   : > { %5103 = vst [vmem:[%s10538_s12 + $0x48] sm:$0xff] %v6202_v43  ;;  %5105 = vst [vmem:[%s10538_s12 + $0x58] sm:$0xff] %v6234_v4 }
 0x539   : > { %v4695_v54 = vpop.f32.mrb[70].mxu0  ;;  %v5017_v21 = vpop.f32.mrb[70].mxu1 }
 0x53a   : > { %v6203_v33 = vadd.f32 %v4695_v54, %v10521_v48  ;;  %v6235_v23 = vadd.f32 %v5017_v21, %v10524_v40  ;;  %v4697_v20 = vpop.f32.mrb[71].mxu0  ;;  %v5019_v13 = vpop.f32.mrb[71].mxu1 }
 0x53b   : > { %v6204_v18 = vadd.f32 %v4697_v20, %v10527_v49  ;;  %v6236_v15 = vadd.f32 %v5019_v13, %v10530_v22 }
 0x53c   : > { %5106 = vst [vmem:[%s10538_s12 + $0x60] sm:$0xff] %v6203_v33  ;;  %5108 = vst [vmem:[%s10538_s12 + $0x70] sm:$0xff] %v6235_v23 }
 0x53d   : > { %5107 = vst [vmem:[%s10538_s12 + $0x68] sm:$0xff] %v6204_v18  ;;  %5109 = vst [vmem:[%s10538_s12 + $0x78] sm:$0xff] %v6236_v15 }
 0x540   : > { %v4701_v62 = vpop.f32.mrb[72].mxu0  ;;  %v5023_v2 = vpop.f32.mrb[72].mxu1 }
 0x541   : > { %v6205_v51 = vadd.f32 %v4701_v62, %v10521_v48  ;;  %v6237_v35 = vadd.f32 %v5023_v2, %v10524_v40  ;;  %v4703_v63 = vpop.f32.mrb[73].mxu0  ;;  %v5025_v12 = vpop.f32.mrb[73].mxu1 }
 0x542   : > { %v6206_v1 = vadd.f32 %v4703_v63, %v10527_v49  ;;  %v6238_v53 = vadd.f32 %v5025_v12, %v10530_v22 }
 0x543   : > { %5110 = vst [vmem:[%s10538_s12 + $0x80] sm:$0xff] %v6205_v51  ;;  %5112 = vst [vmem:[%s10538_s12 + $0x90] sm:$0xff] %v6237_v35 }
 0x544   : > { %5111 = vst [vmem:[%s10538_s12 + $0x88] sm:$0xff] %v6206_v1  ;;  %5113 = vst [vmem:[%s10538_s12 + $0x98] sm:$0xff] %v6238_v53  ;;  %v4707_v41 = vpop.f32.mrb[74].mxu0  ;;  %v5029_v55 = vpop.f32.mrb[74].mxu1 }
 0x545   : > { %v6207_v42 = vadd.f32 %v4707_v41, %v10521_v48  ;;  %v6239_v36 = vadd.f32 %v5029_v55, %v10524_v40  ;;  %v4709_v39 = vpop.f32.mrb[75].mxu0  ;;  %v5031_v44 = vpop.f32.mrb[75].mxu1 }
 0x546   : > { %v6208_v58 = vadd.f32 %v4709_v39, %v10527_v49  ;;  %v6240_v60 = vadd.f32 %v5031_v44, %v10530_v22 }
 0x547   : > { %5114 = vst [vmem:[%s10538_s12 + $0xa0] sm:$0xff] %v6207_v42  ;;  %5116 = vst [vmem:[%s10538_s12 + $0xb0] sm:$0xff] %v6239_v36 }
 0x548   : > { %5115 = vst [vmem:[%s10538_s12 + $0xa8] sm:$0xff] %v6208_v58  ;;  %5117 = vst [vmem:[%s10538_s12 + $0xb8] sm:$0xff] %v6240_v60 }
 0x54a   : > { %v4713_v34 = vpop.f32.mrb[76].mxu0  ;;  %v5035_v17 = vpop.f32.mrb[76].mxu1 }
 0x54b   : > { %v6209_v52 = vadd.f32 %v4713_v34, %v10521_v48  ;;  %v6241_v47 = vadd.f32 %v5035_v17, %v10524_v40  ;;  %v4715_v25 = vpop.f32.mrb[77].mxu0  ;;  %v5037_v3 = vpop.f32.mrb[77].mxu1 }
 0x54c   : > { %v6210_v46 = vadd.f32 %v4715_v25, %v10527_v49  ;;  %v6242_v27 = vadd.f32 %v5037_v3, %v10530_v22 }
 0x54d   : > { %5118 = vst [vmem:[%s10538_s12 + $0xc0] sm:$0xff] %v6209_v52  ;;  %5120 = vst [vmem:[%s10538_s12 + $0xd0] sm:$0xff] %v6241_v47 }
 0x54e   : > { %5119 = vst [vmem:[%s10538_s12 + $0xc8] sm:$0xff] %v6210_v46  ;;  %5121 = vst [vmem:[%s10538_s12 + $0xd8] sm:$0xff] %v6242_v27 }
 0x54f   : > { %v4719_v50 = vpop.f32.mrb[78].mxu0  ;;  %v5041_v8 = vpop.f32.mrb[78].mxu1 }
 0x550   : > { %v6211_v7 = vadd.f32 %v4719_v50, %v10521_v48  ;;  %v6243_v30 = vadd.f32 %v5041_v8, %v10524_v40  ;;  %v4721_v59 = vpop.f32.mrb[79].mxu0  ;;  %v5043_v16 = vpop.f32.mrb[79].mxu1 }
 0x551   : > { %v6212_v29 = vadd.f32 %v4721_v59, %v10527_v49  ;;  %v6244_v9 = vadd.f32 %v5043_v16, %v10530_v22 }
 0x552   : > { %5122 = vst [vmem:[%s10538_s12 + $0xe0] sm:$0xff] %v6211_v7  ;;  %5124 = vst [vmem:[%s10538_s12 + $0xf0] sm:$0xff] %v6243_v30 }
 0x553   : > { %5123 = vst [vmem:[%s10538_s12 + $0xe8] sm:$0xff] %v6212_v29  ;;  %5125 = vst [vmem:[%s10538_s12 + $0xf8] sm:$0xff] %v6244_v9 }
 0x554   : > { %v4725_v37 = vpop.f32.mrb[80].mxu0  ;;  %v5047_v14 = vpop.f32.mrb[80].mxu1 }
 0x555   : > { %v6213_v32 = vadd.f32 %v4725_v37, %v10521_v48  ;;  %v6245_v11 = vadd.f32 %v5047_v14, %v10524_v40  ;;  %v4727_v56 = vpop.f32.mrb[81].mxu0  ;;  %v5049_v10 = vpop.f32.mrb[81].mxu1 }
 0x556   : > { %v6214_v26 = vadd.f32 %v4727_v56, %v10527_v49  ;;  %v6246_v38 = vadd.f32 %v5049_v10, %v10530_v22 }
 0x557   : > { %5126 = vst [vmem:[%s10538_s12 + $0x100] sm:$0xff] %v6213_v32  ;;  %5128 = vst [vmem:[%s10538_s12 + $0x110] sm:$0xff] %v6245_v11 }
 0x558   : > { %5127 = vst [vmem:[%s10538_s12 + $0x108] sm:$0xff] %v6214_v26  ;;  %5129 = vst [vmem:[%s10538_s12 + $0x118] sm:$0xff] %v6246_v38 }
 0x55a   : > { %v4731_v6 = vpop.f32.mrb[82].mxu0  ;;  %v5053_v61 = vpop.f32.mrb[82].mxu1 }
 0x55b   : > { %v6215_v45 = vadd.f32 %v4731_v6, %v10521_v48  ;;  %v6247_v57 = vadd.f32 %v5053_v61, %v10524_v40  ;;  %v4733_v31 = vpop.f32.mrb[83].mxu0  ;;  %v5055_v0 = vpop.f32.mrb[83].mxu1 }
 0x55c   : > { %v6216_v5 = vadd.f32 %v4733_v31, %v10527_v49  ;;  %v6248_v24 = vadd.f32 %v5055_v0, %v10530_v22 }
 0x55d   : > { %5130 = vst [vmem:[%s10538_s12 + $0x120] sm:$0xff] %v6215_v45  ;;  %5132 = vst [vmem:[%s10538_s12 + $0x130] sm:$0xff] %v6247_v57 }
 0x55e   : > { %5131 = vst [vmem:[%s10538_s12 + $0x128] sm:$0xff] %v6216_v5  ;;  %5133 = vst [vmem:[%s10538_s12 + $0x138] sm:$0xff] %v6248_v24 }
 0x55f   : > { %v4737_v28 = vpop.f32.mrb[84].mxu0  ;;  %v5059_v19 = vpop.f32.mrb[84].mxu1 }
 0x560   : > { %v6217_v43 = vadd.f32 %v4737_v28, %v10521_v48  ;;  %v6249_v4 = vadd.f32 %v5059_v19, %v10524_v40  ;;  %v4739_v54 = vpop.f32.mrb[85].mxu0  ;;  %v5061_v21 = vpop.f32.mrb[85].mxu1 }
 0x561   : > { %v6218_v33 = vadd.f32 %v4739_v54, %v10527_v49  ;;  %v6250_v23 = vadd.f32 %v5061_v21, %v10530_v22 }
 0x562   : > { %5134 = vst [vmem:[%s10538_s12 + $0x140] sm:$0xff] %v6217_v43  ;;  %5136 = vst [vmem:[%s10538_s12 + $0x150] sm:$0xff] %v6249_v4 }
 0x563   : > { %5135 = vst [vmem:[%s10538_s12 + $0x148] sm:$0xff] %v6218_v33  ;;  %5137 = vst [vmem:[%s10538_s12 + $0x158] sm:$0xff] %v6250_v23 }
 0x564   : > { %v4743_v20 = vpop.f32.mrb[86].mxu0  ;;  %v5065_v13 = vpop.f32.mrb[86].mxu1 }
 0x565   : > { %v6219_v18 = vadd.f32 %v4743_v20, %v10521_v48  ;;  %v6251_v15 = vadd.f32 %v5065_v13, %v10524_v40  ;;  %v4745_v62 = vpop.f32.mrb[87].mxu0  ;;  %v5067_v2 = vpop.f32.mrb[87].mxu1 }
 0x566   : > { %v6220_v51 = vadd.f32 %v4745_v62, %v10527_v49  ;;  %v6252_v35 = vadd.f32 %v5067_v2, %v10530_v22 }
 0x567   : > { %5138 = vst [vmem:[%s10538_s12 + $0x160] sm:$0xff] %v6219_v18  ;;  %5140 = vst [vmem:[%s10538_s12 + $0x170] sm:$0xff] %v6251_v15 }
 0x568   : > { %5139 = vst [vmem:[%s10538_s12 + $0x168] sm:$0xff] %v6220_v51  ;;  %5141 = vst [vmem:[%s10538_s12 + $0x178] sm:$0xff] %v6252_v35 }
 0x56a   : > { %v4749_v63 = vpop.f32.mrb[88].mxu0  ;;  %v5071_v12 = vpop.f32.mrb[88].mxu1 }
 0x56b   : > { %v6221_v1 = vadd.f32 %v4749_v63, %v10521_v48  ;;  %v6253_v53 = vadd.f32 %v5071_v12, %v10524_v40  ;;  %v4751_v41 = vpop.f32.mrb[89].mxu0  ;;  %v5073_v55 = vpop.f32.mrb[89].mxu1 }
 0x56c   : > { %v6222_v42 = vadd.f32 %v4751_v41, %v10527_v49  ;;  %v6254_v36 = vadd.f32 %v5073_v55, %v10530_v22 }
 0x56d   : > { %5142 = vst [vmem:[%s10538_s12 + $0x180] sm:$0xff] %v6221_v1  ;;  %5144 = vst [vmem:[%s10538_s12 + $0x190] sm:$0xff] %v6253_v53 }
 0x56e   : > { %5143 = vst [vmem:[%s10538_s12 + $0x188] sm:$0xff] %v6222_v42  ;;  %5145 = vst [vmem:[%s10538_s12 + $0x198] sm:$0xff] %v6254_v36  ;;  %v4755_v39 = vpop.f32.mrb[90].mxu0  ;;  %v5077_v44 = vpop.f32.mrb[90].mxu1 }
 0x56f   : > { %v6223_v58 = vadd.f32 %v4755_v39, %v10521_v48  ;;  %v6255_v60 = vadd.f32 %v5077_v44, %v10524_v40  ;;  %v4757_v34 = vpop.f32.mrb[91].mxu0  ;;  %v5079_v17 = vpop.f32.mrb[91].mxu1 }
 0x570   : > { %v6224_v52 = vadd.f32 %v4757_v34, %v10527_v49  ;;  %v6256_v47 = vadd.f32 %v5079_v17, %v10530_v22 }
 0x571   : > { %5146 = vst [vmem:[%s10538_s12 + $0x1a0] sm:$0xff] %v6223_v58  ;;  %5148 = vst [vmem:[%s10538_s12 + $0x1b0] sm:$0xff] %v6255_v60 }
 0x572   : > { %5147 = vst [vmem:[%s10538_s12 + $0x1a8] sm:$0xff] %v6224_v52  ;;  %5149 = vst [vmem:[%s10538_s12 + $0x1b8] sm:$0xff] %v6256_v47 }
 0x574   : > { %v4761_v25 = vpop.f32.mrb[92].mxu0  ;;  %v5083_v3 = vpop.f32.mrb[92].mxu1 }
 0x575   : > { %v6225_v46 = vadd.f32 %v4761_v25, %v10521_v48  ;;  %v6257_v27 = vadd.f32 %v5083_v3, %v10524_v40  ;;  %v4763_v50 = vpop.f32.mrb[93].mxu0  ;;  %v5085_v8 = vpop.f32.mrb[93].mxu1 }
 0x576   : > { %v6226_v7 = vadd.f32 %v4763_v50, %v10527_v49  ;;  %v6258_v30 = vadd.f32 %v5085_v8, %v10530_v22 }
 0x577   : > { %5150 = vst [vmem:[%s10538_s12 + $0x1c0] sm:$0xff] %v6225_v46  ;;  %5152 = vst [vmem:[%s10538_s12 + $0x1d0] sm:$0xff] %v6257_v27 }
 0x578   : > { %5151 = vst [vmem:[%s10538_s12 + $0x1c8] sm:$0xff] %v6226_v7  ;;  %5153 = vst [vmem:[%s10538_s12 + $0x1d8] sm:$0xff] %v6258_v30  ;;  %v4767_v59 = vpop.f32.mrb[94].mxu0  ;;  %v5089_v16 = vpop.f32.mrb[94].mxu1 }
 0x579   : > { %v6227_v29 = vadd.f32 %v4767_v59, %v10521_v48  ;;  %v6259_v9 = vadd.f32 %v5089_v16, %v10524_v40  ;;  %v4769_v37 = vpop.f32.mrb[95].mxu0  ;;  %v5091_v14 = vpop.f32.mrb[95].mxu1 }
 0x57a   : > { %v6228_v32 = vadd.f32 %v4769_v37, %v10527_v49  ;;  %v6260_v11 = vadd.f32 %v5091_v14, %v10530_v22 }
 0x57b   : > { %5154 = vst [vmem:[%s10538_s12 + $0x1e0] sm:$0xff] %v6227_v29  ;;  %5156 = vst [vmem:[%s10538_s12 + $0x1f0] sm:$0xff] %v6259_v9 }
 0x57c   : > { %5155 = vst [vmem:[%s10538_s12 + $0x1e8] sm:$0xff] %v6228_v32  ;;  %5157 = vst [vmem:[%s10538_s12 + $0x1f8] sm:$0xff] %v6260_v11 }
 0x57d   : > { %7173 = shalt.err (!%p7170_p4)
}
 0x57e   : > { %s7174_s13 = scalar_lea.hbm %s10663_s29, 8192  ;;  %s7178_s14 = scalar_lea.hbm %s10722_s7, 16384 }
 0x57f   : > { %p7175_p9 = scmp.ne.s32.totalorder %s10663_s29, %s7174_s13  ;;  %p7179_p8 = scmp.lt.u32.totalorder %s10663_s29, %s10722_s7 }
 0x580   : > { %p7180_p13 = scmp.lt.u32.totalorder %s7178_s14, %s7174_s13  ;;  %p7182_p10 = scmp.lt.u32.totalorder %s7174_s13, %s10663_s29 }
 0x581   : > { %p7176_p0 = pnand %p7175_p9, %p7439_p5 }
 0x582   : > { %p7181_p6 = por %p7180_p13, %p7179_p8 }
 0x583   : > { %p7177_p11 = pneg %p7176_p0 }
 0x584   : > { %p7183_p3 = por %p7182_p10, %p7181_p6 }
 0x586   : > { %p7184_p7 = pnand %p7183_p3, %p7177_p11 }
 0x588   : > { %7187 = shalt.err (!%p7184_p7)
}
 0x589   : > { %s7243_s28 = smov 512   ;;  %s7244_s16 = smov 32  }
 0x58a   : > { %6467 = dma.vmem_to_hbm [thread:$0]  (%p7439_p5), %s10665_s21, 8192, %s10663_s29, %s5159_s23, %s7243_s28, %s7243_s28, %s7244_s16  }
 0x58b PF: > { %s11806_s11 = sld [smem:[#allocation15_spill]]  ;;  %s5188_s8 = sand.u32 1, %s7222_s24  }
 0x58c   : > { %p11808_p1 = scmp.ge.s32.totalorder %s7234_s27, 2  ;;  %s5189_s30 = scalar_lea.sflag [#allocation4], %s5188_s8 }
 0x591   : > { %p11807_p12 = scmp.ne.s32.totalorder %s11806_s11, 0 }
 0x593   : > { %p6484_p2 = pnand %p11808_p1, %p11807_p12 }
 0x595   : > { %7217 = dma.done.wait (!%p6484_p2), %s5189_s30, 8192  }
 0x596   : > { %7219 = vsyncadd (!%p6484_p2), %s5189_s30, 4294959104  ;;  %p22_p4 = scmp.ge.s32.totalorder %s7425_s22, 4   ;;  %s11809_s24 = smov %s7226_s25 }
 0x597   : > { %s11810_s25 = smov %s7230_s26  ;;  %s11811_s26 = smov %s7435_s18 }
 0x598   : > { %s11812_s27 = smov %s7425_s22  ;;  %24 = sbr.rel (!%p22_p4) target bundleno = 7 (0x7), region = 105 }
 0x59f   :  { %5194 = vsyncpa [#allocation3], 1 }
 0x5a0   :  { %5196 = vsyncpa [#allocation3 + $0x1], 1 }
 0x5a1   :  { %5197 = vsyncpa [#allocation6], 1 }
 0x5a2   :  { %5198 = vsyncpa [#allocation9], 1 }
 0x5a3   :  { %5199 = vsyncpa [#allocation4], 1 }
 0x5a4   :  { %5201 = vsyncpa [#allocation4 + $0x1], 1 }

</bundles_post_ra>
